<compile_context>
chip_gen: v7x
topology: tpu7x:2x2x1
jax: 0.10.0
libtpu: 0.0.40
codegen_flags: <defaults>
</compile_context>

<pallas_src>
import jax
import jax.numpy as jnp
from jax.experimental import pallas as pl
from jax.experimental.pallas import tpu as pltpu

DIMS = [3072, 1024, 512, 256, 10]   # fc1..fc4 (in PyTorch orientation)
N_PAD = 128                          # lane-dense padding for the 10-wide output


def lenet_mlp_kernel(x_ref,
                     w1_ref, b1_ref,
                     w2_ref, b2_ref,
                     w3_ref, b3_ref,
                     w4_ref, b4_ref,
                     o_ref):
    """Fused 4-layer MLP: bf16 matmuls on the MXU, f32 accumulation,
    bias + ReLU fused, activations carried in bf16 between layers."""
    h = jnp.dot(x_ref[...], w1_ref[...], preferred_element_type=jnp.float32)
    h = jnp.maximum(h + b1_ref[...], 0.0).astype(jnp.bfloat16)

    h = jnp.dot(h, w2_ref[...], preferred_element_type=jnp.float32)
    h = jnp.maximum(h + b2_ref[...], 0.0).astype(jnp.bfloat16)

    h = jnp.dot(h, w3_ref[...], preferred_element_type=jnp.float32)
    h = jnp.maximum(h + b3_ref[...], 0.0).astype(jnp.bfloat16)

    h = jnp.dot(h, w4_ref[...], preferred_element_type=jnp.float32)
    h = jnp.maximum(h + b4_ref[...], 0.0)          # final ReLU, kept in f32
    o_ref[...] = h.astype(o_ref.dtype)


def lenet_mlp_fused(x_pad, kernel_params):
    """x_pad: (M, 3072) bf16, M % 8 == 0. kernel_params: 4x (w_bf16, b_f32),
    last layer padded to N_PAD lanes. Returns (M, N_PAD) f32."""
    M = x_pad.shape[0]

    operands = [x_pad]
    in_specs = [pl.BlockSpec(x_pad.shape, lambda i: (0, 0))]
    for w, b in kernel_params:
        operands += [w, b]
        in_specs += [pl.BlockSpec(w.shape, lambda i: (0, 0)),
                     pl.BlockSpec(b.shape, lambda i: (0, 0))]

    # Advisory cost estimate so XLA can schedule around this short kernel.
    flops = 2 * M * sum(kw.shape[0] * kw.shape[1] for kw, _ in kernel_params)
    bytes_accessed = sum(int(a.size) * a.dtype.itemsize for a in operands)
    bytes_accessed += M * N_PAD * 4
    cost = pl.CostEstimate(flops=flops, transcendentals=0,
                           bytes_accessed=bytes_accessed)

    return pl.pallas_call(
        lenet_mlp_kernel,
        out_shape=jax.ShapeDtypeStruct((M, N_PAD), jnp.float32),
        grid_spec=pltpu.PrefetchScalarGridSpec(
            num_scalar_prefetch=0,
            grid=(1,),                              # everything resident, one step
            in_specs=in_specs,
            out_specs=pl.BlockSpec((M, N_PAD), lambda i: (0, 0)),
        ),
        compiler_params=pltpu.CompilerParams(
            dimension_semantics=("arbitrary",),
            # bf16 weights double-buffered (~15.5 MB) exceed v5e's 16 MiB scoped
            # default; 48 MiB fits every generation (v7x physical = 64 MiB).
            vmem_limit_bytes=48 * 1024 * 1024,
        ),
        cost_estimate=cost,
    )(*operands)


def init_lenet_params(key):
    """Deterministic init mimicking nn.Linear's U(-1/sqrt(fan_in), 1/sqrt(fan_in)).
    Weights stored as (in_features, out_features), f32 master copies."""
    params = []
    for i in range(4):
        fan_in, fan_out = DIMS[i], DIMS[i + 1]
        key, kw, kb = jax.random.split(key, 3)
        bound = 1.0 / jnp.sqrt(jnp.float32(fan_in))
        w = jax.random.uniform(kw, (fan_in, fan_out), jnp.float32, -bound, bound)
        b = jax.random.uniform(kb, (1, fan_out), jnp.float32, -bound, bound)
        params.append((w, b))
    return params


def prep_kernel_params(params):
    """Cast weights to bf16 (halves HBM weight traffic) and zero-pad fc4 from
    10 -> N_PAD output lanes. Biases stay f32 (tiny, added to f32 accumulator)."""
    kp = []
    for i, (w, b) in enumerate(params):
        if i == len(params) - 1:
            w = jnp.pad(w, ((0, 0), (0, N_PAD - w.shape[1])))
            b = jnp.pad(b, ((0, 0), (0, N_PAD - b.shape[1])))
        kp.append((w.astype(jnp.bfloat16), b.astype(jnp.float32)))
    return kp


def lenet_forward(x_nchw, kernel_params):
    B = x_nchw.shape[0]
    x = x_nchw.reshape(B, -1)                       # same semantics as x.view(B, -1)
    M = max(8, ((B + 7) // 8) * 8)                  # pad batch to sublane multiple
    x_pad = jnp.pad(x.astype(jnp.bfloat16), ((0, M - B), (0, 0)))
    out_pad = lenet_mlp_fused(x_pad, kernel_params)
    return out_pad[:B, :DIMS[-1]]                   # strip batch + lane padding


if __name__ == "__main__":
    key = jax.random.PRNGKey(0)
    kx, kp = jax.random.split(key)

    # Input consistent with the forward pass: flatten must yield 3072 features.
    x = jax.random.normal(kx, (2, 3, 32, 32), jnp.float32)
    params = init_lenet_params(kp)
    kparams = prep_kernel_params(params)

    out = lenet_forward(x, kparams)
    out = jax.block_until_ready(out)

    # Reference in plain JAX using the *same* bf16 weights / activation dtypes,
    # so this checks the kernel (layout, fusion, padding), not quantization.
    h = x.reshape(x.shape[0], -1).astype(jnp.bfloat16)
    for i, (w, b) in enumerate(kparams):
        h = jnp.maximum(jnp.dot(h, w, preferred_element_type=jnp.float32) + b, 0.0)
        if i < len(kparams) - 1:
            h = h.astype(jnp.bfloat16)
    ref = h[:, :DIMS[-1]]

    assert out.shape == (2, 10)
    assert jnp.allclose(out, ref, atol=1e-3, rtol=1e-3)

    print("KERNEL_OK")
</pallas_src>

<mosaic_0001>
module attributes {stable_mosaic.version = 11 : i64} {
  func.func @lenet_mlp_kernel(%arg0: i32, %arg1: memref<8x3072xbf16, #tpu.memory_space<vmem>>, %arg2: memref<3072x1024xbf16, #tpu.memory_space<vmem>>, %arg3: memref<1x1024xf32, #tpu.memory_space<vmem>>, %arg4: memref<1024x512xbf16, #tpu.memory_space<vmem>>, %arg5: memref<1x512xf32, #tpu.memory_space<vmem>>, %arg6: memref<512x256xbf16, #tpu.memory_space<vmem>>, %arg7: memref<1x256xf32, #tpu.memory_space<vmem>>, %arg8: memref<256x128xbf16, #tpu.memory_space<vmem>>, %arg9: memref<1x128xf32, #tpu.memory_space<vmem>>, %arg10: memref<8x128xf32, #tpu.memory_space<vmem>>) attributes {dimension_semantics = [#tpu.dimension_semantics<arbitrary>], iteration_bounds = array<i64: 1>, scalar_prefetch = 0 : i64, scratch_operands = 0 : i64, tpu.core_type = #tpu.core_type<tc>, window_params = [{pipeline_mode = #tpu.pipeline_mode<synchronous>, transform_indices = @transform_0, window_bounds = array<i64: 8, 3072>}, {pipeline_mode = #tpu.pipeline_mode<synchronous>, transform_indices = @transform_1, window_bounds = array<i64: 3072, 1024>}, {pipeline_mode = #tpu.pipeline_mode<synchronous>, transform_indices = @transform_2, window_bounds = array<i64: 1, 1024>}, {pipeline_mode = #tpu.pipeline_mode<synchronous>, transform_indices = @transform_3, window_bounds = array<i64: 1024, 512>}, {pipeline_mode = #tpu.pipeline_mode<synchronous>, transform_indices = @transform_4, window_bounds = array<i64: 1, 512>}, {pipeline_mode = #tpu.pipeline_mode<synchronous>, transform_indices = @transform_5, window_bounds = array<i64: 512, 256>}, {pipeline_mode = #tpu.pipeline_mode<synchronous>, transform_indices = @transform_6, window_bounds = array<i64: 1, 256>}, {pipeline_mode = #tpu.pipeline_mode<synchronous>, transform_indices = @transform_7, window_bounds = array<i64: 256, 128>}, {pipeline_mode = #tpu.pipeline_mode<synchronous>, transform_indices = @transform_8, window_bounds = array<i64: 1, 128>}, {pipeline_mode = #tpu.pipeline_mode<synchronous>, transform_indices = @transform_9, window_bounds = array<i64: 8, 128>}]} {
    %c0 = arith.constant 0 : index
    %c0_0 = arith.constant 0 : index
    %0 = vector.load %arg1[%c0, %c0_0] : memref<8x3072xbf16, #tpu.memory_space<vmem>>, vector<8x3072xbf16>
    %c0_1 = arith.constant 0 : index
    %c0_2 = arith.constant 0 : index
    %1 = vector.load %arg2[%c0_1, %c0_2] : memref<3072x1024xbf16, #tpu.memory_space<vmem>>, vector<3072x1024xbf16>
    %cst = arith.constant dense<0.000000e+00> : vector<8x1024xf32>
    %2 = tpu.matmul %0, %1, %cst {dimension_numbers = #tpu.dot_dimension_numbers<[1], [0], [0], [1], [0, 0, 1, 1], [], []>} : vector<8x3072xbf16>, vector<3072x1024xbf16>, vector<8x1024xf32> -> vector<8x1024xf32>
    %c0_3 = arith.constant 0 : index
    %c0_4 = arith.constant 0 : index
    %3 = vector.load %arg3[%c0_3, %c0_4] : memref<1x1024xf32, #tpu.memory_space<vmem>>, vector<1x1024xf32>
    %4 = vector.broadcast %3 : vector<1x1024xf32> to vector<8x1024xf32>
    %5 = arith.addf %2, %4 : vector<8x1024xf32>
    %cst_5 = arith.constant 0.000000e+00 : f32
    %6 = vector.broadcast %cst_5 : f32 to vector<8x1024xf32>
    %7 = arith.maximumf %5, %6 : vector<8x1024xf32>
    %8 = arith.truncf %7 : vector<8x1024xf32> to vector<8x1024xbf16>
    %c0_6 = arith.constant 0 : index
    %c0_7 = arith.constant 0 : index
    %9 = vector.load %arg4[%c0_6, %c0_7] : memref<1024x512xbf16, #tpu.memory_space<vmem>>, vector<1024x512xbf16>
    %cst_8 = arith.constant dense<0.000000e+00> : vector<8x512xf32>
    %10 = tpu.matmul %8, %9, %cst_8 {dimension_numbers = #tpu.dot_dimension_numbers<[1], [0], [0], [1], [0, 0, 1, 1], [], []>} : vector<8x1024xbf16>, vector<1024x512xbf16>, vector<8x512xf32> -> vector<8x512xf32>
    %c0_9 = arith.constant 0 : index
    %c0_10 = arith.constant 0 : index
    %11 = vector.load %arg5[%c0_9, %c0_10] : memref<1x512xf32, #tpu.memory_space<vmem>>, vector<1x512xf32>
    %12 = vector.broadcast %11 : vector<1x512xf32> to vector<8x512xf32>
    %13 = arith.addf %10, %12 : vector<8x512xf32>
    %cst_11 = arith.constant 0.000000e+00 : f32
    %14 = vector.broadcast %cst_11 : f32 to vector<8x512xf32>
    %15 = arith.maximumf %13, %14 : vector<8x512xf32>
    %16 = arith.truncf %15 : vector<8x512xf32> to vector<8x512xbf16>
    %c0_12 = arith.constant 0 : index
    %c0_13 = arith.constant 0 : index
    %17 = vector.load %arg6[%c0_12, %c0_13] : memref<512x256xbf16, #tpu.memory_space<vmem>>, vector<512x256xbf16>
    %cst_14 = arith.constant dense<0.000000e+00> : vector<8x256xf32>
    %18 = tpu.matmul %16, %17, %cst_14 {dimension_numbers = #tpu.dot_dimension_numbers<[1], [0], [0], [1], [0, 0, 1, 1], [], []>} : vector<8x512xbf16>, vector<512x256xbf16>, vector<8x256xf32> -> vector<8x256xf32>
    %c0_15 = arith.constant 0 : index
    %c0_16 = arith.constant 0 : index
    %19 = vector.load %arg7[%c0_15, %c0_16] : memref<1x256xf32, #tpu.memory_space<vmem>>, vector<1x256xf32>
    %20 = vector.broadcast %19 : vector<1x256xf32> to vector<8x256xf32>
    %21 = arith.addf %18, %20 : vector<8x256xf32>
    %cst_17 = arith.constant 0.000000e+00 : f32
    %22 = vector.broadcast %cst_17 : f32 to vector<8x256xf32>
    %23 = arith.maximumf %21, %22 : vector<8x256xf32>
    %24 = arith.truncf %23 : vector<8x256xf32> to vector<8x256xbf16>
    %c0_18 = arith.constant 0 : index
    %c0_19 = arith.constant 0 : index
    %25 = vector.load %arg8[%c0_18, %c0_19] : memref<256x128xbf16, #tpu.memory_space<vmem>>, vector<256x128xbf16>
    %cst_20 = arith.constant dense<0.000000e+00> : vector<8x128xf32>
    %26 = tpu.matmul %24, %25, %cst_20 {dimension_numbers = #tpu.dot_dimension_numbers<[1], [0], [0], [1], [0, 0, 1, 1], [], []>} : vector<8x256xbf16>, vector<256x128xbf16>, vector<8x128xf32> -> vector<8x128xf32>
    %c0_21 = arith.constant 0 : index
    %c0_22 = arith.constant 0 : index
    %27 = vector.load %arg9[%c0_21, %c0_22] : memref<1x128xf32, #tpu.memory_space<vmem>>, vector<1x128xf32>
    %28 = vector.broadcast %27 : vector<1x128xf32> to vector<8x128xf32>
    %29 = arith.addf %26, %28 : vector<8x128xf32>
    %cst_23 = arith.constant 0.000000e+00 : f32
    %30 = vector.broadcast %cst_23 : f32 to vector<8x128xf32>
    %31 = arith.maximumf %29, %30 : vector<8x128xf32>
    %c0_24 = arith.constant 0 : index
    %c0_25 = arith.constant 0 : index
    %32 = vector.load %arg10[%c0_24, %c0_25] : memref<8x128xf32, #tpu.memory_space<vmem>>, vector<8x128xf32>
    tpu.vector_store %arg10[%c0_24, %c0_25], %31 {strides = array<i32>} : memref<8x128xf32, #tpu.memory_space<vmem>>, vector<8x128xf32>,
    return
  }
  func.func @transform_0(%arg0: i32) -> (i32, i32) {
    %c0_i32 = arith.constant 0 : i32
    %c0_i32_0 = arith.constant 0 : i32
    %c0_i32_1 = arith.constant 0 : i32
    return %c0_i32, %c0_i32_0 : i32, i32
  }
  func.func @transform_1(%arg0: i32) -> (i32, i32) {
    %c0_i32 = arith.constant 0 : i32
    %c0_i32_0 = arith.constant 0 : i32
    %c0_i32_1 = arith.constant 0 : i32
    return %c0_i32, %c0_i32_0 : i32, i32
  }
  func.func @transform_2(%arg0: i32) -> (i32, i32) {
    %c0_i32 = arith.constant 0 : i32
    %c0_i32_0 = arith.constant 0 : i32
    %c0_i32_1 = arith.constant 0 : i32
    return %c0_i32, %c0_i32_0 : i32, i32
  }
  func.func @transform_3(%arg0: i32) -> (i32, i32) {
    %c0_i32 = arith.constant 0 : i32
    %c0_i32_0 = arith.constant 0 : i32
    %c0_i32_1 = arith.constant 0 : i32
    return %c0_i32, %c0_i32_0 : i32, i32
  }
  func.func @transform_4(%arg0: i32) -> (i32, i32) {
    %c0_i32 = arith.constant 0 : i32
    %c0_i32_0 = arith.constant 0 : i32
    %c0_i32_1 = arith.constant 0 : i32
    return %c0_i32, %c0_i32_0 : i32, i32
  }
  func.func @transform_5(%arg0: i32) -> (i32, i32) {
    %c0_i32 = arith.constant 0 : i32
    %c0_i32_0 = arith.constant 0 : i32
    %c0_i32_1 = arith.constant 0 : i32
    return %c0_i32, %c0_i32_0 : i32, i32
  }
  func.func @transform_6(%arg0: i32) -> (i32, i32) {
    %c0_i32 = arith.constant 0 : i32
    %c0_i32_0 = arith.constant 0 : i32
    %c0_i32_1 = arith.constant 0 : i32
    return %c0_i32, %c0_i32_0 : i32, i32
  }
  func.func @transform_7(%arg0: i32) -> (i32, i32) {
    %c0_i32 = arith.constant 0 : i32
    %c0_i32_0 = arith.constant 0 : i32
    %c0_i32_1 = arith.constant 0 : i32
    return %c0_i32, %c0_i32_0 : i32, i32
  }
  func.func @transform_8(%arg0: i32) -> (i32, i32) {
    %c0_i32 = arith.constant 0 : i32
    %c0_i32_0 = arith.constant 0 : i32
    %c0_i32_1 = arith.constant 0 : i32
    return %c0_i32, %c0_i32_0 : i32, i32
  }
  func.func @transform_9(%arg0: i32) -> (i32, i32) {
    %c0_i32 = arith.constant 0 : i32
    %c0_i32_0 = arith.constant 0 : i32
    %c0_i32_1 = arith.constant 0 : i32
    return %c0_i32, %c0_i32_0 : i32, i32
  }
}

</mosaic_0001>

<bundles_post_ra>
// kernel: tpu_custom_call.1
= control target key start
LH: loop header
LB: loop body
LE: loop exit
PB: predicated region body
PF: predicated region fallthrough
CT: control target
= control target key end

     0   :  { %14 = vsyncpa [#allocation3], 0  ;;  %s17453_s0 = inlined_call_operand.hbm [shape: bf16[8,3072], index: 0, kind: input, shape index: {}]   ;;  %s17454_s1 = inlined_call_operand.hbm [shape: bf16[3072,1024], index: 1, kind: input, shape index: {}]   ;;  %s17455_s2 = inlined_call_operand.hbm [shape: f32[1,1024], index: 2, kind: input, shape index: {}]   ;;  %s17456_s3 = inlined_call_operand.hbm [shape: bf16[1024,512], index: 3, kind: input, shape index: {}]   ;;  %s17457_s4 = inlined_call_operand.hbm [shape: f32[1,512], index: 4, kind: input, shape index: {}]   ;;  %s17458_s5 = inlined_call_operand.hbm [shape: bf16[512,256], index: 5, kind: input, shape index: {}]   ;;  %s17459_s6 = inlined_call_operand.hbm [shape: f32[1,256], index: 6, kind: input, shape index: {}]   ;;  %s17460_s7 = inlined_call_operand.hbm [shape: bf16[256,128], index: 7, kind: input, shape index: {}]   ;;  %s17461_s8 = inlined_call_operand.hbm [shape: f32[1,128], index: 8, kind: input, shape index: {}]   ;;  %s17462_s9 = inlined_call_operand.hbm [shape: f32[8,128], index: 9, kind: output, shape index: {}]  }
   0x1   :  { %15 = vsyncpa [#allocation6], 0 }
   0x2   :  { %16 = vsyncpa [#allocation9], 0 }
   0x3   :  { %17 = vsyncpa [#allocation12], 0 }
   0x4   :  { %18 = vsyncpa [#allocation15], 0 }
   0x5   :  { %19 = vsyncpa [#allocation4], 0  ;;  %s16963_s30 = smov [#allocation5]   ;;  %s16731_s13 = scalar_lea.hbm %s17454_s1, 196608 }
   0x6   :  { %s35_s10 = sshll.u32 %s16963_s30, 4  ;;  %p16732_p0 = scmp.ne.s32.totalorder %s17454_s1, %s16731_s13  ;;  %s36_s10 = int_to_ptr.vmem [resolvable:$true] %s35_s10 }
   0x7   :  { %p16735_p1 = scmp.lt.u32.totalorder %s16731_s13, %s17454_s1 }
   0x9   :  { %p16737_p2 = pnand %p16735_p1, %p16732_p0 }
   0xb   :  { %16740 = shalt.err (!%p16737_p2)
}
   0xc   :  { %s16741_s18 = scalar_lea.vmem %s36_s10, 196608  ;;  %p16746_p4 = scmp.lt.s32.totalorder %s36_s10, %s36_s10 }
   0xd   :  { %p16742_p3 = scmp.ne.s32.totalorder %s36_s10, %s16741_s18  ;;  %p16747_p5 = scmp.lt.s32.totalorder %s16741_s18, %s16741_s18 }
   0xf   :  { %p16748_p6 = por %p16747_p5, %p16746_p4 }
  0x11   :  { %p16749_p7 = pnand %p16748_p6, %p16742_p3 }
  0x13   :  { %16752 = shalt.err (!%p16749_p7)
}
  0x14   :  { %s16964_s19 = smov 512   ;;  %s16965_s20 = smov 32  }
  0x15   :  { %41 = dma.hbm_to_vmem [thread:$0]  %s17454_s1, 196608, %s36_s10, [#allocation6], %s16964_s19, %s16964_s19, %s16965_s20  }
  0x16   :  { %s16966_s23 = smov [#allocation8]   ;;  %s16753_s27 = scalar_lea.hbm %s17456_s3, 32768 }
  0x17   :  { %s57_s24 = sshll.u32 %s16966_s23, 4  ;;  %p16754_p8 = scmp.ne.s32.totalorder %s17456_s3, %s16753_s27  ;;  %s58_s24 = int_to_ptr.vmem [resolvable:$true] %s57_s24 }
  0x18   :  { %p16757_p9 = scmp.lt.u32.totalorder %s16753_s27, %s17456_s3 }
  0x1a   :  { %p16759_p10 = pnand %p16757_p9, %p16754_p8 }
  0x1c   :  { %16762 = shalt.err (!%p16759_p10)
}
  0x1d   :  { %s16763_s12 = scalar_lea.vmem %s58_s24, 32768  ;;  %p16768_p12 = scmp.lt.s32.totalorder %s58_s24, %s58_s24 }
  0x1e   :  { %p16764_p11 = scmp.ne.s32.totalorder %s58_s24, %s16763_s12  ;;  %p16769_p13 = scmp.lt.s32.totalorder %s16763_s12, %s16763_s12 }
  0x20   :  { %p16770_p0 = por %p16769_p13, %p16768_p12 }
  0x22   :  { %p16771_p1 = pnand %p16770_p0, %p16764_p11 }
  0x24   :  { %16774 = shalt.err (!%p16771_p1)
}
  0x25   :  { %s16967_s1 = smov 256   ;;  %s16968_s10 = smov 16  }
  0x26   :  { %63 = dma.hbm_to_vmem [thread:$0]  %s17456_s3, 32768, %s58_s24, [#allocation9], %s16967_s1, %s16967_s1, %s16968_s10  }
  0x27   :  { %s16969_s15 = smov [#allocation11]   ;;  %s16775_s19 = scalar_lea.hbm %s17458_s5, 8192 }
  0x28   :  { %s79_s16 = sshll.u32 %s16969_s15, 4  ;;  %p16776_p2 = scmp.ne.s32.totalorder %s17458_s5, %s16775_s19  ;;  %s80_s16 = int_to_ptr.vmem [resolvable:$true] %s79_s16 }
  0x29   :  { %p16779_p3 = scmp.lt.u32.totalorder %s16775_s19, %s17458_s5 }
  0x2b   :  { %p16781_p4 = pnand %p16779_p3, %p16776_p2 }
  0x2d   :  { %16784 = shalt.err (!%p16781_p4)
}
  0x2e   :  { %s16785_s25 = scalar_lea.vmem %s80_s16, 8192  ;;  %p16790_p6 = scmp.lt.s32.totalorder %s80_s16, %s80_s16 }
  0x2f   :  { %p16786_p5 = scmp.ne.s32.totalorder %s80_s16, %s16785_s25  ;;  %p16791_p7 = scmp.lt.s32.totalorder %s16785_s25, %s16785_s25 }
  0x31   :  { %p16792_p8 = por %p16791_p7, %p16790_p6 }
  0x33   :  { %p16793_p9 = pnand %p16792_p8, %p16786_p5 }
  0x35   :  { %16796 = shalt.err (!%p16793_p9)
}
  0x36   :  { %s16970_s3 = smov 128   ;;  %s16971_s24 = smov 8  }
  0x37   :  { %85 = dma.hbm_to_vmem [thread:$0]  %s17458_s5, 8192, %s80_s16, [#allocation12], %s16970_s3, %s16970_s3, %s16971_s24  }
  0x38   :  { %s16972_s28 = smov [#allocation14]   ;;  %s16797_s12 = scalar_lea.hbm %s17460_s7, 2048 }
  0x39   :  { %s101_s29 = sshll.u32 %s16972_s28, 4  ;;  %p16798_p10 = scmp.ne.s32.totalorder %s17460_s7, %s16797_s12  ;;  %s102_s29 = int_to_ptr.vmem [resolvable:$true] %s101_s29 }
  0x3a   :  { %p16801_p11 = scmp.lt.u32.totalorder %s16797_s12, %s17460_s7 }
  0x3c   :  { %p16803_p12 = pnand %p16801_p11, %p16798_p10 }
  0x3e   :  { %16806 = shalt.err (!%p16803_p12)
}
  0x3f   :  { %s16807_s15 = scalar_lea.vmem %s102_s29, 2048  ;;  %p16812_p0 = scmp.lt.s32.totalorder %s102_s29, %s102_s29 }
  0x40   :  { %p16808_p13 = scmp.ne.s32.totalorder %s102_s29, %s16807_s15  ;;  %p16813_p1 = scmp.lt.s32.totalorder %s16807_s15, %s16807_s15 }
  0x42   :  { %p16814_p2 = por %p16813_p1, %p16812_p0 }
  0x44   :  { %p16815_p3 = pnand %p16814_p2, %p16808_p13 }
  0x46   :  { %16818 = shalt.err (!%p16815_p3)
}
  0x47   :  { %s16973_s5 = smov 64   ;;  %s16974_s16 = smov 4  }
  0x48   :  { %107 = dma.hbm_to_vmem [thread:$0]  %s17460_s7, 2048, %s102_s29, [#allocation15], %s16973_s5, %s16973_s5, %s16974_s16  }
  0x49   :  { %s16975_s19 = smov [#allocation2]   ;;  %s16976_s21 = smov [#allocation7]  }
  0x4a   :  { %s26_s20 = sshll.u32 %s16975_s19, 4  ;;  %s48_s22 = sshll.u32 %s16976_s21, 4  ;;  %s27_s20 = int_to_ptr.vmem [resolvable:$true] %s26_s20  ;;  %s49_s22 = int_to_ptr.vmem [resolvable:$true] %s48_s22 }
  0x4b   :  { %s16819_s3 = scalar_lea.hbm %s17453_s0, 1536 }
  0x4c   :  { %p16820_p4 = scmp.ne.s32.totalorder %s17453_s0, %s16819_s3  ;;  %p16823_p5 = scmp.lt.u32.totalorder %s16819_s3, %s17453_s0 }
  0x4e   :  { %p16825_p6 = pnand %p16823_p5, %p16820_p4 }
  0x50   :  { %16828 = shalt.err (!%p16825_p6)
}
  0x51   :  { %s16829_s7 = scalar_lea.vmem %s27_s20, 1536  ;;  %p16834_p8 = scmp.lt.s32.totalorder %s27_s20, %s27_s20 }
  0x52   :  { %p16830_p7 = scmp.ne.s32.totalorder %s27_s20, %s16829_s7  ;;  %p16835_p9 = scmp.lt.s32.totalorder %s16829_s7, %s16829_s7 }
  0x54   :  { %p16836_p10 = por %p16835_p9, %p16834_p8 }
  0x56   :  { %p16837_p11 = pnand %p16836_p10, %p16830_p7 }
  0x58   :  { %16840 = shalt.err (!%p16837_p11)
}
  0x59   :  { %29 = dma.hbm_to_vmem [thread:$0]  %s17453_s0, 1536, %s27_s20, [#allocation3]  }
  0x5a   :  { %s16841_s1 = scalar_lea.hbm %s17455_s2, 128 }
  0x5b   :  { %p16842_p12 = scmp.ne.s32.totalorder %s17455_s2, %s16841_s1  ;;  %p16845_p13 = scmp.lt.u32.totalorder %s16841_s1, %s17455_s2 }
  0x5d   :  { %p16847_p0 = pnand %p16845_p13, %p16842_p12 }
  0x5f   :  { %16850 = shalt.err (!%p16847_p0)
}
  0x60   :  { %s16851_s5 = scalar_lea.vmem %s49_s22, 128  ;;  %p16856_p2 = scmp.lt.s32.totalorder %s49_s22, %s49_s22 }
  0x61   :  { %p16852_p1 = scmp.ne.s32.totalorder %s49_s22, %s16851_s5  ;;  %p16857_p3 = scmp.lt.s32.totalorder %s16851_s5, %s16851_s5 }
  0x63   :  { %p16858_p4 = por %p16857_p3, %p16856_p2 }
  0x65   :  { %p16859_p5 = pnand %p16858_p4, %p16852_p1 }
  0x67   :  { %16862 = shalt.err (!%p16859_p5)
}
  0x68   :  { %51 = dma.hbm_to_vmem [thread:$0]  %s17455_s2, 128, %s49_s22, [#allocation6]  }
  0x69   :  { %s16977_s17 = smov [#allocation10]   ;;  %s16978_s19 = smov [#allocation13]  }
  0x6a   :  { %s70_s18 = sshll.u32 %s16977_s17, 4  ;;  %s92_s20 = sshll.u32 %s16978_s19, 4  ;;  %s71_s18 = int_to_ptr.vmem [resolvable:$true] %s70_s18  ;;  %s93_s20 = int_to_ptr.vmem [resolvable:$true] %s92_s20 }
  0x6b   :  { %s16863_s25 = scalar_lea.hbm %s17457_s4, 64 }
  0x6c   :  { %p16864_p6 = scmp.ne.s32.totalorder %s17457_s4, %s16863_s25  ;;  %p16867_p7 = scmp.lt.u32.totalorder %s16863_s25, %s17457_s4 }
  0x6e   :  { %p16869_p8 = pnand %p16867_p7, %p16864_p6 }
  0x70   :  { %16872 = shalt.err (!%p16869_p8)
}
  0x71   :  { %s16873_s2 = scalar_lea.vmem %s71_s18, 64  ;;  %p16878_p10 = scmp.lt.s32.totalorder %s71_s18, %s71_s18 }
  0x72   :  { %p16874_p9 = scmp.ne.s32.totalorder %s71_s18, %s16873_s2  ;;  %p16879_p11 = scmp.lt.s32.totalorder %s16873_s2, %s16873_s2 }
  0x74   :  { %p16880_p12 = por %p16879_p11, %p16878_p10 }
  0x76   :  { %p16881_p13 = pnand %p16880_p12, %p16874_p9 }
  0x78   :  { %16884 = shalt.err (!%p16881_p13)
}
  0x79   :  { %73 = dma.hbm_to_vmem [thread:$0]  %s17457_s4, 64, %s71_s18, [#allocation9]  }
  0x7a   :  { %s16885_s30 = scalar_lea.hbm %s17459_s6, 32 }
  0x7b   :  { %p16886_p0 = scmp.ne.s32.totalorder %s17459_s6, %s16885_s30  ;;  %p16889_p1 = scmp.lt.u32.totalorder %s16885_s30, %s17459_s6 }
  0x7d   :  { %p16891_p2 = pnand %p16889_p1, %p16886_p0 }
  0x7f   :  { %16894 = shalt.err (!%p16891_p2)
}
  0x80   :  { %s16895_s13 = scalar_lea.vmem %s93_s20, 32  ;;  %p16900_p4 = scmp.lt.s32.totalorder %s93_s20, %s93_s20 }
  0x81   :  { %p16896_p3 = scmp.ne.s32.totalorder %s93_s20, %s16895_s13  ;;  %p16901_p5 = scmp.lt.s32.totalorder %s16895_s13, %s16895_s13 }
  0x83   :  { %p16902_p6 = por %p16901_p5, %p16900_p4 }
  0x85   :  { %p16903_p7 = pnand %p16902_p6, %p16896_p3 }
  0x87   :  { %16906 = shalt.err (!%p16903_p7)
}
  0x88   :  { %95 = dma.hbm_to_vmem [thread:$0]  %s17459_s6, 32, %s93_s20, [#allocation12]  }
  0x89   :  { %s16979_s15 = smov [#allocation16]   ;;  %s16907_s17 = scalar_lea.hbm %s17461_s8, 16 }
  0x8a   :  { %s114_s5 = sshll.u32 %s16979_s15, 4  ;;  %p16908_p8 = scmp.ne.s32.totalorder %s17461_s8, %s16907_s17  ;;  %s115_s5 = int_to_ptr.vmem [resolvable:$true] %s114_s5 }
  0x8b   :  { %p16911_p9 = scmp.lt.u32.totalorder %s16907_s17, %s17461_s8 }
  0x8d   :  { %p16913_p10 = pnand %p16911_p9, %p16908_p8 }
  0x8f   :  { %16916 = shalt.err (!%p16913_p10)
}
  0x90   :  { %s16917_s25 = scalar_lea.vmem %s115_s5, 16  ;;  %s16921_s6 = scalar_lea.vmem %s115_s5, 32 }
  0x91   :  { %p16918_p11 = scmp.ne.s32.totalorder %s115_s5, %s16917_s25  ;;  %p16922_p12 = scmp.lt.s32.totalorder %s115_s5, %s115_s5 }
  0x92   :  { %p16923_p13 = scmp.lt.s32.totalorder %s16921_s6, %s16917_s25 }
  0x94   :  { %p16924_p0 = por %p16923_p13, %p16922_p12 }
  0x96   :  { %p16925_p1 = pnand %p16924_p0, %p16918_p11 }
  0x98   :  { %16928 = shalt.err (!%p16925_p1)
}
  0x99   :  { %117 = dma.hbm_to_vmem [thread:$0]  %s17461_s8, 16, %s115_s5, [#allocation15]  }
  0x9a   :  { %16951 = dma.done.wait [#allocation3], 1536  }
  0x9b   :  { %16952 = vsyncadd [#allocation3], 4294965760 }
  0x9c   :  { %16953 = dma.done.wait [#allocation6], 196736  }
  0x9d   :  { %16954 = vsyncadd [#allocation6], 4294770560 }
  0x9e   :  { %16955 = dma.done.wait [#allocation9], 32832  }
  0x9f   :  { %16956 = vsyncadd [#allocation9], 4294934464 }
  0xa0   :  { %16957 = dma.done.wait [#allocation12], 8224  }
  0xa1   :  { %16958 = vsyncadd [#allocation12], 4294959072 }
  0xa2   :  { %16959 = dma.done.wait [#allocation15], 2064  }
  0xa3   :  { %16960 = vsyncadd [#allocation15], 4294965232  ;;  %v158_v0 = vld [vmem:[#allocation5] sm:$0xff]  ;;  %v17141_v54 = vld [vmem:[#allocation2 + $0x8] sm:$0xff]  ;;  %s16980_s8 = smov [#allocation17]  }
  0xa4   :  { %v162_v1 = vld [vmem:[#allocation5 + $0x20] sm:$0xff]  ;;  %v17149_v61 = vcombine.high %v17141_v54, %v17141_v54  ;;  %s14043_s24 = sshll.u32 %s16980_s8, 4  ;;  %s14044_s24 = int_to_ptr.vmem [resolvable:$true] %s14043_s24 }
  0xa5   :  { %v286_v2 = vld [vmem:[#allocation5 + $0x400] sm:$0xff]  ;;  %v14081_v3 = vcombine.high %v158_v0, %v162_v1  ;;  %v14080_v5 = vcombine.low %v158_v0, %v162_v1  ;;  %s16929_s26 = scalar_lea.vmem %s14044_s24, 128  ;;  %p16934_p3 = scmp.lt.s32.totalorder %s14044_s24, %s14044_s24 }
  0xa6   :  { %v290_v4 = vld [vmem:[#allocation5 + $0x420] sm:$0xff]  ;;  %9573 = vmatprep.mubr.bf16.mxu0 %v17149_v61  ;;  %p16930_p2 = scmp.ne.s32.totalorder %s14044_s24, %s16929_s26  ;;  %p16935_p4 = scmp.lt.s32.totalorder %s16929_s26, %s16929_s26 }
  0xa7   :  { %v166_v6 = vld [vmem:[#allocation5 + $0x40] sm:$0xff]  ;;  %v14209_v8 = vcombine.high %v286_v2, %v290_v4  ;;  %v14208_v9 = vcombine.low %v286_v2, %v290_v4  ;;  %9500 = vmatprep.subr.bf16.mxu1 %v14081_v3 }
  0xa8   :  { %v170_v7 = vld [vmem:[#allocation5 + $0x60] sm:$0xff]  ;;  %9501 = vmatpush1.bf16.msra.mxu1 %v14080_v5  ;;  %p16936_p5 = por %p16935_p4, %p16934_p3 }
  0xa9   :  { %v14089_v10 = vcombine.high %v166_v6, %v170_v7  ;;  %v294_v11 = vld [vmem:[#allocation5 + $0x440] sm:$0xff]  ;;  %9541 = vmatprep.subr.bf16.mxu0 %v14209_v8  ;;  %v14088_v18 = vcombine.low %v166_v6, %v170_v7 }
  0xaa   :  { %v298_v12 = vld [vmem:[#allocation5 + $0x460] sm:$0xff]  ;;  %9542 = vmatpush1.bf16.msra.mxu0 %v14208_v9  ;;  %p16937_p6 = pnand %p16936_p5, %p16930_p2 }
  0xab   :  { %v174_v13 = vld [vmem:[#allocation5 + $0x80] sm:$0xff]  ;;  %v14217_v14 = vcombine.high %v294_v11, %v298_v12  ;;  %9502 = vmatprep.subr.bf16.mxu1 %v14089_v10  ;;  %v14216_v19 = vcombine.low %v294_v11, %v298_v12 }
  0xac   :  { %v178_v15 = vld [vmem:[#allocation5 + $0xa0] sm:$0xff]  ;;  %9503 = vmatpush1.bf16.msra.mxu1 %v14088_v18 }
  0xad   :  { %v302_v16 = vld [vmem:[#allocation5 + $0x480] sm:$0xff]  ;;  %v14097_v20 = vcombine.high %v174_v13, %v178_v15  ;;  %9543 = vmatprep.subr.bf16.mxu0 %v14217_v14  ;;  %v14096_v26 = vcombine.low %v174_v13, %v178_v15 }
  0xae   :  { %v306_v17 = vld [vmem:[#allocation5 + $0x4a0] sm:$0xff]  ;;  %9544 = vmatpush1.bf16.msra.mxu0 %v14216_v19 }
  0xaf   :  { %v14225_v21 = vcombine.high %v302_v16, %v306_v17  ;;  %v182_v22 = vld [vmem:[#allocation5 + $0xc0] sm:$0xff]  ;;  %9504 = vmatprep.subr.bf16.mxu1 %v14097_v20  ;;  %v14224_v27 = vcombine.low %v302_v16, %v306_v17 }
  0xb0   :  { %v186_v23 = vld [vmem:[#allocation5 + $0xe0] sm:$0xff]  ;;  %9505 = vmatpush1.bf16.msra.mxu1 %v14096_v26 }
  0xb1   :  { %v310_v24 = vld [vmem:[#allocation5 + $0x4c0] sm:$0xff]  ;;  %v14105_v28 = vcombine.high %v182_v22, %v186_v23  ;;  %9545 = vmatprep.subr.bf16.mxu0 %v14225_v21  ;;  %v14104_v34 = vcombine.low %v182_v22, %v186_v23 }
  0xb2   :  { %v314_v25 = vld [vmem:[#allocation5 + $0x4e0] sm:$0xff]  ;;  %9546 = vmatpush1.bf16.msra.mxu0 %v14224_v27 }
  0xb3   :  { %v14233_v29 = vcombine.high %v310_v24, %v314_v25  ;;  %v190_v30 = vld [vmem:[#allocation5 + $0x100] sm:$0xff]  ;;  %9506 = vmatprep.subr.bf16.mxu1 %v14105_v28  ;;  %v14232_v35 = vcombine.low %v310_v24, %v314_v25 }
  0xb4   :  { %v194_v31 = vld [vmem:[#allocation5 + $0x120] sm:$0xff]  ;;  %9507 = vmatpush1.bf16.msra.mxu1 %v14104_v34 }
  0xb5   :  { %v318_v32 = vld [vmem:[#allocation5 + $0x500] sm:$0xff]  ;;  %v14113_v36 = vcombine.high %v190_v30, %v194_v31  ;;  %9547 = vmatprep.subr.bf16.mxu0 %v14233_v29  ;;  %v14112_v42 = vcombine.low %v190_v30, %v194_v31 }
  0xb6   :  { %v322_v33 = vld [vmem:[#allocation5 + $0x520] sm:$0xff]  ;;  %9548 = vmatpush1.bf16.msra.mxu0 %v14232_v35 }
  0xb7   :  { %v14241_v37 = vcombine.high %v318_v32, %v322_v33  ;;  %v198_v38 = vld [vmem:[#allocation5 + $0x140] sm:$0xff]  ;;  %9508 = vmatprep.subr.bf16.mxu1 %v14113_v36  ;;  %v14240_v43 = vcombine.low %v318_v32, %v322_v33 }
  0xb8   :  { %v202_v39 = vld [vmem:[#allocation5 + $0x160] sm:$0xff]  ;;  %9509 = vmatpush1.bf16.msra.mxu1 %v14112_v42 }
  0xb9   :  { %v326_v40 = vld [vmem:[#allocation5 + $0x540] sm:$0xff]  ;;  %v14121_v44 = vcombine.high %v198_v38, %v202_v39  ;;  %9549 = vmatprep.subr.bf16.mxu0 %v14241_v37  ;;  %v14120_v50 = vcombine.low %v198_v38, %v202_v39 }
  0xba   :  { %v330_v41 = vld [vmem:[#allocation5 + $0x560] sm:$0xff]  ;;  %9550 = vmatpush1.bf16.msra.mxu0 %v14240_v43 }
  0xbb   :  { %v14249_v45 = vcombine.high %v326_v40, %v330_v41  ;;  %v206_v46 = vld [vmem:[#allocation5 + $0x180] sm:$0xff]  ;;  %9510 = vmatprep.subr.bf16.mxu1 %v14121_v44  ;;  %v14248_v51 = vcombine.low %v326_v40, %v330_v41 }
  0xbc   :  { %v210_v47 = vld [vmem:[#allocation5 + $0x1a0] sm:$0xff]  ;;  %9511 = vmatpush1.bf16.msra.mxu1 %v14120_v50 }
  0xbd   :  { %v334_v48 = vld [vmem:[#allocation5 + $0x580] sm:$0xff]  ;;  %v14129_v52 = vcombine.high %v206_v46, %v210_v47  ;;  %9551 = vmatprep.subr.bf16.mxu0 %v14249_v45  ;;  %v14128_v62 = vcombine.low %v206_v46, %v210_v47 }
  0xbe   :  { %v338_v49 = vld [vmem:[#allocation5 + $0x5a0] sm:$0xff]  ;;  %9552 = vmatpush1.bf16.msra.mxu0 %v14248_v51 }
  0xbf   :  { %v17139_v53 = vld [vmem:[#allocation2] sm:$0xff]  ;;  %v14257_v55 = vcombine.high %v334_v48, %v338_v49  ;;  %9512 = vmatprep.subr.bf16.mxu1 %v14129_v52  ;;  %v14256_v63 = vcombine.low %v334_v48, %v338_v49 }
  0xc0   :  { %v214_v56 = vld [vmem:[#allocation5 + $0x1c0] sm:$0xff]  ;;  %v17145_v58 = vcombine.high %v17139_v53, %v17139_v53  ;;  %9513 = vmatpush1.bf16.msra.mxu1 %v14128_v62 }
  0xc1   :  { %v218_v57 = vld [vmem:[#allocation5 + $0x1e0] sm:$0xff]  ;;  %9553 = vmatprep.subr.bf16.mxu0 %v14257_v55 }
  0xc2   :  { %v342_v59 = vld [vmem:[#allocation5 + $0x5c0] sm:$0xff]  ;;  %9532 = vmatprep.mubr.bf16.mxu1 %v17145_v58  ;;  %v14137_v0 = vcombine.high %v214_v56, %v218_v57  ;;  %v14136_v6 = vcombine.low %v214_v56, %v218_v57  ;;  %9554 = vmatpush1.bf16.msra.mxu0 %v14256_v63 }
  0xc3   :  { %v346_v60 = vld [vmem:[#allocation5 + $0x5e0] sm:$0xff] }
  0xc4   :  { %v14265_v1 = vcombine.high %v342_v59, %v346_v60  ;;  %v222_v2 = vld [vmem:[#allocation5 + $0x200] sm:$0xff]  ;;  %9514 = vmatprep.subr.bf16.mxu1 %v14137_v0  ;;  %v14264_v7 = vcombine.low %v342_v59, %v346_v60 }
  0xc5   :  { %v226_v3 = vld [vmem:[#allocation5 + $0x220] sm:$0xff]  ;;  %9515 = vmatpush1.bf16.msra.mxu1 %v14136_v6  ;;  %v159_v6 = vld [vmem:[#allocation5 + $0x8] sm:$0xff] }
  0xc6   :  { %v350_v4 = vld [vmem:[#allocation5 + $0x600] sm:$0xff]  ;;  %v14145_v8 = vcombine.high %v222_v2, %v226_v3  ;;  %9555 = vmatprep.subr.bf16.mxu0 %v14265_v1  ;;  %v14144_v14 = vcombine.low %v222_v2, %v226_v3 }
  0xc7   :  { %v354_v5 = vld [vmem:[#allocation5 + $0x620] sm:$0xff]  ;;  %9556 = vmatpush1.bf16.msra.mxu0 %v14264_v7  ;;  %v163_v7 = vld [vmem:[#allocation5 + $0x28] sm:$0xff] }
  0xc8   :  { %v14273_v9 = vcombine.high %v350_v4, %v354_v5  ;;  %v230_v10 = vld [vmem:[#allocation5 + $0x240] sm:$0xff]  ;;  %9516 = vmatprep.subr.bf16.mxu1 %v14145_v8  ;;  %v14272_v15 = vcombine.low %v350_v4, %v354_v5 }
  0xc9   :  { %v234_v11 = vld [vmem:[#allocation5 + $0x260] sm:$0xff]  ;;  %9517 = vmatpush1.bf16.msra.mxu1 %v14144_v14  ;;  %v167_v14 = vld [vmem:[#allocation5 + $0x48] sm:$0xff] }
  0xca   :  { %v358_v12 = vld [vmem:[#allocation5 + $0x640] sm:$0xff]  ;;  %v14153_v16 = vcombine.high %v230_v10, %v234_v11  ;;  %9557 = vmatprep.subr.bf16.mxu0 %v14273_v9  ;;  %v14152_v22 = vcombine.low %v230_v10, %v234_v11 }
  0xcb   :  { %v362_v13 = vld [vmem:[#allocation5 + $0x660] sm:$0xff]  ;;  %9558 = vmatpush1.bf16.msra.mxu0 %v14272_v15  ;;  %v171_v15 = vld [vmem:[#allocation5 + $0x68] sm:$0xff] }
  0xcc   :  { %v14281_v17 = vcombine.high %v358_v12, %v362_v13  ;;  %v238_v18 = vld [vmem:[#allocation5 + $0x280] sm:$0xff]  ;;  %9518 = vmatprep.subr.bf16.mxu1 %v14153_v16  ;;  %v14280_v23 = vcombine.low %v358_v12, %v362_v13  ;;  %v14083_v12 = vcombine.high %v159_v6, %v163_v7  ;;  %v17155_v16 = vcombine.low %v17139_v53, %v17139_v53  ;;  %v175_v53 = vld [vmem:[#allocation5 + $0x88] sm:$0xff] }
  0xcd   :  { %v242_v19 = vld [vmem:[#allocation5 + $0x2a0] sm:$0xff]  ;;  %9519 = vmatpush1.bf16.msra.mxu1 %v14152_v22 }
  0xce   :  { %v366_v20 = vld [vmem:[#allocation5 + $0x680] sm:$0xff]  ;;  %v14161_v24 = vcombine.high %v238_v18, %v242_v19  ;;  %9559 = vmatprep.subr.bf16.mxu0 %v14281_v17  ;;  %v14160_v30 = vcombine.low %v238_v18, %v242_v19  ;;  %v17157_v19 = vld [vmem:[#allocation2 + $0x10] sm:$0xff] }
  0xcf   :  { %v370_v21 = vld [vmem:[#allocation5 + $0x6a0] sm:$0xff]  ;;  %9560 = vmatpush1.bf16.msra.mxu0 %v14280_v23  ;;  %v14091_v23 = vcombine.high %v167_v14, %v171_v15 }
  0xd0   :  { %v14289_v25 = vcombine.high %v366_v20, %v370_v21  ;;  %v246_v26 = vld [vmem:[#allocation5 + $0x2c0] sm:$0xff]  ;;  %9520 = vmatprep.subr.bf16.mxu1 %v14161_v24  ;;  %v14288_v31 = vcombine.low %v366_v20, %v370_v21  ;;  %v14082_v20 = vcombine.low %v159_v6, %v163_v7  ;;  %v17161_v21 = vcombine.low %v17141_v54, %v17141_v54  ;;  %v219_v7 = vld [vmem:[#allocation5 + $0x1e8] sm:$0xff] }
  0xd1   :  { %v250_v27 = vld [vmem:[#allocation5 + $0x2e0] sm:$0xff]  ;;  %9521 = vmatpush1.bf16.msra.mxu1 %v14160_v30  ;;  %v14090_v54 = vcombine.low %v167_v14, %v171_v15  ;;  %v227_v15 = vld [vmem:[#allocation5 + $0x228] sm:$0xff] }
  0xd2   :  { %v374_v28 = vld [vmem:[#allocation5 + $0x6c0] sm:$0xff]  ;;  %v14169_v32 = vcombine.high %v246_v26, %v250_v27  ;;  %9561 = vmatprep.subr.bf16.mxu0 %v14289_v25  ;;  %v14168_v38 = vcombine.low %v246_v26, %v250_v27  ;;  %v179_v27 = vld [vmem:[#allocation5 + $0xa8] sm:$0xff] }
  0xd3   :  { %v378_v29 = vld [vmem:[#allocation5 + $0x6e0] sm:$0xff]  ;;  %9562 = vmatpush1.bf16.msra.mxu0 %v14288_v31  ;;  %v14099_v30 = vcombine.high %v175_v53, %v179_v27 }
  0xd4   :  { %v14297_v33 = vcombine.high %v374_v28, %v378_v29  ;;  %v254_v34 = vld [vmem:[#allocation5 + $0x300] sm:$0xff]  ;;  %9522 = vmatprep.subr.bf16.mxu1 %v14169_v32  ;;  %v14296_v39 = vcombine.low %v374_v28, %v378_v29  ;;  %v17165_v28 = vcombine.high %v17157_v19, %v17157_v19 }
  0xd5   :  { %v258_v35 = vld [vmem:[#allocation5 + $0x320] sm:$0xff]  ;;  %9523 = vmatpush1.bf16.msra.mxu1 %v14168_v38 }
  0xd6   :  { %v382_v36 = vld [vmem:[#allocation5 + $0x700] sm:$0xff]  ;;  %v14177_v40 = vcombine.high %v254_v34, %v258_v35  ;;  %9563 = vmatprep.subr.bf16.mxu0 %v14297_v33  ;;  %v14176_v46 = vcombine.low %v254_v34, %v258_v35  ;;  %v183_v33 = vld [vmem:[#allocation5 + $0xc8] sm:$0xff] }
  0xd7   :  { %v386_v37 = vld [vmem:[#allocation5 + $0x720] sm:$0xff]  ;;  %9564 = vmatpush1.bf16.msra.mxu0 %v14296_v39  ;;  %v187_v35 = vld [vmem:[#allocation5 + $0xe8] sm:$0xff] }
  0xd8   :  { %v14305_v41 = vcombine.high %v382_v36, %v386_v37  ;;  %v262_v42 = vld [vmem:[#allocation5 + $0x340] sm:$0xff]  ;;  %9524 = vmatprep.subr.bf16.mxu1 %v14177_v40  ;;  %v14304_v47 = vcombine.low %v382_v36, %v386_v37  ;;  %v14098_v36 = vcombine.low %v175_v53, %v179_v27  ;;  %v14107_v38 = vcombine.high %v183_v33, %v187_v35 }
  0xd9   :  { %v266_v43 = vld [vmem:[#allocation5 + $0x360] sm:$0xff]  ;;  %9525 = vmatpush1.bf16.msra.mxu1 %v14176_v46 }
  0xda   :  { %v390_v44 = vld [vmem:[#allocation5 + $0x740] sm:$0xff]  ;;  %v14185_v48 = vcombine.high %v262_v42, %v266_v43  ;;  %9565 = vmatprep.subr.bf16.mxu0 %v14305_v41  ;;  %v14184_v56 = vcombine.low %v262_v42, %v266_v43  ;;  %v191_v41 = vld [vmem:[#allocation5 + $0x108] sm:$0xff] }
  0xdb   :  { %v394_v45 = vld [vmem:[#allocation5 + $0x760] sm:$0xff]  ;;  %9566 = vmatpush1.bf16.msra.mxu0 %v14304_v47  ;;  %v195_v43 = vld [vmem:[#allocation5 + $0x128] sm:$0xff] }
  0xdc   :  { %v14313_v49 = vcombine.high %v390_v44, %v394_v45  ;;  %v270_v50 = vld [vmem:[#allocation5 + $0x380] sm:$0xff]  ;;  %9526 = vmatprep.subr.bf16.mxu1 %v14185_v48  ;;  %v14312_v57 = vcombine.low %v390_v44, %v394_v45  ;;  %v14106_v44 = vcombine.low %v183_v33, %v187_v35  ;;  %v14115_v46 = vcombine.high %v191_v41, %v195_v43  ;;  %v243_v33 = vld [vmem:[#allocation5 + $0x2a8] sm:$0xff] }
  0xdd   :  { %v274_v51 = vld [vmem:[#allocation5 + $0x3a0] sm:$0xff]  ;;  %9527 = vmatpush1.bf16.msra.mxu1 %v14184_v56 }
  0xde   :  { %v398_v52 = vld [vmem:[#allocation5 + $0x780] sm:$0xff]  ;;  %v14193_v59 = vcombine.high %v270_v50, %v274_v51  ;;  %9567 = vmatprep.subr.bf16.mxu0 %v14313_v49  ;;  %v14192_v2 = vcombine.low %v270_v50, %v274_v51  ;;  %v199_v49 = vld [vmem:[#allocation5 + $0x148] sm:$0xff] }
  0xdf   :  { %v402_v55 = vld [vmem:[#allocation5 + $0x7a0] sm:$0xff]  ;;  %9568 = vmatpush1.bf16.msra.mxu0 %v14312_v57  ;;  %v203_v51 = vld [vmem:[#allocation5 + $0x168] sm:$0xff] }
  0xe0   :  { %v14321_v60 = vcombine.high %v398_v52, %v402_v55  ;;  %v278_v62 = vld [vmem:[#allocation5 + $0x3c0] sm:$0xff]  ;;  %9528 = vmatprep.subr.bf16.mxu1 %v14193_v59  ;;  %v14320_v3 = vcombine.low %v398_v52, %v402_v55  ;;  %v14114_v52 = vcombine.low %v191_v41, %v195_v43  ;;  %v14123_v56 = vcombine.high %v199_v49, %v203_v51  ;;  %v251_v41 = vld [vmem:[#allocation5 + $0x2e8] sm:$0xff] }
  0xe1   :  { %v282_v63 = vld [vmem:[#allocation5 + $0x3e0] sm:$0xff]  ;;  %9529 = vmatpush1.bf16.msra.mxu1 %v14192_v2 }
  0xe2   :  { %v406_v0 = vld [vmem:[#allocation5 + $0x7c0] sm:$0xff]  ;;  %v14201_v4 = vcombine.high %v278_v62, %v282_v63  ;;  %9569 = vmatprep.subr.bf16.mxu0 %v14321_v60  ;;  %v14200_v10 = vcombine.low %v278_v62, %v282_v63  ;;  %v207_v60 = vld [vmem:[#allocation5 + $0x188] sm:$0xff] }
  0xe3   :  { %v410_v1 = vld [vmem:[#allocation5 + $0x7e0] sm:$0xff]  ;;  %9570 = vmatpush1.bf16.msra.mxu0 %v14320_v3  ;;  %v211_v63 = vld [vmem:[#allocation5 + $0x1a8] sm:$0xff] }
  0xe4   :  { %v14329_v5 = vcombine.high %v406_v0, %v410_v1  ;;  %v414_v8 = vld [vmem:[#allocation5 + $0x800] sm:$0xff]  ;;  %9530 = vmatprep.subr.bf16.mxu1 %v14201_v4  ;;  %v14328_v11 = vcombine.low %v406_v0, %v410_v1  ;;  %v14122_v0 = vcombine.low %v199_v49, %v203_v51  ;;  %v14131_v2 = vcombine.high %v207_v60, %v211_v63  ;;  %v259_v49 = vld [vmem:[#allocation5 + $0x328] sm:$0xff] }
  0xe5   :  { %v418_v9 = vld [vmem:[#allocation5 + $0x820] sm:$0xff]  ;;  %9531 = vmatpush1.bf16.msra.mxu1 %v14200_v10 }
  0xe6   :  { %9571 = vmatprep.subr.bf16.mxu0 %v14329_v5  ;;  %v14337_v13 = vcombine.high %v414_v8, %v418_v9  ;;  %v422_v17 = vld [vmem:[#allocation5 + $0x840] sm:$0xff]  ;;  %v14336_v22 = vcombine.low %v414_v8, %v418_v9  ;;  %9992 = vmatprep.subr.bf16.mxu1 %v14083_v12  ;;  %v215_v5 = vld [vmem:[#allocation5 + $0x1c8] sm:$0xff]  ;;  %v14130_v8 = vcombine.low %v207_v60, %v211_v63 }
  0xe7   :  { %v426_v18 = vld [vmem:[#allocation5 + $0x860] sm:$0xff]  ;;  %9572 = vmatpush1.bf16.msra.mxu0 %v14328_v11  ;;  %v14139_v10 = vcombine.high %v215_v5, %v219_v7  ;;  %v267_v60 = vld [vmem:[#allocation5 + $0x368] sm:$0xff] }
  0xe8   :  { %v430_v24 = vld [vmem:[#allocation5 + $0x880] sm:$0xff]  ;;  %9582 = vmatprep.subr.bf16.mxu0 %v14337_v13  ;;  %v14345_v26 = vcombine.high %v422_v17, %v426_v18  ;;  %9533 = vmatmul.mubr.bf16.vlgmr.msra.gmra.mrb[0].mxu1 %v17155_v16  ;;  %v14344_v29 = vcombine.low %v422_v17, %v426_v18  ;;  %v223_v13 = vld [vmem:[#allocation5 + $0x208] sm:$0xff]  ;;  %v14138_v17 = vcombine.low %v215_v5, %v219_v7 }
  0xe9   :  { %v434_v25 = vld [vmem:[#allocation5 + $0x8a0] sm:$0xff]  ;;  %9993 = vmatpush1.bf16.msra.mxu1 %v14082_v20  ;;  %10024 = vmatprep.mubr.bf16.mxu1 %v17145_v58  ;;  %v14147_v20 = vcombine.high %v223_v13, %v227_v15  ;;  %v14146_v53 = vcombine.low %v223_v13, %v227_v15  ;;  %v275_v5 = vld [vmem:[#allocation5 + $0x3a8] sm:$0xff] }
  0xea   :  { %9574 = vmatmul.mubr.bf16.vlgmr.msra.gmra.mrb[0].mxu0 %v17161_v21  ;;  %9994 = vmatprep.subr.bf16.mxu1 %v14091_v23  ;;  %v438_v31 = vld [vmem:[#allocation5 + $0x8c0] sm:$0xff]  ;;  %v14353_v34 = vcombine.high %v430_v24, %v434_v25  ;;  %v14352_v37 = vcombine.low %v430_v24, %v434_v25  ;;  %v231_v24 = vld [vmem:[#allocation5 + $0x248] sm:$0xff] }
  0xeb   :  { %9583 = vmatpush1.bf16.msra.mxu0 %v14336_v22  ;;  %v442_v32 = vld [vmem:[#allocation5 + $0x8e0] sm:$0xff]  ;;  %9614 = vmatprep.mubr.bf16.mxu0 %v17165_v28  ;;  %v283_v13 = vld [vmem:[#allocation5 + $0x3e8] sm:$0xff] }
  0xec   :  { %9584 = vmatprep.subr.bf16.mxu0 %v14345_v26  ;;  %v446_v39 = vld [vmem:[#allocation5 + $0x900] sm:$0xff]  ;;  %v14361_v42 = vcombine.high %v438_v31, %v442_v32  ;;  %v14360_v45 = vcombine.low %v438_v31, %v442_v32  ;;  %v235_v26 = vld [vmem:[#allocation5 + $0x268] sm:$0xff] }
  0xed   :  { %9995 = vmatpush1.bf16.msra.mxu1 %v14090_v54  ;;  %v450_v40 = vld [vmem:[#allocation5 + $0x920] sm:$0xff]  ;;  %v14155_v54 = vcombine.high %v231_v24, %v235_v26  ;;  %v239_v31 = vld [vmem:[#allocation5 + $0x288] sm:$0xff] }
  0xee   :  { %9996 = vmatprep.subr.bf16.mxu1 %v14099_v30  ;;  %v454_v47 = vld [vmem:[#allocation5 + $0x940] sm:$0xff]  ;;  %v14369_v50 = vcombine.high %v446_v39, %v450_v40  ;;  %v14368_v55 = vcombine.low %v446_v39, %v450_v40  ;;  %v247_v39 = vld [vmem:[#allocation5 + $0x2c8] sm:$0xff] }
  0xef   :  { %9585 = vmatpush1.bf16.msra.mxu0 %v14344_v29  ;;  %v458_v48 = vld [vmem:[#allocation5 + $0x960] sm:$0xff] }
  0xf0   :  { %9586 = vmatprep.subr.bf16.mxu0 %v14353_v34  ;;  %v462_v57 = vld [vmem:[#allocation5 + $0x980] sm:$0xff]  ;;  %v14377_v62 = vcombine.high %v454_v47, %v458_v48  ;;  %v14376_v1 = vcombine.low %v454_v47, %v458_v48  ;;  %v14154_v34 = vcombine.low %v231_v24, %v235_v26  ;;  %v255_v47 = vld [vmem:[#allocation5 + $0x308] sm:$0xff] }
  0xf1   :  { %9997 = vmatpush1.bf16.msra.mxu1 %v14098_v36  ;;  %v466_v59 = vld [vmem:[#allocation5 + $0x9a0] sm:$0xff]  ;;  %v14163_v36 = vcombine.high %v239_v31, %v243_v33  ;;  %v291_v24 = vld [vmem:[#allocation5 + $0x428] sm:$0xff] }
  0xf2   :  { %9998 = vmatprep.subr.bf16.mxu1 %v14107_v38  ;;  %v470_v3 = vld [vmem:[#allocation5 + $0x9c0] sm:$0xff]  ;;  %v14385_v6 = vcombine.high %v462_v57, %v466_v59  ;;  %v14384_v9 = vcombine.low %v462_v57, %v466_v59  ;;  %v263_v57 = vld [vmem:[#allocation5 + $0x348] sm:$0xff] }
  0xf3   :  { %9587 = vmatpush1.bf16.msra.mxu0 %v14352_v37  ;;  %v474_v4 = vld [vmem:[#allocation5 + $0x9e0] sm:$0xff] }
  0xf4   :  { %9588 = vmatprep.subr.bf16.mxu0 %v14361_v42  ;;  %v478_v11 = vld [vmem:[#allocation5 + $0xa00] sm:$0xff]  ;;  %v14393_v14 = vcombine.high %v470_v3, %v474_v4  ;;  %v14392_v18 = vcombine.low %v470_v3, %v474_v4  ;;  %v14162_v42 = vcombine.low %v239_v31, %v243_v33  ;;  %v271_v3 = vld [vmem:[#allocation5 + $0x388] sm:$0xff] }
  0xf5   :  { %9999 = vmatpush1.bf16.msra.mxu1 %v14106_v44  ;;  %v482_v12 = vld [vmem:[#allocation5 + $0xa20] sm:$0xff]  ;;  %v14171_v44 = vcombine.high %v247_v39, %v251_v41 }
  0xf6   :  { %10000 = vmatprep.subr.bf16.mxu1 %v14115_v46  ;;  %v486_v22 = vld [vmem:[#allocation5 + $0xa40] sm:$0xff]  ;;  %v14401_v25 = vcombine.high %v478_v11, %v482_v12  ;;  %v14400_v27 = vcombine.low %v478_v11, %v482_v12  ;;  %v279_v11 = vld [vmem:[#allocation5 + $0x3c8] sm:$0xff] }
  0xf7   :  { %9589 = vmatpush1.bf16.msra.mxu0 %v14360_v45  ;;  %v490_v23 = vld [vmem:[#allocation5 + $0xa60] sm:$0xff] }
  0xf8   :  { %9590 = vmatprep.subr.bf16.mxu0 %v14369_v50  ;;  %v494_v29 = vld [vmem:[#allocation5 + $0xa80] sm:$0xff]  ;;  %v14409_v32 = vcombine.high %v486_v22, %v490_v23  ;;  %v14408_v35 = vcombine.low %v486_v22, %v490_v23  ;;  %v14170_v50 = vcombine.low %v247_v39, %v251_v41  ;;  %v287_v22 = vld [vmem:[#allocation5 + $0x408] sm:$0xff] }
  0xf9   :  { %10001 = vmatpush1.bf16.msra.mxu1 %v14114_v52  ;;  %v498_v30 = vld [vmem:[#allocation5 + $0xaa0] sm:$0xff]  ;;  %v14179_v52 = vcombine.high %v255_v47, %v259_v49  ;;  %v14210_v33 = vcombine.low %v287_v22, %v291_v24  ;;  %v307_v41 = vld [vmem:[#allocation5 + $0x4a8] sm:$0xff] }
  0xfa   :  { %10002 = vmatprep.subr.bf16.mxu1 %v14123_v56  ;;  %v502_v37 = vld [vmem:[#allocation5 + $0xac0] sm:$0xff]  ;;  %v14417_v40 = vcombine.high %v494_v29, %v498_v30  ;;  %v14416_v43 = vcombine.low %v494_v29, %v498_v30  ;;  %v295_v29 = vld [vmem:[#allocation5 + $0x448] sm:$0xff] }
  0xfb   :  { %9591 = vmatpush1.bf16.msra.mxu0 %v14368_v55  ;;  %v506_v38 = vld [vmem:[#allocation5 + $0xae0] sm:$0xff]  ;;  %v299_v30 = vld [vmem:[#allocation5 + $0x468] sm:$0xff] }
  0xfc   :  { %9592 = vmatprep.subr.bf16.mxu0 %v14377_v62  ;;  %v510_v45 = vld [vmem:[#allocation5 + $0xb00] sm:$0xff]  ;;  %v14425_v48 = vcombine.high %v502_v37, %v506_v38  ;;  %v14424_v51 = vcombine.low %v502_v37, %v506_v38  ;;  %v14178_v62 = vcombine.low %v255_v47, %v259_v49  ;;  %v311_v47 = vld [vmem:[#allocation5 + $0x4c8] sm:$0xff] }
  0xfd   :  { %10003 = vmatpush1.bf16.msra.mxu1 %v14122_v0  ;;  %v514_v46 = vld [vmem:[#allocation5 + $0xb20] sm:$0xff]  ;;  %v14187_v0 = vcombine.high %v263_v57, %v267_v60  ;;  %v315_v49 = vld [vmem:[#allocation5 + $0x4e8] sm:$0xff] }
  0xfe   :  { %10004 = vmatprep.subr.bf16.mxu1 %v14131_v2  ;;  %v518_v55 = vld [vmem:[#allocation5 + $0xb40] sm:$0xff]  ;;  %v14433_v59 = vcombine.high %v510_v45, %v514_v46  ;;  %v14432_v63 = vcombine.low %v510_v45, %v514_v46 }
  0xff   :  { %9593 = vmatpush1.bf16.msra.mxu0 %v14376_v1  ;;  %v522_v56 = vld [vmem:[#allocation5 + $0xb60] sm:$0xff] }
 0x100   :  { %9594 = vmatprep.subr.bf16.mxu0 %v14385_v6  ;;  %v526_v1 = vld [vmem:[#allocation5 + $0xb80] sm:$0xff]  ;;  %v14441_v4 = vcombine.high %v518_v55, %v522_v56  ;;  %v14186_v6 = vcombine.low %v263_v57, %v267_v60  ;;  %v14440_v7 = vcombine.low %v518_v55, %v522_v56  ;;  %v319_v57 = vld [vmem:[#allocation5 + $0x508] sm:$0xff] }
 0x101   :  { %10005 = vmatpush1.bf16.msra.mxu1 %v14130_v8  ;;  %v530_v2 = vld [vmem:[#allocation5 + $0xba0] sm:$0xff]  ;;  %v14195_v8 = vcombine.high %v271_v3, %v275_v5  ;;  %v323_v60 = vld [vmem:[#allocation5 + $0x528] sm:$0xff] }
 0x102   :  { %10006 = vmatprep.subr.bf16.mxu1 %v14139_v10  ;;  %v538_v10 = vld [vmem:[#allocation5 + $0xbe0] sm:$0xff]  ;;  %v14449_v12 = vcombine.high %v526_v1, %v530_v2  ;;  %v14448_v15 = vcombine.low %v526_v1, %v530_v2 }
 0x103   :  { %9595 = vmatpush1.bf16.msra.mxu0 %v14384_v9  ;;  %v534_v9 = vld [vmem:[#allocation5 + $0xbc0] sm:$0xff] }
 0x104   :  { %9596 = vmatprep.subr.bf16.mxu0 %v14393_v14  ;;  %v14194_v14 = vcombine.low %v271_v3, %v275_v5  ;;  %v14457_v23 = vcombine.high %v534_v9, %v538_v10  ;;  %v14456_v26 = vcombine.low %v534_v9, %v538_v10  ;;  %v558_v37 = vld [vmem:[#allocation5 + $0xc80] sm:$0xff]  ;;  %v327_v3 = vld [vmem:[#allocation5 + $0x548] sm:$0xff] }
 0x105   :  { %10007 = vmatpush1.bf16.msra.mxu1 %v14138_v17  ;;  %v14203_v17 = vcombine.high %v279_v11, %v283_v13  ;;  %v562_v38 = vld [vmem:[#allocation5 + $0xca0] sm:$0xff]  ;;  %v331_v5 = vld [vmem:[#allocation5 + $0x568] sm:$0xff] }
 0x106   :  { %10008 = vmatprep.subr.bf16.mxu1 %v14147_v20  ;;  %v546_v20 = vld [vmem:[#allocation5 + $0xc20] sm:$0xff] }
 0x107   :  { %9597 = vmatpush1.bf16.msra.mxu0 %v14392_v18  ;;  %v542_v18 = vld [vmem:[#allocation5 + $0xc00] sm:$0xff] }
 0x108   :  { %9598 = vmatprep.subr.bf16.mxu0 %v14401_v25  ;;  %v14202_v25 = vcombine.low %v279_v11, %v283_v13  ;;  %v14465_v31 = vcombine.high %v542_v18, %v546_v20  ;;  %v566_v45 = vld [vmem:[#allocation5 + $0xcc0] sm:$0xff]  ;;  %v335_v11 = vld [vmem:[#allocation5 + $0x588] sm:$0xff] }
 0x109   :  { %10009 = vmatpush1.bf16.msra.mxu1 %v14146_v53  ;;  %v14211_v53 = vcombine.high %v287_v22, %v291_v24  ;;  %v570_v46 = vld [vmem:[#allocation5 + $0xce0] sm:$0xff]  ;;  %v339_v13 = vld [vmem:[#allocation5 + $0x5a8] sm:$0xff] }
 0x10a   :  { %10010 = vmatprep.subr.bf16.mxu1 %v14155_v54  ;;  %v554_v54 = vld [vmem:[#allocation5 + $0xc60] sm:$0xff]  ;;  %v347_v24 = vld [vmem:[#allocation5 + $0x5e8] sm:$0xff] }
 0x10b   :  { %9599 = vmatpush1.bf16.msra.mxu0 %v14400_v27  ;;  %v550_v27 = vld [vmem:[#allocation5 + $0xc40] sm:$0xff] }
 0x10c   :  { %9600 = vmatprep.subr.bf16.mxu0 %v14409_v32  ;;  %v17171_v32 = vld [vmem:[#allocation2 + $0x18] sm:$0xff]  ;;  %v14473_v39 = vcombine.high %v550_v27, %v554_v54  ;;  %v574_v55 = vld [vmem:[#allocation5 + $0xd00] sm:$0xff] }
 0x10d   :  { %10011 = vmatpush1.bf16.msra.mxu1 %v14154_v34  ;;  %v17175_v34 = vcombine.low %v17157_v19, %v17157_v19  ;;  %v14218_v19 = vcombine.low %v295_v29, %v299_v30  ;;  %v578_v56 = vld [vmem:[#allocation5 + $0xd20] sm:$0xff] }
 0x10e   :  { %10012 = vmatprep.subr.bf16.mxu1 %v14163_v36  ;;  %v14219_v36 = vcombine.high %v295_v29, %v299_v30  ;;  %v582_v1 = vld [vmem:[#allocation5 + $0xd40] sm:$0xff]  ;;  %v351_v29 = vld [vmem:[#allocation5 + $0x608] sm:$0xff] }
 0x10f   :  { %9601 = vmatpush1.bf16.msra.mxu0 %v14408_v35  ;;  %v14464_v35 = vcombine.low %v542_v18, %v546_v20  ;;  %v586_v2 = vld [vmem:[#allocation5 + $0xd60] sm:$0xff] }
 0x110   :  { %9602 = vmatprep.subr.bf16.mxu0 %v14417_v40  ;;  %v303_v40 = vld [vmem:[#allocation5 + $0x488] sm:$0xff]  ;;  %v590_v9 = vld [vmem:[#allocation5 + $0xd80] sm:$0xff] }
 0x111   :  { %10013 = vmatpush1.bf16.msra.mxu1 %v14162_v42  ;;  %v17179_v42 = vcombine.high %v17171_v32, %v17171_v32  ;;  %v594_v10 = vld [vmem:[#allocation5 + $0xda0] sm:$0xff] }
 0x112   :  { %10014 = vmatprep.subr.bf16.mxu1 %v14171_v44  ;;  %v14227_v44 = vcombine.high %v303_v40, %v307_v41  ;;  %v598_v18 = vld [vmem:[#allocation5 + $0xdc0] sm:$0xff]  ;;  %v14513_v22 = vcombine.high %v590_v9, %v594_v10 }
 0x113   :  { %9603 = vmatpush1.bf16.msra.mxu0 %v14416_v43  ;;  %v14472_v43 = vcombine.low %v550_v27, %v554_v54  ;;  %v602_v20 = vld [vmem:[#allocation5 + $0xde0] sm:$0xff] }
 0x114   :  { %9604 = vmatprep.subr.bf16.mxu0 %v14425_v48  ;;  %v14481_v48 = vcombine.high %v558_v37, %v562_v38  ;;  %v606_v27 = vld [vmem:[#allocation5 + $0xe00] sm:$0xff]  ;;  %v14521_v30 = vcombine.high %v598_v18, %v602_v20 }
 0x115   :  { %10015 = vmatpush1.bf16.msra.mxu1 %v14170_v50  ;;  %v14226_v50 = vcombine.low %v303_v40, %v307_v41  ;;  %v610_v54 = vld [vmem:[#allocation5 + $0xe20] sm:$0xff]  ;;  %v363_v41 = vld [vmem:[#allocation5 + $0x668] sm:$0xff] }
 0x116   :  { %10016 = vmatprep.subr.bf16.mxu1 %v14179_v52  ;;  %v14235_v52 = vcombine.high %v311_v47, %v315_v49  ;;  %v14529_v40 = vcombine.high %v606_v27, %v610_v54 }
 0x117   :  { %9605 = vmatpush1.bf16.msra.mxu0 %v14424_v51  ;;  %v14480_v51 = vcombine.low %v558_v37, %v562_v38  ;;  %v614_v37 = vld [vmem:[#allocation5 + $0xe40] sm:$0xff] }
 0x118   :  { %9606 = vmatprep.subr.bf16.mxu0 %v14433_v59  ;;  %v14489_v59 = vcombine.high %v566_v45, %v570_v46  ;;  %v618_v38 = vld [vmem:[#allocation5 + $0xe60] sm:$0xff] }
 0x119   :  { %10017 = vmatpush1.bf16.msra.mxu1 %v14178_v62  ;;  %v14234_v62 = vcombine.low %v311_v47, %v315_v49  ;;  %v367_v47 = vld [vmem:[#allocation5 + $0x688] sm:$0xff] }
 0x11a   :  { %10018 = vmatprep.subr.bf16.mxu1 %v14187_v0  ;;  %v14243_v0 = vcombine.high %v319_v57, %v323_v60  ;;  %v371_v49 = vld [vmem:[#allocation5 + $0x6a8] sm:$0xff] }
 0x11b   :  { %9607 = vmatpush1.bf16.msra.mxu0 %v14432_v63  ;;  %v14488_v63 = vcombine.low %v566_v45, %v570_v46  ;;  %v622_v45 = vld [vmem:[#allocation5 + $0xe80] sm:$0xff] }
 0x11c   :  { %9608 = vmatprep.subr.bf16.mxu0 %v14441_v4  ;;  %v14497_v4 = vcombine.high %v574_v55, %v578_v56  ;;  %v626_v46 = vld [vmem:[#allocation5 + $0xea0] sm:$0xff] }
 0x11d   :  { %10019 = vmatpush1.bf16.msra.mxu1 %v14186_v6  ;;  %v14242_v6 = vcombine.low %v319_v57, %v323_v60  ;;  %v375_v57 = vld [vmem:[#allocation5 + $0x6c8] sm:$0xff] }
 0x11e   :  { %10020 = vmatprep.subr.bf16.mxu1 %v14195_v8  ;;  %v14251_v8 = vcombine.high %v327_v3, %v331_v5  ;;  %v379_v60 = vld [vmem:[#allocation5 + $0x6e8] sm:$0xff] }
 0x11f   :  { %9609 = vmatpush1.bf16.msra.mxu0 %v14440_v7  ;;  %v14496_v7 = vcombine.low %v574_v55, %v578_v56  ;;  %v630_v55 = vld [vmem:[#allocation5 + $0xec0] sm:$0xff] }
 0x120   :  { %9610 = vmatprep.subr.bf16.mxu0 %v14449_v12  ;;  %v14505_v12 = vcombine.high %v582_v1, %v586_v2  ;;  %v634_v56 = vld [vmem:[#allocation5 + $0xee0] sm:$0xff] }
 0x121   :  { %10021 = vmatpush1.bf16.msra.mxu1 %v14194_v14  ;;  %v14250_v14 = vcombine.low %v327_v3, %v331_v5  ;;  %v383_v3 = vld [vmem:[#allocation5 + $0x708] sm:$0xff] }
 0x122   :  { %10022 = vmatprep.subr.bf16.mxu1 %v14203_v17  ;;  %v14259_v17 = vcombine.high %v335_v11, %v339_v13  ;;  %v387_v5 = vld [vmem:[#allocation5 + $0x728] sm:$0xff] }
 0x123   :  { %9611 = vmatpush1.bf16.msra.mxu0 %v14448_v15  ;;  %v14504_v15 = vcombine.low %v582_v1, %v586_v2  ;;  %v638_v1 = vld [vmem:[#allocation5 + $0xf00] sm:$0xff] }
 0x124   :  { %9612 = vmatprep.subr.bf16.mxu0 %v14457_v23  ;;  %v343_v23 = vld [vmem:[#allocation5 + $0x5c8] sm:$0xff]  ;;  %v642_v2 = vld [vmem:[#allocation5 + $0xf20] sm:$0xff] }
 0x125   :  { %10023 = vmatpush1.bf16.msra.mxu1 %v14202_v25  ;;  %v14258_v25 = vcombine.low %v335_v11, %v339_v13  ;;  %v391_v11 = vld [vmem:[#allocation5 + $0x748] sm:$0xff] }
 0x126   :  { %10033 = vmatprep.subr.bf16.mxu1 %v14211_v53  ;;  %v14267_v53 = vcombine.high %v343_v23, %v347_v24  ;;  %v395_v13 = vld [vmem:[#allocation5 + $0x768] sm:$0xff] }
 0x127   :  { %9613 = vmatpush1.bf16.msra.mxu0 %v14456_v26  ;;  %v14512_v26 = vcombine.low %v590_v9, %v594_v10  ;;  %v646_v9 = vld [vmem:[#allocation5 + $0xf40] sm:$0xff] }
 0x128   :  { %9623 = vmatprep.subr.bf16.mxu0 %v14465_v31  ;;  %10025 = vmatmul.mubr.bf16.vlgmr.msra.gmra.mrb[4].mxu1 %v17155_v16  ;;  %v355_v31 = vld [vmem:[#allocation5 + $0x628] sm:$0xff]  ;;  %v650_v10 = vld [vmem:[#allocation5 + $0xf60] sm:$0xff] }
 0x129   :  { %10034 = vmatpush1.bf16.msra.mxu1 %v14210_v33  ;;  %10065 = vmatprep.mubr.bf16.mxu1 %v17149_v61  ;;  %v14266_v33 = vcombine.low %v343_v23, %v347_v24  ;;  %v14569_v23 = vcombine.high %v646_v9, %v650_v10  ;;  %v403_v24 = vld [vmem:[#allocation5 + $0x7a8] sm:$0xff] }
 0x12a   :  { %9615 = vmatmul.mubr.bf16.vlgmr.msra.gmra.mrb[0].mxu0 %v17175_v34  ;;  %10035 = vmatprep.subr.bf16.mxu1 %v14219_v36  ;;  %v14275_v36 = vcombine.high %v351_v29, %v355_v31 }
 0x12b   :  { %9624 = vmatpush1.bf16.msra.mxu0 %v14464_v35  ;;  %9655 = vmatprep.mubr.bf16.mxu0 %v17179_v42  ;;  %v14520_v35 = vcombine.low %v598_v18, %v602_v20  ;;  %v654_v18 = vld [vmem:[#allocation5 + $0xf80] sm:$0xff] }
 0x12c   :  { %9625 = vmatprep.subr.bf16.mxu0 %v14473_v39  ;;  %v359_v39 = vld [vmem:[#allocation5 + $0x648] sm:$0xff]  ;;  %v658_v20 = vld [vmem:[#allocation5 + $0xfa0] sm:$0xff] }
 0x12d   :  { %10036 = vmatpush1.bf16.msra.mxu1 %v14218_v19  ;;  %v14274_v19 = vcombine.low %v351_v29, %v355_v31  ;;  %v407_v29 = vld [vmem:[#allocation5 + $0x7c8] sm:$0xff] }
 0x12e   :  { %10037 = vmatprep.subr.bf16.mxu1 %v14227_v44  ;;  %v14283_v44 = vcombine.high %v359_v39, %v363_v41  ;;  %v411_v31 = vld [vmem:[#allocation5 + $0x7e8] sm:$0xff] }
 0x12f   :  { %9626 = vmatpush1.bf16.msra.mxu0 %v14472_v43  ;;  %v14528_v43 = vcombine.low %v606_v27, %v610_v54  ;;  %v662_v27 = vld [vmem:[#allocation5 + $0xfc0] sm:$0xff] }
 0x130   :  { %9627 = vmatprep.subr.bf16.mxu0 %v14481_v48  ;;  %v14537_v48 = vcombine.high %v614_v37, %v618_v38  ;;  %v666_v54 = vld [vmem:[#allocation5 + $0xfe0] sm:$0xff] }
 0x131   :  { %10038 = vmatpush1.bf16.msra.mxu1 %v14226_v50  ;;  %v14282_v50 = vcombine.low %v359_v39, %v363_v41  ;;  %v415_v39 = vld [vmem:[#allocation5 + $0x808] sm:$0xff] }
 0x132   :  { %10039 = vmatprep.subr.bf16.mxu1 %v14235_v52  ;;  %v14291_v52 = vcombine.high %v367_v47, %v371_v49  ;;  %v419_v41 = vld [vmem:[#allocation5 + $0x828] sm:$0xff] }
 0x133   :  { %9628 = vmatpush1.bf16.msra.mxu0 %v14480_v51  ;;  %v14536_v51 = vcombine.low %v614_v37, %v618_v38  ;;  %v670_v37 = vld [vmem:[#allocation5 + $0x1000] sm:$0xff] }
 0x134   :  { %9629 = vmatprep.subr.bf16.mxu0 %v14489_v59  ;;  %v14545_v59 = vcombine.high %v622_v45, %v626_v46  ;;  %v674_v38 = vld [vmem:[#allocation5 + $0x1020] sm:$0xff] }
 0x135   :  { %10040 = vmatpush1.bf16.msra.mxu1 %v14234_v62  ;;  %v14290_v62 = vcombine.low %v367_v47, %v371_v49  ;;  %v423_v47 = vld [vmem:[#allocation5 + $0x848] sm:$0xff]  ;;  %v14593_v49 = vcombine.high %v670_v37, %v674_v38 }
 0x136   :  { %10041 = vmatprep.subr.bf16.mxu1 %v14243_v0  ;;  %v14299_v0 = vcombine.high %v375_v57, %v379_v60 }
 0x137   :  { %9630 = vmatpush1.bf16.msra.mxu0 %v14488_v63  ;;  %v14544_v63 = vcombine.low %v622_v45, %v626_v46  ;;  %v678_v45 = vld [vmem:[#allocation5 + $0x1040] sm:$0xff] }
 0x138   :  { %9631 = vmatprep.subr.bf16.mxu0 %v14497_v4  ;;  %v14553_v4 = vcombine.high %v630_v55, %v634_v56  ;;  %v682_v46 = vld [vmem:[#allocation5 + $0x1060] sm:$0xff] }
 0x139   :  { %10042 = vmatpush1.bf16.msra.mxu1 %v14242_v6  ;;  %v14298_v6 = vcombine.low %v375_v57, %v379_v60  ;;  %v686_v57 = vld [vmem:[#allocation5 + $0x1080] sm:$0xff]  ;;  %v14601_v60 = vcombine.high %v678_v45, %v682_v46 }
 0x13a   :  { %10043 = vmatprep.subr.bf16.mxu1 %v14251_v8  ;;  %v14307_v8 = vcombine.high %v383_v3, %v387_v5 }
 0x13b   :  { %9632 = vmatpush1.bf16.msra.mxu0 %v14496_v7  ;;  %v14552_v7 = vcombine.low %v630_v55, %v634_v56  ;;  %v14592_v55 = vcombine.low %v670_v37, %v674_v38 }
 0x13c   :  { %9633 = vmatprep.subr.bf16.mxu0 %v14505_v12  ;;  %v14561_v12 = vcombine.high %v638_v1, %v642_v2 }
 0x13d   :  { %10044 = vmatpush1.bf16.msra.mxu1 %v14250_v14  ;;  %v14306_v14 = vcombine.low %v383_v3, %v387_v5  ;;  %v694_v3 = vld [vmem:[#allocation5 + $0x10c0] sm:$0xff]  ;;  %v439_v5 = vld [vmem:[#allocation5 + $0x8c8] sm:$0xff] }
 0x13e   :  { %10045 = vmatprep.subr.bf16.mxu1 %v14259_v17  ;;  %v14315_v17 = vcombine.high %v391_v11, %v395_v13 }
 0x13f   :  { %9634 = vmatpush1.bf16.msra.mxu0 %v14504_v15  ;;  %v14560_v15 = vcombine.low %v638_v1, %v642_v2  ;;  %v14600_v1 = vcombine.low %v678_v45, %v682_v46 }
 0x140   :  { %9635 = vmatprep.subr.bf16.mxu0 %v14513_v22  ;;  %v399_v22 = vld [vmem:[#allocation5 + $0x788] sm:$0xff] }
 0x141   :  { %10046 = vmatpush1.bf16.msra.mxu1 %v14258_v25  ;;  %v14314_v25 = vcombine.low %v391_v11, %v395_v13  ;;  %v702_v11 = vld [vmem:[#allocation5 + $0x1100] sm:$0xff]  ;;  %v447_v13 = vld [vmem:[#allocation5 + $0x908] sm:$0xff] }
 0x142   :  { %10047 = vmatprep.subr.bf16.mxu1 %v14267_v53  ;;  %v14323_v53 = vcombine.high %v399_v22, %v403_v24 }
 0x143   :  { %9636 = vmatpush1.bf16.msra.mxu0 %v14512_v26  ;;  %v14568_v26 = vcombine.low %v646_v9, %v650_v10 }
 0x144   :  { %9637 = vmatprep.subr.bf16.mxu0 %v14521_v30  ;;  %v14577_v30 = vcombine.high %v654_v18, %v658_v20 }
 0x145   :  { %10048 = vmatpush1.bf16.msra.mxu1 %v14266_v33  ;;  %v14322_v33 = vcombine.low %v399_v22, %v403_v24  ;;  %v710_v22 = vld [vmem:[#allocation5 + $0x1140] sm:$0xff]  ;;  %v455_v24 = vld [vmem:[#allocation5 + $0x948] sm:$0xff] }
 0x146   :  { %10049 = vmatprep.subr.bf16.mxu1 %v14275_v36  ;;  %v14331_v36 = vcombine.high %v407_v29, %v411_v31 }
 0x147   :  { %9638 = vmatpush1.bf16.msra.mxu0 %v14520_v35  ;;  %v14576_v35 = vcombine.low %v654_v18, %v658_v20 }
 0x148   :  { %9639 = vmatprep.subr.bf16.mxu0 %v14529_v40  ;;  %v14585_v40 = vcombine.high %v662_v27, %v666_v54 }
 0x149   :  { %10050 = vmatpush1.bf16.msra.mxu1 %v14274_v19  ;;  %v14330_v19 = vcombine.low %v407_v29, %v411_v31  ;;  %v718_v29 = vld [vmem:[#allocation5 + $0x1180] sm:$0xff]  ;;  %v463_v31 = vld [vmem:[#allocation5 + $0x988] sm:$0xff] }
 0x14a   :  { %10051 = vmatprep.subr.bf16.mxu1 %v14283_v44  ;;  %v14339_v44 = vcombine.high %v415_v39, %v419_v41 }
 0x14b   :  { %9640 = vmatpush1.bf16.msra.mxu0 %v14528_v43  ;;  %v14584_v43 = vcombine.low %v662_v27, %v666_v54 }
 0x14c   :  { %9641 = vmatprep.subr.bf16.mxu0 %v14537_v48  ;;  %v427_v48 = vld [vmem:[#allocation5 + $0x868] sm:$0xff] }
 0x14d   :  { %10052 = vmatpush1.bf16.msra.mxu1 %v14282_v50  ;;  %v17185_v50 = vld [vmem:[#allocation2 + $0x20] sm:$0xff]  ;;  %v14347_v56 = vcombine.high %v423_v47, %v427_v48 }
 0x14e   :  { %10053 = vmatprep.subr.bf16.mxu1 %v14291_v52  ;;  %v17189_v52 = vcombine.low %v17171_v32, %v17171_v32  ;;  %v14346_v32 = vcombine.low %v423_v47, %v427_v48  ;;  %v734_v47 = vld [vmem:[#allocation5 + $0x1200] sm:$0xff] }
 0x14f   :  { %9642 = vmatpush1.bf16.msra.mxu0 %v14536_v51  ;;  %v14338_v51 = vcombine.low %v415_v39, %v419_v41  ;;  %v726_v39 = vld [vmem:[#allocation5 + $0x11c0] sm:$0xff]  ;;  %v471_v41 = vld [vmem:[#allocation5 + $0x9c8] sm:$0xff] }
 0x150   :  { %9643 = vmatprep.subr.bf16.mxu0 %v14545_v59  ;;  %v690_v59 = vld [vmem:[#allocation5 + $0x10a0] sm:$0xff] }
 0x151   :  { %10054 = vmatpush1.bf16.msra.mxu1 %v14290_v62  ;;  %v431_v62 = vld [vmem:[#allocation5 + $0x888] sm:$0xff]  ;;  %v14608_v9 = vcombine.low %v686_v57, %v690_v59  ;;  %v738_v48 = vld [vmem:[#allocation5 + $0x1220] sm:$0xff] }
 0x152   :  { %10055 = vmatprep.subr.bf16.mxu1 %v14299_v0  ;;  %v17193_v0 = vcombine.high %v17185_v50, %v17185_v50 }
 0x153   :  { %9644 = vmatpush1.bf16.msra.mxu0 %v14544_v63  ;;  %v435_v63 = vld [vmem:[#allocation5 + $0x8a8] sm:$0xff] }
 0x154   :  { %9645 = vmatprep.subr.bf16.mxu0 %v14553_v4  ;;  %v14355_v2 = vcombine.high %v431_v62, %v435_v63  ;;  %v698_v4 = vld [vmem:[#allocation5 + $0x10e0] sm:$0xff] }
 0x155   :  { %10056 = vmatpush1.bf16.msra.mxu1 %v14298_v6  ;;  %v14609_v6 = vcombine.high %v686_v57, %v690_v59  ;;  %v14616_v18 = vcombine.low %v694_v3, %v698_v4 }
 0x156   :  { %10057 = vmatprep.subr.bf16.mxu1 %v14307_v8  ;;  %v14354_v8 = vcombine.low %v431_v62, %v435_v63  ;;  %v746_v62 = vld [vmem:[#allocation5 + $0x1260] sm:$0xff]  ;;  %v487_v63 = vld [vmem:[#allocation5 + $0xa48] sm:$0xff] }
 0x157   :  { %9646 = vmatpush1.bf16.msra.mxu0 %v14552_v7  ;;  %v443_v7 = vld [vmem:[#allocation5 + $0x8e8] sm:$0xff] }
 0x158   :  { %9647 = vmatprep.subr.bf16.mxu0 %v14561_v12  ;;  %v14363_v10 = vcombine.high %v439_v5, %v443_v7  ;;  %v706_v12 = vld [vmem:[#allocation5 + $0x1120] sm:$0xff] }
 0x159   :  { %10058 = vmatpush1.bf16.msra.mxu1 %v14306_v14  ;;  %v14617_v14 = vcombine.high %v694_v3, %v698_v4  ;;  %v14624_v27 = vcombine.low %v702_v11, %v706_v12  ;;  %v14656_v3 = vcombine.low %v734_v47, %v738_v48 }
 0x15a   :  { %10059 = vmatprep.subr.bf16.mxu1 %v14315_v17  ;;  %v14362_v17 = vcombine.low %v439_v5, %v443_v7  ;;  %v750_v5 = vld [vmem:[#allocation5 + $0x1280] sm:$0xff]  ;;  %v495_v7 = vld [vmem:[#allocation5 + $0xa88] sm:$0xff] }
 0x15b   :  { %9648 = vmatpush1.bf16.msra.mxu0 %v14560_v15  ;;  %v451_v15 = vld [vmem:[#allocation5 + $0x928] sm:$0xff] }
 0x15c   :  { %9649 = vmatprep.subr.bf16.mxu0 %v14569_v23  ;;  %v14371_v20 = vcombine.high %v447_v13, %v451_v15  ;;  %v714_v23 = vld [vmem:[#allocation5 + $0x1160] sm:$0xff] }
 0x15d   :  { %10060 = vmatpush1.bf16.msra.mxu1 %v14314_v25  ;;  %v14625_v25 = vcombine.high %v702_v11, %v706_v12  ;;  %v14632_v37 = vcombine.low %v710_v22, %v714_v23 }
 0x15e   :  { %10061 = vmatprep.subr.bf16.mxu1 %v14323_v53  ;;  %v14370_v53 = vcombine.low %v447_v13, %v451_v15  ;;  %v758_v13 = vld [vmem:[#allocation5 + $0x12c0] sm:$0xff]  ;;  %v503_v15 = vld [vmem:[#allocation5 + $0xac8] sm:$0xff] }
 0x15f   :  { %9650 = vmatpush1.bf16.msra.mxu0 %v14568_v26  ;;  %v459_v26 = vld [vmem:[#allocation5 + $0x968] sm:$0xff] }
 0x160   :  { %9651 = vmatprep.subr.bf16.mxu0 %v14577_v30  ;;  %v14379_v54 = vcombine.high %v455_v24, %v459_v26  ;;  %v722_v30 = vld [vmem:[#allocation5 + $0x11a0] sm:$0xff] }
 0x161   :  { %10062 = vmatpush1.bf16.msra.mxu1 %v14322_v33  ;;  %v14633_v33 = vcombine.high %v710_v22, %v714_v23  ;;  %v14640_v45 = vcombine.low %v718_v29, %v722_v30 }
 0x162   :  { %10063 = vmatprep.subr.bf16.mxu1 %v14331_v36  ;;  %v14378_v36 = vcombine.low %v455_v24, %v459_v26  ;;  %v766_v24 = vld [vmem:[#allocation5 + $0x1300] sm:$0xff]  ;;  %v511_v26 = vld [vmem:[#allocation5 + $0xb08] sm:$0xff] }
 0x163   :  { %9652 = vmatpush1.bf16.msra.mxu0 %v14576_v35  ;;  %v467_v35 = vld [vmem:[#allocation5 + $0x9a8] sm:$0xff] }
 0x164   :  { %9653 = vmatprep.subr.bf16.mxu0 %v14585_v40  ;;  %v14387_v38 = vcombine.high %v463_v31, %v467_v35  ;;  %v730_v40 = vld [vmem:[#allocation5 + $0x11e0] sm:$0xff] }
 0x165   :  { %10064 = vmatpush1.bf16.msra.mxu1 %v14330_v19  ;;  %v14641_v19 = vcombine.high %v718_v29, %v722_v30  ;;  %v14648_v57 = vcombine.low %v726_v39, %v730_v40 }
 0x166   :  { %10074 = vmatprep.subr.bf16.mxu1 %v14339_v44  ;;  %v14386_v44 = vcombine.low %v463_v31, %v467_v35  ;;  %v774_v31 = vld [vmem:[#allocation5 + $0x1340] sm:$0xff]  ;;  %v519_v35 = vld [vmem:[#allocation5 + $0xb48] sm:$0xff] }
 0x167   :  { %9654 = vmatpush1.bf16.msra.mxu0 %v14584_v43  ;;  %v475_v43 = vld [vmem:[#allocation5 + $0x9e8] sm:$0xff] }
 0x168   :  { %9664 = vmatprep.subr.bf16.mxu0 %v14593_v49  ;;  %10066 = vmatmul.mubr.bf16.vlgmr.msra.gmra.mrb[4].mxu1 %v17161_v21  ;;  %v14395_v46 = vcombine.high %v471_v41, %v475_v43  ;;  %v479_v49 = vld [vmem:[#allocation5 + $0xa08] sm:$0xff] }
 0x169   :  { %10075 = vmatpush1.bf16.msra.mxu1 %v14338_v51  ;;  %10106 = vmatprep.mubr.bf16.mxu1 %v17165_v28  ;;  %v14649_v51 = vcombine.high %v726_v39, %v730_v40 }
 0x16a   :  { %9656 = vmatmul.mubr.bf16.vlgmr.msra.gmra.mrb[0].mxu0 %v17189_v52  ;;  %10076 = vmatprep.subr.bf16.mxu1 %v14347_v56  ;;  %v14394_v56 = vcombine.low %v471_v41, %v475_v43  ;;  %v782_v41 = vld [vmem:[#allocation5 + $0x1380] sm:$0xff] }
 0x16b   :  { %9665 = vmatpush1.bf16.msra.mxu0 %v14592_v55  ;;  %9696 = vmatprep.mubr.bf16.mxu0 %v17193_v0  ;;  %v483_v55 = vld [vmem:[#allocation5 + $0xa28] sm:$0xff] }
 0x16c   :  { %9666 = vmatprep.subr.bf16.mxu0 %v14601_v60  ;;  %v14403_v59 = vcombine.high %v479_v49, %v483_v55  ;;  %v742_v60 = vld [vmem:[#allocation5 + $0x1240] sm:$0xff] }
 0x16d   :  { %10077 = vmatpush1.bf16.msra.mxu1 %v14346_v32  ;;  %v14657_v32 = vcombine.high %v734_v47, %v738_v48  ;;  %v14664_v11 = vcombine.low %v742_v60, %v746_v62 }
 0x16e   :  { %10078 = vmatprep.subr.bf16.mxu1 %v14355_v2  ;;  %v14402_v2 = vcombine.low %v479_v49, %v483_v55  ;;  %v539_v55 = vld [vmem:[#allocation5 + $0xbe8] sm:$0xff] }
 0x16f   :  { %9667 = vmatpush1.bf16.msra.mxu0 %v14600_v1  ;;  %v491_v1 = vld [vmem:[#allocation5 + $0xa68] sm:$0xff] }
 0x170   :  { %9668 = vmatprep.subr.bf16.mxu0 %v14609_v6  ;;  %v14411_v4 = vcombine.high %v487_v63, %v491_v1  ;;  %v754_v6 = vld [vmem:[#allocation5 + $0x12a0] sm:$0xff] }
 0x171   :  { %10079 = vmatpush1.bf16.msra.mxu1 %v14354_v8  ;;  %v14665_v8 = vcombine.high %v742_v60, %v746_v62  ;;  %v14672_v22 = vcombine.low %v750_v5, %v754_v6 }
 0x172   :  { %10080 = vmatprep.subr.bf16.mxu1 %v14363_v10  ;;  %v14410_v10 = vcombine.low %v487_v63, %v491_v1  ;;  %v547_v1 = vld [vmem:[#allocation5 + $0xc28] sm:$0xff] }
 0x173   :  { %9669 = vmatpush1.bf16.msra.mxu0 %v14608_v9  ;;  %v499_v9 = vld [vmem:[#allocation5 + $0xaa8] sm:$0xff] }
 0x174   :  { %9670 = vmatprep.subr.bf16.mxu0 %v14617_v14  ;;  %v14419_v12 = vcombine.high %v495_v7, %v499_v9  ;;  %v762_v14 = vld [vmem:[#allocation5 + $0x12e0] sm:$0xff] }
 0x175   :  { %10081 = vmatpush1.bf16.msra.mxu1 %v14362_v17  ;;  %v14673_v17 = vcombine.high %v750_v5, %v754_v6  ;;  %v14680_v29 = vcombine.low %v758_v13, %v762_v14 }
 0x176   :  { %10082 = vmatprep.subr.bf16.mxu1 %v14371_v20  ;;  %v14418_v20 = vcombine.low %v495_v7, %v499_v9  ;;  %v555_v9 = vld [vmem:[#allocation5 + $0xc68] sm:$0xff] }
 0x177   :  { %9671 = vmatpush1.bf16.msra.mxu0 %v14616_v18  ;;  %v507_v18 = vld [vmem:[#allocation5 + $0xae8] sm:$0xff] }
 0x178   :  { %9672 = vmatprep.subr.bf16.mxu0 %v14625_v25  ;;  %v14427_v23 = vcombine.high %v503_v15, %v507_v18  ;;  %v770_v25 = vld [vmem:[#allocation5 + $0x1320] sm:$0xff] }
 0x179   :  { %10083 = vmatpush1.bf16.msra.mxu1 %v14370_v53  ;;  %v14681_v53 = vcombine.high %v758_v13, %v762_v14  ;;  %v14688_v39 = vcombine.low %v766_v24, %v770_v25  ;;  %v17203_v14 = vcombine.low %v17185_v50, %v17185_v50 }
 0x17a   :  { %10084 = vmatprep.subr.bf16.mxu1 %v14379_v54  ;;  %v14426_v54 = vcombine.low %v503_v15, %v507_v18 }
 0x17b   :  { %9673 = vmatpush1.bf16.msra.mxu0 %v14624_v27  ;;  %v515_v27 = vld [vmem:[#allocation5 + $0xb28] sm:$0xff] }
 0x17c   :  { %9674 = vmatprep.subr.bf16.mxu0 %v14633_v33  ;;  %v14435_v30 = vcombine.high %v511_v26, %v515_v27  ;;  %v778_v33 = vld [vmem:[#allocation5 + $0x1360] sm:$0xff] }
 0x17d   :  { %10085 = vmatpush1.bf16.msra.mxu1 %v14378_v36  ;;  %v14689_v36 = vcombine.high %v766_v24, %v770_v25  ;;  %v14697_v43 = vcombine.high %v774_v31, %v778_v33  ;;  %v14696_v47 = vcombine.low %v774_v31, %v778_v33  ;;  %v814_v24 = vld [vmem:[#allocation5 + $0x1480] sm:$0xff] }
 0x17e   :  { %10086 = vmatprep.subr.bf16.mxu1 %v14387_v38  ;;  %v14434_v38 = vcombine.low %v511_v26, %v515_v27  ;;  %v818_v25 = vld [vmem:[#allocation5 + $0x14a0] sm:$0xff] }
 0x17f   :  { %9675 = vmatpush1.bf16.msra.mxu0 %v14632_v37  ;;  %v523_v37 = vld [vmem:[#allocation5 + $0xb68] sm:$0xff]  ;;  %v14737_v27 = vcombine.high %v814_v24, %v818_v25  ;;  %v826_v31 = vld [vmem:[#allocation5 + $0x14e0] sm:$0xff] }
 0x180   :  { %9676 = vmatprep.subr.bf16.mxu0 %v14641_v19  ;;  %v14443_v40 = vcombine.high %v519_v35, %v523_v37  ;;  %v527_v19 = vld [vmem:[#allocation5 + $0xb88] sm:$0xff] }
 0x181   :  { %10087 = vmatpush1.bf16.msra.mxu1 %v14386_v44  ;;  %v531_v44 = vld [vmem:[#allocation5 + $0xba8] sm:$0xff] }
 0x182   :  { %10088 = vmatprep.subr.bf16.mxu1 %v14395_v46  ;;  %v14442_v46 = vcombine.low %v519_v35, %v523_v37  ;;  %v14451_v48 = vcombine.high %v527_v19, %v531_v44  ;;  %v14736_v35 = vcombine.low %v814_v24, %v818_v25  ;;  %v862_v24 = vld [vmem:[#allocation5 + $0x1600] sm:$0xff] }
 0x183   :  { %9677 = vmatpush1.bf16.msra.mxu0 %v14640_v45  ;;  %v786_v45 = vld [vmem:[#allocation5 + $0x13a0] sm:$0xff] }
 0x184   :  { %9678 = vmatprep.subr.bf16.mxu0 %v14649_v51  ;;  %v14705_v49 = vcombine.high %v782_v41, %v786_v45  ;;  %v535_v51 = vld [vmem:[#allocation5 + $0xbc8] sm:$0xff]  ;;  %v14704_v60 = vcombine.low %v782_v41, %v786_v45  ;;  %v834_v41 = vld [vmem:[#allocation5 + $0x1520] sm:$0xff] }
 0x185   :  { %10089 = vmatpush1.bf16.msra.mxu1 %v14394_v56  ;;  %v790_v56 = vld [vmem:[#allocation5 + $0x13c0] sm:$0xff]  ;;  %v14459_v62 = vcombine.high %v535_v51, %v539_v55 }
 0x186   :  { %10090 = vmatprep.subr.bf16.mxu1 %v14403_v59  ;;  %v14450_v59 = vcombine.low %v527_v19, %v531_v44  ;;  %v866_v25 = vld [vmem:[#allocation5 + $0x1620] sm:$0xff] }
 0x187   :  { %9679 = vmatpush1.bf16.msra.mxu0 %v14648_v57  ;;  %v794_v57 = vld [vmem:[#allocation5 + $0x13e0] sm:$0xff] }
 0x188   :  { %9680 = vmatprep.subr.bf16.mxu0 %v14657_v32  ;;  %v14713_v63 = vcombine.high %v790_v56, %v794_v57  ;;  %v543_v32 = vld [vmem:[#allocation5 + $0xc08] sm:$0xff]  ;;  %v14712_v5 = vcombine.low %v790_v56, %v794_v57 }
 0x189   :  { %10091 = vmatpush1.bf16.msra.mxu1 %v14402_v2  ;;  %v798_v2 = vld [vmem:[#allocation5 + $0x1400] sm:$0xff]  ;;  %v14467_v6 = vcombine.high %v543_v32, %v547_v1  ;;  %v14466_v13 = vcombine.low %v543_v32, %v547_v1 }
 0x18a   :  { %10092 = vmatprep.subr.bf16.mxu1 %v14411_v4  ;;  %v14458_v4 = vcombine.low %v535_v51, %v539_v55 }
 0x18b   :  { %9681 = vmatpush1.bf16.msra.mxu0 %v14656_v3  ;;  %v802_v3 = vld [vmem:[#allocation5 + $0x1420] sm:$0xff] }
 0x18c   :  { %9682 = vmatprep.subr.bf16.mxu0 %v14665_v8  ;;  %v14721_v7 = vcombine.high %v798_v2, %v802_v3  ;;  %v551_v8 = vld [vmem:[#allocation5 + $0xc48] sm:$0xff]  ;;  %v14720_v15 = vcombine.low %v798_v2, %v802_v3 }
 0x18d   :  { %10093 = vmatpush1.bf16.msra.mxu1 %v14410_v10  ;;  %v806_v10 = vld [vmem:[#allocation5 + $0x1440] sm:$0xff]  ;;  %v14474_v50 = vcombine.low %v551_v8, %v555_v9 }
 0x18e   :  { %10094 = vmatprep.subr.bf16.mxu1 %v14419_v12  ;;  %v17199_v12 = vld [vmem:[#allocation2 + $0x28] sm:$0xff] }
 0x18f   :  { %9683 = vmatpush1.bf16.msra.mxu0 %v14664_v11  ;;  %v810_v11 = vld [vmem:[#allocation5 + $0x1460] sm:$0xff] }
 0x190   :  { %9684 = vmatprep.subr.bf16.mxu0 %v14673_v17  ;;  %v14475_v17 = vcombine.high %v551_v8, %v555_v9  ;;  %v14729_v18 = vcombine.high %v806_v10, %v810_v11  ;;  %v14728_v26 = vcombine.low %v806_v10, %v810_v11  ;;  %v854_v8 = vld [vmem:[#allocation5 + $0x15c0] sm:$0xff] }
 0x191   :  { %10095 = vmatpush1.bf16.msra.mxu1 %v14418_v20  ;;  %v559_v20 = vld [vmem:[#allocation5 + $0xc88] sm:$0xff]  ;;  %v858_v9 = vld [vmem:[#allocation5 + $0x15e0] sm:$0xff] }
 0x192   :  { %10096 = vmatprep.subr.bf16.mxu1 %v14427_v23  ;;  %v17207_v23 = vcombine.high %v17199_v12, %v17199_v12 }
 0x193   :  { %9685 = vmatpush1.bf16.msra.mxu0 %v14672_v22  ;;  %v563_v22 = vld [vmem:[#allocation5 + $0xca8] sm:$0xff] }
 0x194   :  { %9686 = vmatprep.subr.bf16.mxu0 %v14681_v53  ;;  %v14483_v53 = vcombine.high %v559_v20, %v563_v22  ;;  %v14482_v33 = vcombine.low %v559_v20, %v563_v22  ;;  %v607_v20 = vld [vmem:[#allocation5 + $0xe08] sm:$0xff] }
 0x195   :  { %10097 = vmatpush1.bf16.msra.mxu1 %v14426_v54  ;;  %v567_v54 = vld [vmem:[#allocation5 + $0xcc8] sm:$0xff] }
 0x196   :  { %10098 = vmatprep.subr.bf16.mxu1 %v14435_v30  ;;  %v822_v30 = vld [vmem:[#allocation5 + $0x14c0] sm:$0xff]  ;;  %v611_v22 = vld [vmem:[#allocation5 + $0xe28] sm:$0xff] }
 0x197   :  { %9687 = vmatpush1.bf16.msra.mxu0 %v14680_v29  ;;  %v571_v29 = vld [vmem:[#allocation5 + $0xce8] sm:$0xff]  ;;  %v14745_v37 = vcombine.high %v822_v30, %v826_v31 }
 0x198   :  { %9688 = vmatprep.subr.bf16.mxu0 %v14689_v36  ;;  %v14491_v36 = vcombine.high %v567_v54, %v571_v29  ;;  %v14490_v19 = vcombine.low %v567_v54, %v571_v29  ;;  %v615_v54 = vld [vmem:[#allocation5 + $0xe48] sm:$0xff] }
 0x199   :  { %10099 = vmatpush1.bf16.msra.mxu1 %v14434_v38  ;;  %v575_v38 = vld [vmem:[#allocation5 + $0xd08] sm:$0xff] }
 0x19a   :  { %10100 = vmatprep.subr.bf16.mxu1 %v14443_v40  ;;  %v830_v40 = vld [vmem:[#allocation5 + $0x1500] sm:$0xff]  ;;  %v619_v29 = vld [vmem:[#allocation5 + $0xe68] sm:$0xff] }
 0x19b   :  { %9689 = vmatpush1.bf16.msra.mxu0 %v14688_v39  ;;  %v579_v39 = vld [vmem:[#allocation5 + $0xd28] sm:$0xff]  ;;  %v14753_v45 = vcombine.high %v830_v40, %v834_v41  ;;  %v14752_v55 = vcombine.low %v830_v40, %v834_v41  ;;  %v878_v40 = vld [vmem:[#allocation5 + $0x1680] sm:$0xff] }
 0x19c   :  { %9690 = vmatprep.subr.bf16.mxu0 %v14697_v43  ;;  %v14744_v43 = vcombine.low %v822_v30, %v826_v31  ;;  %v14499_v44 = vcombine.high %v575_v38, %v579_v39  ;;  %v14498_v51 = vcombine.low %v575_v38, %v579_v39  ;;  %v870_v30 = vld [vmem:[#allocation5 + $0x1640] sm:$0xff]  ;;  %v623_v38 = vld [vmem:[#allocation5 + $0xe88] sm:$0xff] }
 0x19d   :  { %10101 = vmatpush1.bf16.msra.mxu1 %v14442_v46  ;;  %v583_v46 = vld [vmem:[#allocation5 + $0xd48] sm:$0xff]  ;;  %v874_v31 = vld [vmem:[#allocation5 + $0x1660] sm:$0xff] }
 0x19e   :  { %10102 = vmatprep.subr.bf16.mxu1 %v14451_v48  ;;  %v838_v48 = vld [vmem:[#allocation5 + $0x1540] sm:$0xff]  ;;  %v627_v39 = vld [vmem:[#allocation5 + $0xea8] sm:$0xff] }
 0x19f   :  { %9691 = vmatpush1.bf16.msra.mxu0 %v14696_v47  ;;  %v587_v47 = vld [vmem:[#allocation5 + $0xd68] sm:$0xff]  ;;  %v882_v41 = vld [vmem:[#allocation5 + $0x16a0] sm:$0xff] }
 0x1a0   :  { %9692 = vmatprep.subr.bf16.mxu0 %v14705_v49  ;;  %v842_v49 = vld [vmem:[#allocation5 + $0x1560] sm:$0xff]  ;;  %v14507_v56 = vcombine.high %v583_v46, %v587_v47  ;;  %v14506_v32 = vcombine.low %v583_v46, %v587_v47  ;;  %v631_v46 = vld [vmem:[#allocation5 + $0xec8] sm:$0xff] }
 0x1a1   :  { %10103 = vmatpush1.bf16.msra.mxu1 %v14450_v59  ;;  %v14761_v57 = vcombine.high %v838_v48, %v842_v49  ;;  %v591_v59 = vld [vmem:[#allocation5 + $0xd88] sm:$0xff]  ;;  %v14760_v1 = vcombine.low %v838_v48, %v842_v49  ;;  %v886_v48 = vld [vmem:[#allocation5 + $0x16c0] sm:$0xff] }
 0x1a2   :  { %10104 = vmatprep.subr.bf16.mxu1 %v14459_v62  ;;  %v846_v62 = vld [vmem:[#allocation5 + $0x1580] sm:$0xff]  ;;  %v635_v47 = vld [vmem:[#allocation5 + $0xee8] sm:$0xff] }
 0x1a3   :  { %9693 = vmatpush1.bf16.msra.mxu0 %v14704_v60  ;;  %v595_v60 = vld [vmem:[#allocation5 + $0xda8] sm:$0xff]  ;;  %v890_v49 = vld [vmem:[#allocation5 + $0x16e0] sm:$0xff] }
 0x1a4   :  { %9694 = vmatprep.subr.bf16.mxu0 %v14713_v63  ;;  %v850_v63 = vld [vmem:[#allocation5 + $0x15a0] sm:$0xff]  ;;  %v14515_v2 = vcombine.high %v591_v59, %v595_v60  ;;  %v14514_v11 = vcombine.low %v591_v59, %v595_v60  ;;  %v639_v59 = vld [vmem:[#allocation5 + $0xf08] sm:$0xff] }
 0x1a5   :  { %10105 = vmatpush1.bf16.msra.mxu1 %v14458_v4  ;;  %v14769_v4 = vcombine.high %v846_v62, %v850_v63  ;;  %v643_v60 = vld [vmem:[#allocation5 + $0xf28] sm:$0xff] }
 0x1a6   :  { %10115 = vmatprep.subr.bf16.mxu1 %v14467_v6  ;;  %v603_v6 = vld [vmem:[#allocation5 + $0xde8] sm:$0xff] }
 0x1a7   :  { %9695 = vmatpush1.bf16.msra.mxu0 %v14712_v5  ;;  %v599_v5 = vld [vmem:[#allocation5 + $0xdc8] sm:$0xff] }
 0x1a8   :  { %9705 = vmatprep.subr.bf16.mxu0 %v14721_v7  ;;  %10107 = vmatmul.mubr.bf16.vlgmr.msra.gmra.mrb[4].mxu1 %v17175_v34 }
 0x1a9   :  { %10116 = vmatpush1.bf16.msra.mxu1 %v14466_v13  ;;  %10147 = vmatprep.mubr.bf16.mxu1 %v17179_v42 }
 0x1aa   :  { %9697 = vmatmul.mubr.bf16.vlgmr.msra.gmra.mrb[0].mxu0 %v17203_v14  ;;  %10117 = vmatprep.subr.bf16.mxu1 %v14475_v17  ;;  %v14523_v17 = vcombine.high %v599_v5, %v603_v6 }
 0x1ab   :  { %9706 = vmatpush1.bf16.msra.mxu0 %v14720_v15  ;;  %9737 = vmatprep.mubr.bf16.mxu0 %v17207_v23  ;;  %v14768_v15 = vcombine.low %v846_v62, %v850_v63  ;;  %v894_v62 = vld [vmem:[#allocation5 + $0x1700] sm:$0xff] }
 0x1ac   :  { %9707 = vmatprep.subr.bf16.mxu0 %v14729_v18  ;;  %v14777_v18 = vcombine.high %v854_v8, %v858_v9  ;;  %v898_v63 = vld [vmem:[#allocation5 + $0x1720] sm:$0xff] }
 0x1ad   :  { %10118 = vmatpush1.bf16.msra.mxu1 %v14474_v50  ;;  %v14522_v50 = vcombine.low %v599_v5, %v603_v6  ;;  %v647_v5 = vld [vmem:[#allocation5 + $0xf48] sm:$0xff] }
 0x1ae   :  { %10119 = vmatprep.subr.bf16.mxu1 %v14483_v53  ;;  %v14531_v53 = vcombine.high %v607_v20, %v611_v22  ;;  %v651_v6 = vld [vmem:[#allocation5 + $0xf68] sm:$0xff] }
 0x1af   :  { %9708 = vmatpush1.bf16.msra.mxu0 %v14728_v26  ;;  %v14776_v26 = vcombine.low %v854_v8, %v858_v9  ;;  %v902_v8 = vld [vmem:[#allocation5 + $0x1740] sm:$0xff] }
 0x1b0   :  { %9709 = vmatprep.subr.bf16.mxu0 %v14737_v27  ;;  %v14785_v27 = vcombine.high %v862_v24, %v866_v25  ;;  %v906_v9 = vld [vmem:[#allocation5 + $0x1760] sm:$0xff] }
 0x1b1   :  { %10120 = vmatpush1.bf16.msra.mxu1 %v14482_v33  ;;  %v14530_v33 = vcombine.low %v607_v20, %v611_v22  ;;  %v910_v20 = vld [vmem:[#allocation5 + $0x1780] sm:$0xff] }
 0x1b2   :  { %10121 = vmatprep.subr.bf16.mxu1 %v14491_v36  ;;  %v14539_v36 = vcombine.high %v615_v54, %v619_v29  ;;  %v914_v22 = vld [vmem:[#allocation5 + $0x17a0] sm:$0xff] }
 0x1b3   :  { %9710 = vmatpush1.bf16.msra.mxu0 %v14736_v35  ;;  %v14784_v35 = vcombine.low %v862_v24, %v866_v25  ;;  %v14570_v24 = vcombine.low %v647_v5, %v651_v6  ;;  %v14824_v25 = vcombine.low %v902_v8, %v906_v9 }
 0x1b4   :  { %9711 = vmatprep.subr.bf16.mxu0 %v14745_v37  ;;  %v14793_v37 = vcombine.high %v870_v30, %v874_v31 }
 0x1b5   :  { %10122 = vmatpush1.bf16.msra.mxu1 %v14490_v19  ;;  %v14538_v19 = vcombine.low %v615_v54, %v619_v29  ;;  %v918_v54 = vld [vmem:[#allocation5 + $0x17c0] sm:$0xff] }
 0x1b6   :  { %10123 = vmatprep.subr.bf16.mxu1 %v14499_v44  ;;  %v14547_v44 = vcombine.high %v623_v38, %v627_v39  ;;  %v922_v29 = vld [vmem:[#allocation5 + $0x17e0] sm:$0xff] }
 0x1b7   :  { %9712 = vmatpush1.bf16.msra.mxu0 %v14744_v43  ;;  %v14792_v43 = vcombine.low %v870_v30, %v874_v31  ;;  %v14832_v31 = vcombine.low %v910_v20, %v914_v22 }
 0x1b8   :  { %9713 = vmatprep.subr.bf16.mxu0 %v14753_v45  ;;  %v14801_v45 = vcombine.high %v878_v40, %v882_v41 }
 0x1b9   :  { %10124 = vmatpush1.bf16.msra.mxu1 %v14498_v51  ;;  %v14546_v51 = vcombine.low %v623_v38, %v627_v39  ;;  %v926_v38 = vld [vmem:[#allocation5 + $0x1800] sm:$0xff] }
 0x1ba   :  { %10125 = vmatprep.subr.bf16.mxu1 %v14507_v56  ;;  %v14555_v56 = vcombine.high %v631_v46, %v635_v47  ;;  %v930_v39 = vld [vmem:[#allocation5 + $0x1820] sm:$0xff] }
 0x1bb   :  { %9714 = vmatpush1.bf16.msra.mxu0 %v14752_v55  ;;  %v17213_v3 = vpop.f32.mrb[0].mxu1  ;;  %v14800_v55 = vcombine.low %v878_v40, %v882_v41  ;;  %v14840_v41 = vcombine.low %v918_v54, %v922_v29 }
 0x1bc   :  { %9715 = vmatprep.subr.bf16.mxu0 %v14761_v57  ;;  %v17215_v7 = vpop.f32.mrb[1].mxu1  ;;  %v14809_v57 = vcombine.high %v886_v48, %v890_v49 }
 0x1bd   :  { %v9538_v10 = vpop.f32.mrb[2].mxu1  ;;  %10126 = vmatpush1.bf16.msra.mxu1 %v14506_v32  ;;  %v14554_v32 = vcombine.low %v631_v46, %v635_v47  ;;  %v934_v46 = vld [vmem:[#allocation5 + $0x1840] sm:$0xff] }
 0x1be   :  { %v9539_v13 = vpop.f32.mrb[3].mxu1  ;;  %10127 = vmatprep.subr.bf16.mxu1 %v14515_v2  ;;  %v14563_v2 = vcombine.high %v639_v59, %v643_v60  ;;  %v14562_v10 = vcombine.low %v639_v59, %v643_v60  ;;  %v938_v47 = vld [vmem:[#allocation5 + $0x1860] sm:$0xff]  ;;  %v687_v59 = vld [vmem:[#allocation5 + $0x1088] sm:$0xff] }
 0x1bf   :  { %9716 = vmatpush1.bf16.msra.mxu0 %v14760_v1  ;;  %v14808_v1 = vcombine.low %v886_v48, %v890_v49  ;;  %v14571_v13 = vcombine.high %v647_v5, %v651_v6  ;;  %v17217_v48 = vld [vmem:[#allocation2 + $0x30] sm:$0xff]  ;;  %v691_v60 = vld [vmem:[#allocation5 + $0x10a8] sm:$0xff] }
 0x1c0   :  { %9717 = vmatprep.subr.bf16.mxu0 %v14769_v4  ;;  %v14817_v4 = vcombine.high %v894_v62, %v898_v63  ;;  %v695_v5 = vld [vmem:[#allocation5 + $0x10c8] sm:$0xff] }
 0x1c1   :  { %10128 = vmatpush1.bf16.msra.mxu1 %v14514_v11  ;;  %v14816_v11 = vcombine.low %v894_v62, %v898_v63  ;;  %v17225_v62 = vcombine.high %v17217_v48, %v17217_v48  ;;  %v942_v63 = vld [vmem:[#allocation5 + $0x1880] sm:$0xff]  ;;  %v699_v6 = vld [vmem:[#allocation5 + $0x10e8] sm:$0xff] }
 0x1c2   :  { %10129 = vmatprep.subr.bf16.mxu1 %v14523_v17  ;;  %v655_v17 = vld [vmem:[#allocation5 + $0xf88] sm:$0xff] }
 0x1c3   :  { %9718 = vmatpush1.bf16.msra.mxu0 %v14768_v15  ;;  %v14825_v15 = vcombine.high %v902_v8, %v906_v9  ;;  %v950_v8 = vld [vmem:[#allocation5 + $0x18c0] sm:$0xff] }
 0x1c4   :  { %9719 = vmatprep.subr.bf16.mxu0 %v14777_v18  ;;  %v659_v18 = vld [vmem:[#allocation5 + $0xfa8] sm:$0xff]  ;;  %v954_v9 = vld [vmem:[#allocation5 + $0x18e0] sm:$0xff] }
 0x1c5   :  { %10130 = vmatpush1.bf16.msra.mxu1 %v14522_v50  ;;  %v14579_v50 = vcombine.high %v655_v17, %v659_v18  ;;  %v14578_v30 = vcombine.low %v655_v17, %v659_v18  ;;  %v703_v17 = vld [vmem:[#allocation5 + $0x1108] sm:$0xff] }
 0x1c6   :  { %10131 = vmatprep.subr.bf16.mxu1 %v14531_v53  ;;  %v663_v53 = vld [vmem:[#allocation5 + $0xfc8] sm:$0xff] }
 0x1c7   :  { %9720 = vmatpush1.bf16.msra.mxu0 %v14776_v26  ;;  %v14833_v26 = vcombine.high %v910_v20, %v914_v22  ;;  %v707_v18 = vld [vmem:[#allocation5 + $0x1128] sm:$0xff]  ;;  %v958_v20 = vld [vmem:[#allocation5 + $0x1900] sm:$0xff] }
 0x1c8   :  { %9721 = vmatprep.subr.bf16.mxu0 %v14785_v27  ;;  %v667_v27 = vld [vmem:[#allocation5 + $0xfe8] sm:$0xff]  ;;  %v962_v22 = vld [vmem:[#allocation5 + $0x1920] sm:$0xff] }
 0x1c9   :  { %10132 = vmatpush1.bf16.msra.mxu1 %v14530_v33  ;;  %v14587_v33 = vcombine.high %v663_v53, %v667_v27  ;;  %v14586_v40 = vcombine.low %v663_v53, %v667_v27  ;;  %v711_v53 = vld [vmem:[#allocation5 + $0x1148] sm:$0xff] }
 0x1ca   :  { %10133 = vmatprep.subr.bf16.mxu1 %v14539_v36  ;;  %v671_v36 = vld [vmem:[#allocation5 + $0x1008] sm:$0xff] }
 0x1cb   :  { %9722 = vmatpush1.bf16.msra.mxu0 %v14784_v35  ;;  %v14841_v35 = vcombine.high %v918_v54, %v922_v29  ;;  %v715_v27 = vld [vmem:[#allocation5 + $0x1168] sm:$0xff]  ;;  %v966_v54 = vld [vmem:[#allocation5 + $0x1940] sm:$0xff] }
 0x1cc   :  { %9723 = vmatprep.subr.bf16.mxu0 %v14793_v37  ;;  %v675_v37 = vld [vmem:[#allocation5 + $0x1028] sm:$0xff]  ;;  %v970_v29 = vld [vmem:[#allocation5 + $0x1960] sm:$0xff] }
 0x1cd   :  { %10134 = vmatpush1.bf16.msra.mxu1 %v14538_v19  ;;  %v14595_v19 = vcombine.high %v671_v36, %v675_v37  ;;  %v14594_v49 = vcombine.low %v671_v36, %v675_v37  ;;  %v719_v36 = vld [vmem:[#allocation5 + $0x1188] sm:$0xff] }
 0x1ce   :  { %10135 = vmatprep.subr.bf16.mxu1 %v14547_v44  ;;  %v679_v44 = vld [vmem:[#allocation5 + $0x1048] sm:$0xff] }
 0x1cf   :  { %9724 = vmatpush1.bf16.msra.mxu0 %v14792_v43  ;;  %v14849_v43 = vcombine.high %v926_v38, %v930_v39  ;;  %v723_v37 = vld [vmem:[#allocation5 + $0x11a8] sm:$0xff] }
 0x1d0   :  { %9725 = vmatprep.subr.bf16.mxu0 %v14801_v45  ;;  %v683_v45 = vld [vmem:[#allocation5 + $0x1068] sm:$0xff] }
 0x1d1   :  { %10136 = vmatpush1.bf16.msra.mxu1 %v14546_v51  ;;  %v17221_v51 = vcombine.low %v17199_v12, %v17199_v12  ;;  %v14602_v12 = vcombine.low %v679_v44, %v683_v45 }
 0x1d2   :  { %10137 = vmatprep.subr.bf16.mxu1 %v14555_v56  ;;  %v14603_v56 = vcombine.high %v679_v44, %v683_v45  ;;  %v727_v44 = vld [vmem:[#allocation5 + $0x11c8] sm:$0xff] }
 0x1d3   :  { %9726 = vmatpush1.bf16.msra.mxu0 %v14800_v55  ;;  %v14848_v55 = vcombine.low %v926_v38, %v930_v39  ;;  %v974_v38 = vld [vmem:[#allocation5 + $0x1980] sm:$0xff]  ;;  %v731_v45 = vld [vmem:[#allocation5 + $0x11e8] sm:$0xff] }
 0x1d4   :  { %9727 = vmatprep.subr.bf16.mxu0 %v14809_v57  ;;  %v14857_v57 = vcombine.high %v934_v46, %v938_v47  ;;  %v978_v39 = vld [vmem:[#allocation5 + $0x19a0] sm:$0xff] }
 0x1d5   :  { %10138 = vmatpush1.bf16.msra.mxu1 %v14554_v32  ;;  %v946_v32 = vld [vmem:[#allocation5 + $0x18a0] sm:$0xff] }
 0x1d6   :  { %10139 = vmatprep.subr.bf16.mxu1 %v14563_v2  ;;  %v14611_v2 = vcombine.high %v687_v59, %v691_v60 }
 0x1d7   :  { %9728 = vmatpush1.bf16.msra.mxu0 %v14808_v1  ;;  %v14856_v1 = vcombine.low %v934_v46, %v938_v47  ;;  %v982_v46 = vld [vmem:[#allocation5 + $0x19c0] sm:$0xff] }
 0x1d8   :  { %9729 = vmatprep.subr.bf16.mxu0 %v14817_v4  ;;  %v14865_v4 = vcombine.high %v942_v63, %v946_v32  ;;  %v986_v47 = vld [vmem:[#allocation5 + $0x19e0] sm:$0xff] }
 0x1d9   :  { %10140 = vmatpush1.bf16.msra.mxu1 %v14562_v10  ;;  %v14610_v10 = vcombine.low %v687_v59, %v691_v60  ;;  %v735_v59 = vld [vmem:[#allocation5 + $0x1208] sm:$0xff] }
 0x1da   :  { %10141 = vmatprep.subr.bf16.mxu1 %v14571_v13  ;;  %v14619_v13 = vcombine.high %v695_v5, %v699_v6  ;;  %v739_v60 = vld [vmem:[#allocation5 + $0x1228] sm:$0xff] }
 0x1db   :  { %9730 = vmatpush1.bf16.msra.mxu0 %v14816_v11  ;;  %v14864_v11 = vcombine.low %v942_v63, %v946_v32  ;;  %v990_v63 = vld [vmem:[#allocation5 + $0x1a00] sm:$0xff] }
 0x1dc   :  { %9731 = vmatprep.subr.bf16.mxu0 %v14825_v15  ;;  %v14873_v15 = vcombine.high %v950_v8, %v954_v9  ;;  %v994_v32 = vld [vmem:[#allocation5 + $0x1a20] sm:$0xff] }
 0x1dd   :  { %10142 = vmatpush1.bf16.msra.mxu1 %v14570_v24  ;;  %v14618_v24 = vcombine.low %v695_v5, %v699_v6  ;;  %v743_v5 = vld [vmem:[#allocation5 + $0x1248] sm:$0xff] }
 0x1de   :  { %10143 = vmatprep.subr.bf16.mxu1 %v14579_v50  ;;  %v14627_v50 = vcombine.high %v703_v17, %v707_v18  ;;  %v747_v6 = vld [vmem:[#allocation5 + $0x1268] sm:$0xff] }
 0x1df   :  { %9732 = vmatpush1.bf16.msra.mxu0 %v14824_v25  ;;  %v14872_v25 = vcombine.low %v950_v8, %v954_v9  ;;  %v998_v8 = vld [vmem:[#allocation5 + $0x1a40] sm:$0xff] }
 0x1e0   :  { %9733 = vmatprep.subr.bf16.mxu0 %v14833_v26  ;;  %v14881_v26 = vcombine.high %v958_v20, %v962_v22  ;;  %v1002_v9 = vld [vmem:[#allocation5 + $0x1a60] sm:$0xff] }
 0x1e1   :  { %10144 = vmatpush1.bf16.msra.mxu1 %v14578_v30  ;;  %v14626_v30 = vcombine.low %v703_v17, %v707_v18  ;;  %v751_v17 = vld [vmem:[#allocation5 + $0x1288] sm:$0xff] }
 0x1e2   :  { %10145 = vmatprep.subr.bf16.mxu1 %v14587_v33  ;;  %v14635_v33 = vcombine.high %v711_v53, %v715_v27  ;;  %v755_v18 = vld [vmem:[#allocation5 + $0x12a8] sm:$0xff] }
 0x1e3   :  { %9734 = vmatpush1.bf16.msra.mxu0 %v14832_v31  ;;  %v14880_v31 = vcombine.low %v958_v20, %v962_v22  ;;  %v1006_v20 = vld [vmem:[#allocation5 + $0x1a80] sm:$0xff] }
 0x1e4   :  { %9735 = vmatprep.subr.bf16.mxu0 %v14841_v35  ;;  %v14889_v35 = vcombine.high %v966_v54, %v970_v29  ;;  %v1010_v22 = vld [vmem:[#allocation5 + $0x1aa0] sm:$0xff] }
 0x1e5   :  { %10146 = vmatpush1.bf16.msra.mxu1 %v14586_v40  ;;  %v14634_v40 = vcombine.low %v711_v53, %v715_v27  ;;  %v759_v53 = vld [vmem:[#allocation5 + $0x12c8] sm:$0xff] }
 0x1e6   :  { %10156 = vmatprep.subr.bf16.mxu1 %v14595_v19  ;;  %v14643_v19 = vcombine.high %v719_v36, %v723_v37  ;;  %v763_v27 = vld [vmem:[#allocation5 + $0x12e8] sm:$0xff] }
 0x1e7   :  { %9736 = vmatpush1.bf16.msra.mxu0 %v14840_v41  ;;  %v14888_v41 = vcombine.low %v966_v54, %v970_v29  ;;  %v1014_v54 = vld [vmem:[#allocation5 + $0x1ac0] sm:$0xff] }
 0x1e8   :  { %9746 = vmatprep.subr.bf16.mxu0 %v14849_v43  ;;  %10148 = vmatmul.mubr.bf16.vlgmr.msra.gmra.mrb[4].mxu1 %v17189_v52  ;;  %v14897_v43 = vcombine.high %v974_v38, %v978_v39  ;;  %v1018_v29 = vld [vmem:[#allocation5 + $0x1ae0] sm:$0xff] }
 0x1e9   :  { %10157 = vmatpush1.bf16.msra.mxu1 %v14594_v49  ;;  %10188 = vmatprep.mubr.bf16.mxu1 %v17193_v0  ;;  %v14642_v49 = vcombine.low %v719_v36, %v723_v37  ;;  %v767_v36 = vld [vmem:[#allocation5 + $0x1308] sm:$0xff] }
 0x1ea   :  { %9738 = vmatmul.mubr.bf16.vlgmr.msra.gmra.mrb[0].mxu0 %v17221_v51  ;;  %10158 = vmatprep.subr.bf16.mxu1 %v14603_v56  ;;  %v14651_v56 = vcombine.high %v727_v44, %v731_v45  ;;  %v771_v37 = vld [vmem:[#allocation5 + $0x1328] sm:$0xff] }
 0x1eb   :  { %9747 = vmatpush1.bf16.msra.mxu0 %v14848_v55  ;;  %9778 = vmatprep.mubr.bf16.mxu0 %v17225_v62  ;;  %v14896_v55 = vcombine.low %v974_v38, %v978_v39  ;;  %v1022_v38 = vld [vmem:[#allocation5 + $0x1b00] sm:$0xff] }
 0x1ec   :  { %9748 = vmatprep.subr.bf16.mxu0 %v14857_v57  ;;  %v14905_v57 = vcombine.high %v982_v46, %v986_v47  ;;  %v1026_v39 = vld [vmem:[#allocation5 + $0x1b20] sm:$0xff] }
 0x1ed   :  { %10159 = vmatpush1.bf16.msra.mxu1 %v14602_v12  ;;  %v14650_v12 = vcombine.low %v727_v44, %v731_v45  ;;  %v775_v44 = vld [vmem:[#allocation5 + $0x1348] sm:$0xff] }
 0x1ee   :  { %10160 = vmatprep.subr.bf16.mxu1 %v14611_v2  ;;  %v14659_v2 = vcombine.high %v735_v59, %v739_v60  ;;  %v779_v45 = vld [vmem:[#allocation5 + $0x1368] sm:$0xff] }
 0x1ef   :  { %9749 = vmatpush1.bf16.msra.mxu0 %v14856_v1  ;;  %v14904_v1 = vcombine.low %v982_v46, %v986_v47  ;;  %v1030_v46 = vld [vmem:[#allocation5 + $0x1b40] sm:$0xff] }
 0x1f0   :  { %9750 = vmatprep.subr.bf16.mxu0 %v14865_v4  ;;  %v14913_v4 = vcombine.high %v990_v63, %v994_v32  ;;  %v1034_v47 = vld [vmem:[#allocation5 + $0x1b60] sm:$0xff] }
 0x1f1   :  { %10161 = vmatpush1.bf16.msra.mxu1 %v14610_v10  ;;  %v14658_v10 = vcombine.low %v735_v59, %v739_v60  ;;  %v783_v59 = vld [vmem:[#allocation5 + $0x1388] sm:$0xff] }
 0x1f2   :  { %10162 = vmatprep.subr.bf16.mxu1 %v14619_v13  ;;  %v14667_v13 = vcombine.high %v743_v5, %v747_v6  ;;  %v787_v60 = vld [vmem:[#allocation5 + $0x13a8] sm:$0xff] }
 0x1f3   :  { %9751 = vmatpush1.bf16.msra.mxu0 %v14864_v11  ;;  %v14912_v11 = vcombine.low %v990_v63, %v994_v32  ;;  %v1038_v63 = vld [vmem:[#allocation5 + $0x1b80] sm:$0xff] }
 0x1f4   :  { %9752 = vmatprep.subr.bf16.mxu0 %v14873_v15  ;;  %v14921_v15 = vcombine.high %v998_v8, %v1002_v9  ;;  %v1042_v32 = vld [vmem:[#allocation5 + $0x1ba0] sm:$0xff] }
 0x1f5   :  { %10163 = vmatpush1.bf16.msra.mxu1 %v14618_v24  ;;  %v14666_v24 = vcombine.low %v743_v5, %v747_v6  ;;  %v791_v5 = vld [vmem:[#allocation5 + $0x13c8] sm:$0xff] }
 0x1f6   :  { %10164 = vmatprep.subr.bf16.mxu1 %v14627_v50  ;;  %v14675_v50 = vcombine.high %v751_v17, %v755_v18  ;;  %v795_v6 = vld [vmem:[#allocation5 + $0x13e8] sm:$0xff] }
 0x1f7   :  { %9753 = vmatpush1.bf16.msra.mxu0 %v14872_v25  ;;  %v14920_v25 = vcombine.low %v998_v8, %v1002_v9  ;;  %v1046_v8 = vld [vmem:[#allocation5 + $0x1bc0] sm:$0xff] }
 0x1f8   :  { %9754 = vmatprep.subr.bf16.mxu0 %v14881_v26  ;;  %v14929_v26 = vcombine.high %v1006_v20, %v1010_v22  ;;  %v1050_v9 = vld [vmem:[#allocation5 + $0x1be0] sm:$0xff] }
 0x1f9   :  { %10165 = vmatpush1.bf16.msra.mxu1 %v14626_v30  ;;  %v14674_v30 = vcombine.low %v751_v17, %v755_v18  ;;  %v799_v17 = vld [vmem:[#allocation5 + $0x1408] sm:$0xff] }
 0x1fa   :  { %10166 = vmatprep.subr.bf16.mxu1 %v14635_v33  ;;  %v14683_v33 = vcombine.high %v759_v53, %v763_v27  ;;  %v803_v18 = vld [vmem:[#allocation5 + $0x1428] sm:$0xff] }
 0x1fb   :  { %9755 = vmatpush1.bf16.msra.mxu0 %v14880_v31  ;;  %v14928_v31 = vcombine.low %v1006_v20, %v1010_v22  ;;  %v1054_v20 = vld [vmem:[#allocation5 + $0x1c00] sm:$0xff] }
 0x1fc   :  { %9756 = vmatprep.subr.bf16.mxu0 %v14889_v35  ;;  %v14937_v35 = vcombine.high %v1014_v54, %v1018_v29  ;;  %v1058_v22 = vld [vmem:[#allocation5 + $0x1c20] sm:$0xff] }
 0x1fd   :  { %10167 = vmatpush1.bf16.msra.mxu1 %v14634_v40  ;;  %v14682_v40 = vcombine.low %v759_v53, %v763_v27  ;;  %v807_v53 = vld [vmem:[#allocation5 + $0x1448] sm:$0xff] }
 0x1fe   :  { %10168 = vmatprep.subr.bf16.mxu1 %v14643_v19  ;;  %v14691_v19 = vcombine.high %v767_v36, %v771_v37  ;;  %v811_v27 = vld [vmem:[#allocation5 + $0x1468] sm:$0xff] }
 0x1ff   :  { %9757 = vmatpush1.bf16.msra.mxu0 %v14888_v41  ;;  %v14936_v41 = vcombine.low %v1014_v54, %v1018_v29  ;;  %v1062_v54 = vld [vmem:[#allocation5 + $0x1c40] sm:$0xff] }
 0x200   :  { %9758 = vmatprep.subr.bf16.mxu0 %v14897_v43  ;;  %v14945_v43 = vcombine.high %v1022_v38, %v1026_v39  ;;  %v1066_v29 = vld [vmem:[#allocation5 + $0x1c60] sm:$0xff] }
 0x201   :  { %10169 = vmatpush1.bf16.msra.mxu1 %v14642_v49  ;;  %v14690_v49 = vcombine.low %v767_v36, %v771_v37  ;;  %v14731_v36 = vcombine.high %v807_v53, %v811_v27  ;;  %v14985_v37 = vcombine.high %v1062_v54, %v1066_v29 }
 0x202   :  { %10170 = vmatprep.subr.bf16.mxu1 %v14651_v56  ;;  %v14699_v56 = vcombine.high %v775_v44, %v779_v45 }
 0x203   :  { %9759 = vmatpush1.bf16.msra.mxu0 %v14896_v55  ;;  %v14944_v55 = vcombine.low %v1022_v38, %v1026_v39  ;;  %v815_v38 = vld [vmem:[#allocation5 + $0x1488] sm:$0xff] }
 0x204   :  { %9760 = vmatprep.subr.bf16.mxu0 %v14905_v57  ;;  %v14953_v57 = vcombine.high %v1030_v46, %v1034_v47  ;;  %v819_v39 = vld [vmem:[#allocation5 + $0x14a8] sm:$0xff] }
 0x205   :  { %10171 = vmatpush1.bf16.msra.mxu1 %v14650_v12  ;;  %v14698_v12 = vcombine.low %v775_v44, %v779_v45  ;;  %v14739_v44 = vcombine.high %v815_v38, %v819_v39 }
 0x206   :  { %10172 = vmatprep.subr.bf16.mxu1 %v14659_v2  ;;  %v14707_v2 = vcombine.high %v783_v59, %v787_v60 }
 0x207   :  { %9761 = vmatpush1.bf16.msra.mxu0 %v14904_v1  ;;  %v14952_v1 = vcombine.low %v1030_v46, %v1034_v47  ;;  %v823_v46 = vld [vmem:[#allocation5 + $0x14c8] sm:$0xff] }
 0x208   :  { %9762 = vmatprep.subr.bf16.mxu0 %v14913_v4  ;;  %v14961_v4 = vcombine.high %v1038_v63, %v1042_v32  ;;  %v827_v47 = vld [vmem:[#allocation5 + $0x14e8] sm:$0xff] }
 0x209   :  { %10173 = vmatpush1.bf16.msra.mxu1 %v14658_v10  ;;  %v14706_v10 = vcombine.low %v783_v59, %v787_v60  ;;  %v14747_v59 = vcombine.high %v823_v46, %v827_v47 }
 0x20a   :  { %10174 = vmatprep.subr.bf16.mxu1 %v14667_v13  ;;  %v14715_v13 = vcombine.high %v791_v5, %v795_v6 }
 0x20b   :  { %9763 = vmatpush1.bf16.msra.mxu0 %v14912_v11  ;;  %v14960_v11 = vcombine.low %v1038_v63, %v1042_v32  ;;  %v831_v63 = vld [vmem:[#allocation5 + $0x1508] sm:$0xff] }
 0x20c   :  { %9764 = vmatprep.subr.bf16.mxu0 %v14921_v15  ;;  %v14969_v15 = vcombine.high %v1046_v8, %v1050_v9  ;;  %v835_v32 = vld [vmem:[#allocation5 + $0x1528] sm:$0xff] }
 0x20d   :  { %10175 = vmatpush1.bf16.msra.mxu1 %v14666_v24  ;;  %v14714_v24 = vcombine.low %v791_v5, %v795_v6  ;;  %v14755_v5 = vcombine.high %v831_v63, %v835_v32 }
 0x20e   :  { %10176 = vmatprep.subr.bf16.mxu1 %v14675_v50  ;;  %v14723_v50 = vcombine.high %v799_v17, %v803_v18 }
 0x20f   :  { %9765 = vmatpush1.bf16.msra.mxu0 %v14920_v25  ;;  %v14968_v25 = vcombine.low %v1046_v8, %v1050_v9  ;;  %v839_v8 = vld [vmem:[#allocation5 + $0x1548] sm:$0xff] }
 0x210   :  { %9766 = vmatprep.subr.bf16.mxu0 %v14929_v26  ;;  %v14977_v26 = vcombine.high %v1054_v20, %v1058_v22  ;;  %v843_v9 = vld [vmem:[#allocation5 + $0x1568] sm:$0xff] }
 0x211   :  { %10177 = vmatpush1.bf16.msra.mxu1 %v14674_v30  ;;  %v17231_v30 = vld [vmem:[#allocation2 + $0x38] sm:$0xff] }
 0x212   :  { %10178 = vmatprep.subr.bf16.mxu1 %v14683_v33  ;;  %v17235_v33 = vcombine.low %v17217_v48, %v17217_v48  ;;  %v14730_v48 = vcombine.low %v807_v53, %v811_v27 }
 0x213   :  { %9767 = vmatpush1.bf16.msra.mxu0 %v14928_v31  ;;  %v14722_v31 = vcombine.low %v799_v17, %v803_v18  ;;  %v14763_v17 = vcombine.high %v839_v8, %v843_v9 }
 0x214   :  { %9768 = vmatprep.subr.bf16.mxu0 %v14937_v35  ;;  %v14976_v35 = vcombine.low %v1054_v20, %v1058_v22  ;;  %v847_v20 = vld [vmem:[#allocation5 + $0x1588] sm:$0xff] }
 0x215   :  { %10179 = vmatpush1.bf16.msra.mxu1 %v14682_v40  ;;  %v17239_v40 = vcombine.high %v17231_v30, %v17231_v30  ;;  %v851_v22 = vld [vmem:[#allocation5 + $0x15a8] sm:$0xff] }
 0x216   :  { %10180 = vmatprep.subr.bf16.mxu1 %v14691_v19  ;;  %v1074_v19 = vld [vmem:[#allocation5 + $0x1ca0] sm:$0xff]  ;;  %v14771_v53 = vcombine.high %v847_v20, %v851_v22 }
 0x217   :  { %9769 = vmatpush1.bf16.msra.mxu0 %v14936_v41  ;;  %v1070_v41 = vld [vmem:[#allocation5 + $0x1c80] sm:$0xff] }
 0x218   :  { %9770 = vmatprep.subr.bf16.mxu0 %v14945_v43  ;;  %v14984_v43 = vcombine.low %v1062_v54, %v1066_v29  ;;  %v14993_v45 = vcombine.high %v1070_v41, %v1074_v19  ;;  %v855_v54 = vld [vmem:[#allocation5 + $0x15c8] sm:$0xff] }
 0x219   :  { %10181 = vmatpush1.bf16.msra.mxu1 %v14690_v49  ;;  %v1078_v49 = vld [vmem:[#allocation5 + $0x1cc0] sm:$0xff]  ;;  %v859_v29 = vld [vmem:[#allocation5 + $0x15e8] sm:$0xff] }
 0x21a   :  { %10182 = vmatprep.subr.bf16.mxu1 %v14699_v56  ;;  %v14738_v56 = vcombine.low %v815_v38, %v819_v39  ;;  %v14779_v38 = vcombine.high %v855_v54, %v859_v29 }
 0x21b   :  { %9771 = vmatpush1.bf16.msra.mxu0 %v14944_v55  ;;  %v1082_v55 = vld [vmem:[#allocation5 + $0x1ce0] sm:$0xff] }
 0x21c   :  { %9772 = vmatprep.subr.bf16.mxu0 %v14953_v57  ;;  %v14992_v57 = vcombine.low %v1070_v41, %v1074_v19  ;;  %v15001_v60 = vcombine.high %v1078_v49, %v1082_v55  ;;  %v863_v41 = vld [vmem:[#allocation5 + $0x1608] sm:$0xff] }
 0x21d   :  { %10183 = vmatpush1.bf16.msra.mxu1 %v14698_v12  ;;  %v1086_v12 = vld [vmem:[#allocation5 + $0x1d00] sm:$0xff]  ;;  %v867_v19 = vld [vmem:[#allocation5 + $0x1628] sm:$0xff] }
 0x21e   :  { %10184 = vmatprep.subr.bf16.mxu1 %v14707_v2  ;;  %v14746_v2 = vcombine.low %v823_v46, %v827_v47  ;;  %v14787_v46 = vcombine.high %v863_v41, %v867_v19 }
 0x21f   :  { %9773 = vmatpush1.bf16.msra.mxu0 %v14952_v1  ;;  %v1090_v1 = vld [vmem:[#allocation5 + $0x1d20] sm:$0xff] }
 0x220   :  { %9774 = vmatprep.subr.bf16.mxu0 %v14961_v4  ;;  %v15000_v4 = vcombine.low %v1078_v49, %v1082_v55  ;;  %v15009_v6 = vcombine.high %v1086_v12, %v1090_v1  ;;  %v871_v49 = vld [vmem:[#allocation5 + $0x1648] sm:$0xff] }
 0x221   :  { %10185 = vmatpush1.bf16.msra.mxu1 %v14706_v10  ;;  %v1094_v10 = vld [vmem:[#allocation5 + $0x1d40] sm:$0xff]  ;;  %v875_v55 = vld [vmem:[#allocation5 + $0x1668] sm:$0xff] }
 0x222   :  { %10186 = vmatprep.subr.bf16.mxu1 %v14715_v13  ;;  %v14754_v13 = vcombine.low %v831_v63, %v835_v32  ;;  %v14795_v63 = vcombine.high %v871_v49, %v875_v55 }
 0x223   :  { %9775 = vmatpush1.bf16.msra.mxu0 %v14960_v11  ;;  %v1098_v11 = vld [vmem:[#allocation5 + $0x1d60] sm:$0xff] }
 0x224   :  { %9776 = vmatprep.subr.bf16.mxu0 %v14969_v15  ;;  %v15008_v15 = vcombine.low %v1086_v12, %v1090_v1  ;;  %v15017_v18 = vcombine.high %v1094_v10, %v1098_v11  ;;  %v879_v12 = vld [vmem:[#allocation5 + $0x1688] sm:$0xff] }
 0x225   :  { %10187 = vmatpush1.bf16.msra.mxu1 %v14714_v24  ;;  %v1102_v24 = vld [vmem:[#allocation5 + $0x1d80] sm:$0xff]  ;;  %v883_v1 = vld [vmem:[#allocation5 + $0x16a8] sm:$0xff] }
 0x226   :  { %10197 = vmatprep.subr.bf16.mxu1 %v14723_v50  ;;  %v14762_v50 = vcombine.low %v839_v8, %v843_v9  ;;  %v14803_v8 = vcombine.high %v879_v12, %v883_v1 }
 0x227   :  { %9777 = vmatpush1.bf16.msra.mxu0 %v14968_v25  ;;  %v1106_v25 = vld [vmem:[#allocation5 + $0x1da0] sm:$0xff] }
 0x228   :  { %9787 = vmatprep.subr.bf16.mxu0 %v14977_v26  ;;  %10189 = vmatmul.mubr.bf16.vlgmr.msra.gmra.mrb[4].mxu1 %v17203_v14  ;;  %v15016_v26 = vcombine.low %v1094_v10, %v1098_v11  ;;  %v15025_v27 = vcombine.high %v1102_v24, %v1106_v25  ;;  %v887_v10 = vld [vmem:[#allocation5 + $0x16c8] sm:$0xff] }
 0x229   :  { %10198 = vmatpush1.bf16.msra.mxu1 %v14722_v31  ;;  %10229 = vmatprep.mubr.bf16.mxu1 %v17207_v23  ;;  %v1110_v31 = vld [vmem:[#allocation5 + $0x1dc0] sm:$0xff]  ;;  %v891_v11 = vld [vmem:[#allocation5 + $0x16e8] sm:$0xff] }
 0x22a   :  { %9779 = vmatmul.mubr.bf16.vlgmr.msra.gmra.mrb[0].mxu0 %v17235_v33  ;;  %10199 = vmatprep.subr.bf16.mxu1 %v14731_v36  ;;  %v14770_v36 = vcombine.low %v847_v20, %v851_v22  ;;  %v14811_v20 = vcombine.high %v887_v10, %v891_v11 }
 0x22b   :  { %9788 = vmatpush1.bf16.msra.mxu0 %v14976_v35  ;;  %9819 = vmatprep.mubr.bf16.mxu0 %v17239_v40  ;;  %v1114_v35 = vld [vmem:[#allocation5 + $0x1de0] sm:$0xff] }
 0x22c   :  { %9789 = vmatprep.subr.bf16.mxu0 %v14985_v37  ;;  %v15024_v37 = vcombine.low %v1102_v24, %v1106_v25  ;;  %v15033_v39 = vcombine.high %v1110_v31, %v1114_v35  ;;  %v895_v24 = vld [vmem:[#allocation5 + $0x1708] sm:$0xff] }
 0x22d   :  { %10200 = vmatpush1.bf16.msra.mxu1 %v14730_v48  ;;  %v1118_v48 = vld [vmem:[#allocation5 + $0x1e00] sm:$0xff]  ;;  %v899_v25 = vld [vmem:[#allocation5 + $0x1728] sm:$0xff] }
 0x22e   :  { %10201 = vmatprep.subr.bf16.mxu1 %v14739_v44  ;;  %v14778_v44 = vcombine.low %v855_v54, %v859_v29  ;;  %v14819_v54 = vcombine.high %v895_v24, %v899_v25 }
 0x22f   :  { %9790 = vmatpush1.bf16.msra.mxu0 %v14984_v43  ;;  %v1122_v43 = vld [vmem:[#allocation5 + $0x1e20] sm:$0xff] }
 0x230   :  { %9791 = vmatprep.subr.bf16.mxu0 %v14993_v45  ;;  %v15032_v45 = vcombine.low %v1110_v31, %v1114_v35  ;;  %v15041_v47 = vcombine.high %v1118_v48, %v1122_v43  ;;  %v903_v31 = vld [vmem:[#allocation5 + $0x1748] sm:$0xff] }
 0x231   :  { %10202 = vmatpush1.bf16.msra.mxu1 %v14738_v56  ;;  %v1126_v56 = vld [vmem:[#allocation5 + $0x1e40] sm:$0xff]  ;;  %v907_v35 = vld [vmem:[#allocation5 + $0x1768] sm:$0xff] }
 0x232   :  { %10203 = vmatprep.subr.bf16.mxu1 %v14747_v59  ;;  %v14786_v59 = vcombine.low %v863_v41, %v867_v19  ;;  %v14827_v41 = vcombine.high %v903_v31, %v907_v35 }
 0x233   :  { %9792 = vmatpush1.bf16.msra.mxu0 %v14992_v57  ;;  %v1130_v57 = vld [vmem:[#allocation5 + $0x1e60] sm:$0xff] }
 0x234   :  { %9793 = vmatprep.subr.bf16.mxu0 %v15001_v60  ;;  %v15040_v60 = vcombine.low %v1118_v48, %v1122_v43  ;;  %v15049_v32 = vcombine.high %v1126_v56, %v1130_v57  ;;  %v911_v48 = vld [vmem:[#allocation5 + $0x1788] sm:$0xff] }
 0x235   :  { %10204 = vmatpush1.bf16.msra.mxu1 %v14746_v2  ;;  %v1134_v2 = vld [vmem:[#allocation5 + $0x1e80] sm:$0xff]  ;;  %v915_v43 = vld [vmem:[#allocation5 + $0x17a8] sm:$0xff] }
 0x236   :  { %10205 = vmatprep.subr.bf16.mxu1 %v14755_v5  ;;  %v14794_v5 = vcombine.low %v871_v49, %v875_v55  ;;  %v14835_v49 = vcombine.high %v911_v48, %v915_v43 }
 0x237   :  { %9794 = vmatpush1.bf16.msra.mxu0 %v15000_v4  ;;  %v1138_v4 = vld [vmem:[#allocation5 + $0x1ea0] sm:$0xff] }
 0x238   :  { %9795 = vmatprep.subr.bf16.mxu0 %v15009_v6  ;;  %v15048_v6 = vcombine.low %v1126_v56, %v1130_v57  ;;  %v15057_v9 = vcombine.high %v1134_v2, %v1138_v4  ;;  %v919_v56 = vld [vmem:[#allocation5 + $0x17c8] sm:$0xff] }
 0x239   :  { %10206 = vmatpush1.bf16.msra.mxu1 %v14754_v13  ;;  %v1142_v13 = vld [vmem:[#allocation5 + $0x1ec0] sm:$0xff]  ;;  %v923_v57 = vld [vmem:[#allocation5 + $0x17e8] sm:$0xff] }
 0x23a   :  { %10207 = vmatprep.subr.bf16.mxu1 %v14763_v17  ;;  %v14802_v17 = vcombine.low %v879_v12, %v883_v1  ;;  %v14843_v12 = vcombine.high %v919_v56, %v923_v57 }
 0x23b   :  { %9796 = vmatpush1.bf16.msra.mxu0 %v15008_v15  ;;  %v1146_v15 = vld [vmem:[#allocation5 + $0x1ee0] sm:$0xff] }
 0x23c   :  { %9797 = vmatprep.subr.bf16.mxu0 %v15017_v18  ;;  %v15056_v18 = vcombine.low %v1134_v2, %v1138_v4  ;;  %v15065_v22 = vcombine.high %v1142_v13, %v1146_v15  ;;  %v927_v2 = vld [vmem:[#allocation5 + $0x1808] sm:$0xff] }
 0x23d   :  { %10208 = vmatpush1.bf16.msra.mxu1 %v14762_v50  ;;  %v1150_v50 = vld [vmem:[#allocation5 + $0x1f00] sm:$0xff]  ;;  %v931_v4 = vld [vmem:[#allocation5 + $0x1828] sm:$0xff] }
 0x23e   :  { %10209 = vmatprep.subr.bf16.mxu1 %v14771_v53  ;;  %v14810_v53 = vcombine.low %v887_v10, %v891_v11  ;;  %v14851_v10 = vcombine.high %v927_v2, %v931_v4 }
 0x23f   :  { %9798 = vmatpush1.bf16.msra.mxu0 %v15016_v26  ;;  %v1154_v26 = vld [vmem:[#allocation5 + $0x1f20] sm:$0xff] }
 0x240   :  { %9799 = vmatprep.subr.bf16.mxu0 %v15025_v27  ;;  %v15064_v27 = vcombine.low %v1142_v13, %v1146_v15  ;;  %v15073_v29 = vcombine.high %v1150_v50, %v1154_v26  ;;  %v935_v13 = vld [vmem:[#allocation5 + $0x1848] sm:$0xff] }
 0x241   :  { %10210 = vmatpush1.bf16.msra.mxu1 %v14770_v36  ;;  %v1158_v36 = vld [vmem:[#allocation5 + $0x1f40] sm:$0xff]  ;;  %v939_v15 = vld [vmem:[#allocation5 + $0x1868] sm:$0xff] }
 0x242   :  { %10211 = vmatprep.subr.bf16.mxu1 %v14779_v38  ;;  %v14818_v38 = vcombine.low %v895_v24, %v899_v25  ;;  %v17249_v24 = vcombine.low %v17231_v30, %v17231_v30  ;;  %v14858_v30 = vcombine.low %v935_v13, %v939_v15 }
 0x243   :  { %9800 = vmatpush1.bf16.msra.mxu0 %v15024_v37  ;;  %v1162_v37 = vld [vmem:[#allocation5 + $0x1f60] sm:$0xff] }
 0x244   :  { %9801 = vmatprep.subr.bf16.mxu0 %v15033_v39  ;;  %v15072_v39 = vcombine.low %v1150_v50, %v1154_v26  ;;  %v15081_v19 = vcombine.high %v1158_v36, %v1162_v37  ;;  %v14859_v50 = vcombine.high %v935_v13, %v939_v15 }
 0x245   :  { %10212 = vmatpush1.bf16.msra.mxu1 %v14778_v44  ;;  %v1166_v44 = vld [vmem:[#allocation5 + $0x1f80] sm:$0xff] }
 0x246   :  { %10213 = vmatprep.subr.bf16.mxu1 %v14787_v46  ;;  %v14826_v46 = vcombine.low %v903_v31, %v907_v35  ;;  %v1202_v31 = vld [vmem:[#allocation5 + $0x20a0] sm:$0xff] }
 0x247   :  { %9802 = vmatpush1.bf16.msra.mxu0 %v15032_v45  ;;  %v1170_v45 = vld [vmem:[#allocation5 + $0x1fa0] sm:$0xff] }
 0x248   :  { %9803 = vmatprep.subr.bf16.mxu0 %v15041_v47  ;;  %v15080_v47 = vcombine.low %v1158_v36, %v1162_v37  ;;  %v15089_v55 = vcombine.high %v1166_v44, %v1170_v45 }
 0x249   :  { %10214 = vmatpush1.bf16.msra.mxu1 %v14786_v59  ;;  %v1174_v59 = vld [vmem:[#allocation5 + $0x1fc0] sm:$0xff] }
 0x24a   :  { %10215 = vmatprep.subr.bf16.mxu1 %v14795_v63  ;;  %v14834_v63 = vcombine.low %v911_v48, %v915_v43 }
 0x24b   :  { %9804 = vmatpush1.bf16.msra.mxu0 %v15040_v60  ;;  %v1178_v60 = vld [vmem:[#allocation5 + $0x1fe0] sm:$0xff] }
 0x24c   :  { %9805 = vmatprep.subr.bf16.mxu0 %v15049_v32  ;;  %v15088_v32 = vcombine.low %v1166_v44, %v1170_v45  ;;  %v15097_v1 = vcombine.high %v1174_v59, %v1178_v60 }
 0x24d   :  { %10216 = vmatpush1.bf16.msra.mxu1 %v14794_v5  ;;  %v1182_v5 = vld [vmem:[#allocation5 + $0x2000] sm:$0xff] }
 0x24e   :  { %10217 = vmatprep.subr.bf16.mxu1 %v14803_v8  ;;  %v14842_v8 = vcombine.low %v919_v56, %v923_v57 }
 0x24f   :  { %9806 = vmatpush1.bf16.msra.mxu0 %v15048_v6  ;;  %v1186_v6 = vld [vmem:[#allocation5 + $0x2020] sm:$0xff] }
 0x250   :  { %9807 = vmatprep.subr.bf16.mxu0 %v15057_v9  ;;  %v15096_v9 = vcombine.low %v1174_v59, %v1178_v60  ;;  %v15105_v11 = vcombine.high %v1182_v5, %v1186_v6  ;;  %v15104_v25 = vcombine.low %v1182_v5, %v1186_v6 }
 0x251   :  { %10218 = vmatpush1.bf16.msra.mxu1 %v14802_v17  ;;  %v1190_v17 = vld [vmem:[#allocation5 + $0x2040] sm:$0xff] }
 0x252   :  { %10219 = vmatprep.subr.bf16.mxu1 %v14811_v20  ;;  %v17245_v20 = vld [vmem:[#allocation2 + $0x40] sm:$0xff] }
 0x253   :  { %9808 = vmatpush1.bf16.msra.mxu0 %v15056_v18  ;;  %v1194_v18 = vld [vmem:[#allocation5 + $0x2060] sm:$0xff] }
 0x254   :  { %9809 = vmatprep.subr.bf16.mxu0 %v15065_v22  ;;  %v14850_v22 = vcombine.low %v927_v2, %v931_v4  ;;  %v15113_v26 = vcombine.high %v1190_v17, %v1194_v18  ;;  %v15112_v35 = vcombine.low %v1190_v17, %v1194_v18 }
 0x255   :  { %10220 = vmatpush1.bf16.msra.mxu1 %v14810_v53  ;;  %v943_v53 = vld [vmem:[#allocation5 + $0x1888] sm:$0xff] }
 0x256   :  { %10221 = vmatprep.subr.bf16.mxu1 %v14819_v54  ;;  %v17253_v54 = vcombine.high %v17245_v20, %v17245_v20 }
 0x257   :  { %9810 = vmatpush1.bf16.msra.mxu0 %v15064_v27  ;;  %v947_v27 = vld [vmem:[#allocation5 + $0x18a8] sm:$0xff] }
 0x258   :  { %9811 = vmatprep.subr.bf16.mxu0 %v15073_v29  ;;  %v1198_v29 = vld [vmem:[#allocation5 + $0x2080] sm:$0xff]  ;;  %v14867_v36 = vcombine.high %v943_v53, %v947_v27  ;;  %v14866_v48 = vcombine.low %v943_v53, %v947_v27 }
 0x259   :  { %10222 = vmatpush1.bf16.msra.mxu1 %v14818_v38  ;;  %v15121_v37 = vcombine.high %v1198_v29, %v1202_v31  ;;  %v951_v38 = vld [vmem:[#allocation5 + $0x18c8] sm:$0xff]  ;;  %v15120_v43 = vcombine.low %v1198_v29, %v1202_v31 }
 0x25a   :  { %10223 = vmatprep.subr.bf16.mxu1 %v14827_v41  ;;  %v1206_v41 = vld [vmem:[#allocation5 + $0x20c0] sm:$0xff] }
 0x25b   :  { %9812 = vmatpush1.bf16.msra.mxu0 %v15072_v39  ;;  %v955_v39 = vld [vmem:[#allocation5 + $0x18e8] sm:$0xff] }
 0x25c   :  { %9813 = vmatprep.subr.bf16.mxu0 %v15081_v19  ;;  %v1210_v19 = vld [vmem:[#allocation5 + $0x20e0] sm:$0xff]  ;;  %v14875_v44 = vcombine.high %v951_v38, %v955_v39  ;;  %v14874_v56 = vcombine.low %v951_v38, %v955_v39 }
 0x25d   :  { %10224 = vmatpush1.bf16.msra.mxu1 %v14826_v46  ;;  %v15129_v45 = vcombine.high %v1206_v41, %v1210_v19  ;;  %v959_v46 = vld [vmem:[#allocation5 + $0x1908] sm:$0xff]  ;;  %v15128_v57 = vcombine.low %v1206_v41, %v1210_v19 }
 0x25e   :  { %10225 = vmatprep.subr.bf16.mxu1 %v14835_v49  ;;  %v1214_v49 = vld [vmem:[#allocation5 + $0x2100] sm:$0xff] }
 0x25f   :  { %9814 = vmatpush1.bf16.msra.mxu0 %v15080_v47  ;;  %v963_v47 = vld [vmem:[#allocation5 + $0x1928] sm:$0xff] }
 0x260   :  { %9815 = vmatprep.subr.bf16.mxu0 %v15089_v55  ;;  %v1218_v55 = vld [vmem:[#allocation5 + $0x2120] sm:$0xff]  ;;  %v14883_v59 = vcombine.high %v959_v46, %v963_v47  ;;  %v14882_v2 = vcombine.low %v959_v46, %v963_v47 }
 0x261   :  { %10226 = vmatpush1.bf16.msra.mxu1 %v14834_v63  ;;  %v15137_v60 = vcombine.high %v1214_v49, %v1218_v55  ;;  %v967_v63 = vld [vmem:[#allocation5 + $0x1948] sm:$0xff]  ;;  %v15136_v4 = vcombine.low %v1214_v49, %v1218_v55 }
 0x262   :  { %10227 = vmatprep.subr.bf16.mxu1 %v14843_v12  ;;  %v1222_v12 = vld [vmem:[#allocation5 + $0x2140] sm:$0xff] }
 0x263   :  { %9816 = vmatpush1.bf16.msra.mxu0 %v15088_v32  ;;  %v971_v32 = vld [vmem:[#allocation5 + $0x1968] sm:$0xff] }
 0x264   :  { %9817 = vmatprep.subr.bf16.mxu0 %v15097_v1  ;;  %v1226_v1 = vld [vmem:[#allocation5 + $0x2160] sm:$0xff]  ;;  %v14891_v5 = vcombine.high %v967_v63, %v971_v32  ;;  %v14890_v13 = vcombine.low %v967_v63, %v971_v32 }
 0x265   :  { %10228 = vmatpush1.bf16.msra.mxu1 %v14842_v8  ;;  %v15145_v6 = vcombine.high %v1222_v12, %v1226_v1  ;;  %v975_v8 = vld [vmem:[#allocation5 + $0x1988] sm:$0xff]  ;;  %v15144_v15 = vcombine.low %v1222_v12, %v1226_v1 }
 0x266   :  { %10238 = vmatprep.subr.bf16.mxu1 %v14851_v10  ;;  %v1230_v10 = vld [vmem:[#allocation5 + $0x2180] sm:$0xff] }
 0x267   :  { %9818 = vmatpush1.bf16.msra.mxu0 %v15096_v9  ;;  %v979_v9 = vld [vmem:[#allocation5 + $0x19a8] sm:$0xff] }
 0x268   :  { %9828 = vmatprep.subr.bf16.mxu0 %v15105_v11  ;;  %10230 = vmatmul.mubr.bf16.vlgmr.msra.gmra.mrb[4].mxu1 %v17221_v51  ;;  %v1234_v11 = vld [vmem:[#allocation5 + $0x21a0] sm:$0xff]  ;;  %v14899_v17 = vcombine.high %v975_v8, %v979_v9  ;;  %v14898_v53 = vcombine.low %v975_v8, %v979_v9 }
 0x269   :  { %10239 = vmatpush1.bf16.msra.mxu1 %v14850_v22  ;;  %10270 = vmatprep.mubr.bf16.mxu1 %v17225_v62  ;;  %v15153_v18 = vcombine.high %v1230_v10, %v1234_v11  ;;  %v983_v22 = vld [vmem:[#allocation5 + $0x19c8] sm:$0xff]  ;;  %v15152_v27 = vcombine.low %v1230_v10, %v1234_v11 }
 0x26a   :  { %9820 = vmatmul.mubr.bf16.vlgmr.msra.gmra.mrb[0].mxu0 %v17249_v24  ;;  %10240 = vmatprep.subr.bf16.mxu1 %v14859_v50  ;;  %v1238_v50 = vld [vmem:[#allocation5 + $0x21c0] sm:$0xff] }
 0x26b   :  { %9829 = vmatpush1.bf16.msra.mxu0 %v15104_v25  ;;  %9860 = vmatprep.mubr.bf16.mxu0 %v17253_v54  ;;  %v987_v25 = vld [vmem:[#allocation5 + $0x19e8] sm:$0xff] }
 0x26c   :  { %9830 = vmatprep.subr.bf16.mxu0 %v15113_v26  ;;  %v1242_v26 = vld [vmem:[#allocation5 + $0x21e0] sm:$0xff]  ;;  %v14907_v29 = vcombine.high %v983_v22, %v987_v25  ;;  %v14906_v38 = vcombine.low %v983_v22, %v987_v25 }
 0x26d   :  { %10241 = vmatpush1.bf16.msra.mxu1 %v14858_v30  ;;  %v15161_v31 = vcombine.high %v1238_v50, %v1242_v26  ;;  %v991_v30 = vld [vmem:[#allocation5 + $0x1a08] sm:$0xff]  ;;  %v15160_v39 = vcombine.low %v1238_v50, %v1242_v26 }
 0x26e   :  { %10242 = vmatprep.subr.bf16.mxu1 %v14867_v36  ;;  %v1246_v36 = vld [vmem:[#allocation5 + $0x2200] sm:$0xff] }
 0x26f   :  { %9831 = vmatpush1.bf16.msra.mxu0 %v15112_v35  ;;  %v995_v35 = vld [vmem:[#allocation5 + $0x1a28] sm:$0xff] }
 0x270   :  { %9832 = vmatprep.subr.bf16.mxu0 %v15121_v37  ;;  %v1250_v37 = vld [vmem:[#allocation5 + $0x2220] sm:$0xff]  ;;  %v14915_v41 = vcombine.high %v991_v30, %v995_v35  ;;  %v14914_v46 = vcombine.low %v991_v30, %v995_v35 }
 0x271   :  { %10243 = vmatpush1.bf16.msra.mxu1 %v14866_v48  ;;  %v15169_v19 = vcombine.high %v1246_v36, %v1250_v37  ;;  %v999_v48 = vld [vmem:[#allocation5 + $0x1a48] sm:$0xff]  ;;  %v15168_v47 = vcombine.low %v1246_v36, %v1250_v37 }
 0x272   :  { %10244 = vmatprep.subr.bf16.mxu1 %v14875_v44  ;;  %v1254_v44 = vld [vmem:[#allocation5 + $0x2240] sm:$0xff] }
 0x273   :  { %9833 = vmatpush1.bf16.msra.mxu0 %v15120_v43  ;;  %v1003_v43 = vld [vmem:[#allocation5 + $0x1a68] sm:$0xff] }
 0x274   :  { %9834 = vmatprep.subr.bf16.mxu0 %v15129_v45  ;;  %v1258_v45 = vld [vmem:[#allocation5 + $0x2260] sm:$0xff]  ;;  %v14923_v49 = vcombine.high %v999_v48, %v1003_v43  ;;  %v14922_v63 = vcombine.low %v999_v48, %v1003_v43 }
 0x275   :  { %10245 = vmatpush1.bf16.msra.mxu1 %v14874_v56  ;;  %v15177_v55 = vcombine.high %v1254_v44, %v1258_v45  ;;  %v1007_v56 = vld [vmem:[#allocation5 + $0x1a88] sm:$0xff]  ;;  %v15176_v32 = vcombine.low %v1254_v44, %v1258_v45 }
 0x276   :  { %10246 = vmatprep.subr.bf16.mxu1 %v14883_v59  ;;  %v1262_v59 = vld [vmem:[#allocation5 + $0x2280] sm:$0xff] }
 0x277   :  { %9835 = vmatpush1.bf16.msra.mxu0 %v15128_v57  ;;  %v1011_v57 = vld [vmem:[#allocation5 + $0x1aa8] sm:$0xff] }
 0x278   :  { %9836 = vmatprep.subr.bf16.mxu0 %v15137_v60  ;;  %v1266_v60 = vld [vmem:[#allocation5 + $0x22a0] sm:$0xff]  ;;  %v14931_v12 = vcombine.high %v1007_v56, %v1011_v57  ;;  %v14930_v8 = vcombine.low %v1007_v56, %v1011_v57 }
 0x279   :  { %10247 = vmatpush1.bf16.msra.mxu1 %v14882_v2  ;;  %v15185_v1 = vcombine.high %v1262_v59, %v1266_v60  ;;  %v1015_v2 = vld [vmem:[#allocation5 + $0x1ac8] sm:$0xff]  ;;  %v15184_v9 = vcombine.low %v1262_v59, %v1266_v60 }
 0x27a   :  { %10248 = vmatprep.subr.bf16.mxu1 %v14891_v5  ;;  %v1270_v5 = vld [vmem:[#allocation5 + $0x22c0] sm:$0xff] }
 0x27b   :  { %9837 = vmatpush1.bf16.msra.mxu0 %v15136_v4  ;;  %v1019_v4 = vld [vmem:[#allocation5 + $0x1ae8] sm:$0xff] }
 0x27c   :  { %9838 = vmatprep.subr.bf16.mxu0 %v15145_v6  ;;  %v1274_v6 = vld [vmem:[#allocation5 + $0x22e0] sm:$0xff]  ;;  %v14939_v10 = vcombine.high %v1015_v2, %v1019_v4  ;;  %v14938_v22 = vcombine.low %v1015_v2, %v1019_v4 }
 0x27d   :  { %10249 = vmatpush1.bf16.msra.mxu1 %v14890_v13  ;;  %v15193_v11 = vcombine.high %v1270_v5, %v1274_v6  ;;  %v1023_v13 = vld [vmem:[#allocation5 + $0x1b08] sm:$0xff]  ;;  %v15192_v25 = vcombine.low %v1270_v5, %v1274_v6 }
 0x27e   :  { %10250 = vmatprep.subr.bf16.mxu1 %v14899_v17  ;;  %v1278_v17 = vld [vmem:[#allocation5 + $0x2300] sm:$0xff] }
 0x27f   :  { %9839 = vmatpush1.bf16.msra.mxu0 %v15144_v15  ;;  %v1027_v15 = vld [vmem:[#allocation5 + $0x1b28] sm:$0xff] }
 0x280   :  { %9840 = vmatprep.subr.bf16.mxu0 %v15153_v18  ;;  %v1282_v18 = vld [vmem:[#allocation5 + $0x2320] sm:$0xff]  ;;  %v14947_v50 = vcombine.high %v1023_v13, %v1027_v15  ;;  %v14946_v30 = vcombine.low %v1023_v13, %v1027_v15  ;;  %v17259_v13 = vld [vmem:[#allocation2 + $0x48] sm:$0xff] }
 0x281   :  { %10251 = vmatpush1.bf16.msra.mxu1 %v14898_v53  ;;  %v15201_v26 = vcombine.high %v1278_v17, %v1282_v18  ;;  %v1031_v53 = vld [vmem:[#allocation5 + $0x1b48] sm:$0xff]  ;;  %v15200_v35 = vcombine.low %v1278_v17, %v1282_v18  ;;  %v17263_v17 = vcombine.low %v17245_v20, %v17245_v20 }
 0x282   :  { %10252 = vmatprep.subr.bf16.mxu1 %v14907_v29  ;;  %v1286_v29 = vld [vmem:[#allocation5 + $0x2340] sm:$0xff] }
 0x283   :  { %9841 = vmatpush1.bf16.msra.mxu0 %v15152_v27  ;;  %v1035_v27 = vld [vmem:[#allocation5 + $0x1b68] sm:$0xff] }
 0x284   :  { %9842 = vmatprep.subr.bf16.mxu0 %v15161_v31  ;;  %v1290_v31 = vld [vmem:[#allocation5 + $0x2360] sm:$0xff]  ;;  %v14955_v36 = vcombine.high %v1031_v53, %v1035_v27  ;;  %v14954_v48 = vcombine.low %v1031_v53, %v1035_v27  ;;  %v17267_v53 = vcombine.high %v17259_v13, %v17259_v13 }
 0x285   :  { %10253 = vmatpush1.bf16.msra.mxu1 %v14906_v38  ;;  %v15209_v37 = vcombine.high %v1286_v29, %v1290_v31  ;;  %v1039_v38 = vld [vmem:[#allocation5 + $0x1b88] sm:$0xff]  ;;  %v15208_v43 = vcombine.low %v1286_v29, %v1290_v31  ;;  %v1326_v27 = vld [vmem:[#allocation5 + $0x2480] sm:$0xff] }
 0x286   :  { %10254 = vmatprep.subr.bf16.mxu1 %v14915_v41  ;;  %v1294_v41 = vld [vmem:[#allocation5 + $0x2380] sm:$0xff] }
 0x287   :  { %9843 = vmatpush1.bf16.msra.mxu0 %v15160_v39  ;;  %v1043_v39 = vld [vmem:[#allocation5 + $0x1ba8] sm:$0xff]  ;;  %v1330_v29 = vld [vmem:[#allocation5 + $0x24a0] sm:$0xff] }
 0x288   :  { %9844 = vmatprep.subr.bf16.mxu0 %v15169_v19  ;;  %v1298_v19 = vld [vmem:[#allocation5 + $0x23a0] sm:$0xff]  ;;  %v14963_v44 = vcombine.high %v1039_v38, %v1043_v39  ;;  %v14962_v56 = vcombine.low %v1039_v38, %v1043_v39 }
 0x289   :  { %10255 = vmatpush1.bf16.msra.mxu1 %v14914_v46  ;;  %v15217_v45 = vcombine.high %v1294_v41, %v1298_v19  ;;  %v1047_v46 = vld [vmem:[#allocation5 + $0x1bc8] sm:$0xff]  ;;  %v15216_v57 = vcombine.low %v1294_v41, %v1298_v19  ;;  %v1334_v38 = vld [vmem:[#allocation5 + $0x24c0] sm:$0xff]  ;;  %v15248_v19 = vcombine.low %v1326_v27, %v1330_v29 }
 0x28a   :  { %10256 = vmatprep.subr.bf16.mxu1 %v14923_v49  ;;  %v1302_v49 = vld [vmem:[#allocation5 + $0x23c0] sm:$0xff] }
 0x28b   :  { %9845 = vmatpush1.bf16.msra.mxu0 %v15168_v47  ;;  %v1051_v47 = vld [vmem:[#allocation5 + $0x1be8] sm:$0xff]  ;;  %v1338_v39 = vld [vmem:[#allocation5 + $0x24e0] sm:$0xff] }
 0x28c   :  { %9846 = vmatprep.subr.bf16.mxu0 %v15177_v55  ;;  %v1306_v55 = vld [vmem:[#allocation5 + $0x23e0] sm:$0xff]  ;;  %v14971_v59 = vcombine.high %v1047_v46, %v1051_v47  ;;  %v14970_v2 = vcombine.low %v1047_v46, %v1051_v47 }
 0x28d   :  { %10257 = vmatpush1.bf16.msra.mxu1 %v14922_v63  ;;  %v15225_v60 = vcombine.high %v1302_v49, %v1306_v55  ;;  %v1055_v63 = vld [vmem:[#allocation5 + $0x1c08] sm:$0xff]  ;;  %v15224_v4 = vcombine.low %v1302_v49, %v1306_v55  ;;  %v1342_v46 = vld [vmem:[#allocation5 + $0x2500] sm:$0xff]  ;;  %v15256_v55 = vcombine.low %v1334_v38, %v1338_v39 }
 0x28e   :  { %10258 = vmatprep.subr.bf16.mxu1 %v14931_v12  ;;  %v1310_v12 = vld [vmem:[#allocation5 + $0x2400] sm:$0xff] }
 0x28f   :  { %9847 = vmatpush1.bf16.msra.mxu0 %v15176_v32  ;;  %v1059_v32 = vld [vmem:[#allocation5 + $0x1c28] sm:$0xff]  ;;  %v1346_v47 = vld [vmem:[#allocation5 + $0x2520] sm:$0xff] }
 0x290   :  { %9848 = vmatprep.subr.bf16.mxu0 %v15185_v1  ;;  %v1314_v1 = vld [vmem:[#allocation5 + $0x2420] sm:$0xff]  ;;  %v14979_v5 = vcombine.high %v1055_v63, %v1059_v32  ;;  %v14978_v15 = vcombine.low %v1055_v63, %v1059_v32 }
 0x291   :  { %10259 = vmatpush1.bf16.msra.mxu1 %v14930_v8  ;;  %v15233_v6 = vcombine.high %v1310_v12, %v1314_v1  ;;  %v1063_v8 = vld [vmem:[#allocation5 + $0x1c48] sm:$0xff]  ;;  %v15232_v18 = vcombine.low %v1310_v12, %v1314_v1  ;;  %v1350_v63 = vld [vmem:[#allocation5 + $0x2540] sm:$0xff]  ;;  %v15264_v1 = vcombine.low %v1342_v46, %v1346_v47 }
 0x292   :  { %10260 = vmatprep.subr.bf16.mxu1 %v14939_v10  ;;  %v1318_v10 = vld [vmem:[#allocation5 + $0x2440] sm:$0xff] }
 0x293   :  { %9849 = vmatpush1.bf16.msra.mxu0 %v15184_v9  ;;  %v1067_v9 = vld [vmem:[#allocation5 + $0x1c68] sm:$0xff]  ;;  %v1354_v32 = vld [vmem:[#allocation5 + $0x2560] sm:$0xff] }
 0x294   :  { %9850 = vmatprep.subr.bf16.mxu0 %v15193_v11  ;;  %v1322_v11 = vld [vmem:[#allocation5 + $0x2460] sm:$0xff]  ;;  %v14986_v20 = vcombine.low %v1063_v8, %v1067_v9 }
 0x295   :  { %10261 = vmatpush1.bf16.msra.mxu1 %v14938_v22  ;;  %v14987_v22 = vcombine.high %v1063_v8, %v1067_v9  ;;  %v15240_v31 = vcombine.low %v1318_v10, %v1322_v11  ;;  %v1358_v8 = vld [vmem:[#allocation5 + $0x2580] sm:$0xff] }
 0x296   :  { %10262 = vmatprep.subr.bf16.mxu1 %v14947_v50  ;;  %v1071_v50 = vld [vmem:[#allocation5 + $0x1c88] sm:$0xff]  ;;  %v1362_v9 = vld [vmem:[#allocation5 + $0x25a0] sm:$0xff] }
 0x297   :  { %9851 = vmatpush1.bf16.msra.mxu0 %v15192_v25  ;;  %v15241_v25 = vcombine.high %v1318_v10, %v1322_v11  ;;  %v15272_v11 = vcombine.low %v1350_v63, %v1354_v32 }
 0x298   :  { %9852 = vmatprep.subr.bf16.mxu0 %v15201_v26  ;;  %v1075_v26 = vld [vmem:[#allocation5 + $0x1ca8] sm:$0xff] }
 0x299   :  { %10263 = vmatpush1.bf16.msra.mxu1 %v14946_v30  ;;  %v14995_v30 = vcombine.high %v1071_v50, %v1075_v26  ;;  %v14994_v41 = vcombine.low %v1071_v50, %v1075_v26  ;;  %v1366_v50 = vld [vmem:[#allocation5 + $0x25c0] sm:$0xff] }
 0x29a   :  { %10264 = vmatprep.subr.bf16.mxu1 %v14955_v36  ;;  %v1079_v36 = vld [vmem:[#allocation5 + $0x1cc8] sm:$0xff]  ;;  %v1370_v26 = vld [vmem:[#allocation5 + $0x25e0] sm:$0xff] }
 0x29b   :  { %9853 = vmatpush1.bf16.msra.mxu0 %v15200_v35  ;;  %v15249_v35 = vcombine.high %v1326_v27, %v1330_v29  ;;  %v15280_v29 = vcombine.low %v1358_v8, %v1362_v9 }
 0x29c   :  { %9854 = vmatprep.subr.bf16.mxu0 %v15209_v37  ;;  %v1083_v37 = vld [vmem:[#allocation5 + $0x1ce8] sm:$0xff] }
 0x29d   :  { %10265 = vmatpush1.bf16.msra.mxu1 %v14954_v48  ;;  %v15003_v48 = vcombine.high %v1079_v36, %v1083_v37  ;;  %v15002_v49 = vcombine.low %v1079_v36, %v1083_v37  ;;  %v1374_v36 = vld [vmem:[#allocation5 + $0x2600] sm:$0xff] }
 0x29e   :  { %10266 = vmatprep.subr.bf16.mxu1 %v14963_v44  ;;  %v1087_v44 = vld [vmem:[#allocation5 + $0x1d08] sm:$0xff]  ;;  %v1378_v37 = vld [vmem:[#allocation5 + $0x2620] sm:$0xff] }
 0x29f   :  { %9855 = vmatpush1.bf16.msra.mxu0 %v15208_v43  ;;  %v15257_v43 = vcombine.high %v1334_v38, %v1338_v39  ;;  %v15288_v39 = vcombine.low %v1366_v50, %v1370_v26 }
 0x2a0   :  { %9856 = vmatprep.subr.bf16.mxu0 %v15217_v45  ;;  %v1091_v45 = vld [vmem:[#allocation5 + $0x1d28] sm:$0xff] }
 0x2a1   :  { %10267 = vmatpush1.bf16.msra.mxu1 %v14962_v56  ;;  %v15011_v56 = vcombine.high %v1087_v44, %v1091_v45  ;;  %v15010_v12 = vcombine.low %v1087_v44, %v1091_v45  ;;  %v1382_v44 = vld [vmem:[#allocation5 + $0x2640] sm:$0xff] }
 0x2a2   :  { %10268 = vmatprep.subr.bf16.mxu1 %v14971_v59  ;;  %v1095_v59 = vld [vmem:[#allocation5 + $0x1d48] sm:$0xff]  ;;  %v1386_v45 = vld [vmem:[#allocation5 + $0x2660] sm:$0xff] }
 0x2a3   :  { %9857 = vmatpush1.bf16.msra.mxu0 %v15216_v57  ;;  %v15265_v57 = vcombine.high %v1342_v46, %v1346_v47  ;;  %v15296_v47 = vcombine.low %v1374_v36, %v1378_v37 }
 0x2a4   :  { %9858 = vmatprep.subr.bf16.mxu0 %v15225_v60  ;;  %v1099_v60 = vld [vmem:[#allocation5 + $0x1d68] sm:$0xff] }
 0x2a5   :  { %10269 = vmatpush1.bf16.msra.mxu1 %v14970_v2  ;;  %v15019_v2 = vcombine.high %v1095_v59, %v1099_v60  ;;  %v15018_v10 = vcombine.low %v1095_v59, %v1099_v60  ;;  %v1390_v59 = vld [vmem:[#allocation5 + $0x2680] sm:$0xff] }
 0x2a6   :  { %10279 = vmatprep.subr.bf16.mxu1 %v14979_v5  ;;  %v1103_v5 = vld [vmem:[#allocation5 + $0x1d88] sm:$0xff]  ;;  %v1394_v60 = vld [vmem:[#allocation5 + $0x26a0] sm:$0xff] }
 0x2a7   :  { %9859 = vmatpush1.bf16.msra.mxu0 %v15224_v4  ;;  %v15273_v4 = vcombine.high %v1350_v63, %v1354_v32  ;;  %v15304_v32 = vcombine.low %v1382_v44, %v1386_v45 }
 0x2a8   :  { %9869 = vmatprep.subr.bf16.mxu0 %v15233_v6  ;;  %10271 = vmatmul.mubr.bf16.vlgmr.msra.gmra.mrb[4].mxu1 %v17235_v33  ;;  %v1107_v6 = vld [vmem:[#allocation5 + $0x1da8] sm:$0xff] }
 0x2a9   :  { %10280 = vmatpush1.bf16.msra.mxu1 %v14978_v15  ;;  %10311 = vmatprep.mubr.bf16.mxu1 %v17239_v40  ;;  %v15027_v15 = vcombine.high %v1103_v5, %v1107_v6  ;;  %v15026_v27 = vcombine.low %v1103_v5, %v1107_v6  ;;  %v1398_v5 = vld [vmem:[#allocation5 + $0x26c0] sm:$0xff] }
 0x2aa   :  { %9861 = vmatmul.mubr.bf16.vlgmr.msra.gmra.mrb[0].mxu0 %v17263_v17  ;;  %10281 = vmatprep.subr.bf16.mxu1 %v14987_v22  ;;  %v1111_v22 = vld [vmem:[#allocation5 + $0x1dc8] sm:$0xff]  ;;  %v1402_v6 = vld [vmem:[#allocation5 + $0x26e0] sm:$0xff] }
 0x2ab   :  { %9870 = vmatpush1.bf16.msra.mxu0 %v15232_v18  ;;  %9901 = vmatprep.mubr.bf16.mxu0 %v17267_v53  ;;  %v15281_v18 = vcombine.high %v1358_v8, %v1362_v9  ;;  %v15312_v9 = vcombine.low %v1390_v59, %v1394_v60 }
 0x2ac   :  { %9871 = vmatprep.subr.bf16.mxu0 %v15241_v25  ;;  %v1115_v25 = vld [vmem:[#allocation5 + $0x1de8] sm:$0xff] }
 0x2ad   :  { %10282 = vmatpush1.bf16.msra.mxu1 %v14986_v20  ;;  %v15035_v20 = vcombine.high %v1111_v22, %v1115_v25  ;;  %v15034_v38 = vcombine.low %v1111_v22, %v1115_v25  ;;  %v1406_v22 = vld [vmem:[#allocation5 + $0x2700] sm:$0xff] }
 0x2ae   :  { %10283 = vmatprep.subr.bf16.mxu1 %v14995_v30  ;;  %v1119_v30 = vld [vmem:[#allocation5 + $0x1e08] sm:$0xff]  ;;  %v1410_v25 = vld [vmem:[#allocation5 + $0x2720] sm:$0xff] }
 0x2af   :  { %9872 = vmatpush1.bf16.msra.mxu0 %v15240_v31  ;;  %v15289_v31 = vcombine.high %v1366_v50, %v1370_v26  ;;  %v15320_v26 = vcombine.low %v1398_v5, %v1402_v6 }
 0x2b0   :  { %9873 = vmatprep.subr.bf16.mxu0 %v15249_v35  ;;  %v1123_v35 = vld [vmem:[#allocation5 + $0x1e28] sm:$0xff] }
 0x2b1   :  { %10284 = vmatpush1.bf16.msra.mxu1 %v14994_v41  ;;  %v15043_v41 = vcombine.high %v1119_v30, %v1123_v35  ;;  %v15042_v46 = vcombine.low %v1119_v30, %v1123_v35  ;;  %v1414_v30 = vld [vmem:[#allocation5 + $0x2740] sm:$0xff] }
 0x2b2   :  { %10285 = vmatprep.subr.bf16.mxu1 %v15003_v48  ;;  %v1127_v48 = vld [vmem:[#allocation5 + $0x1e48] sm:$0xff]  ;;  %v1418_v35 = vld [vmem:[#allocation5 + $0x2760] sm:$0xff] }
 0x2b3   :  { %9874 = vmatpush1.bf16.msra.mxu0 %v15248_v19  ;;  %v15297_v19 = vcombine.high %v1374_v36, %v1378_v37  ;;  %v15328_v37 = vcombine.low %v1406_v22, %v1410_v25 }
 0x2b4   :  { %9875 = vmatprep.subr.bf16.mxu0 %v15257_v43  ;;  %v1131_v43 = vld [vmem:[#allocation5 + $0x1e68] sm:$0xff] }
 0x2b5   :  { %10286 = vmatpush1.bf16.msra.mxu1 %v15002_v49  ;;  %v15051_v49 = vcombine.high %v1127_v48, %v1131_v43  ;;  %v15050_v63 = vcombine.low %v1127_v48, %v1131_v43  ;;  %v1422_v48 = vld [vmem:[#allocation5 + $0x2780] sm:$0xff] }
 0x2b6   :  { %10287 = vmatprep.subr.bf16.mxu1 %v15011_v56  ;;  %v1135_v56 = vld [vmem:[#allocation5 + $0x1e88] sm:$0xff]  ;;  %v1426_v43 = vld [vmem:[#allocation5 + $0x27a0] sm:$0xff] }
 0x2b7   :  { %9876 = vmatpush1.bf16.msra.mxu0 %v15256_v55  ;;  %v15305_v55 = vcombine.high %v1382_v44, %v1386_v45  ;;  %v15336_v45 = vcombine.low %v1414_v30, %v1418_v35 }
 0x2b8   :  { %9877 = vmatprep.subr.bf16.mxu0 %v15265_v57  ;;  %v1139_v57 = vld [vmem:[#allocation5 + $0x1ea8] sm:$0xff] }
 0x2b9   :  { %10288 = vmatpush1.bf16.msra.mxu1 %v15010_v12  ;;  %v15059_v12 = vcombine.high %v1135_v56, %v1139_v57  ;;  %v15058_v8 = vcombine.low %v1135_v56, %v1139_v57  ;;  %v1430_v56 = vld [vmem:[#allocation5 + $0x27c0] sm:$0xff] }
 0x2ba   :  { %10289 = vmatprep.subr.bf16.mxu1 %v15019_v2  ;;  %v1143_v2 = vld [vmem:[#allocation5 + $0x1ec8] sm:$0xff]  ;;  %v1434_v57 = vld [vmem:[#allocation5 + $0x27e0] sm:$0xff] }
 0x2bb   :  { %9878 = vmatpush1.bf16.msra.mxu0 %v15264_v1  ;;  %v15313_v1 = vcombine.high %v1390_v59, %v1394_v60  ;;  %v15344_v60 = vcombine.low %v1422_v48, %v1426_v43 }
 0x2bc   :  { %9879 = vmatprep.subr.bf16.mxu0 %v15273_v4  ;;  %v1147_v4 = vld [vmem:[#allocation5 + $0x1ee8] sm:$0xff] }
 0x2bd   :  { %10290 = vmatpush1.bf16.msra.mxu1 %v15018_v10  ;;  %v15067_v10 = vcombine.high %v1143_v2, %v1147_v4  ;;  %v15066_v50 = vcombine.low %v1143_v2, %v1147_v4  ;;  %v1438_v2 = vld [vmem:[#allocation5 + $0x2800] sm:$0xff] }
 0x2be   :  { %10291 = vmatprep.subr.bf16.mxu1 %v15027_v15  ;;  %v1151_v15 = vld [vmem:[#allocation5 + $0x1f08] sm:$0xff]  ;;  %v1442_v4 = vld [vmem:[#allocation5 + $0x2820] sm:$0xff] }
 0x2bf   :  { %9880 = vmatpush1.bf16.msra.mxu0 %v15272_v11  ;;  %v15321_v11 = vcombine.high %v1398_v5, %v1402_v6  ;;  %v15352_v6 = vcombine.low %v1430_v56, %v1434_v57 }
 0x2c0   :  { %9881 = vmatprep.subr.bf16.mxu0 %v15281_v18  ;;  %v1155_v18 = vld [vmem:[#allocation5 + $0x1f28] sm:$0xff] }
 0x2c1   :  { %10292 = vmatpush1.bf16.msra.mxu1 %v15026_v27  ;;  %v15075_v27 = vcombine.high %v1151_v15, %v1155_v18  ;;  %v15074_v36 = vcombine.low %v1151_v15, %v1155_v18  ;;  %v1446_v15 = vld [vmem:[#allocation5 + $0x2840] sm:$0xff] }
 0x2c2   :  { %10293 = vmatprep.subr.bf16.mxu1 %v15035_v20  ;;  %v1159_v20 = vld [vmem:[#allocation5 + $0x1f48] sm:$0xff]  ;;  %v1450_v18 = vld [vmem:[#allocation5 + $0x2860] sm:$0xff] }
 0x2c3   :  { %9882 = vmatpush1.bf16.msra.mxu0 %v15280_v29  ;;  %v15329_v29 = vcombine.high %v1406_v22, %v1410_v25  ;;  %v17273_v22 = vld [vmem:[#allocation2 + $0x50] sm:$0xff] }
 0x2c4   :  { %9883 = vmatprep.subr.bf16.mxu0 %v15289_v31  ;;  %v1163_v31 = vld [vmem:[#allocation5 + $0x1f68] sm:$0xff] }
 0x2c5   :  { %10294 = vmatpush1.bf16.msra.mxu1 %v15034_v38  ;;  %v15083_v38 = vcombine.high %v1159_v20, %v1163_v31  ;;  %v15082_v44 = vcombine.low %v1159_v20, %v1163_v31  ;;  %v1199_v20 = vld [vmem:[#allocation5 + $0x2088] sm:$0xff] }
 0x2c6   :  { %10295 = vmatprep.subr.bf16.mxu1 %v15043_v41  ;;  %v1167_v41 = vld [vmem:[#allocation5 + $0x1f88] sm:$0xff] }
 0x2c7   :  { %9884 = vmatpush1.bf16.msra.mxu0 %v15288_v39  ;;  %v15337_v39 = vcombine.high %v1414_v30, %v1418_v35  ;;  %v1203_v31 = vld [vmem:[#allocation5 + $0x20a8] sm:$0xff]  ;;  %v17281_v30 = vcombine.high %v17273_v22, %v17273_v22  ;;  %v1454_v35 = vld [vmem:[#allocation5 + $0x2880] sm:$0xff] }
 0x2c8   :  { %9885 = vmatprep.subr.bf16.mxu0 %v15297_v19  ;;  %v1171_v19 = vld [vmem:[#allocation5 + $0x1fa8] sm:$0xff] }
 0x2c9   :  { %10296 = vmatpush1.bf16.msra.mxu1 %v15042_v46  ;;  %v15091_v46 = vcombine.high %v1167_v41, %v1171_v19  ;;  %v15090_v59 = vcombine.low %v1167_v41, %v1171_v19  ;;  %v1207_v41 = vld [vmem:[#allocation5 + $0x20c8] sm:$0xff] }
 0x2ca   :  { %10297 = vmatprep.subr.bf16.mxu1 %v15051_v49  ;;  %v1175_v49 = vld [vmem:[#allocation5 + $0x1fc8] sm:$0xff] }
 0x2cb   :  { %9886 = vmatpush1.bf16.msra.mxu0 %v15296_v47  ;;  %v15345_v47 = vcombine.high %v1422_v48, %v1426_v43  ;;  %v1211_v19 = vld [vmem:[#allocation5 + $0x20e8] sm:$0xff]  ;;  %v1462_v48 = vld [vmem:[#allocation5 + $0x28c0] sm:$0xff] }
 0x2cc   :  { %9887 = vmatprep.subr.bf16.mxu0 %v15305_v55  ;;  %v1179_v55 = vld [vmem:[#allocation5 + $0x1fe8] sm:$0xff]  ;;  %v1466_v43 = vld [vmem:[#allocation5 + $0x28e0] sm:$0xff] }
 0x2cd   :  { %10298 = vmatpush1.bf16.msra.mxu1 %v15050_v63  ;;  %v15099_v63 = vcombine.high %v1175_v49, %v1179_v55  ;;  %v15098_v5 = vcombine.low %v1175_v49, %v1179_v55  ;;  %v1215_v49 = vld [vmem:[#allocation5 + $0x2108] sm:$0xff] }
 0x2ce   :  { %10299 = vmatprep.subr.bf16.mxu1 %v15059_v12  ;;  %v1183_v12 = vld [vmem:[#allocation5 + $0x2008] sm:$0xff] }
 0x2cf   :  { %9888 = vmatpush1.bf16.msra.mxu0 %v15304_v32  ;;  %v15353_v32 = vcombine.high %v1430_v56, %v1434_v57  ;;  %v1219_v55 = vld [vmem:[#allocation5 + $0x2128] sm:$0xff]  ;;  %v1470_v56 = vld [vmem:[#allocation5 + $0x2900] sm:$0xff] }
 0x2d0   :  { %9889 = vmatprep.subr.bf16.mxu0 %v15313_v1  ;;  %v1187_v1 = vld [vmem:[#allocation5 + $0x2028] sm:$0xff]  ;;  %v1474_v57 = vld [vmem:[#allocation5 + $0x2920] sm:$0xff] }
 0x2d1   :  { %10300 = vmatpush1.bf16.msra.mxu1 %v15058_v8  ;;  %v15107_v8 = vcombine.high %v1183_v12, %v1187_v1  ;;  %v15106_v25 = vcombine.low %v1183_v12, %v1187_v1  ;;  %v1223_v12 = vld [vmem:[#allocation5 + $0x2148] sm:$0xff] }
 0x2d2   :  { %10301 = vmatprep.subr.bf16.mxu1 %v15067_v10  ;;  %v1191_v10 = vld [vmem:[#allocation5 + $0x2048] sm:$0xff] }
 0x2d3   :  { %9890 = vmatpush1.bf16.msra.mxu0 %v15312_v9  ;;  %v15361_v9 = vcombine.high %v1438_v2, %v1442_v4  ;;  %v1227_v1 = vld [vmem:[#allocation5 + $0x2168] sm:$0xff] }
 0x2d4   :  { %9891 = vmatprep.subr.bf16.mxu0 %v15321_v11  ;;  %v1195_v11 = vld [vmem:[#allocation5 + $0x2068] sm:$0xff] }
 0x2d5   :  { %10302 = vmatpush1.bf16.msra.mxu1 %v15066_v50  ;;  %v17277_v50 = vcombine.low %v17259_v13, %v17259_v13  ;;  %v15114_v13 = vcombine.low %v1191_v10, %v1195_v11 }
 0x2d6   :  { %10303 = vmatprep.subr.bf16.mxu1 %v15075_v27  ;;  %v15115_v27 = vcombine.high %v1191_v10, %v1195_v11  ;;  %v1231_v10 = vld [vmem:[#allocation5 + $0x2188] sm:$0xff] }
 0x2d7   :  { %9892 = vmatpush1.bf16.msra.mxu0 %v15320_v26  ;;  %v15360_v26 = vcombine.low %v1438_v2, %v1442_v4  ;;  %v1478_v2 = vld [vmem:[#allocation5 + $0x2940] sm:$0xff]  ;;  %v1235_v11 = vld [vmem:[#allocation5 + $0x21a8] sm:$0xff] }
 0x2d8   :  { %9893 = vmatprep.subr.bf16.mxu0 %v15329_v29  ;;  %v15369_v29 = vcombine.high %v1446_v15, %v1450_v18  ;;  %v1482_v4 = vld [vmem:[#allocation5 + $0x2960] sm:$0xff] }
 0x2d9   :  { %10304 = vmatpush1.bf16.msra.mxu1 %v15074_v36  ;;  %v1458_v36 = vld [vmem:[#allocation5 + $0x28a0] sm:$0xff] }
 0x2da   :  { %10305 = vmatprep.subr.bf16.mxu1 %v15083_v38  ;;  %v15123_v38 = vcombine.high %v1199_v20, %v1203_v31 }
 0x2db   :  { %9894 = vmatpush1.bf16.msra.mxu0 %v15328_v37  ;;  %v15368_v37 = vcombine.low %v1446_v15, %v1450_v18  ;;  %v1486_v15 = vld [vmem:[#allocation5 + $0x2980] sm:$0xff] }
 0x2dc   :  { %9895 = vmatprep.subr.bf16.mxu0 %v15337_v39  ;;  %v15377_v39 = vcombine.high %v1454_v35, %v1458_v36  ;;  %v1490_v18 = vld [vmem:[#allocation5 + $0x29a0] sm:$0xff] }
 0x2dd   :  { %10306 = vmatpush1.bf16.msra.mxu1 %v15082_v44  ;;  %v15122_v44 = vcombine.low %v1199_v20, %v1203_v31  ;;  %v1239_v20 = vld [vmem:[#allocation5 + $0x21c8] sm:$0xff] }
 0x2de   :  { %10307 = vmatprep.subr.bf16.mxu1 %v15091_v46  ;;  %v15131_v46 = vcombine.high %v1207_v41, %v1211_v19  ;;  %v1243_v31 = vld [vmem:[#allocation5 + $0x21e8] sm:$0xff] }
 0x2df   :  { %9896 = vmatpush1.bf16.msra.mxu0 %v15336_v45  ;;  %v15376_v45 = vcombine.low %v1454_v35, %v1458_v36  ;;  %v1494_v35 = vld [vmem:[#allocation5 + $0x29c0] sm:$0xff] }
 0x2e0   :  { %9897 = vmatprep.subr.bf16.mxu0 %v15345_v47  ;;  %v15385_v47 = vcombine.high %v1462_v48, %v1466_v43  ;;  %v1498_v36 = vld [vmem:[#allocation5 + $0x29e0] sm:$0xff] }
 0x2e1   :  { %10308 = vmatpush1.bf16.msra.mxu1 %v15090_v59  ;;  %v15130_v59 = vcombine.low %v1207_v41, %v1211_v19  ;;  %v1247_v41 = vld [vmem:[#allocation5 + $0x2208] sm:$0xff] }
 0x2e2   :  { %10309 = vmatprep.subr.bf16.mxu1 %v15099_v63  ;;  %v15139_v63 = vcombine.high %v1215_v49, %v1219_v55  ;;  %v1251_v19 = vld [vmem:[#allocation5 + $0x2228] sm:$0xff] }
 0x2e3   :  { %9898 = vmatpush1.bf16.msra.mxu0 %v15344_v60  ;;  %v15384_v60 = vcombine.low %v1462_v48, %v1466_v43  ;;  %v1502_v48 = vld [vmem:[#allocation5 + $0x2a00] sm:$0xff] }
 0x2e4   :  { %9899 = vmatprep.subr.bf16.mxu0 %v15353_v32  ;;  %v15393_v32 = vcombine.high %v1470_v56, %v1474_v57  ;;  %v1506_v43 = vld [vmem:[#allocation5 + $0x2a20] sm:$0xff] }
 0x2e5   :  { %10310 = vmatpush1.bf16.msra.mxu1 %v15098_v5  ;;  %v15138_v5 = vcombine.low %v1215_v49, %v1219_v55  ;;  %v1255_v49 = vld [vmem:[#allocation5 + $0x2248] sm:$0xff] }
 0x2e6   :  { %10320 = vmatprep.subr.bf16.mxu1 %v15107_v8  ;;  %v15147_v8 = vcombine.high %v1223_v12, %v1227_v1  ;;  %v1259_v55 = vld [vmem:[#allocation5 + $0x2268] sm:$0xff] }
 0x2e7   :  { %9900 = vmatpush1.bf16.msra.mxu0 %v15352_v6  ;;  %v15392_v6 = vcombine.low %v1470_v56, %v1474_v57  ;;  %v1510_v56 = vld [vmem:[#allocation5 + $0x2a40] sm:$0xff] }
 0x2e8   :  { %9910 = vmatprep.subr.bf16.mxu0 %v15361_v9  ;;  %10312 = vmatmul.mubr.bf16.vlgmr.msra.gmra.mrb[4].mxu1 %v17249_v24  ;;  %v15401_v9 = vcombine.high %v1478_v2, %v1482_v4  ;;  %v1514_v57 = vld [vmem:[#allocation5 + $0x2a60] sm:$0xff] }
 0x2e9   :  { %10321 = vmatpush1.bf16.msra.mxu1 %v15106_v25  ;;  %10352 = vmatprep.mubr.bf16.mxu1 %v17253_v54  ;;  %v15146_v25 = vcombine.low %v1223_v12, %v1227_v1  ;;  %v1263_v12 = vld [vmem:[#allocation5 + $0x2288] sm:$0xff] }
 0x2ea   :  { %9902 = vmatmul.mubr.bf16.vlgmr.msra.gmra.mrb[0].mxu0 %v17277_v50  ;;  %10322 = vmatprep.subr.bf16.mxu1 %v15115_v27  ;;  %v15155_v27 = vcombine.high %v1231_v10, %v1235_v11  ;;  %v1267_v1 = vld [vmem:[#allocation5 + $0x22a8] sm:$0xff] }
 0x2eb   :  { %9911 = vmatpush1.bf16.msra.mxu0 %v15360_v26  ;;  %9942 = vmatprep.mubr.bf16.mxu0 %v17281_v30  ;;  %v15400_v26 = vcombine.low %v1478_v2, %v1482_v4  ;;  %v1518_v2 = vld [vmem:[#allocation5 + $0x2a80] sm:$0xff] }
 0x2ec   :  { %9912 = vmatprep.subr.bf16.mxu0 %v15369_v29  ;;  %v15409_v29 = vcombine.high %v1486_v15, %v1490_v18  ;;  %v1522_v4 = vld [vmem:[#allocation5 + $0x2aa0] sm:$0xff] }
 0x2ed   :  { %10323 = vmatpush1.bf16.msra.mxu1 %v15114_v13  ;;  %v15154_v13 = vcombine.low %v1231_v10, %v1235_v11  ;;  %v1271_v10 = vld [vmem:[#allocation5 + $0x22c8] sm:$0xff] }
 0x2ee   :  { %10324 = vmatprep.subr.bf16.mxu1 %v15123_v38  ;;  %v15163_v38 = vcombine.high %v1239_v20, %v1243_v31  ;;  %v1275_v11 = vld [vmem:[#allocation5 + $0x22e8] sm:$0xff] }
 0x2ef   :  { %9913 = vmatpush1.bf16.msra.mxu0 %v15368_v37  ;;  %v15408_v37 = vcombine.low %v1486_v15, %v1490_v18  ;;  %v1526_v15 = vld [vmem:[#allocation5 + $0x2ac0] sm:$0xff] }
 0x2f0   :  { %9914 = vmatprep.subr.bf16.mxu0 %v15377_v39  ;;  %v15417_v39 = vcombine.high %v1494_v35, %v1498_v36  ;;  %v1530_v18 = vld [vmem:[#allocation5 + $0x2ae0] sm:$0xff] }
 0x2f1   :  { %10325 = vmatpush1.bf16.msra.mxu1 %v15122_v44  ;;  %v15162_v44 = vcombine.low %v1239_v20, %v1243_v31  ;;  %v1279_v20 = vld [vmem:[#allocation5 + $0x2308] sm:$0xff] }
 0x2f2   :  { %10326 = vmatprep.subr.bf16.mxu1 %v15131_v46  ;;  %v15171_v46 = vcombine.high %v1247_v41, %v1251_v19  ;;  %v1283_v31 = vld [vmem:[#allocation5 + $0x2328] sm:$0xff] }
 0x2f3   :  { %9915 = vmatpush1.bf16.msra.mxu0 %v15376_v45  ;;  %v15416_v45 = vcombine.low %v1494_v35, %v1498_v36  ;;  %v1534_v35 = vld [vmem:[#allocation5 + $0x2b00] sm:$0xff] }
 0x2f4   :  { %9916 = vmatprep.subr.bf16.mxu0 %v15385_v47  ;;  %v15425_v47 = vcombine.high %v1502_v48, %v1506_v43  ;;  %v1538_v36 = vld [vmem:[#allocation5 + $0x2b20] sm:$0xff] }
 0x2f5   :  { %10327 = vmatpush1.bf16.msra.mxu1 %v15130_v59  ;;  %v15170_v59 = vcombine.low %v1247_v41, %v1251_v19  ;;  %v1287_v41 = vld [vmem:[#allocation5 + $0x2348] sm:$0xff] }
 0x2f6   :  { %10328 = vmatprep.subr.bf16.mxu1 %v15139_v63  ;;  %v15179_v63 = vcombine.high %v1255_v49, %v1259_v55  ;;  %v1291_v19 = vld [vmem:[#allocation5 + $0x2368] sm:$0xff] }
 0x2f7   :  { %9917 = vmatpush1.bf16.msra.mxu0 %v15384_v60  ;;  %v15424_v60 = vcombine.low %v1502_v48, %v1506_v43  ;;  %v1542_v48 = vld [vmem:[#allocation5 + $0x2b40] sm:$0xff] }
 0x2f8   :  { %9918 = vmatprep.subr.bf16.mxu0 %v15393_v32  ;;  %v15433_v32 = vcombine.high %v1510_v56, %v1514_v57  ;;  %v1546_v43 = vld [vmem:[#allocation5 + $0x2b60] sm:$0xff] }
 0x2f9   :  { %10329 = vmatpush1.bf16.msra.mxu1 %v15138_v5  ;;  %v15178_v5 = vcombine.low %v1255_v49, %v1259_v55  ;;  %v1295_v49 = vld [vmem:[#allocation5 + $0x2388] sm:$0xff] }
 0x2fa   :  { %10330 = vmatprep.subr.bf16.mxu1 %v15147_v8  ;;  %v15187_v8 = vcombine.high %v1263_v12, %v1267_v1  ;;  %v1299_v55 = vld [vmem:[#allocation5 + $0x23a8] sm:$0xff] }
 0x2fb   :  { %9919 = vmatpush1.bf16.msra.mxu0 %v15392_v6  ;;  %v15432_v6 = vcombine.low %v1510_v56, %v1514_v57  ;;  %v1550_v56 = vld [vmem:[#allocation5 + $0x2b80] sm:$0xff] }
 0x2fc   :  { %9920 = vmatprep.subr.bf16.mxu0 %v15401_v9  ;;  %v15441_v9 = vcombine.high %v1518_v2, %v1522_v4  ;;  %v1554_v57 = vld [vmem:[#allocation5 + $0x2ba0] sm:$0xff] }
 0x2fd   :  { %10331 = vmatpush1.bf16.msra.mxu1 %v15146_v25  ;;  %v15186_v25 = vcombine.low %v1263_v12, %v1267_v1  ;;  %v1303_v12 = vld [vmem:[#allocation5 + $0x23c8] sm:$0xff] }
 0x2fe   :  { %10332 = vmatprep.subr.bf16.mxu1 %v15155_v27  ;;  %v15195_v27 = vcombine.high %v1271_v10, %v1275_v11  ;;  %v1307_v1 = vld [vmem:[#allocation5 + $0x23e8] sm:$0xff] }
 0x2ff   :  { %9921 = vmatpush1.bf16.msra.mxu0 %v15400_v26  ;;  %v15440_v26 = vcombine.low %v1518_v2, %v1522_v4  ;;  %v1558_v2 = vld [vmem:[#allocation5 + $0x2bc0] sm:$0xff] }
 0x300   :  { %9922 = vmatprep.subr.bf16.mxu0 %v15409_v29  ;;  %v15449_v29 = vcombine.high %v1526_v15, %v1530_v18  ;;  %v1562_v4 = vld [vmem:[#allocation5 + $0x2be0] sm:$0xff] }
 0x301   :  { %10333 = vmatpush1.bf16.msra.mxu1 %v15154_v13  ;;  %v15194_v13 = vcombine.low %v1271_v10, %v1275_v11  ;;  %v1311_v10 = vld [vmem:[#allocation5 + $0x2408] sm:$0xff] }
 0x302   :  { %10334 = vmatprep.subr.bf16.mxu1 %v15163_v38  ;;  %v15203_v38 = vcombine.high %v1279_v20, %v1283_v31  ;;  %v1315_v11 = vld [vmem:[#allocation5 + $0x2428] sm:$0xff] }
 0x303   :  { %9923 = vmatpush1.bf16.msra.mxu0 %v15408_v37  ;;  %v15448_v37 = vcombine.low %v1526_v15, %v1530_v18  ;;  %v1566_v15 = vld [vmem:[#allocation5 + $0x2c00] sm:$0xff] }
 0x304   :  { %9924 = vmatprep.subr.bf16.mxu0 %v15417_v39  ;;  %v15457_v39 = vcombine.high %v1534_v35, %v1538_v36  ;;  %v1570_v18 = vld [vmem:[#allocation5 + $0x2c20] sm:$0xff] }
 0x305   :  { %10335 = vmatpush1.bf16.msra.mxu1 %v15162_v44  ;;  %v15202_v44 = vcombine.low %v1279_v20, %v1283_v31  ;;  %v1319_v20 = vld [vmem:[#allocation5 + $0x2448] sm:$0xff] }
 0x306   :  { %10336 = vmatprep.subr.bf16.mxu1 %v15171_v46  ;;  %v15211_v46 = vcombine.high %v1287_v41, %v1291_v19  ;;  %v1323_v31 = vld [vmem:[#allocation5 + $0x2468] sm:$0xff] }
 0x307   :  { %9925 = vmatpush1.bf16.msra.mxu0 %v15416_v45  ;;  %v15456_v45 = vcombine.low %v1534_v35, %v1538_v36  ;;  %v1574_v35 = vld [vmem:[#allocation5 + $0x2c40] sm:$0xff] }
 0x308   :  { %9926 = vmatprep.subr.bf16.mxu0 %v15425_v47  ;;  %v15465_v47 = vcombine.high %v1542_v48, %v1546_v43  ;;  %v1578_v36 = vld [vmem:[#allocation5 + $0x2c60] sm:$0xff] }
 0x309   :  { %10337 = vmatpush1.bf16.msra.mxu1 %v15170_v59  ;;  %v15210_v59 = vcombine.low %v1287_v41, %v1291_v19  ;;  %v15243_v41 = vcombine.high %v1319_v20, %v1323_v31  ;;  %v15497_v19 = vcombine.high %v1574_v35, %v1578_v36 }
 0x30a   :  { %10338 = vmatprep.subr.bf16.mxu1 %v15179_v63  ;;  %v15219_v63 = vcombine.high %v1295_v49, %v1299_v55 }
 0x30b   :  { %9927 = vmatpush1.bf16.msra.mxu0 %v15424_v60  ;;  %v15464_v60 = vcombine.low %v1542_v48, %v1546_v43  ;;  %v1327_v48 = vld [vmem:[#allocation5 + $0x2488] sm:$0xff] }
 0x30c   :  { %9928 = vmatprep.subr.bf16.mxu0 %v15433_v32  ;;  %v15473_v32 = vcombine.high %v1550_v56, %v1554_v57  ;;  %v1331_v43 = vld [vmem:[#allocation5 + $0x24a8] sm:$0xff] }
 0x30d   :  { %10339 = vmatpush1.bf16.msra.mxu1 %v15178_v5  ;;  %v15218_v5 = vcombine.low %v1295_v49, %v1299_v55  ;;  %v15251_v49 = vcombine.high %v1327_v48, %v1331_v43 }
 0x30e   :  { %10340 = vmatprep.subr.bf16.mxu1 %v15187_v8  ;;  %v15227_v8 = vcombine.high %v1303_v12, %v1307_v1 }
 0x30f   :  { %9929 = vmatpush1.bf16.msra.mxu0 %v15432_v6  ;;  %v15472_v6 = vcombine.low %v1550_v56, %v1554_v57  ;;  %v1335_v56 = vld [vmem:[#allocation5 + $0x24c8] sm:$0xff] }
 0x310   :  { %9930 = vmatprep.subr.bf16.mxu0 %v15441_v9  ;;  %v15481_v9 = vcombine.high %v1558_v2, %v1562_v4  ;;  %v1339_v57 = vld [vmem:[#allocation5 + $0x24e8] sm:$0xff] }
 0x311   :  { %10341 = vmatpush1.bf16.msra.mxu1 %v15186_v25  ;;  %v15226_v25 = vcombine.low %v1303_v12, %v1307_v1  ;;  %v15259_v12 = vcombine.high %v1335_v56, %v1339_v57 }
 0x312   :  { %10342 = vmatprep.subr.bf16.mxu1 %v15195_v27  ;;  %v15235_v27 = vcombine.high %v1311_v10, %v1315_v11 }
 0x313   :  { %9931 = vmatpush1.bf16.msra.mxu0 %v15440_v26  ;;  %v15480_v26 = vcombine.low %v1558_v2, %v1562_v4  ;;  %v1343_v2 = vld [vmem:[#allocation5 + $0x2508] sm:$0xff] }
 0x314   :  { %9932 = vmatprep.subr.bf16.mxu0 %v15449_v29  ;;  %v15489_v29 = vcombine.high %v1566_v15, %v1570_v18  ;;  %v1347_v4 = vld [vmem:[#allocation5 + $0x2528] sm:$0xff] }
 0x315   :  { %10343 = vmatpush1.bf16.msra.mxu1 %v15194_v13  ;;  %v17287_v13 = vld [vmem:[#allocation2 + $0x58] sm:$0xff] }
 0x316   :  { %10344 = vmatprep.subr.bf16.mxu1 %v15203_v38  ;;  %v17291_v38 = vcombine.low %v17273_v22, %v17273_v22  ;;  %v15242_v22 = vcombine.low %v1319_v20, %v1323_v31 }
 0x317   :  { %9933 = vmatpush1.bf16.msra.mxu0 %v15448_v37  ;;  %v15234_v37 = vcombine.low %v1311_v10, %v1315_v11  ;;  %v15267_v10 = vcombine.high %v1343_v2, %v1347_v4 }
 0x318   :  { %9934 = vmatprep.subr.bf16.mxu0 %v15457_v39  ;;  %v15488_v39 = vcombine.low %v1566_v15, %v1570_v18  ;;  %v1351_v15 = vld [vmem:[#allocation5 + $0x2548] sm:$0xff] }
 0x319   :  { %10345 = vmatpush1.bf16.msra.mxu1 %v15202_v44  ;;  %v17295_v44 = vcombine.high %v17287_v13, %v17287_v13  ;;  %v1355_v18 = vld [vmem:[#allocation5 + $0x2568] sm:$0xff] }
 0x31a   :  { %10346 = vmatprep.subr.bf16.mxu1 %v15211_v46  ;;  %v1586_v46 = vld [vmem:[#allocation5 + $0x2ca0] sm:$0xff]  ;;  %v15275_v20 = vcombine.high %v1351_v15, %v1355_v18 }
 0x31b   :  { %9935 = vmatpush1.bf16.msra.mxu0 %v15456_v45  ;;  %v1582_v45 = vld [vmem:[#allocation5 + $0x2c80] sm:$0xff] }
 0x31c   :  { %9936 = vmatprep.subr.bf16.mxu0 %v15465_v47  ;;  %v15496_v47 = vcombine.low %v1574_v35, %v1578_v36  ;;  %v15505_v55 = vcombine.high %v1582_v45, %v1586_v46  ;;  %v1359_v35 = vld [vmem:[#allocation5 + $0x2588] sm:$0xff] }
 0x31d   :  { %10347 = vmatpush1.bf16.msra.mxu1 %v15210_v59  ;;  %v1590_v59 = vld [vmem:[#allocation5 + $0x2cc0] sm:$0xff]  ;;  %v1363_v36 = vld [vmem:[#allocation5 + $0x25a8] sm:$0xff] }
 0x31e   :  { %10348 = vmatprep.subr.bf16.mxu1 %v15219_v63  ;;  %v15250_v63 = vcombine.low %v1327_v48, %v1331_v43  ;;  %v15283_v48 = vcombine.high %v1359_v35, %v1363_v36 }
 0x31f   :  { %9937 = vmatpush1.bf16.msra.mxu0 %v15464_v60  ;;  %v1594_v60 = vld [vmem:[#allocation5 + $0x2ce0] sm:$0xff] }
 0x320   :  { %9938 = vmatprep.subr.bf16.mxu0 %v15473_v32  ;;  %v15504_v32 = vcombine.low %v1582_v45, %v1586_v46  ;;  %v15513_v1 = vcombine.high %v1590_v59, %v1594_v60  ;;  %v1367_v45 = vld [vmem:[#allocation5 + $0x25c8] sm:$0xff] }
 0x321   :  { %10349 = vmatpush1.bf16.msra.mxu1 %v15218_v5  ;;  %v1598_v5 = vld [vmem:[#allocation5 + $0x2d00] sm:$0xff]  ;;  %v1371_v46 = vld [vmem:[#allocation5 + $0x25e8] sm:$0xff] }
 0x322   :  { %10350 = vmatprep.subr.bf16.mxu1 %v15227_v8  ;;  %v15258_v8 = vcombine.low %v1335_v56, %v1339_v57  ;;  %v15291_v56 = vcombine.high %v1367_v45, %v1371_v46 }
 0x323   :  { %9939 = vmatpush1.bf16.msra.mxu0 %v15472_v6  ;;  %v1602_v6 = vld [vmem:[#allocation5 + $0x2d20] sm:$0xff] }
 0x324   :  { %9940 = vmatprep.subr.bf16.mxu0 %v15481_v9  ;;  %v15512_v9 = vcombine.low %v1590_v59, %v1594_v60  ;;  %v15521_v11 = vcombine.high %v1598_v5, %v1602_v6  ;;  %v1375_v59 = vld [vmem:[#allocation5 + $0x2608] sm:$0xff] }
 0x325   :  { %10351 = vmatpush1.bf16.msra.mxu1 %v15226_v25  ;;  %v1606_v25 = vld [vmem:[#allocation5 + $0x2d40] sm:$0xff]  ;;  %v1379_v60 = vld [vmem:[#allocation5 + $0x2628] sm:$0xff] }
 0x326   :  { %10361 = vmatprep.subr.bf16.mxu1 %v15235_v27  ;;  %v15266_v27 = vcombine.low %v1343_v2, %v1347_v4  ;;  %v15299_v2 = vcombine.high %v1375_v59, %v1379_v60 }
 0x327   :  { %9941 = vmatpush1.bf16.msra.mxu0 %v15480_v26  ;;  %v1610_v26 = vld [vmem:[#allocation5 + $0x2d60] sm:$0xff] }
 0x328   :  { %9951 = vmatprep.subr.bf16.mxu0 %v15489_v29  ;;  %10353 = vmatmul.mubr.bf16.vlgmr.msra.gmra.mrb[4].mxu1 %v17263_v17  ;;  %v15520_v29 = vcombine.low %v1598_v5, %v1602_v6  ;;  %v15529_v31 = vcombine.high %v1606_v25, %v1610_v26  ;;  %v1383_v5 = vld [vmem:[#allocation5 + $0x2648] sm:$0xff] }
 0x329   :  { %10362 = vmatpush1.bf16.msra.mxu1 %v15234_v37  ;;  %10393 = vmatprep.mubr.bf16.mxu1 %v17267_v53  ;;  %v1614_v37 = vld [vmem:[#allocation5 + $0x2d80] sm:$0xff]  ;;  %v1387_v6 = vld [vmem:[#allocation5 + $0x2668] sm:$0xff] }
 0x32a   :  { %9943 = vmatmul.mubr.bf16.vlgmr.msra.gmra.mrb[0].mxu0 %v17291_v38  ;;  %10363 = vmatprep.subr.bf16.mxu1 %v15243_v41  ;;  %v15274_v41 = vcombine.low %v1351_v15, %v1355_v18  ;;  %v15307_v15 = vcombine.high %v1383_v5, %v1387_v6 }
 0x32b   :  { %9952 = vmatpush1.bf16.msra.mxu0 %v15488_v39  ;;  %9983 = vmatprep.mubr.bf16.mxu0 %v17295_v44  ;;  %v1618_v39 = vld [vmem:[#allocation5 + $0x2da0] sm:$0xff] }
 0x32c   :  { %9953 = vmatprep.subr.bf16.mxu0 %v15497_v19  ;;  %v15528_v19 = vcombine.low %v1606_v25, %v1610_v26  ;;  %v15537_v43 = vcombine.high %v1614_v37, %v1618_v39  ;;  %v1391_v25 = vld [vmem:[#allocation5 + $0x2688] sm:$0xff] }
 0x32d   :  { %10364 = vmatpush1.bf16.msra.mxu1 %v15242_v22  ;;  %v1622_v22 = vld [vmem:[#allocation5 + $0x2dc0] sm:$0xff]  ;;  %v1395_v26 = vld [vmem:[#allocation5 + $0x26a8] sm:$0xff] }
 0x32e   :  { %10365 = vmatprep.subr.bf16.mxu1 %v15251_v49  ;;  %v15282_v49 = vcombine.low %v1359_v35, %v1363_v36  ;;  %v15315_v35 = vcombine.high %v1391_v25, %v1395_v26 }
 0x32f   :  { %9954 = vmatpush1.bf16.msra.mxu0 %v15496_v47  ;;  %v1626_v47 = vld [vmem:[#allocation5 + $0x2de0] sm:$0xff] }
 0x330   :  { %9955 = vmatprep.subr.bf16.mxu0 %v15505_v55  ;;  %v15536_v55 = vcombine.low %v1614_v37, %v1618_v39  ;;  %v15545_v57 = vcombine.high %v1622_v22, %v1626_v47  ;;  %v1399_v37 = vld [vmem:[#allocation5 + $0x26c8] sm:$0xff] }
 0x331   :  { %10366 = vmatpush1.bf16.msra.mxu1 %v15250_v63  ;;  %v1630_v63 = vld [vmem:[#allocation5 + $0x2e00] sm:$0xff]  ;;  %v1403_v39 = vld [vmem:[#allocation5 + $0x26e8] sm:$0xff] }
 0x332   :  { %10367 = vmatprep.subr.bf16.mxu1 %v15259_v12  ;;  %v15290_v12 = vcombine.low %v1367_v45, %v1371_v46  ;;  %v15323_v45 = vcombine.high %v1399_v37, %v1403_v39 }
 0x333   :  { %9956 = vmatpush1.bf16.msra.mxu0 %v15504_v32  ;;  %v1634_v32 = vld [vmem:[#allocation5 + $0x2e20] sm:$0xff] }
 0x334   :  { %9957 = vmatprep.subr.bf16.mxu0 %v15513_v1  ;;  %v15544_v1 = vcombine.low %v1622_v22, %v1626_v47  ;;  %v15553_v4 = vcombine.high %v1630_v63, %v1634_v32  ;;  %v1407_v22 = vld [vmem:[#allocation5 + $0x2708] sm:$0xff] }
 0x335   :  { %10368 = vmatpush1.bf16.msra.mxu1 %v15258_v8  ;;  %v1638_v8 = vld [vmem:[#allocation5 + $0x2e40] sm:$0xff]  ;;  %v1411_v47 = vld [vmem:[#allocation5 + $0x2728] sm:$0xff] }
 0x336   :  { %10369 = vmatprep.subr.bf16.mxu1 %v15267_v10  ;;  %v15298_v10 = vcombine.low %v1375_v59, %v1379_v60  ;;  %v15331_v59 = vcombine.high %v1407_v22, %v1411_v47 }
 0x337   :  { %9958 = vmatpush1.bf16.msra.mxu0 %v15512_v9  ;;  %v1642_v9 = vld [vmem:[#allocation5 + $0x2e60] sm:$0xff] }
 0x338   :  { %9959 = vmatprep.subr.bf16.mxu0 %v15521_v11  ;;  %v15552_v11 = vcombine.low %v1630_v63, %v1634_v32  ;;  %v15561_v18 = vcombine.high %v1638_v8, %v1642_v9  ;;  %v1415_v63 = vld [vmem:[#allocation5 + $0x2748] sm:$0xff] }
 0x339   :  { %10370 = vmatpush1.bf16.msra.mxu1 %v15266_v27  ;;  %v1646_v27 = vld [vmem:[#allocation5 + $0x2e80] sm:$0xff]  ;;  %v1419_v32 = vld [vmem:[#allocation5 + $0x2768] sm:$0xff] }
 0x33a   :  { %10371 = vmatprep.subr.bf16.mxu1 %v15275_v20  ;;  %v15306_v20 = vcombine.low %v1383_v5, %v1387_v6  ;;  %v15339_v5 = vcombine.high %v1415_v63, %v1419_v32 }
 0x33b   :  { %9960 = vmatpush1.bf16.msra.mxu0 %v15520_v29  ;;  %v1650_v29 = vld [vmem:[#allocation5 + $0x2ea0] sm:$0xff] }
 0x33c   :  { %9961 = vmatprep.subr.bf16.mxu0 %v15529_v31  ;;  %v15560_v31 = vcombine.low %v1638_v8, %v1642_v9  ;;  %v15569_v36 = vcombine.high %v1646_v27, %v1650_v29  ;;  %v1423_v8 = vld [vmem:[#allocation5 + $0x2788] sm:$0xff] }
 0x33d   :  { %10372 = vmatpush1.bf16.msra.mxu1 %v15274_v41  ;;  %v1654_v41 = vld [vmem:[#allocation5 + $0x2ec0] sm:$0xff]  ;;  %v1427_v9 = vld [vmem:[#allocation5 + $0x27a8] sm:$0xff] }
 0x33e   :  { %10373 = vmatprep.subr.bf16.mxu1 %v15283_v48  ;;  %v15314_v48 = vcombine.low %v1391_v25, %v1395_v26  ;;  %v15347_v25 = vcombine.high %v1423_v8, %v1427_v9 }
 0x33f   :  { %9962 = vmatpush1.bf16.msra.mxu0 %v15528_v19  ;;  %v1658_v19 = vld [vmem:[#allocation5 + $0x2ee0] sm:$0xff] }
 0x340   :  { %9963 = vmatprep.subr.bf16.mxu0 %v15537_v43  ;;  %v15568_v43 = vcombine.low %v1646_v27, %v1650_v29  ;;  %v15577_v46 = vcombine.high %v1654_v41, %v1658_v19  ;;  %v1431_v27 = vld [vmem:[#allocation5 + $0x27c8] sm:$0xff] }
 0x341   :  { %10374 = vmatpush1.bf16.msra.mxu1 %v15282_v49  ;;  %v1662_v49 = vld [vmem:[#allocation5 + $0x2f00] sm:$0xff]  ;;  %v1435_v29 = vld [vmem:[#allocation5 + $0x27e8] sm:$0xff] }
 0x342   :  { %10375 = vmatprep.subr.bf16.mxu1 %v15291_v56  ;;  %v15322_v56 = vcombine.low %v1399_v37, %v1403_v39  ;;  %v15355_v37 = vcombine.high %v1431_v27, %v1435_v29 }
 0x343   :  { %9964 = vmatpush1.bf16.msra.mxu0 %v15536_v55  ;;  %v1666_v55 = vld [vmem:[#allocation5 + $0x2f20] sm:$0xff] }
 0x344   :  { %9965 = vmatprep.subr.bf16.mxu0 %v15545_v57  ;;  %v15576_v57 = vcombine.low %v1654_v41, %v1658_v19  ;;  %v15585_v60 = vcombine.high %v1662_v49, %v1666_v55  ;;  %v1439_v41 = vld [vmem:[#allocation5 + $0x2808] sm:$0xff] }
 0x345   :  { %10376 = vmatpush1.bf16.msra.mxu1 %v15290_v12  ;;  %v1670_v12 = vld [vmem:[#allocation5 + $0x2f40] sm:$0xff]  ;;  %v1443_v19 = vld [vmem:[#allocation5 + $0x2828] sm:$0xff] }
 0x346   :  { %10377 = vmatprep.subr.bf16.mxu1 %v15299_v2  ;;  %v15330_v2 = vcombine.low %v1407_v22, %v1411_v47  ;;  %v15363_v22 = vcombine.high %v1439_v41, %v1443_v19 }
 0x347   :  { %9966 = vmatpush1.bf16.msra.mxu0 %v15544_v1  ;;  %v1674_v1 = vld [vmem:[#allocation5 + $0x2f60] sm:$0xff] }
 0x348   :  { %9967 = vmatprep.subr.bf16.mxu0 %v15553_v4  ;;  %v15584_v4 = vcombine.low %v1662_v49, %v1666_v55  ;;  %v15593_v6 = vcombine.high %v1670_v12, %v1674_v1  ;;  %v1447_v49 = vld [vmem:[#allocation5 + $0x2848] sm:$0xff] }
 0x349   :  { %10378 = vmatpush1.bf16.msra.mxu1 %v15298_v10  ;;  %v1678_v10 = vld [vmem:[#allocation5 + $0x2f80] sm:$0xff]  ;;  %v1451_v55 = vld [vmem:[#allocation5 + $0x2868] sm:$0xff] }
 0x34a   :  { %10379 = vmatprep.subr.bf16.mxu1 %v15307_v15  ;;  %v15338_v15 = vcombine.low %v1415_v63, %v1419_v32  ;;  %v15371_v32 = vcombine.high %v1447_v49, %v1451_v55 }
 0x34b   :  { %9968 = vmatpush1.bf16.msra.mxu0 %v15552_v11  ;;  %v1682_v11 = vld [vmem:[#allocation5 + $0x2fa0] sm:$0xff] }
 0x34c   :  { %9969 = vmatprep.subr.bf16.mxu0 %v15561_v18  ;;  %v15592_v18 = vcombine.low %v1670_v12, %v1674_v1  ;;  %v15601_v26 = vcombine.high %v1678_v10, %v1682_v11  ;;  %v1455_v1 = vld [vmem:[#allocation5 + $0x2888] sm:$0xff] }
 0x34d   :  { %10380 = vmatpush1.bf16.msra.mxu1 %v15306_v20  ;;  %v1686_v20 = vld [vmem:[#allocation5 + $0x2fc0] sm:$0xff] }
 0x34e   :  { %10381 = vmatprep.subr.bf16.mxu1 %v15315_v35  ;;  %v15346_v35 = vcombine.low %v1423_v8, %v1427_v9 }
 0x34f   :  { %9970 = vmatpush1.bf16.msra.mxu0 %v15560_v31  ;;  %v1690_v31 = vld [vmem:[#allocation5 + $0x2fe0] sm:$0xff] }
 0x350   :  { %9971 = vmatprep.subr.bf16.mxu0 %v15569_v36  ;;  %v15600_v36 = vcombine.low %v1678_v10, %v1682_v11  ;;  %v15609_v39 = vcombine.high %v1686_v20, %v1690_v31  ;;  %v1463_v10 = vld [vmem:[#allocation5 + $0x28c8] sm:$0xff] }
 0x351   :  { %10382 = vmatpush1.bf16.msra.mxu1 %v15314_v48  ;;  %v160_v48 = vld [vmem:[#allocation5 + $0x10] sm:$0xff]  ;;  %v1467_v11 = vld [vmem:[#allocation5 + $0x28e8] sm:$0xff] }
 0x352   :  { %10383 = vmatprep.subr.bf16.mxu1 %v15323_v45  ;;  %v15354_v45 = vcombine.low %v1431_v27, %v1435_v29  ;;  %v15387_v27 = vcombine.high %v1463_v10, %v1467_v11 }
 0x353   :  { %9972 = vmatpush1.bf16.msra.mxu0 %v15568_v43  ;;  %v164_v43 = vld [vmem:[#allocation5 + $0x30] sm:$0xff] }
 0x354   :  { %9973 = vmatprep.subr.bf16.mxu0 %v15577_v46  ;;  %v15608_v46 = vcombine.low %v1686_v20, %v1690_v31  ;;  %v14085_v47 = vcombine.high %v160_v48, %v164_v43  ;;  %v14084_v63 = vcombine.low %v160_v48, %v164_v43  ;;  %v1471_v20 = vld [vmem:[#allocation5 + $0x2908] sm:$0xff] }
 0x355   :  { %10384 = vmatpush1.bf16.msra.mxu1 %v15322_v56  ;;  %v168_v56 = vld [vmem:[#allocation5 + $0x50] sm:$0xff]  ;;  %v1475_v31 = vld [vmem:[#allocation5 + $0x2928] sm:$0xff] }
 0x356   :  { %10385 = vmatprep.subr.bf16.mxu1 %v15331_v59  ;;  %v17303_v59 = vcombine.low %v17287_v13, %v17287_v13  ;;  %v1479_v48 = vld [vmem:[#allocation5 + $0x2948] sm:$0xff] }
 0x357   :  { %9974 = vmatpush1.bf16.msra.mxu0 %v15576_v57  ;;  %v172_v57 = vld [vmem:[#allocation5 + $0x70] sm:$0xff]  ;;  %v1483_v43 = vld [vmem:[#allocation5 + $0x2968] sm:$0xff] }
 0x358   :  { %9975 = vmatprep.subr.bf16.mxu0 %v15585_v60  ;;  %v15362_v60 = vcombine.low %v1439_v41, %v1443_v19  ;;  %v14093_v12 = vcombine.high %v168_v56, %v172_v57  ;;  %v14092_v13 = vcombine.low %v168_v56, %v172_v57  ;;  %v15395_v41 = vcombine.high %v1471_v20, %v1475_v31  ;;  %v1487_v56 = vld [vmem:[#allocation5 + $0x2988] sm:$0xff] }
 0x359   :  { %10386 = vmatpush1.bf16.msra.mxu1 %v15330_v2  ;;  %v1459_v2 = vld [vmem:[#allocation5 + $0x28a8] sm:$0xff] }
 0x35a   :  { %10387 = vmatprep.subr.bf16.mxu1 %v15339_v5  ;;  %v180_v5 = vld [vmem:[#allocation5 + $0xb0] sm:$0xff]  ;;  %v15379_v8 = vcombine.high %v1455_v1, %v1459_v2  ;;  %v1491_v57 = vld [vmem:[#allocation5 + $0x29a8] sm:$0xff] }
 0x35b   :  { %9976 = vmatpush1.bf16.msra.mxu0 %v15584_v4  ;;  %v176_v4 = vld [vmem:[#allocation5 + $0x90] sm:$0xff] }
 0x35c   :  { %9977 = vmatprep.subr.bf16.mxu0 %v15593_v6  ;;  %v15370_v6 = vcombine.low %v1447_v49, %v1451_v55  ;;  %v14101_v9 = vcombine.high %v176_v4, %v180_v5  ;;  %v15403_v49 = vcombine.high %v1479_v48, %v1483_v43 }
 0x35d   :  { %10388 = vmatpush1.bf16.msra.mxu1 %v15338_v15  ;;  %v184_v15 = vld [vmem:[#allocation5 + $0xd0] sm:$0xff] }
 0x35e   :  { %10389 = vmatprep.subr.bf16.mxu1 %v15347_v25  ;;  %v15378_v25 = vcombine.low %v1455_v1, %v1459_v2  ;;  %v15411_v1 = vcombine.high %v1487_v56, %v1491_v57 }
 0x35f   :  { %9978 = vmatpush1.bf16.msra.mxu0 %v15592_v18  ;;  %v188_v18 = vld [vmem:[#allocation5 + $0xf0] sm:$0xff] }
 0x360   :  { %9979 = vmatprep.subr.bf16.mxu0 %v15601_v26  ;;  %v14100_v26 = vcombine.low %v176_v4, %v180_v5  ;;  %v14109_v29 = vcombine.high %v184_v15, %v188_v18  ;;  %v1495_v4 = vld [vmem:[#allocation5 + $0x29c8] sm:$0xff] }
 0x361   :  { %10390 = vmatpush1.bf16.msra.mxu1 %v15346_v35  ;;  %v192_v35 = vld [vmem:[#allocation5 + $0x110] sm:$0xff]  ;;  %v1499_v5 = vld [vmem:[#allocation5 + $0x29e8] sm:$0xff] }
 0x362   :  { %10391 = vmatprep.subr.bf16.mxu1 %v15355_v37  ;;  %v15386_v37 = vcombine.low %v1463_v10, %v1467_v11  ;;  %v15419_v10 = vcombine.high %v1495_v4, %v1499_v5 }
 0x363   :  { %9980 = vmatpush1.bf16.msra.mxu0 %v15600_v36  ;;  %v196_v36 = vld [vmem:[#allocation5 + $0x130] sm:$0xff] }
 0x364   :  { %9981 = vmatprep.subr.bf16.mxu0 %v15609_v39  ;;  %v14108_v39 = vcombine.low %v184_v15, %v188_v18  ;;  %v14117_v19 = vcombine.high %v192_v35, %v196_v36  ;;  %v1503_v15 = vld [vmem:[#allocation5 + $0x2a08] sm:$0xff] }
 0x365   :  { %10392 = vmatpush1.bf16.msra.mxu1 %v15354_v45  ;;  %v200_v45 = vld [vmem:[#allocation5 + $0x150] sm:$0xff]  ;;  %v1507_v18 = vld [vmem:[#allocation5 + $0x2a28] sm:$0xff] }
 0x366   :  { %10402 = vmatprep.subr.bf16.mxu1 %v15363_v22  ;;  %v15394_v22 = vcombine.low %v1471_v20, %v1475_v31  ;;  %v15427_v20 = vcombine.high %v1503_v15, %v1507_v18 }
 0x367   :  { %9982 = vmatpush1.bf16.msra.mxu0 %v15608_v46  ;;  %v204_v46 = vld [vmem:[#allocation5 + $0x170] sm:$0xff] }
 0x368   :  { %10484 = vmatprep.subr.bf16.mxu0 %v14085_v47  ;;  %10394 = vmatmul.mubr.bf16.vlgmr.msra.gmra.mrb[4].mxu1 %v17277_v50  ;;  %v14116_v47 = vcombine.low %v192_v35, %v196_v36  ;;  %v14125_v55 = vcombine.high %v200_v45, %v204_v46  ;;  %v1511_v35 = vld [vmem:[#allocation5 + $0x2a48] sm:$0xff] }
 0x369   :  { %10403 = vmatpush1.bf16.msra.mxu1 %v15362_v60  ;;  %10434 = vmatprep.mubr.bf16.mxu1 %v17281_v30  ;;  %v208_v60 = vld [vmem:[#allocation5 + $0x190] sm:$0xff]  ;;  %v1515_v36 = vld [vmem:[#allocation5 + $0x2a68] sm:$0xff] }
 0x36a   :  { %9984 = vmatmul.mubr.bf16.vlgmr.msra.gmra.mrb[0].mxu0 %v17303_v59  ;;  %10404 = vmatprep.subr.bf16.mxu1 %v15371_v32  ;;  %v15402_v32 = vcombine.low %v1479_v48, %v1483_v43  ;;  %v15435_v48 = vcombine.high %v1511_v35, %v1515_v36 }
 0x36b   :  { %10485 = vmatpush1.bf16.msra.mxu0 %v14084_v63  ;;  %10516 = vmatprep.mubr.bf16.mxu0 %v17145_v58  ;;  %v212_v63 = vld [vmem:[#allocation5 + $0x1b0] sm:$0xff] }
 0x36c   :  { %10486 = vmatprep.subr.bf16.mxu0 %v14093_v12  ;;  %v14124_v12 = vcombine.low %v200_v45, %v204_v46  ;;  %v14133_v2 = vcombine.high %v208_v60, %v212_v63  ;;  %v1519_v45 = vld [vmem:[#allocation5 + $0x2a88] sm:$0xff] }
 0x36d   :  { %10405 = vmatpush1.bf16.msra.mxu1 %v15370_v6  ;;  %v216_v6 = vld [vmem:[#allocation5 + $0x1d0] sm:$0xff]  ;;  %v1523_v46 = vld [vmem:[#allocation5 + $0x2aa8] sm:$0xff] }
 0x36e   :  { %10406 = vmatprep.subr.bf16.mxu1 %v15379_v8  ;;  %v15410_v8 = vcombine.low %v1487_v56, %v1491_v57  ;;  %v15443_v56 = vcombine.high %v1519_v45, %v1523_v46 }
 0x36f   :  { %10487 = vmatpush1.bf16.msra.mxu0 %v14092_v13  ;;  %v220_v13 = vld [vmem:[#allocation5 + $0x1f0] sm:$0xff] }
 0x370   :  { %10488 = vmatprep.subr.bf16.mxu0 %v14101_v9  ;;  %v14132_v9 = vcombine.low %v208_v60, %v212_v63  ;;  %v14141_v11 = vcombine.high %v216_v6, %v220_v13  ;;  %v1527_v60 = vld [vmem:[#allocation5 + $0x2ac8] sm:$0xff] }
 0x371   :  { %10407 = vmatpush1.bf16.msra.mxu1 %v15378_v25  ;;  %v224_v25 = vld [vmem:[#allocation5 + $0x210] sm:$0xff]  ;;  %v1531_v63 = vld [vmem:[#allocation5 + $0x2ae8] sm:$0xff] }
 0x372   :  { %10408 = vmatprep.subr.bf16.mxu1 %v15387_v27  ;;  %v15418_v27 = vcombine.low %v1495_v4, %v1499_v5  ;;  %v15451_v4 = vcombine.high %v1527_v60, %v1531_v63 }
 0x373   :  { %10489 = vmatpush1.bf16.msra.mxu0 %v14100_v26  ;;  %v228_v26 = vld [vmem:[#allocation5 + $0x230] sm:$0xff] }
 0x374   :  { %10490 = vmatprep.subr.bf16.mxu0 %v14109_v29  ;;  %v14140_v29 = vcombine.low %v216_v6, %v220_v13  ;;  %v14149_v31 = vcombine.high %v224_v25, %v228_v26  ;;  %v1535_v6 = vld [vmem:[#allocation5 + $0x2b08] sm:$0xff] }
 0x375   :  { %10409 = vmatpush1.bf16.msra.mxu1 %v15386_v37  ;;  %v232_v37 = vld [vmem:[#allocation5 + $0x250] sm:$0xff]  ;;  %v1539_v13 = vld [vmem:[#allocation5 + $0x2b28] sm:$0xff] }
 0x376   :  { %10410 = vmatprep.subr.bf16.mxu1 %v15395_v41  ;;  %v15426_v41 = vcombine.low %v1503_v15, %v1507_v18  ;;  %v15459_v15 = vcombine.high %v1535_v6, %v1539_v13 }
 0x377   :  { %10491 = vmatpush1.bf16.msra.mxu0 %v14108_v39  ;;  %v236_v39 = vld [vmem:[#allocation5 + $0x270] sm:$0xff] }
 0x378   :  { %10492 = vmatprep.subr.bf16.mxu0 %v14117_v19  ;;  %v14148_v19 = vcombine.low %v224_v25, %v228_v26  ;;  %v14157_v43 = vcombine.high %v232_v37, %v236_v39  ;;  %v1543_v25 = vld [vmem:[#allocation5 + $0x2b48] sm:$0xff] }
 0x379   :  { %10411 = vmatpush1.bf16.msra.mxu1 %v15394_v22  ;;  %v240_v22 = vld [vmem:[#allocation5 + $0x290] sm:$0xff]  ;;  %v1547_v26 = vld [vmem:[#allocation5 + $0x2b68] sm:$0xff] }
 0x37a   :  { %10412 = vmatprep.subr.bf16.mxu1 %v15403_v49  ;;  %v15434_v49 = vcombine.low %v1511_v35, %v1515_v36  ;;  %v15467_v35 = vcombine.high %v1543_v25, %v1547_v26 }
 0x37b   :  { %10493 = vmatpush1.bf16.msra.mxu0 %v14116_v47  ;;  %v244_v47 = vld [vmem:[#allocation5 + $0x2b0] sm:$0xff] }
 0x37c   :  { %10494 = vmatprep.subr.bf16.mxu0 %v14125_v55  ;;  %v14156_v55 = vcombine.low %v232_v37, %v236_v39  ;;  %v14165_v57 = vcombine.high %v240_v22, %v244_v47  ;;  %v1551_v37 = vld [vmem:[#allocation5 + $0x2b88] sm:$0xff] }
 0x37d   :  { %10413 = vmatpush1.bf16.msra.mxu1 %v15402_v32  ;;  %v248_v32 = vld [vmem:[#allocation5 + $0x2d0] sm:$0xff]  ;;  %v1555_v39 = vld [vmem:[#allocation5 + $0x2ba8] sm:$0xff] }
 0x37e   :  { %10414 = vmatprep.subr.bf16.mxu1 %v15411_v1  ;;  %v15442_v1 = vcombine.low %v1519_v45, %v1523_v46  ;;  %v15475_v45 = vcombine.high %v1551_v37, %v1555_v39 }
 0x37f   :  { %10495 = vmatpush1.bf16.msra.mxu0 %v14124_v12  ;;  %v252_v12 = vld [vmem:[#allocation5 + $0x2f0] sm:$0xff] }
 0x380   :  { %10496 = vmatprep.subr.bf16.mxu0 %v14133_v2  ;;  %v14164_v2 = vcombine.low %v240_v22, %v244_v47  ;;  %v14173_v5 = vcombine.high %v248_v32, %v252_v12  ;;  %v1559_v22 = vld [vmem:[#allocation5 + $0x2bc8] sm:$0xff] }
 0x381   :  { %10415 = vmatpush1.bf16.msra.mxu1 %v15410_v8  ;;  %v256_v8 = vld [vmem:[#allocation5 + $0x310] sm:$0xff]  ;;  %v1563_v47 = vld [vmem:[#allocation5 + $0x2be8] sm:$0xff] }
 0x382   :  { %10416 = vmatprep.subr.bf16.mxu1 %v15419_v10  ;;  %v15450_v10 = vcombine.low %v1527_v60, %v1531_v63  ;;  %v15483_v60 = vcombine.high %v1559_v22, %v1563_v47 }
 0x383   :  { %10497 = vmatpush1.bf16.msra.mxu0 %v14132_v9  ;;  %v260_v9 = vld [vmem:[#allocation5 + $0x330] sm:$0xff] }
 0x384   :  { %10498 = vmatprep.subr.bf16.mxu0 %v14141_v11  ;;  %v14172_v11 = vcombine.low %v248_v32, %v252_v12  ;;  %v14181_v18 = vcombine.high %v256_v8, %v260_v9  ;;  %v1567_v32 = vld [vmem:[#allocation5 + $0x2c08] sm:$0xff] }
 0x385   :  { %10417 = vmatpush1.bf16.msra.mxu1 %v15418_v27  ;;  %v264_v27 = vld [vmem:[#allocation5 + $0x350] sm:$0xff]  ;;  %v1571_v12 = vld [vmem:[#allocation5 + $0x2c28] sm:$0xff] }
 0x386   :  { %10418 = vmatprep.subr.bf16.mxu1 %v15427_v20  ;;  %v15458_v20 = vcombine.low %v1535_v6, %v1539_v13  ;;  %v15491_v6 = vcombine.high %v1567_v32, %v1571_v12 }
 0x387   :  { %10499 = vmatpush1.bf16.msra.mxu0 %v14140_v29  ;;  %v268_v29 = vld [vmem:[#allocation5 + $0x370] sm:$0xff] }
 0x388   :  { %10500 = vmatprep.subr.bf16.mxu0 %v14149_v31  ;;  %v14180_v31 = vcombine.low %v256_v8, %v260_v9  ;;  %v14189_v36 = vcombine.high %v264_v27, %v268_v29  ;;  %v1575_v8 = vld [vmem:[#allocation5 + $0x2c48] sm:$0xff] }
 0x389   :  { %10419 = vmatpush1.bf16.msra.mxu1 %v15426_v41  ;;  %v272_v41 = vld [vmem:[#allocation5 + $0x390] sm:$0xff]  ;;  %v1579_v9 = vld [vmem:[#allocation5 + $0x2c68] sm:$0xff] }
 0x38a   :  { %10420 = vmatprep.subr.bf16.mxu1 %v15435_v48  ;;  %v15466_v48 = vcombine.low %v1543_v25, %v1547_v26  ;;  %v15499_v25 = vcombine.high %v1575_v8, %v1579_v9 }
 0x38b   :  { %10501 = vmatpush1.bf16.msra.mxu0 %v14148_v19  ;;  %v276_v19 = vld [vmem:[#allocation5 + $0x3b0] sm:$0xff] }
 0x38c   :  { %10502 = vmatprep.subr.bf16.mxu0 %v14157_v43  ;;  %v14188_v43 = vcombine.low %v264_v27, %v268_v29  ;;  %v14197_v46 = vcombine.high %v272_v41, %v276_v19  ;;  %v1583_v27 = vld [vmem:[#allocation5 + $0x2c88] sm:$0xff] }
 0x38d   :  { %10421 = vmatpush1.bf16.msra.mxu1 %v15434_v49  ;;  %v280_v49 = vld [vmem:[#allocation5 + $0x3d0] sm:$0xff]  ;;  %v1587_v29 = vld [vmem:[#allocation5 + $0x2ca8] sm:$0xff] }
 0x38e   :  { %10422 = vmatprep.subr.bf16.mxu1 %v15443_v56  ;;  %v15474_v56 = vcombine.low %v1551_v37, %v1555_v39  ;;  %v15507_v37 = vcombine.high %v1583_v27, %v1587_v29 }
 0x38f   :  { %10503 = vmatpush1.bf16.msra.mxu0 %v14156_v55  ;;  %v284_v55 = vld [vmem:[#allocation5 + $0x3f0] sm:$0xff] }
 0x390   :  { %10504 = vmatprep.subr.bf16.mxu0 %v14165_v57  ;;  %v14196_v57 = vcombine.low %v272_v41, %v276_v19  ;;  %v14205_v63 = vcombine.high %v280_v49, %v284_v55  ;;  %v1591_v41 = vld [vmem:[#allocation5 + $0x2cc8] sm:$0xff] }
 0x391   :  { %10423 = vmatpush1.bf16.msra.mxu1 %v15442_v1  ;;  %v288_v1 = vld [vmem:[#allocation5 + $0x410] sm:$0xff]  ;;  %v1595_v19 = vld [vmem:[#allocation5 + $0x2ce8] sm:$0xff] }
 0x392   :  { %10424 = vmatprep.subr.bf16.mxu1 %v15451_v4  ;;  %v15482_v4 = vcombine.low %v1559_v22, %v1563_v47  ;;  %v15515_v22 = vcombine.high %v1591_v41, %v1595_v19 }
 0x393   :  { %10505 = vmatpush1.bf16.msra.mxu0 %v14164_v2  ;;  %v292_v2 = vld [vmem:[#allocation5 + $0x430] sm:$0xff] }
 0x394   :  { %10506 = vmatprep.subr.bf16.mxu0 %v14173_v5  ;;  %v14204_v5 = vcombine.low %v280_v49, %v284_v55  ;;  %v14213_v13 = vcombine.high %v288_v1, %v292_v2  ;;  %v1599_v49 = vld [vmem:[#allocation5 + $0x2d08] sm:$0xff] }
 0x395   :  { %10425 = vmatpush1.bf16.msra.mxu1 %v15450_v10  ;;  %v296_v10 = vld [vmem:[#allocation5 + $0x450] sm:$0xff]  ;;  %v1603_v55 = vld [vmem:[#allocation5 + $0x2d28] sm:$0xff] }
 0x396   :  { %10426 = vmatprep.subr.bf16.mxu1 %v15459_v15  ;;  %v15490_v15 = vcombine.low %v1567_v32, %v1571_v12  ;;  %v15523_v32 = vcombine.high %v1599_v49, %v1603_v55 }
 0x397   :  { %10507 = vmatpush1.bf16.msra.mxu0 %v14172_v11  ;;  %v300_v11 = vld [vmem:[#allocation5 + $0x470] sm:$0xff] }
 0x398   :  { %10508 = vmatprep.subr.bf16.mxu0 %v14181_v18  ;;  %v14212_v18 = vcombine.low %v288_v1, %v292_v2  ;;  %v14221_v26 = vcombine.high %v296_v10, %v300_v11  ;;  %v1607_v1 = vld [vmem:[#allocation5 + $0x2d48] sm:$0xff] }
 0x399   :  { %10427 = vmatpush1.bf16.msra.mxu1 %v15458_v20  ;;  %v304_v20 = vld [vmem:[#allocation5 + $0x490] sm:$0xff]  ;;  %v1611_v2 = vld [vmem:[#allocation5 + $0x2d68] sm:$0xff] }
 0x39a   :  { %10428 = vmatprep.subr.bf16.mxu1 %v15467_v35  ;;  %v15498_v35 = vcombine.low %v1575_v8, %v1579_v9  ;;  %v15531_v8 = vcombine.high %v1607_v1, %v1611_v2 }
 0x39b   :  { %10509 = vmatpush1.bf16.msra.mxu0 %v14180_v31  ;;  %v308_v31 = vld [vmem:[#allocation5 + $0x4b0] sm:$0xff] }
 0x39c   :  { %10510 = vmatprep.subr.bf16.mxu0 %v14189_v36  ;;  %v14220_v36 = vcombine.low %v296_v10, %v300_v11  ;;  %v14229_v39 = vcombine.high %v304_v20, %v308_v31  ;;  %v1615_v10 = vld [vmem:[#allocation5 + $0x2d88] sm:$0xff] }
 0x39d   :  { %10429 = vmatpush1.bf16.msra.mxu1 %v15466_v48  ;;  %v312_v48 = vld [vmem:[#allocation5 + $0x4d0] sm:$0xff]  ;;  %v1619_v11 = vld [vmem:[#allocation5 + $0x2da8] sm:$0xff] }
 0x39e   :  { %10430 = vmatprep.subr.bf16.mxu1 %v15475_v45  ;;  %v15506_v45 = vcombine.low %v1583_v27, %v1587_v29  ;;  %v15539_v27 = vcombine.high %v1615_v10, %v1619_v11 }
 0x39f   :  { %10511 = vmatpush1.bf16.msra.mxu0 %v14188_v43  ;;  %v316_v43 = vld [vmem:[#allocation5 + $0x4f0] sm:$0xff] }
 0x3a0   :  { %10512 = vmatprep.subr.bf16.mxu0 %v14197_v46  ;;  %v14228_v46 = vcombine.low %v304_v20, %v308_v31  ;;  %v14237_v47 = vcombine.high %v312_v48, %v316_v43  ;;  %v1623_v20 = vld [vmem:[#allocation5 + $0x2dc8] sm:$0xff] }
 0x3a1   :  { %10431 = vmatpush1.bf16.msra.mxu1 %v15474_v56  ;;  %v320_v56 = vld [vmem:[#allocation5 + $0x510] sm:$0xff]  ;;  %v1627_v31 = vld [vmem:[#allocation5 + $0x2de8] sm:$0xff] }
 0x3a2   :  { %10432 = vmatprep.subr.bf16.mxu1 %v15483_v60  ;;  %v15514_v60 = vcombine.low %v1591_v41, %v1595_v19  ;;  %v15547_v41 = vcombine.high %v1623_v20, %v1627_v31 }
 0x3a3   :  { %10513 = vmatpush1.bf16.msra.mxu0 %v14196_v57  ;;  %v324_v57 = vld [vmem:[#allocation5 + $0x530] sm:$0xff] }
 0x3a4   :  { %10514 = vmatprep.subr.bf16.mxu0 %v14205_v63  ;;  %v14236_v63 = vcombine.low %v312_v48, %v316_v43  ;;  %v14245_v12 = vcombine.high %v320_v56, %v324_v57  ;;  %v1631_v48 = vld [vmem:[#allocation5 + $0x2e08] sm:$0xff] }
 0x3a5   :  { %10433 = vmatpush1.bf16.msra.mxu1 %v15482_v4  ;;  %v328_v4 = vld [vmem:[#allocation5 + $0x550] sm:$0xff]  ;;  %v1635_v43 = vld [vmem:[#allocation5 + $0x2e28] sm:$0xff] }
 0x3a6   :  { %10443 = vmatprep.subr.bf16.mxu1 %v15491_v6  ;;  %v15522_v6 = vcombine.low %v1599_v49, %v1603_v55  ;;  %v15555_v49 = vcombine.high %v1631_v48, %v1635_v43 }
 0x3a7   :  { %10515 = vmatpush1.bf16.msra.mxu0 %v14204_v5  ;;  %v332_v5 = vld [vmem:[#allocation5 + $0x570] sm:$0xff] }
 0x3a8   :  { %10525 = vmatprep.subr.bf16.mxu0 %v14213_v13  ;;  %10435 = vmatmul.mubr.bf16.vlgmr.msra.gmra.mrb[4].mxu1 %v17291_v38  ;;  %v14244_v13 = vcombine.low %v320_v56, %v324_v57  ;;  %v14253_v9 = vcombine.high %v328_v4, %v332_v5  ;;  %v1639_v56 = vld [vmem:[#allocation5 + $0x2e48] sm:$0xff] }
 0x3a9   :  { %10444 = vmatpush1.bf16.msra.mxu1 %v15490_v15  ;;  %10475 = vmatprep.mubr.bf16.mxu1 %v17295_v44  ;;  %v336_v15 = vld [vmem:[#allocation5 + $0x590] sm:$0xff]  ;;  %v1643_v57 = vld [vmem:[#allocation5 + $0x2e68] sm:$0xff] }
 0x3aa   :  { %10517 = vmatmul.mubr.bf16.vlgmr.msra.gmra.mrb[4].mxu0 %v17155_v16  ;;  %10445 = vmatprep.subr.bf16.mxu1 %v15499_v25  ;;  %v15530_v25 = vcombine.low %v1607_v1, %v1611_v2  ;;  %v15563_v1 = vcombine.high %v1639_v56, %v1643_v57 }
 0x3ab   :  { %10526 = vmatpush1.bf16.msra.mxu0 %v14212_v18  ;;  %10557 = vmatprep.mubr.bf16.mxu0 %v17149_v61  ;;  %v340_v18 = vld [vmem:[#allocation5 + $0x5b0] sm:$0xff] }
 0x3ac   :  { %10527 = vmatprep.subr.bf16.mxu0 %v14221_v26  ;;  %v14252_v26 = vcombine.low %v328_v4, %v332_v5  ;;  %v14261_v29 = vcombine.high %v336_v15, %v340_v18  ;;  %v1647_v4 = vld [vmem:[#allocation5 + $0x2e88] sm:$0xff] }
 0x3ad   :  { %10446 = vmatpush1.bf16.msra.mxu1 %v15498_v35  ;;  %v344_v35 = vld [vmem:[#allocation5 + $0x5d0] sm:$0xff]  ;;  %v1651_v5 = vld [vmem:[#allocation5 + $0x2ea8] sm:$0xff] }
 0x3ae   :  { %10447 = vmatprep.subr.bf16.mxu1 %v15507_v37  ;;  %v15538_v37 = vcombine.low %v1615_v10, %v1619_v11  ;;  %v15571_v10 = vcombine.high %v1647_v4, %v1651_v5 }
 0x3af   :  { %10528 = vmatpush1.bf16.msra.mxu0 %v14220_v36  ;;  %v348_v36 = vld [vmem:[#allocation5 + $0x5f0] sm:$0xff] }
 0x3b0   :  { %10529 = vmatprep.subr.bf16.mxu0 %v14229_v39  ;;  %v14260_v39 = vcombine.low %v336_v15, %v340_v18  ;;  %v14269_v19 = vcombine.high %v344_v35, %v348_v36  ;;  %v1655_v15 = vld [vmem:[#allocation5 + $0x2ec8] sm:$0xff] }
 0x3b1   :  { %10448 = vmatpush1.bf16.msra.mxu1 %v15506_v45  ;;  %v352_v45 = vld [vmem:[#allocation5 + $0x610] sm:$0xff]  ;;  %v1659_v18 = vld [vmem:[#allocation5 + $0x2ee8] sm:$0xff] }
 0x3b2   :  { %10449 = vmatprep.subr.bf16.mxu1 %v15515_v22  ;;  %v15546_v22 = vcombine.low %v1623_v20, %v1627_v31  ;;  %v15579_v20 = vcombine.high %v1655_v15, %v1659_v18 }
 0x3b3   :  { %10530 = vmatpush1.bf16.msra.mxu0 %v14228_v46  ;;  %v356_v46 = vld [vmem:[#allocation5 + $0x630] sm:$0xff] }
 0x3b4   :  { %10531 = vmatprep.subr.bf16.mxu0 %v14237_v47  ;;  %v14268_v47 = vcombine.low %v344_v35, %v348_v36  ;;  %v14277_v55 = vcombine.high %v352_v45, %v356_v46  ;;  %v1663_v35 = vld [vmem:[#allocation5 + $0x2f08] sm:$0xff] }
 0x3b5   :  { %10450 = vmatpush1.bf16.msra.mxu1 %v15514_v60  ;;  %v360_v60 = vld [vmem:[#allocation5 + $0x650] sm:$0xff]  ;;  %v1667_v36 = vld [vmem:[#allocation5 + $0x2f28] sm:$0xff] }
 0x3b6   :  { %10451 = vmatprep.subr.bf16.mxu1 %v15523_v32  ;;  %v15554_v32 = vcombine.low %v1631_v48, %v1635_v43  ;;  %v15587_v48 = vcombine.high %v1663_v35, %v1667_v36 }
 0x3b7   :  { %10532 = vmatpush1.bf16.msra.mxu0 %v14236_v63  ;;  %v364_v63 = vld [vmem:[#allocation5 + $0x670] sm:$0xff] }
 0x3b8   :  { %10533 = vmatprep.subr.bf16.mxu0 %v14245_v12  ;;  %v14276_v12 = vcombine.low %v352_v45, %v356_v46  ;;  %v14285_v2 = vcombine.high %v360_v60, %v364_v63  ;;  %v1671_v45 = vld [vmem:[#allocation5 + $0x2f48] sm:$0xff] }
 0x3b9   :  { %10452 = vmatpush1.bf16.msra.mxu1 %v15522_v6  ;;  %v368_v6 = vld [vmem:[#allocation5 + $0x690] sm:$0xff]  ;;  %v1675_v46 = vld [vmem:[#allocation5 + $0x2f68] sm:$0xff] }
 0x3ba   :  { %10453 = vmatprep.subr.bf16.mxu1 %v15531_v8  ;;  %v15562_v8 = vcombine.low %v1639_v56, %v1643_v57  ;;  %v15595_v56 = vcombine.high %v1671_v45, %v1675_v46 }
 0x3bb   :  { %10534 = vmatpush1.bf16.msra.mxu0 %v14244_v13  ;;  %v372_v13 = vld [vmem:[#allocation5 + $0x6b0] sm:$0xff] }
 0x3bc   :  { %10535 = vmatprep.subr.bf16.mxu0 %v14253_v9  ;;  %v14284_v9 = vcombine.low %v360_v60, %v364_v63  ;;  %v14293_v11 = vcombine.high %v368_v6, %v372_v13  ;;  %v1679_v60 = vld [vmem:[#allocation5 + $0x2f88] sm:$0xff] }
 0x3bd   :  { %10454 = vmatpush1.bf16.msra.mxu1 %v15530_v25  ;;  %v376_v25 = vld [vmem:[#allocation5 + $0x6d0] sm:$0xff]  ;;  %v1683_v63 = vld [vmem:[#allocation5 + $0x2fa8] sm:$0xff] }
 0x3be   :  { %10455 = vmatprep.subr.bf16.mxu1 %v15539_v27  ;;  %v15570_v27 = vcombine.low %v1647_v4, %v1651_v5  ;;  %v15603_v4 = vcombine.high %v1679_v60, %v1683_v63 }
 0x3bf   :  { %10536 = vmatpush1.bf16.msra.mxu0 %v14252_v26  ;;  %v380_v26 = vld [vmem:[#allocation5 + $0x6f0] sm:$0xff] }
 0x3c0   :  { %10537 = vmatprep.subr.bf16.mxu0 %v14261_v29  ;;  %v14292_v29 = vcombine.low %v368_v6, %v372_v13  ;;  %v14301_v31 = vcombine.high %v376_v25, %v380_v26  ;;  %v1687_v6 = vld [vmem:[#allocation5 + $0x2fc8] sm:$0xff] }
 0x3c1   :  { %10456 = vmatpush1.bf16.msra.mxu1 %v15538_v37  ;;  %v384_v37 = vld [vmem:[#allocation5 + $0x710] sm:$0xff]  ;;  %v1691_v13 = vld [vmem:[#allocation5 + $0x2fe8] sm:$0xff] }
 0x3c2   :  { %10457 = vmatprep.subr.bf16.mxu1 %v15547_v41  ;;  %v15578_v41 = vcombine.low %v1655_v15, %v1659_v18  ;;  %v15611_v15 = vcombine.high %v1687_v6, %v1691_v13 }
 0x3c3   :  { %10538 = vmatpush1.bf16.msra.mxu0 %v14260_v39  ;;  %v388_v39 = vld [vmem:[#allocation5 + $0x730] sm:$0xff] }
 0x3c4   :  { %10539 = vmatprep.subr.bf16.mxu0 %v14269_v19  ;;  %v14300_v19 = vcombine.low %v376_v25, %v380_v26  ;;  %v14309_v43 = vcombine.high %v384_v37, %v388_v39  ;;  %v161_v25 = vld [vmem:[#allocation5 + $0x18] sm:$0xff] }
 0x3c5   :  { %10458 = vmatpush1.bf16.msra.mxu1 %v15546_v22  ;;  %v392_v22 = vld [vmem:[#allocation5 + $0x750] sm:$0xff]  ;;  %v165_v26 = vld [vmem:[#allocation5 + $0x38] sm:$0xff] }
 0x3c6   :  { %10459 = vmatprep.subr.bf16.mxu1 %v15555_v49  ;;  %v15586_v49 = vcombine.low %v1663_v35, %v1667_v36  ;;  %v14087_v35 = vcombine.high %v161_v25, %v165_v26 }
 0x3c7   :  { %10540 = vmatpush1.bf16.msra.mxu0 %v14268_v47  ;;  %v396_v47 = vld [vmem:[#allocation5 + $0x770] sm:$0xff] }
 0x3c8   :  { %10541 = vmatprep.subr.bf16.mxu0 %v14277_v55  ;;  %v14308_v55 = vcombine.low %v384_v37, %v388_v39  ;;  %v14317_v57 = vcombine.high %v392_v22, %v396_v47  ;;  %v169_v37 = vld [vmem:[#allocation5 + $0x58] sm:$0xff] }
 0x3c9   :  { %10460 = vmatpush1.bf16.msra.mxu1 %v15554_v32  ;;  %v400_v32 = vld [vmem:[#allocation5 + $0x790] sm:$0xff]  ;;  %v173_v39 = vld [vmem:[#allocation5 + $0x78] sm:$0xff] }
 0x3ca   :  { %10461 = vmatprep.subr.bf16.mxu1 %v15563_v1  ;;  %v15594_v1 = vcombine.low %v1671_v45, %v1675_v46  ;;  %v14095_v45 = vcombine.high %v169_v37, %v173_v39 }
 0x3cb   :  { %10542 = vmatpush1.bf16.msra.mxu0 %v14276_v12  ;;  %v404_v12 = vld [vmem:[#allocation5 + $0x7b0] sm:$0xff] }
 0x3cc   :  { %10543 = vmatprep.subr.bf16.mxu0 %v14285_v2  ;;  %v14316_v2 = vcombine.low %v392_v22, %v396_v47  ;;  %v14325_v5 = vcombine.high %v400_v32, %v404_v12  ;;  %v177_v22 = vld [vmem:[#allocation5 + $0x98] sm:$0xff] }
 0x3cd   :  { %10462 = vmatpush1.bf16.msra.mxu1 %v15562_v8  ;;  %v408_v8 = vld [vmem:[#allocation5 + $0x7d0] sm:$0xff]  ;;  %v181_v47 = vld [vmem:[#allocation5 + $0xb8] sm:$0xff] }
 0x3ce   :  { %10463 = vmatprep.subr.bf16.mxu1 %v15571_v10  ;;  %v15602_v10 = vcombine.low %v1679_v60, %v1683_v63  ;;  %v14103_v60 = vcombine.high %v177_v22, %v181_v47 }
 0x3cf   :  { %10544 = vmatpush1.bf16.msra.mxu0 %v14284_v9  ;;  %v412_v9 = vld [vmem:[#allocation5 + $0x7f0] sm:$0xff] }
 0x3d0   :  { %10545 = vmatprep.subr.bf16.mxu0 %v14293_v11  ;;  %v14324_v11 = vcombine.low %v400_v32, %v404_v12  ;;  %v14333_v18 = vcombine.high %v408_v8, %v412_v9  ;;  %v185_v32 = vld [vmem:[#allocation5 + $0xd8] sm:$0xff] }
 0x3d1   :  { %10464 = vmatpush1.bf16.msra.mxu1 %v15570_v27  ;;  %v416_v27 = vld [vmem:[#allocation5 + $0x810] sm:$0xff]  ;;  %v189_v12 = vld [vmem:[#allocation5 + $0xf8] sm:$0xff] }
 0x3d2   :  { %10465 = vmatprep.subr.bf16.mxu1 %v15579_v20  ;;  %v15610_v20 = vcombine.low %v1687_v6, %v1691_v13  ;;  %v14111_v6 = vcombine.high %v185_v32, %v189_v12 }
 0x3d3   :  { %10546 = vmatpush1.bf16.msra.mxu0 %v14292_v29  ;;  %v420_v29 = vld [vmem:[#allocation5 + $0x830] sm:$0xff] }
 0x3d4   :  { %10547 = vmatprep.subr.bf16.mxu0 %v14301_v31  ;;  %v14332_v31 = vcombine.low %v408_v8, %v412_v9  ;;  %v14341_v36 = vcombine.high %v416_v27, %v420_v29  ;;  %v193_v8 = vld [vmem:[#allocation5 + $0x118] sm:$0xff] }
 0x3d5   :  { %10466 = vmatpush1.bf16.msra.mxu1 %v15578_v41  ;;  %v424_v41 = vld [vmem:[#allocation5 + $0x850] sm:$0xff]  ;;  %v197_v9 = vld [vmem:[#allocation5 + $0x138] sm:$0xff] }
 0x3d6   :  { %10467 = vmatprep.subr.bf16.mxu1 %v15587_v48  ;;  %v14086_v48 = vcombine.low %v161_v25, %v165_v26  ;;  %v14119_v25 = vcombine.high %v193_v8, %v197_v9  ;;  %v201_v26 = vld [vmem:[#allocation5 + $0x158] sm:$0xff] }
 0x3d7   :  { %10548 = vmatpush1.bf16.msra.mxu0 %v14300_v19  ;;  %v428_v19 = vld [vmem:[#allocation5 + $0x870] sm:$0xff] }
 0x3d8   :  { %10549 = vmatprep.subr.bf16.mxu0 %v14309_v43  ;;  %v14340_v43 = vcombine.low %v416_v27, %v420_v29  ;;  %v14349_v46 = vcombine.high %v424_v41, %v428_v19  ;;  %v205_v27 = vld [vmem:[#allocation5 + $0x178] sm:$0xff]  ;;  %v456_v29 = vld [vmem:[#allocation5 + $0x950] sm:$0xff] }
 0x3d9   :  { %10468 = vmatpush1.bf16.msra.mxu1 %v15586_v49  ;;  %v432_v49 = vld [vmem:[#allocation5 + $0x890] sm:$0xff] }
 0x3da   :  { %10469 = vmatprep.subr.bf16.mxu1 %v15595_v56  ;;  %v14094_v56 = vcombine.low %v169_v37, %v173_v39  ;;  %v209_v39 = vld [vmem:[#allocation5 + $0x198] sm:$0xff] }
 0x3db   :  { %10550 = vmatpush1.bf16.msra.mxu0 %v14308_v55  ;;  %v436_v55 = vld [vmem:[#allocation5 + $0x8b0] sm:$0xff] }
 0x3dc   :  { %10551 = vmatprep.subr.bf16.mxu0 %v14317_v57  ;;  %v14348_v57 = vcombine.low %v424_v41, %v428_v19  ;;  %v14357_v63 = vcombine.high %v432_v49, %v436_v55  ;;  %v213_v41 = vld [vmem:[#allocation5 + $0x1b8] sm:$0xff]  ;;  %v464_v19 = vld [vmem:[#allocation5 + $0x990] sm:$0xff] }
 0x3dd   :  { %10470 = vmatpush1.bf16.msra.mxu1 %v15594_v1  ;;  %v440_v1 = vld [vmem:[#allocation5 + $0x8d0] sm:$0xff] }
 0x3de   :  { %10471 = vmatprep.subr.bf16.mxu1 %v15603_v4  ;;  %v14102_v4 = vcombine.low %v177_v22, %v181_v47  ;;  %v217_v47 = vld [vmem:[#allocation5 + $0x1d8] sm:$0xff] }
 0x3df   :  { %10552 = vmatpush1.bf16.msra.mxu0 %v14316_v2  ;;  %v444_v2 = vld [vmem:[#allocation5 + $0x8f0] sm:$0xff] }
 0x3e0   :  { %10553 = vmatprep.subr.bf16.mxu0 %v14325_v5  ;;  %v14356_v5 = vcombine.low %v432_v49, %v436_v55  ;;  %v14365_v13 = vcombine.high %v440_v1, %v444_v2  ;;  %v221_v49 = vld [vmem:[#allocation5 + $0x1f8] sm:$0xff]  ;;  %v472_v55 = vld [vmem:[#allocation5 + $0x9d0] sm:$0xff] }
 0x3e1   :  { %10472 = vmatpush1.bf16.msra.mxu1 %v15602_v10  ;;  %v448_v10 = vld [vmem:[#allocation5 + $0x910] sm:$0xff] }
 0x3e2   :  { %10473 = vmatprep.subr.bf16.mxu1 %v15611_v15  ;;  %v14110_v15 = vcombine.low %v185_v32, %v189_v12  ;;  %v225_v12 = vld [vmem:[#allocation5 + $0x218] sm:$0xff] }
 0x3e3   :  { %10554 = vmatpush1.bf16.msra.mxu0 %v14324_v11  ;;  %v452_v11 = vld [vmem:[#allocation5 + $0x930] sm:$0xff] }
 0x3e4   :  { %10555 = vmatprep.subr.bf16.mxu0 %v14333_v18  ;;  %v14364_v18 = vcombine.low %v440_v1, %v444_v2  ;;  %v229_v1 = vld [vmem:[#allocation5 + $0x238] sm:$0xff]  ;;  %v480_v2 = vld [vmem:[#allocation5 + $0xa10] sm:$0xff] }
 0x3e5   :  { %10474 = vmatpush1.bf16.msra.mxu1 %v15610_v20  ;;  %v460_v20 = vld [vmem:[#allocation5 + $0x970] sm:$0xff] }
 0x3e6   :  { %10976 = vmatprep.subr.bf16.mxu1 %v14087_v35  ;;  %v14372_v35 = vcombine.low %v448_v10, %v452_v11  ;;  %v14381_v37 = vcombine.high %v456_v29, %v460_v20 }
 0x3e7   :  { %10556 = vmatpush1.bf16.msra.mxu0 %v14332_v31  ;;  %v14118_v31 = vcombine.low %v193_v8, %v197_v9  ;;  %v233_v9 = vld [vmem:[#allocation5 + $0x258] sm:$0xff] }
 0x3e8   :  { %10566 = vmatprep.subr.bf16.mxu0 %v14341_v36  ;;  %10476 = vmatmul.mubr.bf16.vlgmr.msra.gmra.mrb[4].mxu1 %v17303_v59  ;;  %v14127_v36 = vcombine.high %v201_v26, %v205_v27 }
 0x3e9   :  { %10977 = vmatpush1.bf16.msra.mxu1 %v14086_v48  ;;  %11008 = vmatprep.mubr.bf16.mxu1 %v17145_v58  ;;  %v14373_v58 = vcombine.high %v448_v10, %v452_v11  ;;  %v468_v48 = vld [vmem:[#allocation5 + $0x9b0] sm:$0xff]  ;;  %v237_v10 = vld [vmem:[#allocation5 + $0x278] sm:$0xff] }
 0x3ea   :  { %10558 = vmatmul.mubr.bf16.vlgmr.msra.gmra.mrb[4].mxu0 %v17161_v21  ;;  %10978 = vmatprep.subr.bf16.mxu1 %v14095_v45  ;;  %v14380_v45 = vcombine.low %v456_v29, %v460_v20  ;;  %v14389_v22 = vcombine.high %v464_v19, %v468_v48  ;;  %v488_v11 = vld [vmem:[#allocation5 + $0xa50] sm:$0xff]  ;;  %v245_v29 = vld [vmem:[#allocation5 + $0x2b8] sm:$0xff] }
 0x3eb   :  { %10567 = vmatpush1.bf16.msra.mxu0 %v14340_v43  ;;  %10598 = vmatprep.mubr.bf16.mxu0 %v17165_v28  ;;  %v14126_v43 = vcombine.low %v201_v26, %v205_v27  ;;  %v241_v27 = vld [vmem:[#allocation5 + $0x298] sm:$0xff]  ;;  %v496_v20 = vld [vmem:[#allocation5 + $0xa90] sm:$0xff] }
 0x3ec   :  { %10568 = vmatprep.subr.bf16.mxu0 %v14349_v46  ;;  %v14135_v46 = vcombine.high %v209_v39, %v213_v41 }
 0x3ed   :  { %10979 = vmatpush1.bf16.msra.mxu1 %v14094_v56  ;;  %v476_v56 = vld [vmem:[#allocation5 + $0x9f0] sm:$0xff] }
 0x3ee   :  { %10980 = vmatprep.subr.bf16.mxu1 %v14103_v60  ;;  %v14388_v60 = vcombine.low %v464_v19, %v468_v48  ;;  %v14397_v32 = vcombine.high %v472_v55, %v476_v56  ;;  %v253_v19 = vld [vmem:[#allocation5 + $0x2f8] sm:$0xff]  ;;  %v504_v48 = vld [vmem:[#allocation5 + $0xad0] sm:$0xff] }
 0x3ef   :  { %10569 = vmatpush1.bf16.msra.mxu0 %v14348_v57  ;;  %v14134_v57 = vcombine.low %v209_v39, %v213_v41  ;;  %v249_v41 = vld [vmem:[#allocation5 + $0x2d8] sm:$0xff] }
 0x3f0   :  { %10570 = vmatprep.subr.bf16.mxu0 %v14357_v63  ;;  %v14143_v63 = vcombine.high %v217_v47, %v221_v49 }
 0x3f1   :  { %10981 = vmatpush1.bf16.msra.mxu1 %v14102_v4  ;;  %v484_v4 = vld [vmem:[#allocation5 + $0xa30] sm:$0xff] }
 0x3f2   :  { %10982 = vmatprep.subr.bf16.mxu1 %v14111_v6  ;;  %v14396_v6 = vcombine.low %v472_v55, %v476_v56  ;;  %v14405_v8 = vcombine.high %v480_v2, %v484_v4  ;;  %v261_v55 = vld [vmem:[#allocation5 + $0x338] sm:$0xff]  ;;  %v512_v56 = vld [vmem:[#allocation5 + $0xb10] sm:$0xff] }
 0x3f3   :  { %10571 = vmatpush1.bf16.msra.mxu0 %v14356_v5  ;;  %v14142_v5 = vcombine.low %v217_v47, %v221_v49  ;;  %v257_v49 = vld [vmem:[#allocation5 + $0x318] sm:$0xff] }
 0x3f4   :  { %10572 = vmatprep.subr.bf16.mxu0 %v14365_v13  ;;  %v14151_v13 = vcombine.high %v225_v12, %v229_v1 }
 0x3f5   :  { %10983 = vmatpush1.bf16.msra.mxu1 %v14110_v15  ;;  %v492_v15 = vld [vmem:[#allocation5 + $0xa70] sm:$0xff] }
 0x3f6   :  { %10984 = vmatprep.subr.bf16.mxu1 %v14119_v25  ;;  %v14404_v25 = vcombine.low %v480_v2, %v484_v4  ;;  %v14413_v26 = vcombine.high %v488_v11, %v492_v15  ;;  %v269_v2 = vld [vmem:[#allocation5 + $0x378] sm:$0xff]  ;;  %v520_v4 = vld [vmem:[#allocation5 + $0xb50] sm:$0xff] }
 0x3f7   :  { %10573 = vmatpush1.bf16.msra.mxu0 %v14364_v18  ;;  %v14150_v18 = vcombine.low %v225_v12, %v229_v1  ;;  %v265_v1 = vld [vmem:[#allocation5 + $0x358] sm:$0xff] }
 0x3f8   :  { %10574 = vmatprep.subr.bf16.mxu0 %v14373_v58  ;;  %v14159_v58 = vcombine.high %v233_v9, %v237_v10 }
 0x3f9   :  { %10985 = vmatpush1.bf16.msra.mxu1 %v14118_v31  ;;  %v500_v31 = vld [vmem:[#allocation5 + $0xab0] sm:$0xff] }
 0x3fa   :  { %10986 = vmatprep.subr.bf16.mxu1 %v14127_v36  ;;  %v14412_v36 = vcombine.low %v488_v11, %v492_v15  ;;  %v14421_v39 = vcombine.high %v496_v20, %v500_v31  ;;  %v277_v11 = vld [vmem:[#allocation5 + $0x3b8] sm:$0xff]  ;;  %v528_v15 = vld [vmem:[#allocation5 + $0xb90] sm:$0xff] }
 0x3fb   :  { %10575 = vmatpush1.bf16.msra.mxu0 %v14372_v35  ;;  %v14158_v35 = vcombine.low %v233_v9, %v237_v10  ;;  %v273_v10 = vld [vmem:[#allocation5 + $0x398] sm:$0xff] }
 0x3fc   :  { %10576 = vmatprep.subr.bf16.mxu0 %v14381_v37  ;;  %v14167_v37 = vcombine.high %v241_v27, %v245_v29 }
 0x3fd   :  { %10987 = vmatpush1.bf16.msra.mxu1 %v14126_v43  ;;  %v508_v43 = vld [vmem:[#allocation5 + $0xaf0] sm:$0xff] }
 0x3fe   :  { %10988 = vmatprep.subr.bf16.mxu1 %v14135_v46  ;;  %v14420_v46 = vcombine.low %v496_v20, %v500_v31  ;;  %v14429_v47 = vcombine.high %v504_v48, %v508_v43  ;;  %v285_v20 = vld [vmem:[#allocation5 + $0x3f8] sm:$0xff]  ;;  %v536_v31 = vld [vmem:[#allocation5 + $0xbd0] sm:$0xff] }
 0x3ff   :  { %10577 = vmatpush1.bf16.msra.mxu0 %v14380_v45  ;;  %v14166_v45 = vcombine.low %v241_v27, %v245_v29  ;;  %v281_v29 = vld [vmem:[#allocation5 + $0x3d8] sm:$0xff] }
 0x400   :  { %10578 = vmatprep.subr.bf16.mxu0 %v14389_v22  ;;  %v14175_v22 = vcombine.high %v249_v41, %v253_v19 }
 0x401   :  { %10989 = vmatpush1.bf16.msra.mxu1 %v14134_v57  ;;  %v516_v57 = vld [vmem:[#allocation5 + $0xb30] sm:$0xff] }
 0x402   :  { %10990 = vmatprep.subr.bf16.mxu1 %v14143_v63  ;;  %v14428_v63 = vcombine.low %v504_v48, %v508_v43  ;;  %v14437_v12 = vcombine.high %v512_v56, %v516_v57  ;;  %v293_v48 = vld [vmem:[#allocation5 + $0x438] sm:$0xff]  ;;  %v544_v43 = vld [vmem:[#allocation5 + $0xc10] sm:$0xff] }
 0x403   :  { %10579 = vmatpush1.bf16.msra.mxu0 %v14388_v60  ;;  %v14174_v60 = vcombine.low %v249_v41, %v253_v19  ;;  %v289_v19 = vld [vmem:[#allocation5 + $0x418] sm:$0xff] }
 0x404   :  { %10580 = vmatprep.subr.bf16.mxu0 %v14397_v32  ;;  %v14183_v32 = vcombine.high %v257_v49, %v261_v55 }
 0x405   :  { %10991 = vmatpush1.bf16.msra.mxu1 %v14142_v5  ;;  %v524_v5 = vld [vmem:[#allocation5 + $0xb70] sm:$0xff] }
 0x406   :  { %10992 = vmatprep.subr.bf16.mxu1 %v14151_v13  ;;  %v14436_v13 = vcombine.low %v512_v56, %v516_v57  ;;  %v14445_v9 = vcombine.high %v520_v4, %v524_v5  ;;  %v301_v56 = vld [vmem:[#allocation5 + $0x478] sm:$0xff]  ;;  %v552_v57 = vld [vmem:[#allocation5 + $0xc50] sm:$0xff] }
 0x407   :  { %10581 = vmatpush1.bf16.msra.mxu0 %v14396_v6  ;;  %v14182_v6 = vcombine.low %v257_v49, %v261_v55  ;;  %v297_v55 = vld [vmem:[#allocation5 + $0x458] sm:$0xff] }
 0x408   :  { %10582 = vmatprep.subr.bf16.mxu0 %v14405_v8  ;;  %v14191_v8 = vcombine.high %v265_v1, %v269_v2 }
 0x409   :  { %10993 = vmatpush1.bf16.msra.mxu1 %v14150_v18  ;;  %v532_v18 = vld [vmem:[#allocation5 + $0xbb0] sm:$0xff] }
 0x40a   :  { %10994 = vmatprep.subr.bf16.mxu1 %v14159_v58  ;;  %v14444_v58 = vcombine.low %v520_v4, %v524_v5  ;;  %v14453_v27 = vcombine.high %v528_v15, %v532_v18  ;;  %v309_v4 = vld [vmem:[#allocation5 + $0x4b8] sm:$0xff]  ;;  %v560_v5 = vld [vmem:[#allocation5 + $0xc90] sm:$0xff] }
 0x40b   :  { %10583 = vmatpush1.bf16.msra.mxu0 %v14404_v25  ;;  %v14190_v25 = vcombine.low %v265_v1, %v269_v2  ;;  %v305_v2 = vld [vmem:[#allocation5 + $0x498] sm:$0xff] }
 0x40c   :  { %10584 = vmatprep.subr.bf16.mxu0 %v14413_v26  ;;  %v14199_v26 = vcombine.high %v273_v10, %v277_v11 }
 0x40d   :  { %10995 = vmatpush1.bf16.msra.mxu1 %v14158_v35  ;;  %v540_v35 = vld [vmem:[#allocation5 + $0xbf0] sm:$0xff] }
 0x40e   :  { %10996 = vmatprep.subr.bf16.mxu1 %v14167_v37  ;;  %v14452_v37 = vcombine.low %v528_v15, %v532_v18  ;;  %v14461_v41 = vcombine.high %v536_v31, %v540_v35  ;;  %v313_v15 = vld [vmem:[#allocation5 + $0x4d8] sm:$0xff] }
 0x40f   :  { %10585 = vmatpush1.bf16.msra.mxu0 %v14412_v36  ;;  %v14198_v36 = vcombine.low %v273_v10, %v277_v11  ;;  %v1696_v10 = vlaneseq  ;;  %v317_v18 = vld [vmem:[#allocation5 + $0x4f8] sm:$0xff] }
 0x410   :  { %10586 = vmatprep.subr.bf16.mxu0 %v14421_v39  ;;  %v14207_v39 = vcombine.high %v281_v29, %v285_v20 }
 0x411   :  { %10997 = vmatpush1.bf16.msra.mxu1 %v14166_v45  ;;  %v548_v45 = vld [vmem:[#allocation5 + $0xc30] sm:$0xff] }
 0x412   :  { %10998 = vmatprep.subr.bf16.mxu1 %v14175_v22  ;;  %v14460_v22 = vcombine.low %v536_v31, %v540_v35  ;;  %v14469_v49 = vcombine.high %v544_v43, %v548_v45  ;;  %v321_v31 = vld [vmem:[#allocation5 + $0x518] sm:$0xff] }
 0x413   :  { %10587 = vmatpush1.bf16.msra.mxu0 %v14420_v46  ;;  %v14206_v46 = vcombine.low %v281_v29, %v285_v20  ;;  %v17321_v29 = vshrl.u32 %v1696_v10, 7  ;;  %v325_v35 = vld [vmem:[#allocation5 + $0x538] sm:$0xff] }
 0x414   :  { %10588 = vmatprep.subr.bf16.mxu0 %v14429_v47  ;;  %v14215_v47 = vcombine.high %v289_v19, %v293_v48  ;;  %v345_v10 = vld [vmem:[#allocation5 + $0x5d8] sm:$0xff] }
 0x415   :  { %10999 = vmatpush1.bf16.msra.mxu1 %v14174_v60  ;;  %v556_v60 = vld [vmem:[#allocation5 + $0xc70] sm:$0xff] }
 0x416   :  { %11000 = vmatprep.subr.bf16.mxu1 %v14183_v32  ;;  %v14468_v32 = vcombine.low %v544_v43, %v548_v45  ;;  %v14477_v1 = vcombine.high %v552_v57, %v556_v60  ;;  %v329_v43 = vld [vmem:[#allocation5 + $0x558] sm:$0xff] }
 0x417   :  { %10589 = vmatpush1.bf16.msra.mxu0 %v14428_v63  ;;  %v14214_v63 = vcombine.low %v289_v19, %v293_v48  ;;  %v17324_v19 = vsub.s32 0, %v17321_v29  ;;  %v333_v45 = vld [vmem:[#allocation5 + $0x578] sm:$0xff] }
 0x418   :  { %10590 = vmatprep.subr.bf16.mxu0 %v14437_v12  ;;  %v14223_v12 = vcombine.high %v297_v55, %v301_v56 }
 0x419   :  { %11001 = vmatpush1.bf16.msra.mxu1 %v14182_v6  ;;  %v564_v6 = vld [vmem:[#allocation5 + $0xcb0] sm:$0xff] }
 0x41a   :  { %11002 = vmatprep.subr.bf16.mxu1 %v14191_v8  ;;  %v14476_v8 = vcombine.low %v552_v57, %v556_v60  ;;  %v14485_v11 = vcombine.high %v560_v5, %v564_v6  ;;  %v14255_v57 = vcombine.high %v329_v43, %v333_v45 }
 0x41b   :  { %10591 = vmatpush1.bf16.msra.mxu0 %v14436_v13  ;;  %v14222_v13 = vcombine.low %v297_v55, %v301_v56  ;;  %v14246_v55 = vcombine.low %v321_v31, %v325_v35 }
 0x41c   :  { %10592 = vmatprep.subr.bf16.mxu0 %v14445_v9  ;;  %v14231_v9 = vcombine.high %v305_v2, %v309_v4 }
 0x41d   :  { %11003 = vmatpush1.bf16.msra.mxu1 %v14190_v25  ;;  %v568_v25 = vld [vmem:[#allocation5 + $0xcd0] sm:$0xff] }
 0x41e   :  { %11004 = vmatprep.subr.bf16.mxu1 %v14199_v26  ;;  %v14484_v26 = vcombine.low %v560_v5, %v564_v6  ;;  %v14254_v5 = vcombine.low %v329_v43, %v333_v45 }
 0x41f   :  { %10593 = vmatpush1.bf16.msra.mxu0 %v14444_v58  ;;  %v572_v58 = vld [vmem:[#allocation5 + $0xcf0] sm:$0xff] }
 0x420   :  { %10594 = vmatprep.subr.bf16.mxu0 %v14453_v27  ;;  %v14239_v27 = vcombine.high %v313_v15, %v317_v18  ;;  %v14493_v20 = vcombine.high %v568_v25, %v572_v58 }
 0x421   :  { %11005 = vmatpush1.bf16.msra.mxu1 %v14198_v36  ;;  %v576_v36 = vld [vmem:[#allocation5 + $0xd10] sm:$0xff] }
 0x422   :  { %11006 = vmatprep.subr.bf16.mxu1 %v14207_v39  ;;  %v14238_v39 = vcombine.low %v313_v15, %v317_v18 }
 0x423   :  { %10595 = vmatpush1.bf16.msra.mxu0 %v14452_v37  ;;  %v580_v37 = vld [vmem:[#allocation5 + $0xd30] sm:$0xff] }
 0x424   :  { %10596 = vmatprep.subr.bf16.mxu0 %v14461_v41  ;;  %v14492_v41 = vcombine.low %v568_v25, %v572_v58  ;;  %v14501_v48 = vcombine.high %v576_v36, %v580_v37  ;;  %v14500_v56 = vcombine.low %v576_v36, %v580_v37  ;;  %v600_v25 = vld [vmem:[#allocation5 + $0xdd0] sm:$0xff] }
 0x425   :  { %11007 = vmatpush1.bf16.msra.mxu1 %v14206_v46  ;;  %v1694_v46 = vld [vmem:[#allocation7] sm:$0xff]  ;;  %v604_v58 = vld [vmem:[#allocation5 + $0xdf0] sm:$0xff] }
 0x426   :  { %11017 = vmatprep.subr.bf16.mxu1 %v14215_v47  ;;  %v584_v47 = vld [vmem:[#allocation5 + $0xd50] sm:$0xff]  ;;  %v1699_v60 = vrot.slane %v1694_v46, %v17324_v19  ;;  %v14525_v37 = vcombine.high %v600_v25, %v604_v58  ;;  %v14524_v43 = vcombine.low %v600_v25, %v604_v58 }
 0x427   :  { %10597 = vmatpush1.bf16.msra.mxu0 %v14460_v22  ;;  %v17327_v22 = vsub.s32 1, %v17321_v29 }
 0x428   :  { %10607 = vmatprep.subr.bf16.mxu0 %v14469_v49  ;;  %11009 = vmatmul.mubr.bf16.vlgmr.msra.gmra.mrb[8].mxu1 %v17155_v16  ;;  %v14230_v16 = vcombine.low %v305_v2, %v309_v4  ;;  %v588_v49 = vld [vmem:[#allocation5 + $0xd70] sm:$0xff] }
 0x429   :  { %11018 = vmatpush1.bf16.msra.mxu1 %v14214_v63  ;;  %11049 = vmatprep.mubr.bf16.mxu1 %v17149_v61  ;;  %v14247_v61 = vcombine.high %v321_v31, %v325_v35  ;;  %v14509_v63 = vcombine.high %v584_v47, %v588_v49  ;;  %v592_v2 = vld [vmem:[#allocation5 + $0xd90] sm:$0xff]  ;;  %v14508_v6 = vcombine.low %v584_v47, %v588_v49  ;;  %v361_v47 = vld [vmem:[#allocation5 + $0x658] sm:$0xff] }
 0x42a   :  { %10599 = vmatmul.mubr.bf16.vlgmr.msra.gmra.mrb[4].mxu0 %v17175_v34  ;;  %11019 = vmatprep.subr.bf16.mxu1 %v14223_v12  ;;  %v341_v12 = vld [vmem:[#allocation5 + $0x5b8] sm:$0xff]  ;;  %v596_v4 = vld [vmem:[#allocation5 + $0xdb0] sm:$0xff] }
 0x42b   :  { %10608 = vmatpush1.bf16.msra.mxu0 %v14468_v32  ;;  %10639 = vmatprep.mubr.bf16.mxu0 %v17179_v42  ;;  %v337_v32 = vld [vmem:[#allocation5 + $0x598] sm:$0xff]  ;;  %v14516_v35 = vcombine.low %v592_v2, %v596_v4 }
 0x42c   :  { %10609 = vmatprep.subr.bf16.mxu0 %v14477_v1  ;;  %v1703_v1 = vrot.slane %v1694_v46, %v17327_v22  ;;  %v365_v49 = vld [vmem:[#allocation5 + $0x678] sm:$0xff] }
 0x42d   :  { %11020 = vmatpush1.bf16.msra.mxu1 %v14222_v13  ;;  %v14263_v13 = vcombine.high %v337_v32, %v341_v12 }
 0x42e   :  { %11021 = vmatprep.subr.bf16.mxu1 %v14231_v9  ;;  %v14517_v9 = vcombine.high %v592_v2, %v596_v4  ;;  %v9537_v15 = vadd.f32 %v17215_v7, %v1703_v1  ;;  %v357_v7 = vld [vmem:[#allocation5 + $0x638] sm:$0xff]  ;;  %v624_v2 = vld [vmem:[#allocation5 + $0xe90] sm:$0xff] }
 0x42f   :  { %10610 = vmatpush1.bf16.msra.mxu0 %v14476_v8  ;;  %v9535_v8 = vadd.f32 %v17213_v3, %v1699_v60  ;;  %v373_v1 = vld [vmem:[#allocation5 + $0x6b8] sm:$0xff]  ;;  %v628_v4 = vld [vmem:[#allocation5 + $0xeb0] sm:$0xff] }
 0x430   :  { %10611 = vmatprep.subr.bf16.mxu0 %v14485_v11  ;;  %v349_v11 = vld [vmem:[#allocation5 + $0x5f8] sm:$0xff]  ;;  %v14548_v25 = vcombine.low %v624_v2, %v628_v4 }
 0x431   :  { %11022 = vmatpush1.bf16.msra.mxu1 %v14230_v16  ;;  %v14271_v3 = vcombine.high %v345_v10, %v349_v11 }
 0x432   :  { %11023 = vmatprep.subr.bf16.mxu1 %v14239_v27  ;;  %v14262_v27 = vcombine.low %v337_v32, %v341_v12  ;;  %v369_v12 = vld [vmem:[#allocation5 + $0x698] sm:$0xff] }
 0x433   :  { %10612 = vmatpush1.bf16.msra.mxu0 %v14484_v26 }
 0x434   :  { %10613 = vmatprep.subr.bf16.mxu0 %v14493_v20 }
 0x435   :  { %11024 = vmatpush1.bf16.msra.mxu1 %v14238_v39  ;;  %v353_v39 = vld [vmem:[#allocation5 + $0x618] sm:$0xff] }
 0x436   :  { %11025 = vmatprep.subr.bf16.mxu1 %v14247_v61  ;;  %v612_v61 = vld [vmem:[#allocation5 + $0xe30] sm:$0xff]  ;;  %v14279_v45 = vcombine.high %v353_v39, %v357_v7 }
 0x437   :  { %10614 = vmatpush1.bf16.msra.mxu0 %v14492_v41  ;;  %v608_v41 = vld [vmem:[#allocation5 + $0xe10] sm:$0xff] }
 0x438   :  { %10615 = vmatprep.subr.bf16.mxu0 %v14501_v48  ;;  %v14270_v48 = vcombine.low %v345_v10, %v349_v11  ;;  %v14533_v46 = vcombine.high %v608_v41, %v612_v61  ;;  %v14532_v60 = vcombine.low %v608_v41, %v612_v61  ;;  %v381_v10 = vld [vmem:[#allocation5 + $0x6f8] sm:$0xff]  ;;  %v632_v11 = vld [vmem:[#allocation5 + $0xed0] sm:$0xff] }
 0x439   :  { %11026 = vmatpush1.bf16.msra.mxu1 %v14246_v55  ;;  %v616_v55 = vld [vmem:[#allocation5 + $0xe50] sm:$0xff]  ;;  %v393_v41 = vld [vmem:[#allocation5 + $0x758] sm:$0xff] }
 0x43a   :  { %11027 = vmatprep.subr.bf16.mxu1 %v14255_v57  ;;  %v14278_v57 = vcombine.low %v353_v39, %v357_v7  ;;  %v397_v61 = vld [vmem:[#allocation5 + $0x778] sm:$0xff] }
 0x43b   :  { %10616 = vmatpush1.bf16.msra.mxu0 %v14500_v56  ;;  %v620_v56 = vld [vmem:[#allocation5 + $0xe70] sm:$0xff] }
 0x43c   :  { %10617 = vmatprep.subr.bf16.mxu0 %v14509_v63  ;;  %v14287_v63 = vcombine.high %v361_v47, %v365_v49  ;;  %v14541_v32 = vcombine.high %v616_v55, %v620_v56 }
 0x43d   :  { %v9985_v18 = vpop.f32.mrb[0].mxu0  ;;  %11028 = vmatpush1.bf16.msra.mxu1 %v14254_v5  ;;  %v14286_v5 = vcombine.low %v361_v47, %v365_v49  ;;  %v14319_v47 = vcombine.high %v393_v41, %v397_v61 }
 0x43e   :  { %v17333_v16 = vadd.f32 %v9985_v18, %v9535_v8  ;;  %v9987_v26 = vpop.f32.mrb[1].mxu0  ;;  %11029 = vmatprep.subr.bf16.mxu1 %v14263_v13  ;;  %v14295_v13 = vcombine.high %v369_v12, %v373_v1  ;;  %v14549_v8 = vcombine.high %v624_v2, %v628_v4  ;;  %v14294_v18 = vcombine.low %v369_v12, %v373_v1  ;;  %v409_v2 = vld [vmem:[#allocation5 + $0x7d8] sm:$0xff] }
 0x43f   :  { %v17335_v20 = vadd.f32 %v9987_v26, %v9537_v15  ;;  %v9989_v31 = vpop.f32.mrb[2].mxu0  ;;  %10618 = vmatpush1.bf16.msra.mxu0 %v14508_v6  ;;  %v14540_v6 = vcombine.low %v616_v55, %v620_v56  ;;  %v636_v15 = vld [vmem:[#allocation5 + $0xef0] sm:$0xff]  ;;  %v401_v55 = vld [vmem:[#allocation5 + $0x798] sm:$0xff] }
 0x440   :  { %v9990_v36 = vpop.f32.mrb[3].mxu0  ;;  %10619 = vmatprep.subr.bf16.mxu0 %v14517_v9  ;;  %v377_v9 = vld [vmem:[#allocation5 + $0x6d8] sm:$0xff]  ;;  %v14557_v26 = vcombine.high %v632_v11, %v636_v15 }
 0x441   :  { %11030 = vmatpush1.bf16.msra.mxu1 %v14262_v27  ;;  %v14303_v58 = vcombine.high %v377_v9, %v381_v10  ;;  %v385_v27 = vld [vmem:[#allocation5 + $0x718] sm:$0xff]  ;;  %v14302_v36 = vcombine.low %v377_v9, %v381_v10 }
 0x442   :  { %11031 = vmatprep.subr.bf16.mxu1 %v14271_v3  ;;  %v389_v31 = vld [vmem:[#allocation5 + $0x738] sm:$0xff]  ;;  %v644_v3 = vld [vmem:[#allocation5 + $0xf30] sm:$0xff] }
 0x443   :  { %10620 = vmatpush1.bf16.msra.mxu0 %v14516_v35  ;;  %v640_v35 = vld [vmem:[#allocation5 + $0xf10] sm:$0xff]  ;;  %v14311_v39 = vcombine.high %v385_v27, %v389_v31  ;;  %v405_v56 = vld [vmem:[#allocation5 + $0x7b8] sm:$0xff] }
 0x444   :  { %10621 = vmatprep.subr.bf16.mxu0 %v14525_v37  ;;  %v14556_v37 = vcombine.low %v632_v11, %v636_v15  ;;  %v14565_v7 = vcombine.high %v640_v35, %v644_v3  ;;  %v14327_v12 = vcombine.high %v401_v55, %v405_v56  ;;  %v413_v4 = vld [vmem:[#allocation5 + $0x7f8] sm:$0xff] }
 0x445   :  { %11032 = vmatpush1.bf16.msra.mxu1 %v14270_v48  ;;  %v648_v48 = vld [vmem:[#allocation5 + $0xf50] sm:$0xff]  ;;  %v14335_v9 = vcombine.high %v409_v2, %v413_v4  ;;  %v417_v11 = vld [vmem:[#allocation5 + $0x818] sm:$0xff] }
 0x446   :  { %11033 = vmatprep.subr.bf16.mxu1 %v14279_v45  ;;  %v14310_v45 = vcombine.low %v385_v27, %v389_v31  ;;  %v421_v15 = vld [vmem:[#allocation5 + $0x838] sm:$0xff] }
 0x447   :  { %10622 = vmatpush1.bf16.msra.mxu0 %v14524_v43  ;;  %v652_v43 = vld [vmem:[#allocation5 + $0xf70] sm:$0xff]  ;;  %v14343_v27 = vcombine.high %v417_v11, %v421_v15 }
 0x448   :  { %10623 = vmatprep.subr.bf16.mxu0 %v14533_v46  ;;  %v14564_v46 = vcombine.low %v640_v35, %v644_v3  ;;  %v14573_v49 = vcombine.high %v648_v48, %v652_v43  ;;  %v425_v35 = vld [vmem:[#allocation5 + $0x858] sm:$0xff] }
 0x449   :  { %11034 = vmatpush1.bf16.msra.mxu1 %v14278_v57  ;;  %v656_v57 = vld [vmem:[#allocation5 + $0xf90] sm:$0xff]  ;;  %v429_v3 = vld [vmem:[#allocation5 + $0x878] sm:$0xff] }
 0x44a   :  { %11035 = vmatprep.subr.bf16.mxu1 %v14287_v63  ;;  %v14318_v63 = vcombine.low %v393_v41, %v397_v61  ;;  %v14351_v41 = vcombine.high %v425_v35, %v429_v3 }
 0x44b   :  { %10624 = vmatpush1.bf16.msra.mxu0 %v14532_v60  ;;  %v660_v60 = vld [vmem:[#allocation5 + $0xfb0] sm:$0xff] }
 0x44c   :  { %10625 = vmatprep.subr.bf16.mxu0 %v14541_v32  ;;  %v14572_v32 = vcombine.low %v648_v48, %v652_v43  ;;  %v14581_v1 = vcombine.high %v656_v57, %v660_v60  ;;  %v433_v48 = vld [vmem:[#allocation5 + $0x898] sm:$0xff] }
 0x44d   :  { %11036 = vmatpush1.bf16.msra.mxu1 %v14286_v5  ;;  %v664_v5 = vld [vmem:[#allocation5 + $0xfd0] sm:$0xff]  ;;  %v437_v43 = vld [vmem:[#allocation5 + $0x8b8] sm:$0xff] }
 0x44e   :  { %11037 = vmatprep.subr.bf16.mxu1 %v14295_v13  ;;  %v14326_v13 = vcombine.low %v401_v55, %v405_v56  ;;  %v14359_v55 = vcombine.high %v433_v48, %v437_v43 }
 0x44f   :  { %10626 = vmatpush1.bf16.msra.mxu0 %v14540_v6  ;;  %v668_v6 = vld [vmem:[#allocation5 + $0xff0] sm:$0xff] }
 0x450   :  { %10627 = vmatprep.subr.bf16.mxu0 %v14549_v8  ;;  %v14580_v8 = vcombine.low %v656_v57, %v660_v60  ;;  %v14589_v10 = vcombine.high %v664_v5, %v668_v6  ;;  %v441_v57 = vld [vmem:[#allocation5 + $0x8d8] sm:$0xff] }
 0x451   :  { %11038 = vmatpush1.bf16.msra.mxu1 %v14294_v18  ;;  %v672_v18 = vld [vmem:[#allocation5 + $0x1010] sm:$0xff]  ;;  %v445_v60 = vld [vmem:[#allocation5 + $0x8f8] sm:$0xff] }
 0x452   :  { %11039 = vmatprep.subr.bf16.mxu1 %v14303_v58  ;;  %v14334_v58 = vcombine.low %v409_v2, %v413_v4  ;;  %v449_v4 = vld [vmem:[#allocation5 + $0x918] sm:$0xff] }
 0x453   :  { %10628 = vmatpush1.bf16.msra.mxu0 %v14548_v25  ;;  %v676_v25 = vld [vmem:[#allocation5 + $0x1030] sm:$0xff] }
 0x454   :  { %10629 = vmatprep.subr.bf16.mxu0 %v14557_v26  ;;  %v14588_v26 = vcombine.low %v664_v5, %v668_v6  ;;  %v14597_v31 = vcombine.high %v672_v18, %v676_v25  ;;  %v453_v5 = vld [vmem:[#allocation5 + $0x938] sm:$0xff]  ;;  %v704_v6 = vld [vmem:[#allocation5 + $0x1110] sm:$0xff] }
 0x455   :  { %11040 = vmatpush1.bf16.msra.mxu1 %v14302_v36  ;;  %v680_v36 = vld [vmem:[#allocation5 + $0x1050] sm:$0xff] }
 0x456   :  { %11041 = vmatprep.subr.bf16.mxu1 %v14311_v39  ;;  %v14342_v39 = vcombine.low %v417_v11, %v421_v15  ;;  %v457_v11 = vld [vmem:[#allocation5 + $0x958] sm:$0xff] }
 0x457   :  { %10630 = vmatpush1.bf16.msra.mxu0 %v14556_v37  ;;  %v684_v37 = vld [vmem:[#allocation5 + $0x1070] sm:$0xff]  ;;  %v461_v15 = vld [vmem:[#allocation5 + $0x978] sm:$0xff] }
 0x458   :  { %10631 = vmatprep.subr.bf16.mxu0 %v14565_v7  ;;  %v14596_v7 = vcombine.low %v672_v18, %v676_v25  ;;  %v14605_v61 = vcombine.high %v680_v36, %v684_v37  ;;  %v712_v18 = vld [vmem:[#allocation5 + $0x1150] sm:$0xff] }
 0x459   :  { %11042 = vmatpush1.bf16.msra.mxu1 %v14310_v45  ;;  %v688_v45 = vld [vmem:[#allocation5 + $0x1090] sm:$0xff] }
 0x45a   :  { %11043 = vmatprep.subr.bf16.mxu1 %v14319_v47  ;;  %v14350_v47 = vcombine.low %v425_v35, %v429_v3  ;;  %v716_v25 = vld [vmem:[#allocation5 + $0x1170] sm:$0xff]  ;;  %v465_v35 = vld [vmem:[#allocation5 + $0x998] sm:$0xff] }
 0x45b   :  { %10632 = vmatpush1.bf16.msra.mxu0 %v14564_v46  ;;  %v692_v46 = vld [vmem:[#allocation5 + $0x10b0] sm:$0xff]  ;;  %v469_v3 = vld [vmem:[#allocation5 + $0x9b8] sm:$0xff] }
 0x45c   :  { %10633 = vmatprep.subr.bf16.mxu0 %v14573_v49  ;;  %v14604_v49 = vcombine.low %v680_v36, %v684_v37  ;;  %v14613_v56 = vcombine.high %v688_v45, %v692_v46  ;;  %v720_v36 = vld [vmem:[#allocation5 + $0x1190] sm:$0xff] }
 0x45d   :  { %11044 = vmatpush1.bf16.msra.mxu1 %v14318_v63  ;;  %v696_v63 = vld [vmem:[#allocation5 + $0x10d0] sm:$0xff] }
 0x45e   :  { %11045 = vmatprep.subr.bf16.mxu1 %v14327_v12  ;;  %v14612_v12 = vcombine.low %v688_v45, %v692_v46  ;;  %v724_v37 = vld [vmem:[#allocation5 + $0x11b0] sm:$0xff] }
 0x45f   :  { %10634 = vmatpush1.bf16.msra.mxu0 %v14572_v32  ;;  %v700_v32 = vld [vmem:[#allocation5 + $0x10f0] sm:$0xff] }
 0x460   :  { %10635 = vmatprep.subr.bf16.mxu0 %v14581_v1  ;;  %v14367_v1 = vcombine.high %v441_v57, %v445_v60  ;;  %v14621_v2 = vcombine.high %v696_v63, %v700_v32  ;;  %v728_v45 = vld [vmem:[#allocation5 + $0x11d0] sm:$0xff] }
 0x461   :  { %11046 = vmatpush1.bf16.msra.mxu1 %v14326_v13  ;;  %v708_v13 = vld [vmem:[#allocation5 + $0x1130] sm:$0xff] }
 0x462   :  { %11047 = vmatprep.subr.bf16.mxu1 %v14335_v9  ;;  %v14620_v9 = vcombine.low %v696_v63, %v700_v32  ;;  %v732_v46 = vld [vmem:[#allocation5 + $0x11f0] sm:$0xff] }
 0x463   :  { %10636 = vmatpush1.bf16.msra.mxu0 %v14580_v8  ;;  %v14366_v8 = vcombine.low %v441_v57, %v445_v60  ;;  %v481_v57 = vld [vmem:[#allocation5 + $0xa18] sm:$0xff]  ;;  %v736_v63 = vld [vmem:[#allocation5 + $0x1210] sm:$0xff] }
 0x464   :  { %10637 = vmatprep.subr.bf16.mxu0 %v14589_v10  ;;  %v14375_v10 = vcombine.high %v449_v4, %v453_v5  ;;  %v485_v60 = vld [vmem:[#allocation5 + $0xa38] sm:$0xff]  ;;  %v740_v32 = vld [vmem:[#allocation5 + $0x1230] sm:$0xff] }
 0x465   :  { %11048 = vmatpush1.bf16.msra.mxu1 %v14334_v58  ;;  %v14374_v58 = vcombine.low %v449_v4, %v453_v5  ;;  %v489_v4 = vld [vmem:[#allocation5 + $0xa58] sm:$0xff] }
 0x466   :  { %11058 = vmatprep.subr.bf16.mxu1 %v14343_v27  ;;  %v14383_v27 = vcombine.high %v457_v11, %v461_v15  ;;  %v493_v5 = vld [vmem:[#allocation5 + $0xa78] sm:$0xff] }
 0x467   :  { %10638 = vmatpush1.bf16.msra.mxu0 %v14588_v26  ;;  %v14628_v26 = vcombine.low %v704_v6, %v708_v13 }
 0x468   :  { %10648 = vmatprep.subr.bf16.mxu0 %v14597_v31  ;;  %11050 = vmatmul.mubr.bf16.vlgmr.msra.gmra.mrb[8].mxu1 %v17161_v21  ;;  %v14358_v21 = vcombine.low %v433_v48, %v437_v43  ;;  %v14637_v31 = vcombine.high %v712_v18, %v716_v25  ;;  %v473_v48 = vld [vmem:[#allocation5 + $0x9d8] sm:$0xff] }
 0x469   :  { %11059 = vmatpush1.bf16.msra.mxu1 %v14342_v39  ;;  %11090 = vmatprep.mubr.bf16.mxu1 %v17165_v28  ;;  %v14629_v28 = vcombine.high %v704_v6, %v708_v13  ;;  %v14382_v39 = vcombine.low %v457_v11, %v461_v15  ;;  %v477_v43 = vld [vmem:[#allocation5 + $0x9f8] sm:$0xff]  ;;  %v744_v6 = vld [vmem:[#allocation5 + $0x1250] sm:$0xff] }
 0x46a   :  { %10640 = vmatmul.mubr.bf16.vlgmr.msra.gmra.mrb[4].mxu0 %v17189_v52  ;;  %11060 = vmatprep.subr.bf16.mxu1 %v14351_v41  ;;  %v14391_v41 = vcombine.high %v465_v35, %v469_v3  ;;  %v748_v13 = vld [vmem:[#allocation5 + $0x1270] sm:$0xff]  ;;  %v497_v11 = vld [vmem:[#allocation5 + $0xa98] sm:$0xff] }
 0x46b   :  { %10649 = vmatpush1.bf16.msra.mxu0 %v14596_v7  ;;  %10680 = vmatprep.mubr.bf16.mxu0 %v17193_v0  ;;  %v14636_v7 = vcombine.low %v712_v18, %v716_v25  ;;  %v501_v15 = vld [vmem:[#allocation5 + $0xab8] sm:$0xff]  ;;  %v752_v18 = vld [vmem:[#allocation5 + $0x1290] sm:$0xff] }
 0x46c   :  { %10650 = vmatprep.subr.bf16.mxu0 %v14605_v61  ;;  %v14645_v61 = vcombine.high %v720_v36, %v724_v37  ;;  %v756_v25 = vld [vmem:[#allocation5 + $0x12b0] sm:$0xff] }
 0x46d   :  { %11061 = vmatpush1.bf16.msra.mxu1 %v14350_v47  ;;  %v14390_v47 = vcombine.low %v465_v35, %v469_v3  ;;  %v505_v35 = vld [vmem:[#allocation5 + $0xad8] sm:$0xff] }
 0x46e   :  { %11062 = vmatprep.subr.bf16.mxu1 %v14359_v55  ;;  %v14399_v55 = vcombine.high %v473_v48, %v477_v43  ;;  %v509_v3 = vld [vmem:[#allocation5 + $0xaf8] sm:$0xff] }
 0x46f   :  { %10651 = vmatpush1.bf16.msra.mxu0 %v14604_v49  ;;  %v14644_v49 = vcombine.low %v720_v36, %v724_v37  ;;  %v760_v36 = vld [vmem:[#allocation5 + $0x12d0] sm:$0xff] }
 0x470   :  { %10652 = vmatprep.subr.bf16.mxu0 %v14613_v56  ;;  %v14653_v56 = vcombine.high %v728_v45, %v732_v46  ;;  %v764_v37 = vld [vmem:[#allocation5 + $0x12f0] sm:$0xff] }
 0x471   :  { %11063 = vmatpush1.bf16.msra.mxu1 %v14358_v21  ;;  %v14398_v21 = vcombine.low %v473_v48, %v477_v43  ;;  %v513_v48 = vld [vmem:[#allocation5 + $0xb18] sm:$0xff] }
 0x472   :  { %11064 = vmatprep.subr.bf16.mxu1 %v14367_v1  ;;  %v14407_v1 = vcombine.high %v481_v57, %v485_v60  ;;  %v517_v43 = vld [vmem:[#allocation5 + $0xb38] sm:$0xff] }
 0x473   :  { %10653 = vmatpush1.bf16.msra.mxu0 %v14612_v12  ;;  %v14652_v12 = vcombine.low %v728_v45, %v732_v46  ;;  %v768_v45 = vld [vmem:[#allocation5 + $0x1310] sm:$0xff] }
 0x474   :  { %10654 = vmatprep.subr.bf16.mxu0 %v14621_v2  ;;  %v14661_v2 = vcombine.high %v736_v63, %v740_v32  ;;  %v772_v46 = vld [vmem:[#allocation5 + $0x1330] sm:$0xff] }
 0x475   :  { %11065 = vmatpush1.bf16.msra.mxu1 %v14366_v8  ;;  %v14406_v8 = vcombine.low %v481_v57, %v485_v60  ;;  %v521_v57 = vld [vmem:[#allocation5 + $0xb58] sm:$0xff] }
 0x476   :  { %11066 = vmatprep.subr.bf16.mxu1 %v14375_v10  ;;  %v14415_v10 = vcombine.high %v489_v4, %v493_v5  ;;  %v525_v60 = vld [vmem:[#allocation5 + $0xb78] sm:$0xff] }
 0x477   :  { %10655 = vmatpush1.bf16.msra.mxu0 %v14620_v9  ;;  %v14660_v9 = vcombine.low %v736_v63, %v740_v32  ;;  %v776_v63 = vld [vmem:[#allocation5 + $0x1350] sm:$0xff] }
 0x478   :  { %10656 = vmatprep.subr.bf16.mxu0 %v14629_v28  ;;  %v14669_v28 = vcombine.high %v744_v6, %v748_v13  ;;  %v780_v32 = vld [vmem:[#allocation5 + $0x1370] sm:$0xff] }
 0x479   :  { %11067 = vmatpush1.bf16.msra.mxu1 %v14374_v58  ;;  %v14414_v58 = vcombine.low %v489_v4, %v493_v5  ;;  %v529_v4 = vld [vmem:[#allocation5 + $0xb98] sm:$0xff] }
 0x47a   :  { %11068 = vmatprep.subr.bf16.mxu1 %v14383_v27  ;;  %v14423_v27 = vcombine.high %v497_v11, %v501_v15  ;;  %v533_v5 = vld [vmem:[#allocation5 + $0xbb8] sm:$0xff] }
 0x47b   :  { %10657 = vmatpush1.bf16.msra.mxu0 %v14628_v26  ;;  %v14668_v26 = vcombine.low %v744_v6, %v748_v13  ;;  %v784_v6 = vld [vmem:[#allocation5 + $0x1390] sm:$0xff] }
 0x47c   :  { %10658 = vmatprep.subr.bf16.mxu0 %v14637_v31  ;;  %v14677_v31 = vcombine.high %v752_v18, %v756_v25  ;;  %v788_v13 = vld [vmem:[#allocation5 + $0x13b0] sm:$0xff] }
 0x47d   :  { %11069 = vmatpush1.bf16.msra.mxu1 %v14382_v39  ;;  %v14422_v39 = vcombine.low %v497_v11, %v501_v15  ;;  %v537_v11 = vld [vmem:[#allocation5 + $0xbd8] sm:$0xff] }
 0x47e   :  { %11070 = vmatprep.subr.bf16.mxu1 %v14391_v41  ;;  %v14431_v41 = vcombine.high %v505_v35, %v509_v3  ;;  %v541_v15 = vld [vmem:[#allocation5 + $0xbf8] sm:$0xff] }
 0x47f   :  { %10659 = vmatpush1.bf16.msra.mxu0 %v14636_v7  ;;  %v14676_v7 = vcombine.low %v752_v18, %v756_v25  ;;  %v792_v18 = vld [vmem:[#allocation5 + $0x13d0] sm:$0xff] }
 0x480   :  { %10660 = vmatprep.subr.bf16.mxu0 %v14645_v61  ;;  %v14685_v61 = vcombine.high %v760_v36, %v764_v37  ;;  %v796_v25 = vld [vmem:[#allocation5 + $0x13f0] sm:$0xff] }
 0x481   :  { %11071 = vmatpush1.bf16.msra.mxu1 %v14390_v47  ;;  %v14430_v47 = vcombine.low %v505_v35, %v509_v3  ;;  %v545_v35 = vld [vmem:[#allocation5 + $0xc18] sm:$0xff] }
 0x482   :  { %11072 = vmatprep.subr.bf16.mxu1 %v14399_v55  ;;  %v14439_v55 = vcombine.high %v513_v48, %v517_v43  ;;  %v549_v3 = vld [vmem:[#allocation5 + $0xc38] sm:$0xff] }
 0x483   :  { %10661 = vmatpush1.bf16.msra.mxu0 %v14644_v49  ;;  %v14684_v49 = vcombine.low %v760_v36, %v764_v37  ;;  %v800_v36 = vld [vmem:[#allocation5 + $0x1410] sm:$0xff] }
 0x484   :  { %10662 = vmatprep.subr.bf16.mxu0 %v14653_v56  ;;  %v14693_v56 = vcombine.high %v768_v45, %v772_v46  ;;  %v804_v37 = vld [vmem:[#allocation5 + $0x1430] sm:$0xff] }
 0x485   :  { %11073 = vmatpush1.bf16.msra.mxu1 %v14398_v21  ;;  %v14438_v21 = vcombine.low %v513_v48, %v517_v43  ;;  %v553_v48 = vld [vmem:[#allocation5 + $0xc58] sm:$0xff] }
 0x486   :  { %11074 = vmatprep.subr.bf16.mxu1 %v14407_v1  ;;  %v14447_v1 = vcombine.high %v521_v57, %v525_v60  ;;  %v557_v43 = vld [vmem:[#allocation5 + $0xc78] sm:$0xff] }
 0x487   :  { %10663 = vmatpush1.bf16.msra.mxu0 %v14652_v12  ;;  %v14692_v12 = vcombine.low %v768_v45, %v772_v46  ;;  %v808_v45 = vld [vmem:[#allocation5 + $0x1450] sm:$0xff] }
 0x488   :  { %10664 = vmatprep.subr.bf16.mxu0 %v14661_v2  ;;  %v14701_v2 = vcombine.high %v776_v63, %v780_v32  ;;  %v812_v46 = vld [vmem:[#allocation5 + $0x1470] sm:$0xff] }
 0x489   :  { %11075 = vmatpush1.bf16.msra.mxu1 %v14406_v8  ;;  %v14446_v8 = vcombine.low %v521_v57, %v525_v60  ;;  %v561_v57 = vld [vmem:[#allocation5 + $0xc98] sm:$0xff] }
 0x48a   :  { %11076 = vmatprep.subr.bf16.mxu1 %v14415_v10  ;;  %v14455_v10 = vcombine.high %v529_v4, %v533_v5  ;;  %v565_v60 = vld [vmem:[#allocation5 + $0xcb8] sm:$0xff] }
 0x48b   :  { %10665 = vmatpush1.bf16.msra.mxu0 %v14660_v9  ;;  %v14700_v9 = vcombine.low %v776_v63, %v780_v32  ;;  %v816_v63 = vld [vmem:[#allocation5 + $0x1490] sm:$0xff] }
 0x48c   :  { %10666 = vmatprep.subr.bf16.mxu0 %v14669_v28  ;;  %v14709_v28 = vcombine.high %v784_v6, %v788_v13  ;;  %v820_v32 = vld [vmem:[#allocation5 + $0x14b0] sm:$0xff] }
 0x48d   :  { %11077 = vmatpush1.bf16.msra.mxu1 %v14414_v58  ;;  %v14454_v58 = vcombine.low %v529_v4, %v533_v5  ;;  %v569_v4 = vld [vmem:[#allocation5 + $0xcd8] sm:$0xff] }
 0x48e   :  { %11078 = vmatprep.subr.bf16.mxu1 %v14423_v27  ;;  %v14463_v27 = vcombine.high %v537_v11, %v541_v15  ;;  %v573_v5 = vld [vmem:[#allocation5 + $0xcf8] sm:$0xff] }
 0x48f   :  { %10667 = vmatpush1.bf16.msra.mxu0 %v14668_v26  ;;  %v14708_v26 = vcombine.low %v784_v6, %v788_v13  ;;  %v824_v6 = vld [vmem:[#allocation5 + $0x14d0] sm:$0xff] }
 0x490   :  { %10668 = vmatprep.subr.bf16.mxu0 %v14677_v31  ;;  %v14717_v31 = vcombine.high %v792_v18, %v796_v25  ;;  %v828_v13 = vld [vmem:[#allocation5 + $0x14f0] sm:$0xff] }
 0x491   :  { %11079 = vmatpush1.bf16.msra.mxu1 %v14422_v39  ;;  %v14462_v39 = vcombine.low %v537_v11, %v541_v15  ;;  %v581_v11 = vld [vmem:[#allocation5 + $0xd38] sm:$0xff]  ;;  %v832_v15 = vld [vmem:[#allocation5 + $0x1510] sm:$0xff] }
 0x492   :  { %11080 = vmatprep.subr.bf16.mxu1 %v14431_v41  ;;  %v14471_v41 = vcombine.high %v545_v35, %v549_v3 }
 0x493   :  { %10669 = vmatpush1.bf16.msra.mxu0 %v14676_v7  ;;  %v14716_v7 = vcombine.low %v792_v18, %v796_v25  ;;  %v836_v18 = vld [vmem:[#allocation5 + $0x1530] sm:$0xff]  ;;  %v14494_v25 = vcombine.low %v569_v4, %v573_v5 }
 0x494   :  { %10670 = vmatprep.subr.bf16.mxu0 %v14685_v61  ;;  %v14725_v61 = vcombine.high %v800_v36, %v804_v37 }
 0x495   :  { %11081 = vmatpush1.bf16.msra.mxu1 %v14430_v47  ;;  %v14470_v47 = vcombine.low %v545_v35, %v549_v3  ;;  %v840_v35 = vld [vmem:[#allocation5 + $0x1550] sm:$0xff] }
 0x496   :  { %11082 = vmatprep.subr.bf16.mxu1 %v14439_v55  ;;  %v14479_v55 = vcombine.high %v553_v48, %v557_v43  ;;  %v844_v3 = vld [vmem:[#allocation5 + $0x1570] sm:$0xff] }
 0x497   :  { %10671 = vmatpush1.bf16.msra.mxu0 %v14684_v49  ;;  %v14724_v49 = vcombine.low %v800_v36, %v804_v37  ;;  %v14756_v37 = vcombine.low %v832_v15, %v836_v18 }
 0x498   :  { %10672 = vmatprep.subr.bf16.mxu0 %v14693_v56  ;;  %v14733_v56 = vcombine.high %v808_v45, %v812_v46 }
 0x499   :  { %11083 = vmatpush1.bf16.msra.mxu1 %v14438_v21  ;;  %v14478_v21 = vcombine.low %v553_v48, %v557_v43  ;;  %v848_v48 = vld [vmem:[#allocation5 + $0x1590] sm:$0xff] }
 0x49a   :  { %11084 = vmatprep.subr.bf16.mxu1 %v14447_v1  ;;  %v14487_v1 = vcombine.high %v561_v57, %v565_v60  ;;  %v852_v43 = vld [vmem:[#allocation5 + $0x15b0] sm:$0xff] }
 0x49b   :  { %10673 = vmatpush1.bf16.msra.mxu0 %v14692_v12  ;;  %v14732_v12 = vcombine.low %v808_v45, %v812_v46  ;;  %v14764_v46 = vcombine.low %v840_v35, %v844_v3 }
 0x49c   :  { %10674 = vmatprep.subr.bf16.mxu0 %v14701_v2  ;;  %v14741_v2 = vcombine.high %v816_v63, %v820_v32 }
 0x49d   :  { %11085 = vmatpush1.bf16.msra.mxu1 %v14446_v8  ;;  %v14740_v8 = vcombine.low %v816_v63, %v820_v32  ;;  %v856_v63 = vld [vmem:[#allocation5 + $0x15d0] sm:$0xff] }
 0x49e   :  { %11086 = vmatprep.subr.bf16.mxu1 %v14455_v10  ;;  %v14749_v10 = vcombine.high %v824_v6, %v828_v13  ;;  %v860_v32 = vld [vmem:[#allocation5 + $0x15f0] sm:$0xff] }
 0x49f   :  { %10675 = vmatpush1.bf16.msra.mxu0 %v14700_v9  ;;  %v14495_v9 = vcombine.high %v569_v4, %v573_v5  ;;  %v14781_v5 = vcombine.high %v856_v63, %v860_v32 }
 0x4a0   :  { %10676 = vmatprep.subr.bf16.mxu0 %v14709_v28  ;;  %v577_v28 = vld [vmem:[#allocation5 + $0xd18] sm:$0xff] }
 0x4a1   :  { %11087 = vmatpush1.bf16.msra.mxu1 %v14454_v58  ;;  %v14748_v58 = vcombine.low %v824_v6, %v828_v13  ;;  %v14502_v36 = vcombine.low %v577_v28, %v581_v11  ;;  %v609_v6 = vld [vmem:[#allocation5 + $0xe18] sm:$0xff] }
 0x4a2   :  { %11088 = vmatprep.subr.bf16.mxu1 %v14463_v27  ;;  %v585_v27 = vld [vmem:[#allocation5 + $0xd58] sm:$0xff] }
 0x4a3   :  { %10677 = vmatpush1.bf16.msra.mxu0 %v14708_v26  ;;  %v14503_v26 = vcombine.high %v577_v28, %v581_v11  ;;  %v613_v13 = vld [vmem:[#allocation5 + $0xe38] sm:$0xff] }
 0x4a4   :  { %10678 = vmatprep.subr.bf16.mxu0 %v14717_v31  ;;  %v589_v31 = vld [vmem:[#allocation5 + $0xd78] sm:$0xff]  ;;  %v14535_v28 = vcombine.high %v609_v6, %v613_v13 }
 0x4a5   :  { %11089 = vmatpush1.bf16.msra.mxu1 %v14462_v39  ;;  %v14511_v39 = vcombine.high %v585_v27, %v589_v31  ;;  %v14510_v45 = vcombine.low %v585_v27, %v589_v31 }
 0x4a6   :  { %11099 = vmatprep.subr.bf16.mxu1 %v14471_v41  ;;  %v593_v41 = vld [vmem:[#allocation5 + $0xd98] sm:$0xff] }
 0x4a7   :  { %10679 = vmatpush1.bf16.msra.mxu0 %v14716_v7  ;;  %v14765_v7 = vcombine.high %v840_v35, %v844_v3  ;;  %v625_v35 = vld [vmem:[#allocation5 + $0xe98] sm:$0xff] }
 0x4a8   :  { %10689 = vmatprep.subr.bf16.mxu0 %v14725_v61  ;;  %11091 = vmatmul.mubr.bf16.vlgmr.msra.gmra.mrb[8].mxu1 %v17175_v34  ;;  %v14486_v34 = vcombine.low %v561_v57, %v565_v60  ;;  %v597_v61 = vld [vmem:[#allocation5 + $0xdb8] sm:$0xff] }
 0x4a9   :  { %11100 = vmatpush1.bf16.msra.mxu1 %v14470_v47  ;;  %11131 = vmatprep.mubr.bf16.mxu1 %v17179_v42  ;;  %v14757_v42 = vcombine.high %v832_v15, %v836_v18  ;;  %v14519_v47 = vcombine.high %v593_v41, %v597_v61  ;;  %v605_v57 = vld [vmem:[#allocation5 + $0xdf8] sm:$0xff] }
 0x4aa   :  { %10681 = vmatmul.mubr.bf16.vlgmr.msra.gmra.mrb[4].mxu0 %v17203_v14  ;;  %11101 = vmatprep.subr.bf16.mxu1 %v14479_v55  ;;  %v14773_v55 = vcombine.high %v848_v48, %v852_v43  ;;  %v617_v15 = vld [vmem:[#allocation5 + $0xe58] sm:$0xff] }
 0x4ab   :  { %10690 = vmatpush1.bf16.msra.mxu0 %v14724_v49  ;;  %10721 = vmatprep.mubr.bf16.mxu0 %v17207_v23  ;;  %v621_v18 = vld [vmem:[#allocation5 + $0xe78] sm:$0xff] }
 0x4ac   :  { %10691 = vmatprep.subr.bf16.mxu0 %v14733_v56  ;;  %v601_v56 = vld [vmem:[#allocation5 + $0xdd8] sm:$0xff]  ;;  %v14543_v27 = vcombine.high %v617_v15, %v621_v18 }
 0x4ad   :  { %11102 = vmatpush1.bf16.msra.mxu1 %v14478_v21  ;;  %v14527_v4 = vcombine.high %v601_v56, %v605_v57  ;;  %v629_v3 = vld [vmem:[#allocation5 + $0xeb8] sm:$0xff] }
 0x4ae   :  { %11103 = vmatprep.subr.bf16.mxu1 %v14487_v1 }
 0x4af   :  { %10692 = vmatpush1.bf16.msra.mxu0 %v14732_v12  ;;  %v14518_v12 = vcombine.low %v593_v41, %v597_v61  ;;  %v14551_v41 = vcombine.high %v625_v35, %v629_v3 }
 0x4b0   :  { %10693 = vmatprep.subr.bf16.mxu0 %v14741_v2  ;;  %v14772_v2 = vcombine.low %v848_v48, %v852_v43  ;;  %v633_v48 = vld [vmem:[#allocation5 + $0xed8] sm:$0xff] }
 0x4b1   :  { %11104 = vmatpush1.bf16.msra.mxu1 %v14486_v34  ;;  %v864_v34 = vld [vmem:[#allocation5 + $0x1610] sm:$0xff]  ;;  %v637_v43 = vld [vmem:[#allocation5 + $0xef8] sm:$0xff] }
 0x4b2   :  { %11105 = vmatprep.subr.bf16.mxu1 %v14495_v9  ;;  %v14526_v9 = vcombine.low %v601_v56, %v605_v57  ;;  %v14559_v56 = vcombine.high %v633_v48, %v637_v43 }
 0x4b3   :  { %10694 = vmatpush1.bf16.msra.mxu0 %v14740_v8  ;;  %v868_v8 = vld [vmem:[#allocation5 + $0x1630] sm:$0xff] }
 0x4b4   :  { %10695 = vmatprep.subr.bf16.mxu0 %v14749_v10  ;;  %v14780_v10 = vcombine.low %v856_v63, %v860_v32  ;;  %v14789_v11 = vcombine.high %v864_v34, %v868_v8  ;;  %v641_v63 = vld [vmem:[#allocation5 + $0xf18] sm:$0xff] }
 0x4b5   :  { %11106 = vmatpush1.bf16.msra.mxu1 %v14494_v25  ;;  %v872_v25 = vld [vmem:[#allocation5 + $0x1650] sm:$0xff]  ;;  %v645_v32 = vld [vmem:[#allocation5 + $0xf38] sm:$0xff] }
 0x4b6   :  { %11107 = vmatprep.subr.bf16.mxu1 %v14503_v26  ;;  %v14534_v26 = vcombine.low %v609_v6, %v613_v13  ;;  %v649_v6 = vld [vmem:[#allocation5 + $0xf58] sm:$0xff] }
 0x4b7   :  { %10696 = vmatpush1.bf16.msra.mxu0 %v14748_v58  ;;  %v876_v58 = vld [vmem:[#allocation5 + $0x1670] sm:$0xff]  ;;  %v653_v13 = vld [vmem:[#allocation5 + $0xf78] sm:$0xff] }
 0x4b8   :  { %10697 = vmatprep.subr.bf16.mxu0 %v14757_v42  ;;  %v14788_v42 = vcombine.low %v864_v34, %v868_v8  ;;  %v14797_v31 = vcombine.high %v872_v25, %v876_v58  ;;  %v904_v34 = vld [vmem:[#allocation5 + $0x1750] sm:$0xff] }
 0x4b9   :  { %11108 = vmatpush1.bf16.msra.mxu1 %v14502_v36  ;;  %v880_v36 = vld [vmem:[#allocation5 + $0x1690] sm:$0xff] }
 0x4ba   :  { %11109 = vmatprep.subr.bf16.mxu1 %v14511_v39  ;;  %v14542_v39 = vcombine.low %v617_v15, %v621_v18  ;;  %v908_v8 = vld [vmem:[#allocation5 + $0x1770] sm:$0xff]  ;;  %v657_v15 = vld [vmem:[#allocation5 + $0xf98] sm:$0xff] }
 0x4bb   :  { %10698 = vmatpush1.bf16.msra.mxu0 %v14756_v37  ;;  %v17345_v49 = vpop.f32.mrb[4].mxu1  ;;  %v884_v37 = vld [vmem:[#allocation5 + $0x16b0] sm:$0xff]  ;;  %v661_v18 = vld [vmem:[#allocation5 + $0xfb8] sm:$0xff] }
 0x4bc   :  { %10699 = vmatprep.subr.bf16.mxu0 %v14765_v7  ;;  %v17347_v60 = vpop.f32.mrb[5].mxu1  ;;  %v14796_v7 = vcombine.low %v872_v25, %v876_v58  ;;  %v14805_v61 = vcombine.high %v880_v36, %v884_v37  ;;  %v912_v25 = vld [vmem:[#allocation5 + $0x1790] sm:$0xff] }
 0x4bd   :  { %v10481_v21 = vpop.f32.mrb[6].mxu1  ;;  %11110 = vmatpush1.bf16.msra.mxu1 %v14510_v45  ;;  %v888_v45 = vld [vmem:[#allocation5 + $0x16d0] sm:$0xff] }
 0x4be   :  { %v10482_v1 = vpop.f32.mrb[7].mxu1  ;;  %11111 = vmatprep.subr.bf16.mxu1 %v14519_v47  ;;  %v14550_v47 = vcombine.low %v625_v35, %v629_v3  ;;  %v896_v21 = vld [vmem:[#allocation5 + $0x1710] sm:$0xff]  ;;  %v665_v35 = vld [vmem:[#allocation5 + $0xfd8] sm:$0xff] }
 0x4bf   :  { %10700 = vmatpush1.bf16.msra.mxu0 %v14764_v46  ;;  %v892_v46 = vld [vmem:[#allocation5 + $0x16f0] sm:$0xff]  ;;  %v14558_v1 = vcombine.low %v633_v48, %v637_v43  ;;  %v669_v3 = vld [vmem:[#allocation5 + $0xff8] sm:$0xff] }
 0x4c0   :  { %10701 = vmatprep.subr.bf16.mxu0 %v14773_v55  ;;  %v14804_v55 = vcombine.low %v880_v36, %v884_v37  ;;  %v14813_v57 = vcombine.high %v888_v45, %v892_v46  ;;  %v916_v58 = vld [vmem:[#allocation5 + $0x17b0] sm:$0xff]  ;;  %v673_v48 = vld [vmem:[#allocation5 + $0x1018] sm:$0xff] }
 0x4c1   :  { %11112 = vmatpush1.bf16.msra.mxu1 %v14518_v12  ;;  %v900_v12 = vld [vmem:[#allocation5 + $0x1730] sm:$0xff]  ;;  %v677_v43 = vld [vmem:[#allocation5 + $0x1038] sm:$0xff] }
 0x4c2   :  { %11113 = vmatprep.subr.bf16.mxu1 %v14527_v4  ;;  %v14567_v4 = vcombine.high %v641_v63, %v645_v32  ;;  %v920_v36 = vld [vmem:[#allocation5 + $0x17d0] sm:$0xff] }
 0x4c3   :  { %10702 = vmatpush1.bf16.msra.mxu0 %v14772_v2  ;;  %v14812_v2 = vcombine.low %v888_v45, %v892_v46  ;;  %v924_v37 = vld [vmem:[#allocation5 + $0x17f0] sm:$0xff] }
 0x4c4   :  { %10703 = vmatprep.subr.bf16.mxu0 %v14781_v5  ;;  %v14821_v5 = vcombine.high %v896_v21, %v900_v12  ;;  %v928_v45 = vld [vmem:[#allocation5 + $0x1810] sm:$0xff] }
 0x4c5   :  { %11114 = vmatpush1.bf16.msra.mxu1 %v14526_v9  ;;  %v14566_v9 = vcombine.low %v641_v63, %v645_v32  ;;  %v932_v46 = vld [vmem:[#allocation5 + $0x1830] sm:$0xff]  ;;  %v681_v63 = vld [vmem:[#allocation5 + $0x1058] sm:$0xff] }
 0x4c6   :  { %11115 = vmatprep.subr.bf16.mxu1 %v14535_v28  ;;  %v14575_v28 = vcombine.high %v649_v6, %v653_v13  ;;  %v685_v32 = vld [vmem:[#allocation5 + $0x1078] sm:$0xff] }
 0x4c7   :  { %10704 = vmatpush1.bf16.msra.mxu0 %v14780_v10  ;;  %v14820_v10 = vcombine.low %v896_v21, %v900_v12  ;;  %v936_v21 = vld [vmem:[#allocation5 + $0x1850] sm:$0xff] }
 0x4c8   :  { %10705 = vmatprep.subr.bf16.mxu0 %v14789_v11  ;;  %v14829_v11 = vcombine.high %v904_v34, %v908_v8  ;;  %v940_v12 = vld [vmem:[#allocation5 + $0x1870] sm:$0xff] }
 0x4c9   :  { %11116 = vmatpush1.bf16.msra.mxu1 %v14534_v26  ;;  %v14574_v26 = vcombine.low %v649_v6, %v653_v13  ;;  %v689_v6 = vld [vmem:[#allocation5 + $0x1098] sm:$0xff] }
 0x4ca   :  { %11117 = vmatprep.subr.bf16.mxu1 %v14543_v27  ;;  %v14583_v27 = vcombine.high %v657_v15, %v661_v18  ;;  %v693_v13 = vld [vmem:[#allocation5 + $0x10b8] sm:$0xff] }
 0x4cb   :  { %10706 = vmatpush1.bf16.msra.mxu0 %v14788_v42  ;;  %v14828_v42 = vcombine.low %v904_v34, %v908_v8  ;;  %v944_v34 = vld [vmem:[#allocation5 + $0x1890] sm:$0xff] }
 0x4cc   :  { %10707 = vmatprep.subr.bf16.mxu0 %v14797_v31  ;;  %v14837_v31 = vcombine.high %v912_v25, %v916_v58  ;;  %v948_v8 = vld [vmem:[#allocation5 + $0x18b0] sm:$0xff] }
 0x4cd   :  { %11118 = vmatpush1.bf16.msra.mxu1 %v14542_v39  ;;  %v14582_v39 = vcombine.low %v657_v15, %v661_v18  ;;  %v697_v15 = vld [vmem:[#allocation5 + $0x10d8] sm:$0xff] }
 0x4ce   :  { %11119 = vmatprep.subr.bf16.mxu1 %v14551_v41  ;;  %v14591_v41 = vcombine.high %v665_v35, %v669_v3  ;;  %v701_v18 = vld [vmem:[#allocation5 + $0x10f8] sm:$0xff] }
 0x4cf   :  { %10708 = vmatpush1.bf16.msra.mxu0 %v14796_v7  ;;  %v14836_v7 = vcombine.low %v912_v25, %v916_v58  ;;  %v952_v25 = vld [vmem:[#allocation5 + $0x18d0] sm:$0xff] }
 0x4d0   :  { %10709 = vmatprep.subr.bf16.mxu0 %v14805_v61  ;;  %v14845_v61 = vcombine.high %v920_v36, %v924_v37  ;;  %v956_v58 = vld [vmem:[#allocation5 + $0x18f0] sm:$0xff] }
 0x4d1   :  { %11120 = vmatpush1.bf16.msra.mxu1 %v14550_v47  ;;  %v14590_v47 = vcombine.low %v665_v35, %v669_v3  ;;  %v709_v35 = vld [vmem:[#allocation5 + $0x1138] sm:$0xff]  ;;  %v960_v3 = vld [vmem:[#allocation5 + $0x1910] sm:$0xff] }
 0x4d2   :  { %11121 = vmatprep.subr.bf16.mxu1 %v14559_v56  ;;  %v14599_v56 = vcombine.high %v673_v48, %v677_v43 }
 0x4d3   :  { %10710 = vmatpush1.bf16.msra.mxu0 %v14804_v55  ;;  %v14844_v55 = vcombine.low %v920_v36, %v924_v37  ;;  %v964_v36 = vld [vmem:[#allocation5 + $0x1930] sm:$0xff]  ;;  %v14622_v37 = vcombine.low %v697_v15, %v701_v18 }
 0x4d4   :  { %10711 = vmatprep.subr.bf16.mxu0 %v14813_v57  ;;  %v14853_v57 = vcombine.high %v928_v45, %v932_v46 }
 0x4d5   :  { %11122 = vmatpush1.bf16.msra.mxu1 %v14558_v1  ;;  %v14598_v1 = vcombine.low %v673_v48, %v677_v43  ;;  %v968_v48 = vld [vmem:[#allocation5 + $0x1950] sm:$0xff] }
 0x4d6   :  { %11123 = vmatprep.subr.bf16.mxu1 %v14567_v4  ;;  %v14607_v4 = vcombine.high %v681_v63, %v685_v32  ;;  %v972_v43 = vld [vmem:[#allocation5 + $0x1970] sm:$0xff] }
 0x4d7   :  { %10712 = vmatpush1.bf16.msra.mxu0 %v14812_v2  ;;  %v14852_v2 = vcombine.low %v928_v45, %v932_v46  ;;  %v14884_v46 = vcombine.low %v960_v3, %v964_v36 }
 0x4d8   :  { %10713 = vmatprep.subr.bf16.mxu0 %v14821_v5  ;;  %v14861_v5 = vcombine.high %v936_v21, %v940_v12 }
 0x4d9   :  { %11124 = vmatpush1.bf16.msra.mxu1 %v14566_v9  ;;  %v14606_v9 = vcombine.low %v681_v63, %v685_v32  ;;  %v976_v63 = vld [vmem:[#allocation5 + $0x1990] sm:$0xff] }
 0x4da   :  { %11125 = vmatprep.subr.bf16.mxu1 %v14575_v28  ;;  %v14615_v28 = vcombine.high %v689_v6, %v693_v13  ;;  %v980_v32 = vld [vmem:[#allocation5 + $0x19b0] sm:$0xff] }
 0x4db   :  { %10714 = vmatpush1.bf16.msra.mxu0 %v14820_v10  ;;  %v14860_v10 = vcombine.low %v936_v21, %v940_v12  ;;  %v14892_v12 = vcombine.low %v968_v48, %v972_v43 }
 0x4dc   :  { %10715 = vmatprep.subr.bf16.mxu0 %v14829_v11  ;;  %v14869_v11 = vcombine.high %v944_v34, %v948_v8 }
 0x4dd   :  { %11126 = vmatpush1.bf16.msra.mxu1 %v14574_v26  ;;  %v14868_v26 = vcombine.low %v944_v34, %v948_v8  ;;  %v14900_v8 = vcombine.low %v976_v63, %v980_v32 }
 0x4de   :  { %11127 = vmatprep.subr.bf16.mxu1 %v14583_v27  ;;  %v14877_v27 = vcombine.high %v952_v25, %v956_v58 }
 0x4df   :  { %10716 = vmatpush1.bf16.msra.mxu0 %v14828_v42  ;;  %v14623_v42 = vcombine.high %v697_v15, %v701_v18  ;;  %v992_v15 = vld [vmem:[#allocation5 + $0x1a10] sm:$0xff] }
 0x4e0   :  { %10717 = vmatprep.subr.bf16.mxu0 %v14837_v31  ;;  %v705_v31 = vld [vmem:[#allocation5 + $0x1118] sm:$0xff]  ;;  %v996_v18 = vld [vmem:[#allocation5 + $0x1a30] sm:$0xff] }
 0x4e1   :  { %11128 = vmatpush1.bf16.msra.mxu1 %v14582_v39  ;;  %v14876_v39 = vcombine.low %v952_v25, %v956_v58  ;;  %v14630_v45 = vcombine.low %v705_v31, %v709_v35 }
 0x4e2   :  { %11129 = vmatprep.subr.bf16.mxu1 %v14591_v41  ;;  %v713_v41 = vld [vmem:[#allocation5 + $0x1158] sm:$0xff] }
 0x4e3   :  { %10718 = vmatpush1.bf16.msra.mxu0 %v14836_v7  ;;  %v14631_v7 = vcombine.high %v705_v31, %v709_v35  ;;  %v1000_v31 = vld [vmem:[#allocation5 + $0x1a50] sm:$0xff] }
 0x4e4   :  { %10719 = vmatprep.subr.bf16.mxu0 %v14845_v61  ;;  %v717_v61 = vld [vmem:[#allocation5 + $0x1178] sm:$0xff]  ;;  %v1004_v35 = vld [vmem:[#allocation5 + $0x1a70] sm:$0xff] }
 0x4e5   :  { %11130 = vmatpush1.bf16.msra.mxu1 %v14590_v47  ;;  %v14639_v47 = vcombine.high %v713_v41, %v717_v61  ;;  %v14638_v21 = vcombine.low %v713_v41, %v717_v61  ;;  %v1008_v41 = vld [vmem:[#allocation5 + $0x1a90] sm:$0xff] }
 0x4e6   :  { %11140 = vmatprep.subr.bf16.mxu1 %v14599_v56  ;;  %v721_v56 = vld [vmem:[#allocation5 + $0x1198] sm:$0xff]  ;;  %v1012_v61 = vld [vmem:[#allocation5 + $0x1ab0] sm:$0xff] }
 0x4e7   :  { %10720 = vmatpush1.bf16.msra.mxu0 %v14844_v55  ;;  %v14893_v55 = vcombine.high %v968_v48, %v972_v43  ;;  %v14924_v43 = vcombine.low %v1000_v31, %v1004_v35 }
 0x4e8   :  { %10730 = vmatprep.subr.bf16.mxu0 %v14853_v57  ;;  %11132 = vmatmul.mubr.bf16.vlgmr.msra.gmra.mrb[8].mxu1 %v17189_v52  ;;  %v14614_v52 = vcombine.low %v689_v6, %v693_v13  ;;  %v725_v57 = vld [vmem:[#allocation5 + $0x11b8] sm:$0xff]  ;;  %v984_v6 = vld [vmem:[#allocation5 + $0x19d0] sm:$0xff] }
 0x4e9   :  { %11141 = vmatpush1.bf16.msra.mxu1 %v14598_v1  ;;  %11172 = vmatprep.mubr.bf16.mxu1 %v17193_v0  ;;  %v14885_v0 = vcombine.high %v960_v3, %v964_v36  ;;  %v14647_v1 = vcombine.high %v721_v56, %v725_v57  ;;  %v988_v13 = vld [vmem:[#allocation5 + $0x19f0] sm:$0xff]  ;;  %v14646_v34 = vcombine.low %v721_v56, %v725_v57 }
 0x4ea   :  { %10722 = vmatmul.mubr.bf16.vlgmr.msra.gmra.mrb[4].mxu0 %v17221_v51  ;;  %11142 = vmatprep.subr.bf16.mxu1 %v14607_v4  ;;  %v729_v4 = vld [vmem:[#allocation5 + $0x11d8] sm:$0xff]  ;;  %v14908_v58 = vcombine.low %v984_v6, %v988_v13  ;;  %v14916_v36 = vcombine.low %v992_v15, %v996_v18  ;;  %v1016_v56 = vld [vmem:[#allocation5 + $0x1ad0] sm:$0xff] }
 0x4eb   :  { %10731 = vmatpush1.bf16.msra.mxu0 %v14852_v2  ;;  %10762 = vmatprep.mubr.bf16.mxu0 %v17225_v62  ;;  %v14901_v2 = vcombine.high %v976_v63, %v980_v32  ;;  %v1020_v57 = vld [vmem:[#allocation5 + $0x1af0] sm:$0xff]  ;;  %v14932_v32 = vcombine.low %v1008_v41, %v1012_v61 }
 0x4ec   :  { %10732 = vmatprep.subr.bf16.mxu0 %v14861_v5  ;;  %v733_v5 = vld [vmem:[#allocation5 + $0x11f8] sm:$0xff] }
 0x4ed   :  { %11143 = vmatpush1.bf16.msra.mxu1 %v14606_v9  ;;  %v14655_v9 = vcombine.high %v729_v4, %v733_v5  ;;  %v14654_v25 = vcombine.low %v729_v4, %v733_v5  ;;  %v1024_v4 = vld [vmem:[#allocation5 + $0x1b10] sm:$0xff] }
 0x4ee   :  { %11144 = vmatprep.subr.bf16.mxu1 %v14615_v28  ;;  %v737_v28 = vld [vmem:[#allocation5 + $0x1218] sm:$0xff]  ;;  %v1028_v5 = vld [vmem:[#allocation5 + $0x1b30] sm:$0xff] }
 0x4ef   :  { %10733 = vmatpush1.bf16.msra.mxu0 %v14860_v10  ;;  %v14909_v10 = vcombine.high %v984_v6, %v988_v13  ;;  %v14940_v13 = vcombine.low %v1016_v56, %v1020_v57 }
 0x4f0   :  { %10734 = vmatprep.subr.bf16.mxu0 %v14869_v11  ;;  %v741_v11 = vld [vmem:[#allocation5 + $0x1238] sm:$0xff] }
 0x4f1   :  { %11145 = vmatpush1.bf16.msra.mxu1 %v14614_v52  ;;  %v14663_v52 = vcombine.high %v737_v28, %v741_v11  ;;  %v14662_v3 = vcombine.low %v737_v28, %v741_v11  ;;  %v1032_v28 = vld [vmem:[#allocation5 + $0x1b50] sm:$0xff] }
 0x4f2   :  { %11146 = vmatprep.subr.bf16.mxu1 %v14623_v42  ;;  %v745_v42 = vld [vmem:[#allocation5 + $0x1258] sm:$0xff]  ;;  %v1036_v11 = vld [vmem:[#allocation5 + $0x1b70] sm:$0xff] }
 0x4f3   :  { %10735 = vmatpush1.bf16.msra.mxu0 %v14868_v26  ;;  %v14917_v26 = vcombine.high %v992_v15, %v996_v18  ;;  %v14948_v18 = vcombine.low %v1024_v4, %v1028_v5 }
 0x4f4   :  { %10736 = vmatprep.subr.bf16.mxu0 %v14877_v27  ;;  %v749_v27 = vld [vmem:[#allocation5 + $0x1278] sm:$0xff] }
 0x4f5   :  { %11147 = vmatpush1.bf16.msra.mxu1 %v14622_v37  ;;  %v14671_v37 = vcombine.high %v745_v42, %v749_v27  ;;  %v14670_v48 = vcombine.low %v745_v42, %v749_v27  ;;  %v1040_v42 = vld [vmem:[#allocation5 + $0x1b90] sm:$0xff] }
 0x4f6   :  { %11148 = vmatprep.subr.bf16.mxu1 %v14631_v7  ;;  %v753_v7 = vld [vmem:[#allocation5 + $0x1298] sm:$0xff]  ;;  %v1044_v27 = vld [vmem:[#allocation5 + $0x1bb0] sm:$0xff] }
 0x4f7   :  { %10737 = vmatpush1.bf16.msra.mxu0 %v14876_v39  ;;  %v14925_v39 = vcombine.high %v1000_v31, %v1004_v35  ;;  %v14956_v35 = vcombine.low %v1032_v28, %v1036_v11 }
 0x4f8   :  { %10738 = vmatprep.subr.bf16.mxu0 %v14885_v0  ;;  %v757_v0 = vld [vmem:[#allocation5 + $0x12b8] sm:$0xff] }
 0x4f9   :  { %11149 = vmatpush1.bf16.msra.mxu1 %v14630_v45  ;;  %v14679_v45 = vcombine.high %v753_v7, %v757_v0  ;;  %v14678_v63 = vcombine.low %v753_v7, %v757_v0  ;;  %v1048_v7 = vld [vmem:[#allocation5 + $0x1bd0] sm:$0xff] }
 0x4fa   :  { %11150 = vmatprep.subr.bf16.mxu1 %v14639_v47  ;;  %v761_v47 = vld [vmem:[#allocation5 + $0x12d8] sm:$0xff]  ;;  %v1052_v0 = vld [vmem:[#allocation5 + $0x1bf0] sm:$0xff] }
 0x4fb   :  { %10739 = vmatpush1.bf16.msra.mxu0 %v14884_v46  ;;  %v14933_v46 = vcombine.high %v1008_v41, %v1012_v61  ;;  %v14964_v61 = vcombine.low %v1040_v42, %v1044_v27 }
 0x4fc   :  { %10740 = vmatprep.subr.bf16.mxu0 %v14893_v55  ;;  %v765_v55 = vld [vmem:[#allocation5 + $0x12f8] sm:$0xff] }
 0x4fd   :  { %11151 = vmatpush1.bf16.msra.mxu1 %v14638_v21  ;;  %v14687_v21 = vcombine.high %v761_v47, %v765_v55  ;;  %v14686_v6 = vcombine.low %v761_v47, %v765_v55  ;;  %v1056_v47 = vld [vmem:[#allocation5 + $0x1c10] sm:$0xff] }
 0x4fe   :  { %11152 = vmatprep.subr.bf16.mxu1 %v14647_v1  ;;  %v769_v1 = vld [vmem:[#allocation5 + $0x1318] sm:$0xff]  ;;  %v1060_v55 = vld [vmem:[#allocation5 + $0x1c30] sm:$0xff] }
 0x4ff   :  { %10741 = vmatpush1.bf16.msra.mxu0 %v14892_v12  ;;  %v14941_v12 = vcombine.high %v1016_v56, %v1020_v57  ;;  %v14972_v57 = vcombine.low %v1048_v7, %v1052_v0 }
 0x500   :  { %10742 = vmatprep.subr.bf16.mxu0 %v14901_v2  ;;  %v773_v2 = vld [vmem:[#allocation5 + $0x1338] sm:$0xff] }
 0x501   :  { %11153 = vmatpush1.bf16.msra.mxu1 %v14646_v34  ;;  %v14695_v34 = vcombine.high %v769_v1, %v773_v2  ;;  %v14694_v15 = vcombine.low %v769_v1, %v773_v2  ;;  %v1064_v1 = vld [vmem:[#allocation5 + $0x1c50] sm:$0xff] }
 0x502   :  { %11154 = vmatprep.subr.bf16.mxu1 %v14655_v9  ;;  %v777_v9 = vld [vmem:[#allocation5 + $0x1358] sm:$0xff]  ;;  %v1068_v2 = vld [vmem:[#allocation5 + $0x1c70] sm:$0xff] }
 0x503   :  { %10743 = vmatpush1.bf16.msra.mxu0 %v14900_v8  ;;  %v14949_v8 = vcombine.high %v1024_v4, %v1028_v5  ;;  %v14980_v5 = vcombine.low %v1056_v47, %v1060_v55 }
 0x504   :  { %10744 = vmatprep.subr.bf16.mxu0 %v14909_v10  ;;  %v781_v10 = vld [vmem:[#allocation5 + $0x1378] sm:$0xff] }
 0x505   :  { %11155 = vmatpush1.bf16.msra.mxu1 %v14654_v25  ;;  %v14703_v25 = vcombine.high %v777_v9, %v781_v10  ;;  %v14702_v31 = vcombine.low %v777_v9, %v781_v10  ;;  %v1072_v9 = vld [vmem:[#allocation5 + $0x1c90] sm:$0xff] }
 0x506   :  { %11156 = vmatprep.subr.bf16.mxu1 %v14663_v52  ;;  %v785_v52 = vld [vmem:[#allocation5 + $0x1398] sm:$0xff]  ;;  %v1076_v10 = vld [vmem:[#allocation5 + $0x1cb0] sm:$0xff] }
 0x507   :  { %10745 = vmatpush1.bf16.msra.mxu0 %v14908_v58  ;;  %v14957_v58 = vcombine.high %v1032_v28, %v1036_v11  ;;  %v14988_v11 = vcombine.low %v1064_v1, %v1068_v2 }
 0x508   :  { %10746 = vmatprep.subr.bf16.mxu0 %v14917_v26  ;;  %v789_v26 = vld [vmem:[#allocation5 + $0x13b8] sm:$0xff] }
 0x509   :  { %11157 = vmatpush1.bf16.msra.mxu1 %v14662_v3  ;;  %v14711_v3 = vcombine.high %v785_v52, %v789_v26  ;;  %v14710_v41 = vcombine.low %v785_v52, %v789_v26  ;;  %v1080_v52 = vld [vmem:[#allocation5 + $0x1cd0] sm:$0xff] }
 0x50a   :  { %11158 = vmatprep.subr.bf16.mxu1 %v14671_v37  ;;  %v793_v37 = vld [vmem:[#allocation5 + $0x13d8] sm:$0xff]  ;;  %v1084_v26 = vld [vmem:[#allocation5 + $0x1cf0] sm:$0xff] }
 0x50b   :  { %10747 = vmatpush1.bf16.msra.mxu0 %v14916_v36  ;;  %v14965_v36 = vcombine.high %v1040_v42, %v1044_v27  ;;  %v14996_v42 = vcombine.low %v1072_v9, %v1076_v10 }
 0x50c   :  { %10748 = vmatprep.subr.bf16.mxu0 %v14925_v39  ;;  %v797_v39 = vld [vmem:[#allocation5 + $0x13f8] sm:$0xff] }
 0x50d   :  { %11159 = vmatpush1.bf16.msra.mxu1 %v14670_v48  ;;  %v14719_v48 = vcombine.high %v793_v37, %v797_v39  ;;  %v14718_v56 = vcombine.low %v793_v37, %v797_v39  ;;  %v1092_v37 = vld [vmem:[#allocation5 + $0x1d30] sm:$0xff] }
 0x50e   :  { %11160 = vmatprep.subr.bf16.mxu1 %v14679_v45  ;;  %v801_v45 = vld [vmem:[#allocation5 + $0x1418] sm:$0xff] }
 0x50f   :  { %10749 = vmatpush1.bf16.msra.mxu0 %v14924_v43  ;;  %v14973_v43 = vcombine.high %v1048_v7, %v1052_v0  ;;  %v15004_v7 = vcombine.low %v1080_v52, %v1084_v26 }
 0x510   :  { %10750 = vmatprep.subr.bf16.mxu0 %v14933_v46  ;;  %v805_v46 = vld [vmem:[#allocation5 + $0x1438] sm:$0xff] }
 0x511   :  { %11161 = vmatpush1.bf16.msra.mxu1 %v14678_v63  ;;  %v14727_v63 = vcombine.high %v801_v45, %v805_v46  ;;  %v14726_v4 = vcombine.low %v801_v45, %v805_v46 }
 0x512   :  { %11162 = vmatprep.subr.bf16.mxu1 %v14687_v21  ;;  %v809_v21 = vld [vmem:[#allocation5 + $0x1458] sm:$0xff] }
 0x513   :  { %10751 = vmatpush1.bf16.msra.mxu0 %v14932_v32  ;;  %v14981_v32 = vcombine.high %v1056_v47, %v1060_v55 }
 0x514   :  { %10752 = vmatprep.subr.bf16.mxu0 %v14941_v12  ;;  %v813_v12 = vld [vmem:[#allocation5 + $0x1478] sm:$0xff] }
 0x515   :  { %11163 = vmatpush1.bf16.msra.mxu1 %v14686_v6  ;;  %v14735_v6 = vcombine.high %v809_v21, %v813_v12  ;;  %v14734_v28 = vcombine.low %v809_v21, %v813_v12 }
 0x516   :  { %11164 = vmatprep.subr.bf16.mxu1 %v14695_v34  ;;  %v817_v34 = vld [vmem:[#allocation5 + $0x1498] sm:$0xff] }
 0x517   :  { %10753 = vmatpush1.bf16.msra.mxu0 %v14940_v13  ;;  %v14989_v13 = vcombine.high %v1064_v1, %v1068_v2 }
 0x518   :  { %10754 = vmatprep.subr.bf16.mxu0 %v14949_v8  ;;  %v821_v8 = vld [vmem:[#allocation5 + $0x14b8] sm:$0xff] }
 0x519   :  { %11165 = vmatpush1.bf16.msra.mxu1 %v14694_v15  ;;  %v14743_v15 = vcombine.high %v817_v34, %v821_v8 }
 0x51a   :  { %11166 = vmatprep.subr.bf16.mxu1 %v14703_v25  ;;  %v825_v25 = vld [vmem:[#allocation5 + $0x14d8] sm:$0xff] }
 0x51b   :  { %10755 = vmatpush1.bf16.msra.mxu0 %v14948_v18  ;;  %v14997_v18 = vcombine.high %v1072_v9, %v1076_v10 }
 0x51c   :  { %10756 = vmatprep.subr.bf16.mxu0 %v14957_v58  ;;  %v829_v58 = vld [vmem:[#allocation5 + $0x14f8] sm:$0xff] }
 0x51d   :  { %11167 = vmatpush1.bf16.msra.mxu1 %v14702_v31  ;;  %v14751_v27 = vcombine.high %v825_v25, %v829_v58  ;;  %v15005_v31 = vcombine.high %v1080_v52, %v1084_v26  ;;  %v14750_v39 = vcombine.low %v825_v25, %v829_v58 }
 0x51e   :  { %11168 = vmatprep.subr.bf16.mxu1 %v14711_v3  ;;  %v837_v3 = vld [vmem:[#allocation5 + $0x1538] sm:$0xff] }
 0x51f   :  { %10757 = vmatpush1.bf16.msra.mxu0 %v14956_v35  ;;  %v833_v35 = vld [vmem:[#allocation5 + $0x1518] sm:$0xff] }
 0x520   :  { %10758 = vmatprep.subr.bf16.mxu0 %v14965_v36  ;;  %v1088_v36 = vld [vmem:[#allocation5 + $0x1d10] sm:$0xff]  ;;  %v14759_v0 = vcombine.high %v833_v35, %v837_v3  ;;  %v14758_v45 = vcombine.low %v833_v35, %v837_v3 }
 0x521   :  { %11169 = vmatpush1.bf16.msra.mxu1 %v14710_v41  ;;  %v841_v41 = vld [vmem:[#allocation5 + $0x1558] sm:$0xff]  ;;  %v15012_v46 = vcombine.low %v1088_v36, %v1092_v37 }
 0x522   :  { %11170 = vmatprep.subr.bf16.mxu1 %v14719_v48  ;;  %v1096_v48 = vld [vmem:[#allocation5 + $0x1d50] sm:$0xff] }
 0x523   :  { %10759 = vmatpush1.bf16.msra.mxu0 %v14964_v61  ;;  %v845_v61 = vld [vmem:[#allocation5 + $0x1578] sm:$0xff] }
 0x524   :  { %10760 = vmatprep.subr.bf16.mxu0 %v14973_v43  ;;  %v1100_v43 = vld [vmem:[#allocation5 + $0x1d70] sm:$0xff]  ;;  %v14767_v47 = vcombine.high %v841_v41, %v845_v61  ;;  %v14766_v21 = vcombine.low %v841_v41, %v845_v61 }
 0x525   :  { %11171 = vmatpush1.bf16.msra.mxu1 %v14718_v56  ;;  %v15021_v55 = vcombine.high %v1096_v48, %v1100_v43  ;;  %v849_v56 = vld [vmem:[#allocation5 + $0x1598] sm:$0xff]  ;;  %v15020_v12 = vcombine.low %v1096_v48, %v1100_v43 }
 0x526   :  { %11181 = vmatprep.subr.bf16.mxu1 %v14727_v63  ;;  %v1104_v63 = vld [vmem:[#allocation5 + $0x1d90] sm:$0xff] }
 0x527   :  { %10761 = vmatpush1.bf16.msra.mxu0 %v14972_v57  ;;  %v853_v57 = vld [vmem:[#allocation5 + $0x15b8] sm:$0xff] }
 0x528   :  { %10771 = vmatprep.subr.bf16.mxu0 %v14981_v32  ;;  %11173 = vmatmul.mubr.bf16.vlgmr.msra.gmra.mrb[8].mxu1 %v17203_v14  ;;  %v14742_v14 = vcombine.low %v817_v34, %v821_v8  ;;  %v1108_v32 = vld [vmem:[#allocation5 + $0x1db0] sm:$0xff]  ;;  %v14775_v1 = vcombine.high %v849_v56, %v853_v57  ;;  %v14774_v34 = vcombine.low %v849_v56, %v853_v57 }
 0x529   :  { %11182 = vmatpush1.bf16.msra.mxu1 %v14726_v4  ;;  %11213 = vmatprep.mubr.bf16.mxu1 %v17207_v23  ;;  %v15013_v23 = vcombine.high %v1088_v36, %v1092_v37  ;;  %v15029_v2 = vcombine.high %v1104_v63, %v1108_v32  ;;  %v857_v4 = vld [vmem:[#allocation5 + $0x15d8] sm:$0xff]  ;;  %v15028_v8 = vcombine.low %v1104_v63, %v1108_v32 }
 0x52a   :  { %10763 = vmatmul.mubr.bf16.vlgmr.msra.gmra.mrb[4].mxu0 %v17235_v33  ;;  %11183 = vmatprep.subr.bf16.mxu1 %v14735_v6  ;;  %v1112_v6 = vld [vmem:[#allocation5 + $0x1dd0] sm:$0xff] }
 0x52b   :  { %10772 = vmatpush1.bf16.msra.mxu0 %v14980_v5  ;;  %10803 = vmatprep.mubr.bf16.mxu0 %v17239_v40  ;;  %v861_v5 = vld [vmem:[#allocation5 + $0x15f8] sm:$0xff] }
 0x52c   :  { %10773 = vmatprep.subr.bf16.mxu0 %v14989_v13  ;;  %v1116_v13 = vld [vmem:[#allocation5 + $0x1df0] sm:$0xff]  ;;  %v14783_v9 = vcombine.high %v857_v4, %v861_v5  ;;  %v14782_v25 = vcombine.low %v857_v4, %v861_v5 }
 0x52d   :  { %11184 = vmatpush1.bf16.msra.mxu1 %v14734_v28  ;;  %v15037_v10 = vcombine.high %v1112_v6, %v1116_v13  ;;  %v865_v28 = vld [vmem:[#allocation5 + $0x1618] sm:$0xff]  ;;  %v15036_v58 = vcombine.low %v1112_v6, %v1116_v13 }
 0x52e   :  { %11185 = vmatprep.subr.bf16.mxu1 %v14743_v15  ;;  %v1120_v15 = vld [vmem:[#allocation5 + $0x1e10] sm:$0xff] }
 0x52f   :  { %10774 = vmatpush1.bf16.msra.mxu0 %v14988_v11  ;;  %v869_v11 = vld [vmem:[#allocation5 + $0x1638] sm:$0xff] }
 0x530   :  { %10775 = vmatprep.subr.bf16.mxu0 %v14997_v18  ;;  %v1124_v18 = vld [vmem:[#allocation5 + $0x1e30] sm:$0xff]  ;;  %v14791_v52 = vcombine.high %v865_v28, %v869_v11  ;;  %v14790_v35 = vcombine.low %v865_v28, %v869_v11 }
 0x531   :  { %11186 = vmatpush1.bf16.msra.mxu1 %v14742_v14  ;;  %v15045_v26 = vcombine.high %v1120_v15, %v1124_v18  ;;  %v873_v14 = vld [vmem:[#allocation5 + $0x1658] sm:$0xff]  ;;  %v15044_v3 = vcombine.low %v1120_v15, %v1124_v18 }
 0x532   :  { %11187 = vmatprep.subr.bf16.mxu1 %v14751_v27  ;;  %v1128_v27 = vld [vmem:[#allocation5 + $0x1e50] sm:$0xff] }
 0x533   :  { %10776 = vmatpush1.bf16.msra.mxu0 %v14996_v42  ;;  %v877_v42 = vld [vmem:[#allocation5 + $0x1678] sm:$0xff] }
 0x534   :  { %10777 = vmatprep.subr.bf16.mxu0 %v15005_v31  ;;  %v1132_v31 = vld [vmem:[#allocation5 + $0x1e70] sm:$0xff]  ;;  %v14799_v36 = vcombine.high %v873_v14, %v877_v42  ;;  %v14798_v41 = vcombine.low %v873_v14, %v877_v42 }
 0x535   :  { %11188 = vmatpush1.bf16.msra.mxu1 %v14750_v39  ;;  %v15053_v37 = vcombine.high %v1128_v27, %v1132_v31  ;;  %v881_v39 = vld [vmem:[#allocation5 + $0x1698] sm:$0xff]  ;;  %v15052_v61 = vcombine.low %v1128_v27, %v1132_v31 }
 0x536   :  { %11189 = vmatprep.subr.bf16.mxu1 %v14759_v0  ;;  %v1136_v0 = vld [vmem:[#allocation5 + $0x1e90] sm:$0xff] }
 0x537   :  { %10778 = vmatpush1.bf16.msra.mxu0 %v15004_v7  ;;  %v885_v7 = vld [vmem:[#allocation5 + $0x16b8] sm:$0xff] }
 0x538   :  { %10779 = vmatprep.subr.bf16.mxu0 %v15013_v23  ;;  %v1140_v23 = vld [vmem:[#allocation5 + $0x1eb0] sm:$0xff]  ;;  %v14807_v48 = vcombine.high %v881_v39, %v885_v7  ;;  %v14806_v56 = vcombine.low %v881_v39, %v885_v7 }
 0x539   :  { %11190 = vmatpush1.bf16.msra.mxu1 %v14758_v45  ;;  %v15061_v43 = vcombine.high %v1136_v0, %v1140_v23  ;;  %v889_v45 = vld [vmem:[#allocation5 + $0x16d8] sm:$0xff]  ;;  %v15060_v57 = vcombine.low %v1136_v0, %v1140_v23 }
 0x53a   :  { %11191 = vmatprep.subr.bf16.mxu1 %v14767_v47  ;;  %v1144_v47 = vld [vmem:[#allocation5 + $0x1ed0] sm:$0xff] }
 0x53b   :  { %10780 = vmatpush1.bf16.msra.mxu0 %v15012_v46  ;;  %v893_v46 = vld [vmem:[#allocation5 + $0x16f8] sm:$0xff] }
 0x53c   :  { %10781 = vmatprep.subr.bf16.mxu0 %v15021_v55  ;;  %v1148_v55 = vld [vmem:[#allocation5 + $0x1ef0] sm:$0xff]  ;;  %v14815_v63 = vcombine.high %v889_v45, %v893_v46  ;;  %v14814_v4 = vcombine.low %v889_v45, %v893_v46 }
 0x53d   :  { %11192 = vmatpush1.bf16.msra.mxu1 %v14766_v21  ;;  %v15069_v32 = vcombine.high %v1144_v47, %v1148_v55  ;;  %v897_v21 = vld [vmem:[#allocation5 + $0x1718] sm:$0xff]  ;;  %v15068_v5 = vcombine.low %v1144_v47, %v1148_v55 }
 0x53e   :  { %11193 = vmatprep.subr.bf16.mxu1 %v14775_v1  ;;  %v1152_v1 = vld [vmem:[#allocation5 + $0x1f10] sm:$0xff] }
 0x53f   :  { %10782 = vmatpush1.bf16.msra.mxu0 %v15020_v12  ;;  %v901_v12 = vld [vmem:[#allocation5 + $0x1738] sm:$0xff] }
 0x540   :  { %10783 = vmatprep.subr.bf16.mxu0 %v15029_v2  ;;  %v1156_v2 = vld [vmem:[#allocation5 + $0x1f30] sm:$0xff]  ;;  %v14823_v6 = vcombine.high %v897_v21, %v901_v12  ;;  %v14822_v28 = vcombine.low %v897_v21, %v901_v12 }
 0x541   :  { %11194 = vmatpush1.bf16.msra.mxu1 %v14774_v34  ;;  %v15077_v13 = vcombine.high %v1152_v1, %v1156_v2  ;;  %v905_v34 = vld [vmem:[#allocation5 + $0x1758] sm:$0xff]  ;;  %v15076_v11 = vcombine.low %v1152_v1, %v1156_v2 }
 0x542   :  { %11195 = vmatprep.subr.bf16.mxu1 %v14783_v9  ;;  %v1160_v9 = vld [vmem:[#allocation5 + $0x1f50] sm:$0xff] }
 0x543   :  { %10784 = vmatpush1.bf16.msra.mxu0 %v15028_v8  ;;  %v909_v8 = vld [vmem:[#allocation5 + $0x1778] sm:$0xff] }
 0x544   :  { %10785 = vmatprep.subr.bf16.mxu0 %v15037_v10  ;;  %v1164_v10 = vld [vmem:[#allocation5 + $0x1f70] sm:$0xff]  ;;  %v14831_v15 = vcombine.high %v905_v34, %v909_v8  ;;  %v14830_v14 = vcombine.low %v905_v34, %v909_v8 }
 0x545   :  { %11196 = vmatpush1.bf16.msra.mxu1 %v14782_v25  ;;  %v15085_v18 = vcombine.high %v1160_v9, %v1164_v10  ;;  %v913_v25 = vld [vmem:[#allocation5 + $0x1798] sm:$0xff]  ;;  %v15084_v42 = vcombine.low %v1160_v9, %v1164_v10 }
 0x546   :  { %11197 = vmatprep.subr.bf16.mxu1 %v14791_v52  ;;  %v1168_v52 = vld [vmem:[#allocation5 + $0x1f90] sm:$0xff] }
 0x547   :  { %10786 = vmatpush1.bf16.msra.mxu0 %v15036_v58  ;;  %v917_v58 = vld [vmem:[#allocation5 + $0x17b8] sm:$0xff] }
 0x548   :  { %10787 = vmatprep.subr.bf16.mxu0 %v15045_v26  ;;  %v1172_v26 = vld [vmem:[#allocation5 + $0x1fb0] sm:$0xff]  ;;  %v14839_v27 = vcombine.high %v913_v25, %v917_v58  ;;  %v14838_v39 = vcombine.low %v913_v25, %v917_v58 }
 0x549   :  { %11198 = vmatpush1.bf16.msra.mxu1 %v14790_v35  ;;  %v15093_v31 = vcombine.high %v1168_v52, %v1172_v26  ;;  %v921_v35 = vld [vmem:[#allocation5 + $0x17d8] sm:$0xff]  ;;  %v15092_v7 = vcombine.low %v1168_v52, %v1172_v26 }
 0x54a   :  { %11199 = vmatprep.subr.bf16.mxu1 %v14799_v36  ;;  %v1176_v36 = vld [vmem:[#allocation5 + $0x1fd0] sm:$0xff]  ;;  %v961_v26 = vld [vmem:[#allocation5 + $0x1918] sm:$0xff] }
 0x54b   :  { %10788 = vmatpush1.bf16.msra.mxu0 %v15044_v3  ;;  %v925_v3 = vld [vmem:[#allocation5 + $0x17f8] sm:$0xff] }
 0x54c   :  { %10789 = vmatprep.subr.bf16.mxu0 %v15053_v37  ;;  %v1180_v37 = vld [vmem:[#allocation5 + $0x1ff0] sm:$0xff]  ;;  %v14847_v0 = vcombine.high %v921_v35, %v925_v3  ;;  %v14846_v45 = vcombine.low %v921_v35, %v925_v3 }
 0x54d   :  { %11200 = vmatpush1.bf16.msra.mxu1 %v14798_v41  ;;  %v15101_v23 = vcombine.high %v1176_v36, %v1180_v37  ;;  %v929_v41 = vld [vmem:[#allocation5 + $0x1818] sm:$0xff]  ;;  %v15100_v46 = vcombine.low %v1176_v36, %v1180_v37 }
 0x54e   :  { %11201 = vmatprep.subr.bf16.mxu1 %v14807_v48  ;;  %v1184_v48 = vld [vmem:[#allocation5 + $0x2010] sm:$0xff]  ;;  %v969_v36 = vld [vmem:[#allocation5 + $0x1958] sm:$0xff] }
 0x54f   :  { %10790 = vmatpush1.bf16.msra.mxu0 %v15052_v61  ;;  %v933_v61 = vld [vmem:[#allocation5 + $0x1838] sm:$0xff] }
 0x550   :  { %10791 = vmatprep.subr.bf16.mxu0 %v15061_v43  ;;  %v1188_v43 = vld [vmem:[#allocation5 + $0x2030] sm:$0xff]  ;;  %v14855_v47 = vcombine.high %v929_v41, %v933_v61  ;;  %v14854_v21 = vcombine.low %v929_v41, %v933_v61  ;;  %v973_v37 = vld [vmem:[#allocation5 + $0x1978] sm:$0xff] }
 0x551   :  { %11202 = vmatpush1.bf16.msra.mxu1 %v14806_v56  ;;  %v15109_v55 = vcombine.high %v1184_v48, %v1188_v43  ;;  %v937_v56 = vld [vmem:[#allocation5 + $0x1858] sm:$0xff]  ;;  %v15108_v12 = vcombine.low %v1184_v48, %v1188_v43  ;;  %v14895_v41 = vcombine.high %v969_v36, %v973_v37 }
 0x552   :  { %11203 = vmatprep.subr.bf16.mxu1 %v14815_v63  ;;  %v1192_v63 = vld [vmem:[#allocation5 + $0x2050] sm:$0xff]  ;;  %v977_v48 = vld [vmem:[#allocation5 + $0x1998] sm:$0xff] }
 0x553   :  { %10792 = vmatpush1.bf16.msra.mxu0 %v15060_v57  ;;  %v941_v57 = vld [vmem:[#allocation5 + $0x1878] sm:$0xff] }
 0x554   :  { %10793 = vmatprep.subr.bf16.mxu0 %v15069_v32  ;;  %v1196_v32 = vld [vmem:[#allocation5 + $0x2070] sm:$0xff]  ;;  %v14863_v1 = vcombine.high %v937_v56, %v941_v57  ;;  %v14862_v34 = vcombine.low %v937_v56, %v941_v57  ;;  %v981_v43 = vld [vmem:[#allocation5 + $0x19b8] sm:$0xff] }
 0x555   :  { %11204 = vmatpush1.bf16.msra.mxu1 %v14814_v4  ;;  %v15117_v2 = vcombine.high %v1192_v63, %v1196_v32  ;;  %v945_v4 = vld [vmem:[#allocation5 + $0x1898] sm:$0xff]  ;;  %v15116_v8 = vcombine.low %v1192_v63, %v1196_v32  ;;  %v14903_v56 = vcombine.high %v977_v48, %v981_v43 }
 0x556   :  { %11205 = vmatprep.subr.bf16.mxu1 %v14823_v6  ;;  %v1200_v6 = vld [vmem:[#allocation5 + $0x2090] sm:$0xff]  ;;  %v985_v63 = vld [vmem:[#allocation5 + $0x19d8] sm:$0xff] }
 0x557   :  { %10794 = vmatpush1.bf16.msra.mxu0 %v15068_v5  ;;  %v949_v5 = vld [vmem:[#allocation5 + $0x18b8] sm:$0xff] }
 0x558   :  { %10795 = vmatprep.subr.bf16.mxu0 %v15077_v13  ;;  %v1204_v13 = vld [vmem:[#allocation5 + $0x20b0] sm:$0xff]  ;;  %v14871_v9 = vcombine.high %v945_v4, %v949_v5  ;;  %v989_v32 = vld [vmem:[#allocation5 + $0x19f8] sm:$0xff] }
 0x559   :  { %11206 = vmatpush1.bf16.msra.mxu1 %v14822_v28  ;;  %v15125_v10 = vcombine.high %v1200_v6, %v1204_v13  ;;  %v953_v28 = vld [vmem:[#allocation5 + $0x18d8] sm:$0xff]  ;;  %v15124_v25 = vcombine.low %v1200_v6, %v1204_v13 }
 0x55a   :  { %11207 = vmatprep.subr.bf16.mxu1 %v14831_v15  ;;  %v1208_v15 = vld [vmem:[#allocation5 + $0x20d0] sm:$0xff]  ;;  %v993_v6 = vld [vmem:[#allocation5 + $0x1a18] sm:$0xff] }
 0x55b   :  { %10796 = vmatpush1.bf16.msra.mxu0 %v15076_v11  ;;  %v957_v11 = vld [vmem:[#allocation5 + $0x18f8] sm:$0xff] }
 0x55c   :  { %10797 = vmatprep.subr.bf16.mxu0 %v15085_v18  ;;  %v1212_v18 = vld [vmem:[#allocation5 + $0x20f0] sm:$0xff]  ;;  %v14879_v58 = vcombine.high %v953_v28, %v957_v11  ;;  %v997_v13 = vld [vmem:[#allocation5 + $0x1a38] sm:$0xff] }
 0x55d   :  { %11208 = vmatpush1.bf16.msra.mxu1 %v14830_v14  ;;  %v15133_v52 = vcombine.high %v1208_v15, %v1212_v18  ;;  %v965_v14 = vld [vmem:[#allocation5 + $0x1938] sm:$0xff]  ;;  %v15132_v35 = vcombine.low %v1208_v15, %v1212_v18 }
 0x55e   :  { %11209 = vmatprep.subr.bf16.mxu1 %v14839_v27  ;;  %v1220_v27 = vld [vmem:[#allocation5 + $0x2130] sm:$0xff]  ;;  %v14887_v3 = vcombine.high %v961_v26, %v965_v14  ;;  %v1001_v15 = vld [vmem:[#allocation5 + $0x1a58] sm:$0xff] }
 0x55f   :  { %10798 = vmatpush1.bf16.msra.mxu0 %v15084_v42  ;;  %v1216_v42 = vld [vmem:[#allocation5 + $0x2110] sm:$0xff]  ;;  %v1005_v18 = vld [vmem:[#allocation5 + $0x1a78] sm:$0xff] }
 0x560   :  { %10799 = vmatprep.subr.bf16.mxu0 %v15093_v31  ;;  %v14878_v31 = vcombine.low %v953_v28, %v957_v11  ;;  %v14919_v28 = vcombine.high %v993_v6, %v997_v13 }
 0x561   :  { %11210 = vmatpush1.bf16.msra.mxu1 %v14838_v39  ;;  %v1224_v39 = vld [vmem:[#allocation5 + $0x2150] sm:$0xff] }
 0x562   :  { %11211 = vmatprep.subr.bf16.mxu1 %v14847_v0  ;;  %v14886_v0 = vcombine.low %v961_v26, %v965_v14  ;;  %v14927_v26 = vcombine.high %v1001_v15, %v1005_v18 }
 0x563   :  { %10800 = vmatpush1.bf16.msra.mxu0 %v15092_v7  ;;  %v1228_v7 = vld [vmem:[#allocation5 + $0x2170] sm:$0xff] }
 0x564   :  { %10801 = vmatprep.subr.bf16.mxu0 %v15101_v23  ;;  %v15140_v23 = vcombine.low %v1216_v42, %v1220_v27  ;;  %v15149_v61 = vcombine.high %v1224_v39, %v1228_v7 }
 0x565   :  { %11212 = vmatpush1.bf16.msra.mxu1 %v14846_v45  ;;  %v1232_v45 = vld [vmem:[#allocation5 + $0x2190] sm:$0xff] }
 0x566   :  { %11222 = vmatprep.subr.bf16.mxu1 %v14855_v47  ;;  %v14894_v47 = vcombine.low %v969_v36, %v973_v37 }
 0x567   :  { %10802 = vmatpush1.bf16.msra.mxu0 %v15100_v46  ;;  %v1236_v46 = vld [vmem:[#allocation5 + $0x21b0] sm:$0xff] }
 0x568   :  { %10812 = vmatprep.subr.bf16.mxu0 %v15109_v55  ;;  %11214 = vmatmul.mubr.bf16.vlgmr.msra.gmra.mrb[8].mxu1 %v17221_v51  ;;  %v14870_v51 = vcombine.low %v945_v4, %v949_v5  ;;  %v15148_v55 = vcombine.low %v1224_v39, %v1228_v7  ;;  %v15157_v57 = vcombine.high %v1232_v45, %v1236_v46  ;;  %v1017_v39 = vld [vmem:[#allocation5 + $0x1ad8] sm:$0xff] }
 0x569   :  { %11223 = vmatpush1.bf16.msra.mxu1 %v14854_v21  ;;  %11254 = vmatprep.mubr.bf16.mxu1 %v17225_v62  ;;  %v15141_v62 = vcombine.high %v1216_v42, %v1220_v27  ;;  %v1240_v21 = vld [vmem:[#allocation5 + $0x21d0] sm:$0xff]  ;;  %v14911_v4 = vcombine.high %v985_v63, %v989_v32  ;;  %v1009_v42 = vld [vmem:[#allocation5 + $0x1a98] sm:$0xff] }
 0x56a   :  { %10804 = vmatmul.mubr.bf16.vlgmr.msra.gmra.mrb[4].mxu0 %v17249_v24  ;;  %11224 = vmatprep.subr.bf16.mxu1 %v14863_v1  ;;  %v14902_v1 = vcombine.low %v977_v48, %v981_v43  ;;  %v1013_v27 = vld [vmem:[#allocation5 + $0x1ab8] sm:$0xff] }
 0x56b   :  { %10813 = vmatpush1.bf16.msra.mxu0 %v15108_v12  ;;  %10844 = vmatprep.mubr.bf16.mxu0 %v17253_v54  ;;  %v1244_v12 = vld [vmem:[#allocation5 + $0x21f0] sm:$0xff]  ;;  %v14935_v36 = vcombine.high %v1009_v42, %v1013_v27  ;;  %v1021_v7 = vld [vmem:[#allocation5 + $0x1af8] sm:$0xff] }
 0x56c   :  { %10814 = vmatprep.subr.bf16.mxu0 %v15117_v2  ;;  %v15156_v2 = vcombine.low %v1232_v45, %v1236_v46  ;;  %v15165_v5 = vcombine.high %v1240_v21, %v1244_v12  ;;  %v14943_v48 = vcombine.high %v1017_v39, %v1021_v7  ;;  %v1025_v45 = vld [vmem:[#allocation5 + $0x1b18] sm:$0xff] }
 0x56d   :  { %11225 = vmatpush1.bf16.msra.mxu1 %v14862_v34  ;;  %v1248_v34 = vld [vmem:[#allocation5 + $0x2210] sm:$0xff]  ;;  %v1029_v46 = vld [vmem:[#allocation5 + $0x1b38] sm:$0xff] }
 0x56e   :  { %11226 = vmatprep.subr.bf16.mxu1 %v14871_v9  ;;  %v14910_v9 = vcombine.low %v985_v63, %v989_v32  ;;  %v14951_v63 = vcombine.high %v1025_v45, %v1029_v46 }
 0x56f   :  { %10815 = vmatpush1.bf16.msra.mxu0 %v15116_v8  ;;  %v1252_v8 = vld [vmem:[#allocation5 + $0x2230] sm:$0xff] }
 0x570   :  { %10816 = vmatprep.subr.bf16.mxu0 %v15125_v10  ;;  %v15164_v10 = vcombine.low %v1240_v21, %v1244_v12  ;;  %v15173_v11 = vcombine.high %v1248_v34, %v1252_v8  ;;  %v1033_v21 = vld [vmem:[#allocation5 + $0x1b58] sm:$0xff] }
 0x571   :  { %11227 = vmatpush1.bf16.msra.mxu1 %v14870_v51  ;;  %v1256_v51 = vld [vmem:[#allocation5 + $0x2250] sm:$0xff]  ;;  %v1037_v12 = vld [vmem:[#allocation5 + $0x1b78] sm:$0xff] }
 0x572   :  { %11228 = vmatprep.subr.bf16.mxu1 %v14879_v58  ;;  %v14918_v58 = vcombine.low %v993_v6, %v997_v13  ;;  %v14959_v6 = vcombine.high %v1033_v21, %v1037_v12 }
 0x573   :  { %10817 = vmatpush1.bf16.msra.mxu0 %v15124_v25  ;;  %v1260_v25 = vld [vmem:[#allocation5 + $0x2270] sm:$0xff] }
 0x574   :  { %10818 = vmatprep.subr.bf16.mxu0 %v15133_v52  ;;  %v15172_v52 = vcombine.low %v1248_v34, %v1252_v8  ;;  %v15181_v14 = vcombine.high %v1256_v51, %v1260_v25  ;;  %v1041_v34 = vld [vmem:[#allocation5 + $0x1b98] sm:$0xff] }
 0x575   :  { %11229 = vmatpush1.bf16.msra.mxu1 %v14878_v31  ;;  %v1264_v31 = vld [vmem:[#allocation5 + $0x2290] sm:$0xff]  ;;  %v1045_v8 = vld [vmem:[#allocation5 + $0x1bb8] sm:$0xff] }
 0x576   :  { %11230 = vmatprep.subr.bf16.mxu1 %v14887_v3  ;;  %v14926_v3 = vcombine.low %v1001_v15, %v1005_v18  ;;  %v14967_v15 = vcombine.high %v1041_v34, %v1045_v8 }
 0x577   :  { %10819 = vmatpush1.bf16.msra.mxu0 %v15132_v35  ;;  %v1268_v35 = vld [vmem:[#allocation5 + $0x22b0] sm:$0xff] }
 0x578   :  { %10820 = vmatprep.subr.bf16.mxu0 %v15141_v62  ;;  %v15180_v62 = vcombine.low %v1256_v51, %v1260_v25  ;;  %v15189_v37 = vcombine.high %v1264_v31, %v1268_v35  ;;  %v1049_v51 = vld [vmem:[#allocation5 + $0x1bd8] sm:$0xff] }
 0x579   :  { %11231 = vmatpush1.bf16.msra.mxu1 %v14886_v0  ;;  %v1272_v0 = vld [vmem:[#allocation5 + $0x22d0] sm:$0xff]  ;;  %v1053_v25 = vld [vmem:[#allocation5 + $0x1bf8] sm:$0xff] }
 0x57a   :  { %11232 = vmatprep.subr.bf16.mxu1 %v14895_v41  ;;  %v14934_v41 = vcombine.low %v1009_v42, %v1013_v27  ;;  %v14975_v42 = vcombine.high %v1049_v51, %v1053_v25 }
 0x57b   :  { %10821 = vmatpush1.bf16.msra.mxu0 %v15140_v23  ;;  %v1276_v23 = vld [vmem:[#allocation5 + $0x22f0] sm:$0xff] }
 0x57c   :  { %10822 = vmatprep.subr.bf16.mxu0 %v15149_v61  ;;  %v15188_v61 = vcombine.low %v1264_v31, %v1268_v35  ;;  %v15197_v43 = vcombine.high %v1272_v0, %v1276_v23  ;;  %v1057_v31 = vld [vmem:[#allocation5 + $0x1c18] sm:$0xff] }
 0x57d   :  { %11233 = vmatpush1.bf16.msra.mxu1 %v14894_v47  ;;  %v1280_v47 = vld [vmem:[#allocation5 + $0x2310] sm:$0xff]  ;;  %v1061_v35 = vld [vmem:[#allocation5 + $0x1c38] sm:$0xff] }
 0x57e   :  { %11234 = vmatprep.subr.bf16.mxu1 %v14903_v56  ;;  %v14942_v56 = vcombine.low %v1017_v39, %v1021_v7  ;;  %v14983_v39 = vcombine.high %v1057_v31, %v1061_v35 }
 0x57f   :  { %10823 = vmatpush1.bf16.msra.mxu0 %v15148_v55  ;;  %v1284_v55 = vld [vmem:[#allocation5 + $0x2330] sm:$0xff] }
 0x580   :  { %10824 = vmatprep.subr.bf16.mxu0 %v15157_v57  ;;  %v15196_v57 = vcombine.low %v1272_v0, %v1276_v23  ;;  %v15205_v32 = vcombine.high %v1280_v47, %v1284_v55  ;;  %v1065_v0 = vld [vmem:[#allocation5 + $0x1c58] sm:$0xff] }
 0x581   :  { %11235 = vmatpush1.bf16.msra.mxu1 %v14902_v1  ;;  %v1288_v1 = vld [vmem:[#allocation5 + $0x2350] sm:$0xff]  ;;  %v1069_v23 = vld [vmem:[#allocation5 + $0x1c78] sm:$0xff] }
 0x582   :  { %11236 = vmatprep.subr.bf16.mxu1 %v14911_v4  ;;  %v14950_v4 = vcombine.low %v1025_v45, %v1029_v46  ;;  %v14991_v45 = vcombine.high %v1065_v0, %v1069_v23 }
 0x583   :  { %10825 = vmatpush1.bf16.msra.mxu0 %v15156_v2  ;;  %v1292_v2 = vld [vmem:[#allocation5 + $0x2370] sm:$0xff] }
 0x584   :  { %10826 = vmatprep.subr.bf16.mxu0 %v15165_v5  ;;  %v15204_v5 = vcombine.low %v1280_v47, %v1284_v55  ;;  %v15213_v13 = vcombine.high %v1288_v1, %v1292_v2  ;;  %v1073_v47 = vld [vmem:[#allocation5 + $0x1c98] sm:$0xff] }
 0x585   :  { %11237 = vmatpush1.bf16.msra.mxu1 %v14910_v9  ;;  %v1296_v9 = vld [vmem:[#allocation5 + $0x2390] sm:$0xff]  ;;  %v1077_v55 = vld [vmem:[#allocation5 + $0x1cb8] sm:$0xff] }
 0x586   :  { %11238 = vmatprep.subr.bf16.mxu1 %v14919_v28  ;;  %v14958_v28 = vcombine.low %v1033_v21, %v1037_v12  ;;  %v14999_v21 = vcombine.high %v1073_v47, %v1077_v55 }
 0x587   :  { %10827 = vmatpush1.bf16.msra.mxu0 %v15164_v10  ;;  %v1300_v10 = vld [vmem:[#allocation5 + $0x23b0] sm:$0xff] }
 0x588   :  { %10828 = vmatprep.subr.bf16.mxu0 %v15173_v11  ;;  %v15212_v11 = vcombine.low %v1288_v1, %v1292_v2  ;;  %v15221_v18 = vcombine.high %v1296_v9, %v1300_v10  ;;  %v1081_v1 = vld [vmem:[#allocation5 + $0x1cd8] sm:$0xff] }
 0x589   :  { %11239 = vmatpush1.bf16.msra.mxu1 %v14918_v58  ;;  %v1304_v58 = vld [vmem:[#allocation5 + $0x23d0] sm:$0xff]  ;;  %v1085_v2 = vld [vmem:[#allocation5 + $0x1cf8] sm:$0xff] }
 0x58a   :  { %11240 = vmatprep.subr.bf16.mxu1 %v14927_v26  ;;  %v14966_v26 = vcombine.low %v1041_v34, %v1045_v8  ;;  %v1089_v8 = vld [vmem:[#allocation5 + $0x1d18] sm:$0xff] }
 0x58b   :  { %10829 = vmatpush1.bf16.msra.mxu0 %v15172_v52  ;;  %v1308_v52 = vld [vmem:[#allocation5 + $0x23f0] sm:$0xff] }
 0x58c   :  { %10830 = vmatprep.subr.bf16.mxu0 %v15181_v14  ;;  %v15220_v14 = vcombine.low %v1296_v9, %v1300_v10  ;;  %v15229_v27 = vcombine.high %v1304_v58, %v1308_v52  ;;  %v1093_v9 = vld [vmem:[#allocation5 + $0x1d38] sm:$0xff]  ;;  %v1344_v10 = vld [vmem:[#allocation5 + $0x2510] sm:$0xff] }
 0x58d   :  { %11241 = vmatpush1.bf16.msra.mxu1 %v14926_v3  ;;  %v1312_v3 = vld [vmem:[#allocation5 + $0x2410] sm:$0xff] }
 0x58e   :  { %11242 = vmatprep.subr.bf16.mxu1 %v14935_v36  ;;  %v14974_v36 = vcombine.low %v1049_v51, %v1053_v25  ;;  %v1097_v51 = vld [vmem:[#allocation5 + $0x1d58] sm:$0xff] }
 0x58f   :  { %10831 = vmatpush1.bf16.msra.mxu0 %v15180_v62  ;;  %v1316_v62 = vld [vmem:[#allocation5 + $0x2430] sm:$0xff]  ;;  %v1101_v25 = vld [vmem:[#allocation5 + $0x1d78] sm:$0xff] }
 0x590   :  { %10832 = vmatprep.subr.bf16.mxu0 %v15189_v37  ;;  %v15228_v37 = vcombine.low %v1304_v58, %v1308_v52  ;;  %v15237_v7 = vcombine.high %v1312_v3, %v1316_v62  ;;  %v1352_v58 = vld [vmem:[#allocation5 + $0x2550] sm:$0xff] }
 0x591   :  { %11243 = vmatpush1.bf16.msra.mxu1 %v14934_v41  ;;  %v1320_v41 = vld [vmem:[#allocation5 + $0x2450] sm:$0xff] }
 0x592   :  { %11244 = vmatprep.subr.bf16.mxu1 %v14943_v48  ;;  %v14982_v48 = vcombine.low %v1057_v31, %v1061_v35  ;;  %v1356_v52 = vld [vmem:[#allocation5 + $0x2570] sm:$0xff]  ;;  %v1105_v31 = vld [vmem:[#allocation5 + $0x1d98] sm:$0xff] }
 0x593   :  { %10833 = vmatpush1.bf16.msra.mxu0 %v15188_v61  ;;  %v1324_v61 = vld [vmem:[#allocation5 + $0x2470] sm:$0xff]  ;;  %v1109_v35 = vld [vmem:[#allocation5 + $0x1db8] sm:$0xff] }
 0x594   :  { %10834 = vmatprep.subr.bf16.mxu0 %v15197_v43  ;;  %v15236_v43 = vcombine.low %v1312_v3, %v1316_v62  ;;  %v15245_v46 = vcombine.high %v1320_v41, %v1324_v61  ;;  %v1360_v3 = vld [vmem:[#allocation5 + $0x2590] sm:$0xff] }
 0x595   :  { %11245 = vmatpush1.bf16.msra.mxu1 %v14942_v56  ;;  %v1328_v56 = vld [vmem:[#allocation5 + $0x2490] sm:$0xff] }
 0x596   :  { %11246 = vmatprep.subr.bf16.mxu1 %v14951_v63  ;;  %v14990_v63 = vcombine.low %v1065_v0, %v1069_v23  ;;  %v1364_v62 = vld [vmem:[#allocation5 + $0x25b0] sm:$0xff]  ;;  %v1113_v0 = vld [vmem:[#allocation5 + $0x1dd8] sm:$0xff] }
 0x597   :  { %10835 = vmatpush1.bf16.msra.mxu0 %v15196_v57  ;;  %v1332_v57 = vld [vmem:[#allocation5 + $0x24b0] sm:$0xff]  ;;  %v1117_v23 = vld [vmem:[#allocation5 + $0x1df8] sm:$0xff] }
 0x598   :  { %10836 = vmatprep.subr.bf16.mxu0 %v15205_v32  ;;  %v15244_v32 = vcombine.low %v1320_v41, %v1324_v61  ;;  %v15253_v12 = vcombine.high %v1328_v56, %v1332_v57  ;;  %v1368_v41 = vld [vmem:[#allocation5 + $0x25d0] sm:$0xff] }
 0x599   :  { %11247 = vmatpush1.bf16.msra.mxu1 %v14950_v4  ;;  %v1336_v4 = vld [vmem:[#allocation5 + $0x24d0] sm:$0xff] }
 0x59a   :  { %11248 = vmatprep.subr.bf16.mxu1 %v14959_v6  ;;  %v15252_v6 = vcombine.low %v1328_v56, %v1332_v57  ;;  %v1372_v61 = vld [vmem:[#allocation5 + $0x25f0] sm:$0xff] }
 0x59b   :  { %10837 = vmatpush1.bf16.msra.mxu0 %v15204_v5  ;;  %v1340_v5 = vld [vmem:[#allocation5 + $0x24f0] sm:$0xff] }
 0x59c   :  { %10838 = vmatprep.subr.bf16.mxu0 %v15213_v13  ;;  %v15007_v13 = vcombine.high %v1081_v1, %v1085_v2  ;;  %v15261_v34 = vcombine.high %v1336_v4, %v1340_v5  ;;  %v1376_v56 = vld [vmem:[#allocation5 + $0x2610] sm:$0xff] }
 0x59d   :  { %11249 = vmatpush1.bf16.msra.mxu1 %v14958_v28  ;;  %v1348_v28 = vld [vmem:[#allocation5 + $0x2530] sm:$0xff] }
 0x59e   :  { %11250 = vmatprep.subr.bf16.mxu1 %v14967_v15  ;;  %v15260_v15 = vcombine.low %v1336_v4, %v1340_v5  ;;  %v1380_v57 = vld [vmem:[#allocation5 + $0x2630] sm:$0xff] }
 0x59f   :  { %10839 = vmatpush1.bf16.msra.mxu0 %v15212_v11  ;;  %v15006_v11 = vcombine.low %v1081_v1, %v1085_v2  ;;  %v1129_v1 = vld [vmem:[#allocation5 + $0x1e58] sm:$0xff]  ;;  %v1384_v4 = vld [vmem:[#allocation5 + $0x2650] sm:$0xff] }
 0x5a0   :  { %10840 = vmatprep.subr.bf16.mxu0 %v15221_v18  ;;  %v15015_v18 = vcombine.high %v1089_v8, %v1093_v9  ;;  %v1133_v2 = vld [vmem:[#allocation5 + $0x1e78] sm:$0xff]  ;;  %v1388_v5 = vld [vmem:[#allocation5 + $0x2670] sm:$0xff] }
 0x5a1   :  { %11251 = vmatpush1.bf16.msra.mxu1 %v14966_v26  ;;  %v15014_v26 = vcombine.low %v1089_v8, %v1093_v9  ;;  %v1137_v8 = vld [vmem:[#allocation5 + $0x1e98] sm:$0xff] }
 0x5a2   :  { %11252 = vmatprep.subr.bf16.mxu1 %v14975_v42  ;;  %v15023_v42 = vcombine.high %v1097_v51, %v1101_v25  ;;  %v1141_v9 = vld [vmem:[#allocation5 + $0x1eb8] sm:$0xff] }
 0x5a3   :  { %10841 = vmatpush1.bf16.msra.mxu0 %v15220_v14  ;;  %v15268_v14 = vcombine.low %v1344_v10, %v1348_v28 }
 0x5a4   :  { %10842 = vmatprep.subr.bf16.mxu0 %v15229_v27  ;;  %v15277_v27 = vcombine.high %v1352_v58, %v1356_v52 }
 0x5a5   :  { %11253 = vmatpush1.bf16.msra.mxu1 %v14974_v36  ;;  %v15022_v36 = vcombine.low %v1097_v51, %v1101_v25  ;;  %v1145_v51 = vld [vmem:[#allocation5 + $0x1ed8] sm:$0xff] }
 0x5a6   :  { %11263 = vmatprep.subr.bf16.mxu1 %v14983_v39  ;;  %v15031_v39 = vcombine.high %v1105_v31, %v1109_v35  ;;  %v1149_v25 = vld [vmem:[#allocation5 + $0x1ef8] sm:$0xff] }
 0x5a7   :  { %10843 = vmatpush1.bf16.msra.mxu0 %v15228_v37  ;;  %v15276_v37 = vcombine.low %v1352_v58, %v1356_v52  ;;  %v1400_v58 = vld [vmem:[#allocation5 + $0x26d0] sm:$0xff] }
 0x5a8   :  { %10853 = vmatprep.subr.bf16.mxu0 %v15237_v7  ;;  %11255 = vmatmul.mubr.bf16.vlgmr.msra.gmra.mrb[8].mxu1 %v17235_v33  ;;  %v14998_v33 = vcombine.low %v1073_v47, %v1077_v55  ;;  %v15285_v7 = vcombine.high %v1360_v3, %v1364_v62  ;;  %v1121_v47 = vld [vmem:[#allocation5 + $0x1e18] sm:$0xff]  ;;  %v1404_v52 = vld [vmem:[#allocation5 + $0x26f0] sm:$0xff] }
 0x5a9   :  { %11264 = vmatpush1.bf16.msra.mxu1 %v14982_v48  ;;  %11295 = vmatprep.mubr.bf16.mxu1 %v17239_v40  ;;  %v15269_v40 = vcombine.high %v1344_v10, %v1348_v28  ;;  %v15030_v48 = vcombine.low %v1105_v31, %v1109_v35  ;;  %v1125_v55 = vld [vmem:[#allocation5 + $0x1e38] sm:$0xff]  ;;  %v1392_v10 = vld [vmem:[#allocation5 + $0x2690] sm:$0xff] }
 0x5aa   :  { %10845 = vmatmul.mubr.bf16.vlgmr.msra.gmra.mrb[4].mxu0 %v17263_v17  ;;  %11265 = vmatprep.subr.bf16.mxu1 %v14991_v45  ;;  %v15039_v45 = vcombine.high %v1113_v0, %v1117_v23  ;;  %v1396_v28 = vld [vmem:[#allocation5 + $0x26b0] sm:$0xff]  ;;  %v1153_v31 = vld [vmem:[#allocation5 + $0x1f18] sm:$0xff] }
 0x5ab   :  { %10854 = vmatpush1.bf16.msra.mxu0 %v15236_v43  ;;  %10885 = vmatprep.mubr.bf16.mxu0 %v17267_v53  ;;  %v15284_v43 = vcombine.low %v1360_v3, %v1364_v62  ;;  %v1157_v35 = vld [vmem:[#allocation5 + $0x1f38] sm:$0xff]  ;;  %v1408_v3 = vld [vmem:[#allocation5 + $0x2710] sm:$0xff] }
 0x5ac   :  { %10855 = vmatprep.subr.bf16.mxu0 %v15245_v46  ;;  %v15293_v46 = vcombine.high %v1368_v41, %v1372_v61  ;;  %v1412_v62 = vld [vmem:[#allocation5 + $0x2730] sm:$0xff] }
 0x5ad   :  { %11266 = vmatpush1.bf16.msra.mxu1 %v14990_v63  ;;  %v15038_v63 = vcombine.low %v1113_v0, %v1117_v23  ;;  %v1161_v0 = vld [vmem:[#allocation5 + $0x1f58] sm:$0xff] }
 0x5ae   :  { %11267 = vmatprep.subr.bf16.mxu1 %v14999_v21  ;;  %v15047_v21 = vcombine.high %v1121_v47, %v1125_v55  ;;  %v1165_v23 = vld [vmem:[#allocation5 + $0x1f78] sm:$0xff] }
 0x5af   :  { %10856 = vmatpush1.bf16.msra.mxu0 %v15244_v32  ;;  %v15292_v32 = vcombine.low %v1368_v41, %v1372_v61  ;;  %v1416_v41 = vld [vmem:[#allocation5 + $0x2750] sm:$0xff] }
 0x5b0   :  { %10857 = vmatprep.subr.bf16.mxu0 %v15253_v12  ;;  %v15301_v12 = vcombine.high %v1376_v56, %v1380_v57  ;;  %v1420_v61 = vld [vmem:[#allocation5 + $0x2770] sm:$0xff] }
 0x5b1   :  { %11268 = vmatpush1.bf16.msra.mxu1 %v14998_v33  ;;  %v15046_v33 = vcombine.low %v1121_v47, %v1125_v55  ;;  %v1169_v47 = vld [vmem:[#allocation5 + $0x1f98] sm:$0xff] }
 0x5b2   :  { %11269 = vmatprep.subr.bf16.mxu1 %v15007_v13  ;;  %v15055_v13 = vcombine.high %v1129_v1, %v1133_v2  ;;  %v1173_v55 = vld [vmem:[#allocation5 + $0x1fb8] sm:$0xff] }
 0x5b3   :  { %10858 = vmatpush1.bf16.msra.mxu0 %v15252_v6  ;;  %v15300_v6 = vcombine.low %v1376_v56, %v1380_v57  ;;  %v1424_v56 = vld [vmem:[#allocation5 + $0x2790] sm:$0xff] }
 0x5b4   :  { %10859 = vmatprep.subr.bf16.mxu0 %v15261_v34  ;;  %v15309_v34 = vcombine.high %v1384_v4, %v1388_v5  ;;  %v1428_v57 = vld [vmem:[#allocation5 + $0x27b0] sm:$0xff] }
 0x5b5   :  { %11270 = vmatpush1.bf16.msra.mxu1 %v15006_v11  ;;  %v15054_v11 = vcombine.low %v1129_v1, %v1133_v2  ;;  %v1177_v1 = vld [vmem:[#allocation5 + $0x1fd8] sm:$0xff] }
 0x5b6   :  { %11271 = vmatprep.subr.bf16.mxu1 %v15015_v18  ;;  %v15063_v18 = vcombine.high %v1137_v8, %v1141_v9  ;;  %v1181_v2 = vld [vmem:[#allocation5 + $0x1ff8] sm:$0xff] }
 0x5b7   :  { %10860 = vmatpush1.bf16.msra.mxu0 %v15260_v15  ;;  %v15308_v15 = vcombine.low %v1384_v4, %v1388_v5  ;;  %v1432_v4 = vld [vmem:[#allocation5 + $0x27d0] sm:$0xff] }
 0x5b8   :  { %10861 = vmatprep.subr.bf16.mxu0 %v15269_v40  ;;  %v15317_v40 = vcombine.high %v1392_v10, %v1396_v28  ;;  %v1436_v5 = vld [vmem:[#allocation5 + $0x27f0] sm:$0xff] }
 0x5b9   :  { %11272 = vmatpush1.bf16.msra.mxu1 %v15014_v26  ;;  %v15062_v26 = vcombine.low %v1137_v8, %v1141_v9  ;;  %v1185_v8 = vld [vmem:[#allocation5 + $0x2018] sm:$0xff] }
 0x5ba   :  { %11273 = vmatprep.subr.bf16.mxu1 %v15023_v42  ;;  %v15071_v42 = vcombine.high %v1145_v51, %v1149_v25  ;;  %v1189_v9 = vld [vmem:[#allocation5 + $0x2038] sm:$0xff] }
 0x5bb   :  { %10862 = vmatpush1.bf16.msra.mxu0 %v15268_v14  ;;  %v15316_v14 = vcombine.low %v1392_v10, %v1396_v28  ;;  %v1440_v10 = vld [vmem:[#allocation5 + $0x2810] sm:$0xff] }
 0x5bc   :  { %10863 = vmatprep.subr.bf16.mxu0 %v15277_v27  ;;  %v15325_v27 = vcombine.high %v1400_v58, %v1404_v52  ;;  %v1444_v28 = vld [vmem:[#allocation5 + $0x2830] sm:$0xff] }
 0x5bd   :  { %11274 = vmatpush1.bf16.msra.mxu1 %v15022_v36  ;;  %v15070_v36 = vcombine.low %v1145_v51, %v1149_v25  ;;  %v1193_v51 = vld [vmem:[#allocation5 + $0x2058] sm:$0xff] }
 0x5be   :  { %11275 = vmatprep.subr.bf16.mxu1 %v15031_v39  ;;  %v15079_v39 = vcombine.high %v1153_v31, %v1157_v35  ;;  %v1197_v25 = vld [vmem:[#allocation5 + $0x2078] sm:$0xff] }
 0x5bf   :  { %10864 = vmatpush1.bf16.msra.mxu0 %v15276_v37  ;;  %v15324_v37 = vcombine.low %v1400_v58, %v1404_v52  ;;  %v1448_v58 = vld [vmem:[#allocation5 + $0x2850] sm:$0xff] }
 0x5c0   :  { %10865 = vmatprep.subr.bf16.mxu0 %v15285_v7  ;;  %v15333_v7 = vcombine.high %v1408_v3, %v1412_v62  ;;  %v1452_v52 = vld [vmem:[#allocation5 + $0x2870] sm:$0xff] }
 0x5c1   :  { %11276 = vmatpush1.bf16.msra.mxu1 %v15030_v48  ;;  %v15078_v48 = vcombine.low %v1153_v31, %v1157_v35  ;;  %v1201_v31 = vld [vmem:[#allocation5 + $0x2098] sm:$0xff] }
 0x5c2   :  { %11277 = vmatprep.subr.bf16.mxu1 %v15039_v45  ;;  %v15087_v45 = vcombine.high %v1161_v0, %v1165_v23  ;;  %v1205_v35 = vld [vmem:[#allocation5 + $0x20b8] sm:$0xff] }
 0x5c3   :  { %10866 = vmatpush1.bf16.msra.mxu0 %v15284_v43  ;;  %v15332_v43 = vcombine.low %v1408_v3, %v1412_v62  ;;  %v1456_v3 = vld [vmem:[#allocation5 + $0x2890] sm:$0xff] }
 0x5c4   :  { %10867 = vmatprep.subr.bf16.mxu0 %v15293_v46  ;;  %v15341_v46 = vcombine.high %v1416_v41, %v1420_v61  ;;  %v1460_v62 = vld [vmem:[#allocation5 + $0x28b0] sm:$0xff] }
 0x5c5   :  { %11278 = vmatpush1.bf16.msra.mxu1 %v15038_v63  ;;  %v15086_v63 = vcombine.low %v1161_v0, %v1165_v23  ;;  %v1209_v0 = vld [vmem:[#allocation5 + $0x20d8] sm:$0xff] }
 0x5c6   :  { %11279 = vmatprep.subr.bf16.mxu1 %v15047_v21  ;;  %v15095_v21 = vcombine.high %v1169_v47, %v1173_v55  ;;  %v1213_v23 = vld [vmem:[#allocation5 + $0x20f8] sm:$0xff] }
 0x5c7   :  { %10868 = vmatpush1.bf16.msra.mxu0 %v15292_v32  ;;  %v15340_v32 = vcombine.low %v1416_v41, %v1420_v61  ;;  %v1464_v41 = vld [vmem:[#allocation5 + $0x28d0] sm:$0xff] }
 0x5c8   :  { %10869 = vmatprep.subr.bf16.mxu0 %v15301_v12  ;;  %v15349_v12 = vcombine.high %v1424_v56, %v1428_v57  ;;  %v1468_v61 = vld [vmem:[#allocation5 + $0x28f0] sm:$0xff] }
 0x5c9   :  { %11280 = vmatpush1.bf16.msra.mxu1 %v15046_v33  ;;  %v15094_v33 = vcombine.low %v1169_v47, %v1173_v55  ;;  %v1221_v47 = vld [vmem:[#allocation5 + $0x2138] sm:$0xff]  ;;  %v1472_v55 = vld [vmem:[#allocation5 + $0x2910] sm:$0xff] }
 0x5ca   :  { %11281 = vmatprep.subr.bf16.mxu1 %v15055_v13  ;;  %v15103_v13 = vcombine.high %v1177_v1, %v1181_v2 }
 0x5cb   :  { %10870 = vmatpush1.bf16.msra.mxu0 %v15300_v6  ;;  %v15348_v6 = vcombine.low %v1424_v56, %v1428_v57  ;;  %v1476_v56 = vld [vmem:[#allocation5 + $0x2930] sm:$0xff]  ;;  %v15134_v57 = vcombine.low %v1209_v0, %v1213_v23 }
 0x5cc   :  { %10871 = vmatprep.subr.bf16.mxu0 %v15309_v34  ;;  %v15357_v34 = vcombine.high %v1432_v4, %v1436_v5 }
 0x5cd   :  { %11282 = vmatpush1.bf16.msra.mxu1 %v15054_v11  ;;  %v15102_v11 = vcombine.low %v1177_v1, %v1181_v2  ;;  %v1480_v1 = vld [vmem:[#allocation5 + $0x2950] sm:$0xff] }
 0x5ce   :  { %11283 = vmatprep.subr.bf16.mxu1 %v15063_v18  ;;  %v15111_v18 = vcombine.high %v1185_v8, %v1189_v9  ;;  %v1484_v2 = vld [vmem:[#allocation5 + $0x2970] sm:$0xff] }
 0x5cf   :  { %10872 = vmatpush1.bf16.msra.mxu0 %v15308_v15  ;;  %v15356_v15 = vcombine.low %v1432_v4, %v1436_v5  ;;  %v15396_v5 = vcombine.low %v1472_v55, %v1476_v56 }
 0x5d0   :  { %10873 = vmatprep.subr.bf16.mxu0 %v15317_v40  ;;  %v15365_v40 = vcombine.high %v1440_v10, %v1444_v28 }
 0x5d1   :  { %11284 = vmatpush1.bf16.msra.mxu1 %v15062_v26  ;;  %v15110_v26 = vcombine.low %v1185_v8, %v1189_v9  ;;  %v1488_v8 = vld [vmem:[#allocation5 + $0x2990] sm:$0xff] }
 0x5d2   :  { %11285 = vmatprep.subr.bf16.mxu1 %v15071_v42  ;;  %v15119_v42 = vcombine.high %v1193_v51, %v1197_v25  ;;  %v1492_v9 = vld [vmem:[#allocation5 + $0x29b0] sm:$0xff] }
 0x5d3   :  { %10874 = vmatpush1.bf16.msra.mxu0 %v15316_v14  ;;  %v15364_v14 = vcombine.low %v1440_v10, %v1444_v28  ;;  %v15404_v28 = vcombine.low %v1480_v1, %v1484_v2 }
 0x5d4   :  { %10875 = vmatprep.subr.bf16.mxu0 %v15325_v27  ;;  %v15373_v27 = vcombine.high %v1448_v58, %v1452_v52 }
 0x5d5   :  { %11286 = vmatpush1.bf16.msra.mxu1 %v15070_v36  ;;  %v15118_v36 = vcombine.low %v1193_v51, %v1197_v25  ;;  %v1496_v51 = vld [vmem:[#allocation5 + $0x29d0] sm:$0xff] }
 0x5d6   :  { %11287 = vmatprep.subr.bf16.mxu1 %v15079_v39  ;;  %v15127_v39 = vcombine.high %v1201_v31, %v1205_v35  ;;  %v1500_v25 = vld [vmem:[#allocation5 + $0x29f0] sm:$0xff] }
 0x5d7   :  { %10876 = vmatpush1.bf16.msra.mxu0 %v15324_v37  ;;  %v15372_v37 = vcombine.low %v1448_v58, %v1452_v52  ;;  %v15412_v52 = vcombine.low %v1488_v8, %v1492_v9 }
 0x5d8   :  { %10877 = vmatprep.subr.bf16.mxu0 %v15333_v7  ;;  %v15381_v7 = vcombine.high %v1456_v3, %v1460_v62 }
 0x5d9   :  { %11288 = vmatpush1.bf16.msra.mxu1 %v15078_v48  ;;  %v15380_v48 = vcombine.low %v1456_v3, %v1460_v62  ;;  %v15420_v62 = vcombine.low %v1496_v51, %v1500_v25 }
 0x5da   :  { %11289 = vmatprep.subr.bf16.mxu1 %v15087_v45  ;;  %v15389_v45 = vcombine.high %v1464_v41, %v1468_v61 }
 0x5db   :  { %10878 = vmatpush1.bf16.msra.mxu0 %v15332_v43  ;;  %v15135_v43 = vcombine.high %v1209_v0, %v1213_v23  ;;  %v1512_v0 = vld [vmem:[#allocation5 + $0x2a50] sm:$0xff] }
 0x5dc   :  { %10879 = vmatprep.subr.bf16.mxu0 %v15341_v46  ;;  %v1217_v46 = vld [vmem:[#allocation5 + $0x2118] sm:$0xff]  ;;  %v1516_v23 = vld [vmem:[#allocation5 + $0x2a70] sm:$0xff] }
 0x5dd   :  { %11290 = vmatpush1.bf16.msra.mxu1 %v15086_v63  ;;  %v15388_v63 = vcombine.low %v1464_v41, %v1468_v61  ;;  %v15142_v4 = vcombine.low %v1217_v46, %v1221_v47 }
 0x5de   :  { %11291 = vmatprep.subr.bf16.mxu1 %v15095_v21  ;;  %v1225_v21 = vld [vmem:[#allocation5 + $0x2158] sm:$0xff] }
 0x5df   :  { %10880 = vmatpush1.bf16.msra.mxu0 %v15340_v32  ;;  %v15143_v32 = vcombine.high %v1217_v46, %v1221_v47  ;;  %v1520_v46 = vld [vmem:[#allocation5 + $0x2a90] sm:$0xff] }
 0x5e0   :  { %10881 = vmatprep.subr.bf16.mxu0 %v15349_v12  ;;  %v1229_v12 = vld [vmem:[#allocation5 + $0x2178] sm:$0xff]  ;;  %v1524_v47 = vld [vmem:[#allocation5 + $0x2ab0] sm:$0xff] }
 0x5e1   :  { %11292 = vmatpush1.bf16.msra.mxu1 %v15094_v33  ;;  %v15151_v33 = vcombine.high %v1225_v21, %v1229_v12  ;;  %v15150_v10 = vcombine.low %v1225_v21, %v1229_v12  ;;  %v1528_v21 = vld [vmem:[#allocation5 + $0x2ad0] sm:$0xff] }
 0x5e2   :  { %11293 = vmatprep.subr.bf16.mxu1 %v15103_v13  ;;  %v1233_v13 = vld [vmem:[#allocation5 + $0x2198] sm:$0xff]  ;;  %v1532_v12 = vld [vmem:[#allocation5 + $0x2af0] sm:$0xff] }
 0x5e3   :  { %10882 = vmatpush1.bf16.msra.mxu0 %v15348_v6  ;;  %v15405_v6 = vcombine.high %v1480_v1, %v1484_v2  ;;  %v15444_v2 = vcombine.low %v1520_v46, %v1524_v47 }
 0x5e4   :  { %10883 = vmatprep.subr.bf16.mxu0 %v15357_v34  ;;  %v1237_v34 = vld [vmem:[#allocation5 + $0x21b8] sm:$0xff] }
 0x5e5   :  { %11294 = vmatpush1.bf16.msra.mxu1 %v15102_v11  ;;  %v15159_v11 = vcombine.high %v1233_v13, %v1237_v34  ;;  %v15158_v58 = vcombine.low %v1233_v13, %v1237_v34  ;;  %v1536_v13 = vld [vmem:[#allocation5 + $0x2b10] sm:$0xff] }
 0x5e6   :  { %11304 = vmatprep.subr.bf16.mxu1 %v15111_v18  ;;  %v1241_v18 = vld [vmem:[#allocation5 + $0x21d8] sm:$0xff]  ;;  %v1540_v34 = vld [vmem:[#allocation5 + $0x2b30] sm:$0xff] }
 0x5e7   :  { %10884 = vmatpush1.bf16.msra.mxu0 %v15356_v15  ;;  %v15413_v15 = vcombine.high %v1488_v8, %v1492_v9  ;;  %v15452_v9 = vcombine.low %v1528_v21, %v1532_v12 }
 0x5e8   :  { %10894 = vmatprep.subr.bf16.mxu0 %v15365_v40  ;;  %11296 = vmatmul.mubr.bf16.vlgmr.msra.gmra.mrb[8].mxu1 %v17249_v24  ;;  %v15126_v24 = vcombine.low %v1201_v31, %v1205_v35  ;;  %v1245_v40 = vld [vmem:[#allocation5 + $0x21f8] sm:$0xff]  ;;  %v1504_v31 = vld [vmem:[#allocation5 + $0x2a10] sm:$0xff] }
 0x5e9   :  { %11305 = vmatpush1.bf16.msra.mxu1 %v15110_v26  ;;  %11336 = vmatprep.mubr.bf16.mxu1 %v17253_v54  ;;  %v15397_v54 = vcombine.high %v1472_v55, %v1476_v56  ;;  %v15167_v26 = vcombine.high %v1241_v18, %v1245_v40  ;;  %v1508_v35 = vld [vmem:[#allocation5 + $0x2a30] sm:$0xff]  ;;  %v15166_v3 = vcombine.low %v1241_v18, %v1245_v40 }
 0x5ea   :  { %10886 = vmatmul.mubr.bf16.vlgmr.msra.gmra.mrb[4].mxu0 %v17277_v50  ;;  %11306 = vmatprep.subr.bf16.mxu1 %v15119_v42  ;;  %v1249_v42 = vld [vmem:[#allocation5 + $0x2218] sm:$0xff]  ;;  %v15428_v61 = vcombine.low %v1504_v31, %v1508_v35  ;;  %v15436_v56 = vcombine.low %v1512_v0, %v1516_v23  ;;  %v1544_v18 = vld [vmem:[#allocation5 + $0x2b50] sm:$0xff] }
 0x5eb   :  { %10895 = vmatpush1.bf16.msra.mxu0 %v15364_v14  ;;  %10926 = vmatprep.mubr.bf16.mxu0 %v17281_v30  ;;  %v15421_v14 = vcombine.high %v1496_v51, %v1500_v25  ;;  %v1548_v40 = vld [vmem:[#allocation5 + $0x2b70] sm:$0xff]  ;;  %v15460_v25 = vcombine.low %v1536_v13, %v1540_v34 }
 0x5ec   :  { %10896 = vmatprep.subr.bf16.mxu0 %v15373_v27  ;;  %v1253_v27 = vld [vmem:[#allocation5 + $0x2238] sm:$0xff] }
 0x5ed   :  { %11307 = vmatpush1.bf16.msra.mxu1 %v15118_v36  ;;  %v15175_v36 = vcombine.high %v1249_v42, %v1253_v27  ;;  %v15174_v41 = vcombine.low %v1249_v42, %v1253_v27  ;;  %v1552_v42 = vld [vmem:[#allocation5 + $0x2b90] sm:$0xff] }
 0x5ee   :  { %11308 = vmatprep.subr.bf16.mxu1 %v15127_v39  ;;  %v1257_v39 = vld [vmem:[#allocation5 + $0x2258] sm:$0xff]  ;;  %v1556_v27 = vld [vmem:[#allocation5 + $0x2bb0] sm:$0xff] }
 0x5ef   :  { %10897 = vmatpush1.bf16.msra.mxu0 %v15372_v37  ;;  %v15429_v37 = vcombine.high %v1504_v31, %v1508_v35  ;;  %v15468_v35 = vcombine.low %v1544_v18, %v1548_v40 }
 0x5f0   :  { %10898 = vmatprep.subr.bf16.mxu0 %v15381_v7  ;;  %v1261_v7 = vld [vmem:[#allocation5 + $0x2278] sm:$0xff] }
 0x5f1   :  { %11309 = vmatpush1.bf16.msra.mxu1 %v15126_v24  ;;  %v15183_v24 = vcombine.high %v1257_v39, %v1261_v7  ;;  %v15182_v55 = vcombine.low %v1257_v39, %v1261_v7  ;;  %v1560_v39 = vld [vmem:[#allocation5 + $0x2bd0] sm:$0xff] }
 0x5f2   :  { %11310 = vmatprep.subr.bf16.mxu1 %v15135_v43  ;;  %v1265_v43 = vld [vmem:[#allocation5 + $0x2298] sm:$0xff]  ;;  %v1564_v7 = vld [vmem:[#allocation5 + $0x2bf0] sm:$0xff] }
 0x5f3   :  { %10899 = vmatpush1.bf16.msra.mxu0 %v15380_v48  ;;  %v15437_v48 = vcombine.high %v1512_v0, %v1516_v23  ;;  %v15476_v23 = vcombine.low %v1552_v42, %v1556_v27 }
 0x5f4   :  { %10900 = vmatprep.subr.bf16.mxu0 %v15389_v45  ;;  %v1269_v45 = vld [vmem:[#allocation5 + $0x22b8] sm:$0xff] }
 0x5f5   :  { %11311 = vmatpush1.bf16.msra.mxu1 %v15134_v57  ;;  %v15191_v57 = vcombine.high %v1265_v43, %v1269_v45  ;;  %v15190_v1 = vcombine.low %v1265_v43, %v1269_v45  ;;  %v1568_v43 = vld [vmem:[#allocation5 + $0x2c10] sm:$0xff] }
 0x5f6   :  { %11312 = vmatprep.subr.bf16.mxu1 %v15143_v32  ;;  %v1273_v32 = vld [vmem:[#allocation5 + $0x22d8] sm:$0xff]  ;;  %v1572_v45 = vld [vmem:[#allocation5 + $0x2c30] sm:$0xff] }
 0x5f7   :  { %10901 = vmatpush1.bf16.msra.mxu0 %v15388_v63  ;;  %v15445_v63 = vcombine.high %v1520_v46, %v1524_v47  ;;  %v15484_v47 = vcombine.low %v1560_v39, %v1564_v7 }
 0x5f8   :  { %10902 = vmatprep.subr.bf16.mxu0 %v15397_v54  ;;  %v1277_v54 = vld [vmem:[#allocation5 + $0x22f8] sm:$0xff] }
 0x5f9   :  { %11313 = vmatpush1.bf16.msra.mxu1 %v15142_v4  ;;  %v15199_v4 = vcombine.high %v1273_v32, %v1277_v54  ;;  %v15198_v8 = vcombine.low %v1273_v32, %v1277_v54  ;;  %v1576_v32 = vld [vmem:[#allocation5 + $0x2c50] sm:$0xff] }
 0x5fa   :  { %11314 = vmatprep.subr.bf16.mxu1 %v15151_v33  ;;  %v1281_v33 = vld [vmem:[#allocation5 + $0x2318] sm:$0xff]  ;;  %v1580_v54 = vld [vmem:[#allocation5 + $0x2c70] sm:$0xff] }
 0x5fb   :  { %10903 = vmatpush1.bf16.msra.mxu0 %v15396_v5  ;;  %v15453_v5 = vcombine.high %v1528_v21, %v1532_v12  ;;  %v15492_v12 = vcombine.low %v1568_v43, %v1572_v45 }
 0x5fc   :  { %10904 = vmatprep.subr.bf16.mxu0 %v15405_v6  ;;  %v1285_v6 = vld [vmem:[#allocation5 + $0x2338] sm:$0xff] }
 0x5fd   :  { %11315 = vmatpush1.bf16.msra.mxu1 %v15150_v10  ;;  %v15207_v10 = vcombine.high %v1281_v33, %v1285_v6  ;;  %v15206_v51 = vcombine.low %v1281_v33, %v1285_v6  ;;  %v1584_v33 = vld [vmem:[#allocation5 + $0x2c90] sm:$0xff] }
 0x5fe   :  { %11316 = vmatprep.subr.bf16.mxu1 %v15159_v11  ;;  %v1289_v11 = vld [vmem:[#allocation5 + $0x2358] sm:$0xff]  ;;  %v1588_v6 = vld [vmem:[#allocation5 + $0x2cb0] sm:$0xff] }
 0x5ff   :  { %10905 = vmatpush1.bf16.msra.mxu0 %v15404_v28  ;;  %v15461_v28 = vcombine.high %v1536_v13, %v1540_v34  ;;  %v15500_v34 = vcombine.low %v1576_v32, %v1580_v54 }
 0x600   :  { %10906 = vmatprep.subr.bf16.mxu0 %v15413_v15  ;;  %v1293_v15 = vld [vmem:[#allocation5 + $0x2378] sm:$0xff] }
 0x601   :  { %11317 = vmatpush1.bf16.msra.mxu1 %v15158_v58  ;;  %v15215_v58 = vcombine.high %v1289_v11, %v1293_v15  ;;  %v15214_v31 = vcombine.low %v1289_v11, %v1293_v15  ;;  %v1592_v11 = vld [vmem:[#allocation5 + $0x2cd0] sm:$0xff] }
 0x602   :  { %11318 = vmatprep.subr.bf16.mxu1 %v15167_v26  ;;  %v1297_v26 = vld [vmem:[#allocation5 + $0x2398] sm:$0xff]  ;;  %v1596_v15 = vld [vmem:[#allocation5 + $0x2cf0] sm:$0xff] }
 0x603   :  { %10907 = vmatpush1.bf16.msra.mxu0 %v15412_v52  ;;  %v15469_v52 = vcombine.high %v1544_v18, %v1548_v40  ;;  %v15508_v18 = vcombine.low %v1584_v33, %v1588_v6 }
 0x604   :  { %10908 = vmatprep.subr.bf16.mxu0 %v15421_v14  ;;  %v1301_v14 = vld [vmem:[#allocation5 + $0x23b8] sm:$0xff] }
 0x605   :  { %11319 = vmatpush1.bf16.msra.mxu1 %v15166_v3  ;;  %v15223_v3 = vcombine.high %v1297_v26, %v1301_v14  ;;  %v15222_v0 = vcombine.low %v1297_v26, %v1301_v14  ;;  %v1604_v26 = vld [vmem:[#allocation5 + $0x2d30] sm:$0xff] }
 0x606   :  { %11320 = vmatprep.subr.bf16.mxu1 %v15175_v36  ;;  %v1305_v36 = vld [vmem:[#allocation5 + $0x23d8] sm:$0xff] }
 0x607   :  { %10909 = vmatpush1.bf16.msra.mxu0 %v15420_v62  ;;  %v15477_v62 = vcombine.high %v1552_v42, %v1556_v27  ;;  %v15516_v42 = vcombine.low %v1592_v11, %v1596_v15 }
 0x608   :  { %10910 = vmatprep.subr.bf16.mxu0 %v15429_v37  ;;  %v1309_v37 = vld [vmem:[#allocation5 + $0x23f8] sm:$0xff] }
 0x609   :  { %11321 = vmatpush1.bf16.msra.mxu1 %v15174_v41  ;;  %v15231_v41 = vcombine.high %v1305_v36, %v1309_v37  ;;  %v15230_v46 = vcombine.low %v1305_v36, %v1309_v37 }
 0x60a   :  { %11322 = vmatprep.subr.bf16.mxu1 %v15183_v24  ;;  %v1313_v24 = vld [vmem:[#allocation5 + $0x2418] sm:$0xff] }
 0x60b   :  { %10911 = vmatpush1.bf16.msra.mxu0 %v15428_v61  ;;  %v15485_v61 = vcombine.high %v1560_v39, %v1564_v7 }
 0x60c   :  { %10912 = vmatprep.subr.bf16.mxu0 %v15437_v48  ;;  %v1317_v48 = vld [vmem:[#allocation5 + $0x2438] sm:$0xff] }
 0x60d   :  { %11323 = vmatpush1.bf16.msra.mxu1 %v15182_v55  ;;  %v15239_v55 = vcombine.high %v1313_v24, %v1317_v48  ;;  %v15238_v21 = vcombine.low %v1313_v24, %v1317_v48 }
 0x60e   :  { %11324 = vmatprep.subr.bf16.mxu1 %v15191_v57  ;;  %v1321_v57 = vld [vmem:[#allocation5 + $0x2458] sm:$0xff] }
 0x60f   :  { %10913 = vmatpush1.bf16.msra.mxu0 %v15436_v56  ;;  %v15493_v56 = vcombine.high %v1568_v43, %v1572_v45 }
 0x610   :  { %10914 = vmatprep.subr.bf16.mxu0 %v15445_v63  ;;  %v1325_v63 = vld [vmem:[#allocation5 + $0x2478] sm:$0xff] }
 0x611   :  { %11325 = vmatpush1.bf16.msra.mxu1 %v15190_v1  ;;  %v15247_v1 = vcombine.high %v1321_v57, %v1325_v63  ;;  %v15246_v13 = vcombine.low %v1321_v57, %v1325_v63 }
 0x612   :  { %11326 = vmatprep.subr.bf16.mxu1 %v15199_v4  ;;  %v1329_v4 = vld [vmem:[#allocation5 + $0x2498] sm:$0xff] }
 0x613   :  { %10915 = vmatpush1.bf16.msra.mxu0 %v15444_v2  ;;  %v15501_v2 = vcombine.high %v1576_v32, %v1580_v54 }
 0x614   :  { %10916 = vmatprep.subr.bf16.mxu0 %v15453_v5  ;;  %v1333_v5 = vld [vmem:[#allocation5 + $0x24b8] sm:$0xff] }
 0x615   :  { %11327 = vmatpush1.bf16.msra.mxu1 %v15198_v8  ;;  %v15255_v8 = vcombine.high %v1329_v4, %v1333_v5 }
 0x616   :  { %11328 = vmatprep.subr.bf16.mxu1 %v15207_v10  ;;  %v1337_v10 = vld [vmem:[#allocation5 + $0x24d8] sm:$0xff] }
 0x617   :  { %10917 = vmatpush1.bf16.msra.mxu0 %v15452_v9  ;;  %v15509_v9 = vcombine.high %v1584_v33, %v1588_v6 }
 0x618   :  { %10918 = vmatprep.subr.bf16.mxu0 %v15461_v28  ;;  %v1341_v28 = vld [vmem:[#allocation5 + $0x24f8] sm:$0xff] }
 0x619   :  { %11329 = vmatpush1.bf16.msra.mxu1 %v15206_v51  ;;  %v15263_v40 = vcombine.high %v1337_v10, %v1341_v28  ;;  %v15517_v51 = vcombine.high %v1592_v11, %v1596_v15  ;;  %v15262_v14 = vcombine.low %v1337_v10, %v1341_v28 }
 0x61a   :  { %11330 = vmatprep.subr.bf16.mxu1 %v15215_v58  ;;  %v1349_v58 = vld [vmem:[#allocation5 + $0x2538] sm:$0xff] }
 0x61b   :  { %10919 = vmatpush1.bf16.msra.mxu0 %v15460_v25  ;;  %v1345_v25 = vld [vmem:[#allocation5 + $0x2518] sm:$0xff] }
 0x61c   :  { %10920 = vmatprep.subr.bf16.mxu0 %v15469_v52  ;;  %v1600_v52 = vld [vmem:[#allocation5 + $0x2d10] sm:$0xff]  ;;  %v15271_v27 = vcombine.high %v1345_v25, %v1349_v58  ;;  %v15270_v36 = vcombine.low %v1345_v25, %v1349_v58 }
 0x61d   :  { %11331 = vmatpush1.bf16.msra.mxu1 %v15214_v31  ;;  %v1353_v31 = vld [vmem:[#allocation5 + $0x2558] sm:$0xff]  ;;  %v15524_v37 = vcombine.low %v1600_v52, %v1604_v26 }
 0x61e   :  { %11332 = vmatprep.subr.bf16.mxu1 %v15223_v3  ;;  %v1608_v3 = vld [vmem:[#allocation5 + $0x2d50] sm:$0xff] }
 0x61f   :  { %10921 = vmatpush1.bf16.msra.mxu0 %v15468_v35  ;;  %v1357_v35 = vld [vmem:[#allocation5 + $0x2578] sm:$0xff] }
 0x620   :  { %10922 = vmatprep.subr.bf16.mxu0 %v15477_v62  ;;  %v1612_v62 = vld [vmem:[#allocation5 + $0x2d70] sm:$0xff]  ;;  %v15279_v39 = vcombine.high %v1353_v31, %v1357_v35  ;;  %v15278_v24 = vcombine.low %v1353_v31, %v1357_v35 }
 0x621   :  { %11333 = vmatpush1.bf16.msra.mxu1 %v15222_v0  ;;  %v15533_v7 = vcombine.high %v1608_v3, %v1612_v62  ;;  %v1361_v0 = vld [vmem:[#allocation5 + $0x2598] sm:$0xff]  ;;  %v15532_v48 = vcombine.low %v1608_v3, %v1612_v62 }
 0x622   :  { %11334 = vmatprep.subr.bf16.mxu1 %v15231_v41  ;;  %v1616_v41 = vld [vmem:[#allocation5 + $0x2d90] sm:$0xff] }
 0x623   :  { %10923 = vmatpush1.bf16.msra.mxu0 %v15476_v23  ;;  %v1365_v23 = vld [vmem:[#allocation5 + $0x25b8] sm:$0xff] }
 0x624   :  { %10924 = vmatprep.subr.bf16.mxu0 %v15485_v61  ;;  %v1620_v61 = vld [vmem:[#allocation5 + $0x2db0] sm:$0xff]  ;;  %v15287_v43 = vcombine.high %v1361_v0, %v1365_v23  ;;  %v15286_v57 = vcombine.low %v1361_v0, %v1365_v23 }
 0x625   :  { %11335 = vmatpush1.bf16.msra.mxu1 %v15230_v46  ;;  %v15541_v45 = vcombine.high %v1616_v41, %v1620_v61  ;;  %v1369_v46 = vld [vmem:[#allocation5 + $0x25d8] sm:$0xff]  ;;  %v15540_v63 = vcombine.low %v1616_v41, %v1620_v61 }
 0x626   :  { %11345 = vmatprep.subr.bf16.mxu1 %v15239_v55  ;;  %v1624_v55 = vld [vmem:[#allocation5 + $0x2dd0] sm:$0xff] }
 0x627   :  { %10925 = vmatpush1.bf16.msra.mxu0 %v15484_v47  ;;  %v1373_v47 = vld [vmem:[#allocation5 + $0x25f8] sm:$0xff] }
 0x628   :  { %10935 = vmatprep.subr.bf16.mxu0 %v15493_v56  ;;  %11337 = vmatmul.mubr.bf16.vlgmr.msra.gmra.mrb[8].mxu1 %v17263_v17  ;;  %v15254_v17 = vcombine.low %v1329_v4, %v1333_v5  ;;  %v1628_v56 = vld [vmem:[#allocation5 + $0x2df0] sm:$0xff]  ;;  %v15295_v32 = vcombine.high %v1369_v46, %v1373_v47  ;;  %v15294_v4 = vcombine.low %v1369_v46, %v1373_v47 }
 0x629   :  { %11346 = vmatpush1.bf16.msra.mxu1 %v15238_v21  ;;  %11377 = vmatprep.mubr.bf16.mxu1 %v17267_v53  ;;  %v15525_v53 = vcombine.high %v1600_v52, %v1604_v26  ;;  %v15549_v54 = vcombine.high %v1624_v55, %v1628_v56  ;;  %v1377_v21 = vld [vmem:[#allocation5 + $0x2618] sm:$0xff]  ;;  %v15548_v5 = vcombine.low %v1624_v55, %v1628_v56 }
 0x62a   :  { %10927 = vmatmul.mubr.bf16.vlgmr.msra.gmra.mrb[4].mxu0 %v17291_v38  ;;  %11347 = vmatprep.subr.bf16.mxu1 %v15247_v1  ;;  %v1632_v1 = vld [vmem:[#allocation5 + $0x2e10] sm:$0xff] }
 0x62b   :  { %10936 = vmatpush1.bf16.msra.mxu0 %v15492_v12  ;;  %10967 = vmatprep.mubr.bf16.mxu0 %v17295_v44  ;;  %v1381_v12 = vld [vmem:[#allocation5 + $0x2638] sm:$0xff] }
 0x62c   :  { %10937 = vmatprep.subr.bf16.mxu0 %v15501_v2  ;;  %v1636_v2 = vld [vmem:[#allocation5 + $0x2e30] sm:$0xff]  ;;  %v15303_v33 = vcombine.high %v1377_v21, %v1381_v12  ;;  %v15302_v10 = vcombine.low %v1377_v21, %v1381_v12 }
 0x62d   :  { %11348 = vmatpush1.bf16.msra.mxu1 %v15246_v13  ;;  %v15557_v6 = vcombine.high %v1632_v1, %v1636_v2  ;;  %v1385_v13 = vld [vmem:[#allocation5 + $0x2658] sm:$0xff]  ;;  %v15556_v28 = vcombine.low %v1632_v1, %v1636_v2 }
 0x62e   :  { %11349 = vmatprep.subr.bf16.mxu1 %v15255_v8  ;;  %v1640_v8 = vld [vmem:[#allocation5 + $0x2e50] sm:$0xff] }
 0x62f   :  { %10938 = vmatpush1.bf16.msra.mxu0 %v15500_v34  ;;  %v1389_v34 = vld [vmem:[#allocation5 + $0x2678] sm:$0xff] }
 0x630   :  { %10939 = vmatprep.subr.bf16.mxu0 %v15509_v9  ;;  %v1644_v9 = vld [vmem:[#allocation5 + $0x2e70] sm:$0xff]  ;;  %v15311_v11 = vcombine.high %v1385_v13, %v1389_v34  ;;  %v15310_v25 = vcombine.low %v1385_v13, %v1389_v34 }
 0x631   :  { %11350 = vmatpush1.bf16.msra.mxu1 %v15254_v17  ;;  %v15565_v15 = vcombine.high %v1640_v8, %v1644_v9  ;;  %v1393_v17 = vld [vmem:[#allocation5 + $0x2698] sm:$0xff]  ;;  %v15564_v58 = vcombine.low %v1640_v8, %v1644_v9 }
 0x632   :  { %11351 = vmatprep.subr.bf16.mxu1 %v15263_v40  ;;  %v1648_v40 = vld [vmem:[#allocation5 + $0x2e90] sm:$0xff] }
 0x633   :  { %10940 = vmatpush1.bf16.msra.mxu0 %v15508_v18  ;;  %v1397_v18 = vld [vmem:[#allocation5 + $0x26b8] sm:$0xff] }
 0x634   :  { %10941 = vmatprep.subr.bf16.mxu0 %v15517_v51  ;;  %v1652_v51 = vld [vmem:[#allocation5 + $0x2eb0] sm:$0xff]  ;;  %v15319_v52 = vcombine.high %v1393_v17, %v1397_v18  ;;  %v15318_v31 = vcombine.low %v1393_v17, %v1397_v18  ;;  %v16235_v18 = vld [vmem:[#allocation8 + $0x4] ss:$16 sps:$4 sm:$0xff]  }
 0x635   :  { %11352 = vmatpush1.bf16.msra.mxu1 %v15262_v14  ;;  %v15573_v26 = vcombine.high %v1648_v40, %v1652_v51  ;;  %v1401_v14 = vld [vmem:[#allocation5 + $0x26d8] sm:$0xff]  ;;  %v15572_v35 = vcombine.low %v1648_v40, %v1652_v51  ;;  %v11469_v40 = vmax.f32 %v17335_v20, 0.0 }
 0x636   :  { %11353 = vmatprep.subr.bf16.mxu1 %v15271_v27  ;;  %v1656_v27 = vld [vmem:[#allocation5 + $0x2ed0] sm:$0xff]  ;;  %v1449_v51 = vld [vmem:[#allocation5 + $0x2858] sm:$0xff] }
 0x637   :  { %10942 = vmatpush1.bf16.msra.mxu0 %v15516_v42  ;;  %v1405_v42 = vld [vmem:[#allocation5 + $0x26f8] sm:$0xff] }
 0x638   :  { %10943 = vmatprep.subr.bf16.mxu0 %v15525_v53  ;;  %v1660_v53 = vld [vmem:[#allocation5 + $0x2ef0] sm:$0xff]  ;;  %v15327_v3 = vcombine.high %v1401_v14, %v1405_v42  ;;  %v15326_v0 = vcombine.low %v1401_v14, %v1405_v42  ;;  %v16238_v14 = vld [vmem:[#allocation8 + $0x24] ss:$16 sps:$4 sm:$0xff]  }
 0x639   :  { %11354 = vmatpush1.bf16.msra.mxu1 %v15270_v36  ;;  %v15581_v62 = vcombine.high %v1656_v27, %v1660_v53  ;;  %v1409_v36 = vld [vmem:[#allocation5 + $0x2718] sm:$0xff]  ;;  %v15580_v23 = vcombine.low %v1656_v27, %v1660_v53  ;;  %v17374_v53 = vpack.c.bf16 %v11469_v40, %v11469_v40 }
 0x63a   :  { %11355 = vmatprep.subr.bf16.mxu1 %v15279_v39  ;;  %v1664_v39 = vld [vmem:[#allocation5 + $0x2f10] sm:$0xff]  ;;  %v1457_v42 = vld [vmem:[#allocation5 + $0x2898] sm:$0xff] }
 0x63b   :  { %10944 = vmatpush1.bf16.msra.mxu0 %v15524_v37  ;;  %v1413_v37 = vld [vmem:[#allocation5 + $0x2738] sm:$0xff] }
 0x63c   :  { %10945 = vmatprep.subr.bf16.mxu0 %v15533_v7  ;;  %v1668_v7 = vld [vmem:[#allocation5 + $0x2f30] sm:$0xff]  ;;  %v15335_v41 = vcombine.high %v1409_v36, %v1413_v37  ;;  %v15334_v46 = vcombine.low %v1409_v36, %v1413_v37  ;;  %v1461_v27 = vld [vmem:[#allocation5 + $0x28b8] sm:$0xff] }
 0x63d   :  { %11356 = vmatpush1.bf16.msra.mxu1 %v15278_v24  ;;  %v15589_v61 = vcombine.high %v1664_v39, %v1668_v7  ;;  %v1417_v24 = vld [vmem:[#allocation5 + $0x2758] sm:$0xff]  ;;  %v15588_v47 = vcombine.low %v1664_v39, %v1668_v7  ;;  %v15382_v37 = vcombine.low %v1457_v42, %v1461_v27 }
 0x63e   :  { %11357 = vmatprep.subr.bf16.mxu1 %v15287_v43  ;;  %v1672_v43 = vld [vmem:[#allocation5 + $0x2f50] sm:$0xff]  ;;  %v1469_v36 = vld [vmem:[#allocation5 + $0x28f8] sm:$0xff] }
 0x63f   :  { %10946 = vmatpush1.bf16.msra.mxu0 %v15532_v48  ;;  %v1421_v48 = vld [vmem:[#allocation5 + $0x2778] sm:$0xff] }
 0x640   :  { %10947 = vmatprep.subr.bf16.mxu0 %v15541_v45  ;;  %v1676_v45 = vld [vmem:[#allocation5 + $0x2f70] sm:$0xff]  ;;  %v15343_v55 = vcombine.high %v1417_v24, %v1421_v48  ;;  %v15342_v21 = vcombine.low %v1417_v24, %v1421_v48  ;;  %v16244_v7 = vld [vmem:[#allocation8 + $0x64] ss:$16 sps:$4 sm:$0xff]  }
 0x641   :  { %11358 = vmatpush1.bf16.msra.mxu1 %v15286_v57  ;;  %v15597_v56 = vcombine.high %v1672_v43, %v1676_v45  ;;  %v1425_v57 = vld [vmem:[#allocation5 + $0x2798] sm:$0xff]  ;;  %v15596_v12 = vcombine.low %v1672_v43, %v1676_v45 }
 0x642   :  { %11359 = vmatprep.subr.bf16.mxu1 %v15295_v32  ;;  %v1680_v32 = vld [vmem:[#allocation5 + $0x2f90] sm:$0xff]  ;;  %v16247_v48 = vld [vmem:[#allocation8 + $0x84] ss:$16 sps:$4 sm:$0xff]  }
 0x643   :  { %10948 = vmatpush1.bf16.msra.mxu0 %v15540_v63  ;;  %v1429_v63 = vld [vmem:[#allocation5 + $0x27b8] sm:$0xff] }
 0x644   :  { %10949 = vmatprep.subr.bf16.mxu0 %v15549_v54  ;;  %v1684_v54 = vld [vmem:[#allocation5 + $0x2fb0] sm:$0xff]  ;;  %v15351_v1 = vcombine.high %v1425_v57, %v1429_v63  ;;  %v15350_v13 = vcombine.low %v1425_v57, %v1429_v63  ;;  %v1481_v43 = vld [vmem:[#allocation5 + $0x2958] sm:$0xff] }
 0x645   :  { %11360 = vmatpush1.bf16.msra.mxu1 %v15294_v4  ;;  %v15605_v2 = vcombine.high %v1680_v32, %v1684_v54  ;;  %v1433_v4 = vld [vmem:[#allocation5 + $0x27d8] sm:$0xff]  ;;  %v15604_v34 = vcombine.low %v1680_v32, %v1684_v54 }
 0x646   :  { %11361 = vmatprep.subr.bf16.mxu1 %v15303_v33  ;;  %v1688_v33 = vld [vmem:[#allocation5 + $0x2fd0] sm:$0xff]  ;;  %v1493_v57 = vld [vmem:[#allocation5 + $0x29b8] sm:$0xff] }
 0x647   :  { %10950 = vmatpush1.bf16.msra.mxu0 %v15548_v5  ;;  %v1437_v5 = vld [vmem:[#allocation5 + $0x27f8] sm:$0xff] }
 0x648   :  { %10951 = vmatprep.subr.bf16.mxu0 %v15557_v6  ;;  %v1692_v6 = vld [vmem:[#allocation5 + $0x2ff0] sm:$0xff]  ;;  %v15359_v8 = vcombine.high %v1433_v4, %v1437_v5  ;;  %v16248_v32 = vld [vmem:[#allocation8 + $0xa0] ss:$16 sps:$4 sm:$0xff]   ;;  %v16262_v40 = vld [vmem:[#allocation8 + $0x124] ss:$16 sps:$4 sm:$0xff]  }
 0x649   :  { %11362 = vmatpush1.bf16.msra.mxu1 %v15302_v10  ;;  %v15613_v9 = vcombine.high %v1688_v33, %v1692_v6  ;;  %v1441_v10 = vld [vmem:[#allocation5 + $0x2818] sm:$0xff] }
 0x64a   :  { %11363 = vmatprep.subr.bf16.mxu1 %v15311_v11  ;;  %v15358_v11 = vcombine.low %v1433_v4, %v1437_v5  ;;  %v16251_v4 = vld [vmem:[#allocation8 + $0xc0] ss:$16 sps:$4 sm:$0xff]  }
 0x64b   :  { %10952 = vmatpush1.bf16.msra.mxu0 %v15556_v28  ;;  %v1445_v28 = vld [vmem:[#allocation5 + $0x2838] sm:$0xff] }
 0x64c   :  { %10953 = vmatprep.subr.bf16.mxu0 %v15565_v15  ;;  %v15612_v15 = vcombine.low %v1688_v33, %v1692_v6  ;;  %v15367_v17 = vcombine.high %v1441_v10, %v1445_v28  ;;  %v16256_v33 = vld [vmem:[#allocation8 + $0xe4] ss:$16 sps:$4 sm:$0xff]  }
 0x64d   :  { %11364 = vmatpush1.bf16.msra.mxu1 %v15310_v25  ;;  %v1453_v25 = vld [vmem:[#allocation5 + $0x2878] sm:$0xff] }
 0x64e   :  { %11365 = vmatprep.subr.bf16.mxu1 %v15319_v52  ;;  %v16233_v52 = vld [vmem:[#allocation8] ss:$16 sps:$4 sm:$0xff]   ;;  %v15374_v20 = vcombine.low %v1449_v51, %v1453_v25 }
 0x64f   :  { %10954 = vmatpush1.bf16.msra.mxu0 %v15564_v58  ;;  %v15366_v58 = vcombine.low %v1441_v10, %v1445_v28  ;;  %v1505_v6 = vld [vmem:[#allocation5 + $0x2a18] sm:$0xff] }
 0x650   :  { %10955 = vmatprep.subr.bf16.mxu0 %v15573_v26  ;;  %v15375_v26 = vcombine.high %v1449_v51, %v1453_v25  ;;  %v16259_v10 = vld [vmem:[#allocation8 + $0x104] ss:$16 sps:$4 sm:$0xff]  }
 0x651   :  { %11366 = vmatpush1.bf16.msra.mxu1 %v15318_v31  ;;  %v16236_v31 = vld [vmem:[#allocation8 + $0x20] ss:$16 sps:$4 sm:$0xff]  }
 0x652   :  { %11367 = vmatprep.subr.bf16.mxu1 %v15327_v3  ;;  %v16241_v3 = vld [vmem:[#allocation8 + $0x44] ss:$16 sps:$4 sm:$0xff]  }
 0x653   :  { %10956 = vmatpush1.bf16.msra.mxu0 %v15572_v35  ;;  %v15383_v35 = vcombine.high %v1457_v42, %v1461_v27  ;;  %v1513_v28 = vld [vmem:[#allocation5 + $0x2a58] sm:$0xff] }
 0x654   :  { %10957 = vmatprep.subr.bf16.mxu0 %v15581_v62  ;;  %v1465_v62 = vld [vmem:[#allocation5 + $0x28d8] sm:$0xff] }
 0x655   :  { %11368 = vmatpush1.bf16.msra.mxu1 %v15326_v0  ;;  %v15391_v39 = vcombine.high %v1465_v62, %v1469_v36  ;;  %v1473_v0 = vld [vmem:[#allocation5 + $0x2918] sm:$0xff] }
 0x656   :  { %11369 = vmatprep.subr.bf16.mxu1 %v15335_v41  ;;  %v15390_v41 = vcombine.low %v1465_v62, %v1469_v36  ;;  %v1521_v51 = vld [vmem:[#allocation5 + $0x2a98] sm:$0xff] }
 0x657   :  { %10958 = vmatpush1.bf16.msra.mxu0 %v15580_v23  ;;  %v1477_v23 = vld [vmem:[#allocation5 + $0x2938] sm:$0xff] }
 0x658   :  { %10959 = vmatprep.subr.bf16.mxu0 %v15589_v61  ;;  %v16242_v61 = vld [vmem:[#allocation8 + $0x60] ss:$16 sps:$4 sm:$0xff]   ;;  %v15399_v24 = vcombine.high %v1473_v0, %v1477_v23  ;;  %v15398_v45 = vcombine.low %v1473_v0, %v1477_v23 }
 0x659   :  { %11370 = vmatpush1.bf16.msra.mxu1 %v15334_v46  ;;  %v16245_v46 = vld [vmem:[#allocation8 + $0x80] ss:$16 sps:$4 sm:$0xff]  }
 0x65a   :  { %11371 = vmatprep.subr.bf16.mxu1 %v15343_v55  ;;  %v16250_v55 = vld [vmem:[#allocation8 + $0xa4] ss:$16 sps:$4 sm:$0xff]  }
 0x65b   :  { %10960 = vmatpush1.bf16.msra.mxu0 %v15588_v47  ;;  %v1525_v25 = vld [vmem:[#allocation5 + $0x2ab8] sm:$0xff] }
 0x65c   :  { %10961 = vmatprep.subr.bf16.mxu0 %v15597_v56  ;;  %v1489_v56 = vld [vmem:[#allocation5 + $0x2998] sm:$0xff] }
 0x65d   :  { %11372 = vmatpush1.bf16.msra.mxu1 %v15342_v21  ;;  %v15415_v54 = vcombine.high %v1489_v56, %v1493_v57  ;;  %v16253_v21 = vld [vmem:[#allocation8 + $0xc4] ss:$16 sps:$4 sm:$0xff]  }
 0x65e   :  { %11373 = vmatprep.subr.bf16.mxu1 %v15351_v1  ;;  %v1501_v1 = vld [vmem:[#allocation5 + $0x29f8] sm:$0xff] }
 0x65f   :  { %10962 = vmatpush1.bf16.msra.mxu0 %v15596_v12  ;;  %v1497_v12 = vld [vmem:[#allocation5 + $0x29d8] sm:$0xff] }
 0x660   :  { %10963 = vmatprep.subr.bf16.mxu0 %v15605_v2  ;;  %v15414_v2 = vcombine.low %v1489_v56, %v1493_v57  ;;  %v15423_v5 = vcombine.high %v1497_v12, %v1501_v1  ;;  %v1529_v42 = vld [vmem:[#allocation5 + $0x2ad8] sm:$0xff] }
 0x661   :  { %11374 = vmatpush1.bf16.msra.mxu1 %v15350_v13  ;;  %v1509_v13 = vld [vmem:[#allocation5 + $0x2a38] sm:$0xff] }
 0x662   :  { %11375 = vmatprep.subr.bf16.mxu1 %v15359_v8  ;;  %v16254_v8 = vld [vmem:[#allocation8 + $0xe0] ss:$16 sps:$4 sm:$0xff]   ;;  %v16277_v56 = vld [vmem:[#allocation8 + $0x1c4] ss:$16 sps:$4 sm:$0xff]  }
 0x663   :  { %10964 = vmatpush1.bf16.msra.mxu0 %v15604_v34  ;;  %v15422_v34 = vcombine.low %v1497_v12, %v1501_v1  ;;  %v1533_v27 = vld [vmem:[#allocation5 + $0x2af8] sm:$0xff] }
 0x664   :  { %10965 = vmatprep.subr.bf16.mxu0 %v15613_v9  ;;  %v15431_v9 = vcombine.high %v1505_v6, %v1509_v13  ;;  %v1537_v62 = vld [vmem:[#allocation5 + $0x2b18] sm:$0xff] }
 0x665   :  { %11376 = vmatpush1.bf16.msra.mxu1 %v15358_v11  ;;  %v1517_v11 = vld [vmem:[#allocation5 + $0x2a78] sm:$0xff] }
 0x666   :  { %11386 = vmatprep.subr.bf16.mxu1 %v15367_v17  ;;  %v16257_v17 = vld [vmem:[#allocation8 + $0x100] ss:$16 sps:$4 sm:$0xff]  }
 0x667   :  { %10966 = vmatpush1.bf16.msra.mxu0 %v15612_v15  ;;  %v15430_v15 = vcombine.low %v1505_v6, %v1509_v13  ;;  %v1541_v36 = vld [vmem:[#allocation5 + $0x2b38] sm:$0xff] }
 0x668   :  { %13042 = vmatprep.subr.bf16.mxu0 %v16235_v18  ;;  %11378 = vmatmul.mubr.bf16.vlgmr.msra.gmra.mrb[8].mxu1 %v17277_v50  ;;  %v16239_v50 = vld [vmem:[#allocation8 + $0x40] ss:$16 sps:$4 sm:$0xff]   ;;  %v15439_v18 = vcombine.high %v1513_v28, %v1517_v11 }
 0x669   :  { %11387 = vmatpush1.bf16.msra.mxu1 %v15366_v58  ;;  %11418 = vmatprep.mubr.bf16.mxu1 %v17281_v30  ;;  %v1485_v30 = vld [vmem:[#allocation5 + $0x2978] sm:$0xff]  ;;  %v15438_v58 = vcombine.low %v1513_v28, %v1517_v11 }
 0x66a   :  { %10968 = vmatmul.mubr.bf16.vlgmr.msra.gmra.mrb[4].mxu0 %v17303_v59  ;;  %11388 = vmatprep.subr.bf16.mxu1 %v15375_v26  ;;  %v15407_v47 = vcombine.high %v1481_v43, %v1485_v30  ;;  %v15406_v63 = vcombine.low %v1481_v43, %v1485_v30  ;;  %v15447_v26 = vcombine.high %v1521_v51, %v1525_v25  ;;  %v1545_v0 = vld [vmem:[#allocation5 + $0x2b58] sm:$0xff] }
 0x66b   :  { %13043 = vmatpush1.bf16.msra.mxu0 %v16233_v52  ;;  %13074 = vmatprep.mubr.bf16.mxu0 %v17374_v53  ;;  %v16260_v52 = vld [vmem:[#allocation8 + $0x120] ss:$16 sps:$4 sm:$0xff]  }
 0x66c   :  { %13044 = vmatprep.subr.bf16.mxu0 %v16238_v14  ;;  %v16265_v14 = vld [vmem:[#allocation8 + $0x144] ss:$16 sps:$4 sm:$0xff]   ;;  %v16275_v12 = vld [vmem:[#allocation8 + $0x1c0] ss:$16 sps:$4 sm:$0xff]  }
 0x66d   :  { %11389 = vmatpush1.bf16.msra.mxu1 %v15374_v20  ;;  %v15446_v20 = vcombine.low %v1521_v51, %v1525_v25  ;;  %v1549_v23 = vld [vmem:[#allocation5 + $0x2b78] sm:$0xff] }
 0x66e   :  { %11390 = vmatprep.subr.bf16.mxu1 %v15383_v35  ;;  %v15455_v35 = vcombine.high %v1529_v42, %v1533_v27  ;;  %v1553_v43 = vld [vmem:[#allocation5 + $0x2b98] sm:$0xff] }
 0x66f   :  { %13045 = vmatpush1.bf16.msra.mxu0 %v16236_v31  ;;  %v16263_v31 = vld [vmem:[#allocation8 + $0x140] ss:$16 sps:$4 sm:$0xff]  }
 0x670   :  { %13046 = vmatprep.subr.bf16.mxu0 %v16241_v3  ;;  %v16268_v3 = vld [vmem:[#allocation8 + $0x164] ss:$16 sps:$4 sm:$0xff]   ;;  %v16278_v13 = vld [vmem:[#allocation8 + $0x1e0] ss:$16 sps:$4 sm:$0xff]  }
 0x671   :  { %11391 = vmatpush1.bf16.msra.mxu1 %v15382_v37  ;;  %v15454_v37 = vcombine.low %v1529_v42, %v1533_v27  ;;  %v1557_v30 = vld [vmem:[#allocation5 + $0x2bb8] sm:$0xff] }
 0x672   :  { %11392 = vmatprep.subr.bf16.mxu1 %v15391_v39  ;;  %v15463_v39 = vcombine.high %v1537_v62, %v1541_v36  ;;  %v1561_v57 = vld [vmem:[#allocation5 + $0x2bd8] sm:$0xff] }
 0x673   :  { %13047 = vmatpush1.bf16.msra.mxu0 %v16239_v50  ;;  %v16266_v50 = vld [vmem:[#allocation8 + $0x160] ss:$16 sps:$4 sm:$0xff]  }
 0x674   :  { %13048 = vmatprep.subr.bf16.mxu0 %v16244_v7  ;;  %v16271_v7 = vld [vmem:[#allocation8 + $0x184] ss:$16 sps:$4 sm:$0xff]  }
 0x675   :  { %11393 = vmatpush1.bf16.msra.mxu1 %v15390_v41  ;;  %v15462_v41 = vcombine.low %v1537_v62, %v1541_v36  ;;  %v1577_v28 = vld [vmem:[#allocation5 + $0x2c58] sm:$0xff] }
 0x676   :  { %11394 = vmatprep.subr.bf16.mxu1 %v15399_v24  ;;  %v15471_v24 = vcombine.high %v1545_v0, %v1549_v23  ;;  %v1581_v11 = vld [vmem:[#allocation5 + $0x2c78] sm:$0xff] }
 0x677   :  { %13049 = vmatpush1.bf16.msra.mxu0 %v16242_v61  ;;  %v16269_v61 = vld [vmem:[#allocation8 + $0x180] ss:$16 sps:$4 sm:$0xff]  }
 0x678   :  { %13050 = vmatprep.subr.bf16.mxu0 %v16247_v48  ;;  %v16274_v48 = vld [vmem:[#allocation8 + $0x1a4] ss:$16 sps:$4 sm:$0xff]  }
 0x679   :  { %11395 = vmatpush1.bf16.msra.mxu1 %v15398_v45  ;;  %v1710_v45 = vsub.s32 3, %v17321_v29  ;;  %v1585_v51 = vld [vmem:[#allocation5 + $0x2c98] sm:$0xff] }
 0x67a   :  { %11396 = vmatprep.subr.bf16.mxu1 %v15407_v47  ;;  %v16272_v47 = vld [vmem:[#allocation8 + $0x1a0] ss:$16 sps:$4 sm:$0xff]  }
 0x67b   :  { %13051 = vmatpush1.bf16.msra.mxu0 %v16245_v46  ;;  %v15470_v46 = vcombine.low %v1545_v0, %v1549_v23  ;;  %v1589_v25 = vld [vmem:[#allocation5 + $0x2cb8] sm:$0xff] }
 0x67c   :  { %13052 = vmatprep.subr.bf16.mxu0 %v16250_v55  ;;  %v15479_v55 = vcombine.high %v1553_v43, %v1557_v30  ;;  %v1593_v42 = vld [vmem:[#allocation5 + $0x2cd8] sm:$0xff] }
 0x67d   :  { %11397 = vmatpush1.bf16.msra.mxu1 %v15406_v63  ;;  %v1565_v63 = vld [vmem:[#allocation5 + $0x2bf8] sm:$0xff] }
 0x67e   :  { %11398 = vmatprep.subr.bf16.mxu1 %v15415_v54  ;;  %v15487_v1 = vcombine.high %v1561_v57, %v1565_v63  ;;  %v15486_v6 = vcombine.low %v1561_v57, %v1565_v63  ;;  %v1597_v27 = vld [vmem:[#allocation5 + $0x2cf8] sm:$0xff] }
 0x67f   :  { %13053 = vmatpush1.bf16.msra.mxu0 %v16248_v32  ;;  %v17381_v32 = vld [vmem:[#allocation7] sm:$0xff]  ;;  %v1605_v62 = vld [vmem:[#allocation5 + $0x2d38] sm:$0xff]  ;;  %v15518_v36 = vcombine.low %v1593_v42, %v1597_v27 }
 0x680   :  { %13054 = vmatprep.subr.bf16.mxu0 %v16253_v21  ;;  %v1711_v54 = vrot.slane %v17381_v32, %v1710_v45  ;;  %v15478_v21 = vcombine.low %v1553_v43, %v1557_v30  ;;  %v16293_v23 = vld [vmem:[#allocation8 + $0x280] ss:$16 sps:$4 sm:$0xff]  }
 0x681   :  { %11399 = vmatpush1.bf16.msra.mxu1 %v15414_v2  ;;  %v16280_v2 = vld [vmem:[#allocation8 + $0x1e4] ss:$16 sps:$4 sm:$0xff]   ;;  %v16296_v30 = vld [vmem:[#allocation8 + $0x2a0] ss:$16 sps:$4 sm:$0xff]  }
 0x682   :  { %11400 = vmatprep.subr.bf16.mxu1 %v15423_v5  ;;  %v1573_v5 = vld [vmem:[#allocation5 + $0x2c38] sm:$0xff] }
 0x683   :  { %13055 = vmatpush1.bf16.msra.mxu0 %v16251_v4  ;;  %v1569_v4 = vld [vmem:[#allocation5 + $0x2c18] sm:$0xff] }
 0x684   :  { %13056 = vmatprep.subr.bf16.mxu0 %v16256_v33  ;;  %v15980_v33 = vadd.f32 %v17347_v60, %v1711_v54  ;;  %v15503_v60 = vcombine.high %v1577_v28, %v1581_v11  ;;  %v16299_v63 = vld [vmem:[#allocation8 + $0x2c0] ss:$16 sps:$4 sm:$0xff]  }
 0x685   :  { %11401 = vmatpush1.bf16.msra.mxu1 %v15422_v34  ;;  %v15495_v34 = vcombine.high %v1569_v4, %v1573_v5 }
 0x686   :  { %11402 = vmatprep.subr.bf16.mxu1 %v15431_v9  ;;  %v16283_v9 = vld [vmem:[#allocation8 + $0x204] ss:$16 sps:$4 sm:$0xff]  }
 0x687   :  { %13057 = vmatpush1.bf16.msra.mxu0 %v16254_v8  ;;  %v11468_v8 = vmax.f32 %v17333_v16, 0.0  ;;  %v15502_v16 = vcombine.low %v1577_v28, %v1581_v11  ;;  %v1649_v28 = vld [vmem:[#allocation5 + $0x2e98] sm:$0xff] }
 0x688   :  { %13058 = vmatprep.subr.bf16.mxu0 %v16259_v10  ;;  %v11471_v10 = vmax.f32 %v15980_v33, 0.0  ;;  %v16307_v33 = vld [vmem:[#allocation8 + $0x304] ss:$16 sps:$4 sm:$0xff]  }
 0x689   :  { %11403 = vmatpush1.bf16.msra.mxu1 %v15430_v15  ;;  %v15494_v15 = vcombine.low %v1569_v4, %v1573_v5  ;;  %v16302_v4 = vld [vmem:[#allocation8 + $0x2e0] ss:$16 sps:$4 sm:$0xff]  }
 0x68a   :  { %11404 = vmatprep.subr.bf16.mxu1 %v15439_v18  ;;  %v17388_v18 = vpack.c.bf16 %v11468_v8, %v11468_v8  ;;  %v16305_v8 = vld [vmem:[#allocation8 + $0x300] ss:$16 sps:$4 sm:$0xff]  }
 0x68b   :  { %13059 = vmatpush1.bf16.msra.mxu0 %v16257_v17  ;;  %v16281_v17 = vld [vmem:[#allocation8 + $0x200] ss:$16 sps:$4 sm:$0xff]  }
 0x68c   :  { %13060 = vmatprep.subr.bf16.mxu0 %v16262_v40  ;;  %v16286_v40 = vld [vmem:[#allocation8 + $0x224] ss:$16 sps:$4 sm:$0xff]  }
 0x68d   :  { %11405 = vmatpush1.bf16.msra.mxu1 %v15438_v58  ;;  %v17390_v58 = vpack.c.bf16 %v11471_v10, %v11471_v10  ;;  %v16310_v10 = vld [vmem:[#allocation8 + $0x324] ss:$16 sps:$4 sm:$0xff]  }
 0x68e   :  { %11406 = vmatprep.subr.bf16.mxu1 %v15447_v26  ;;  %v15511_v26 = vcombine.high %v1585_v51, %v1589_v25  ;;  %v1653_v11 = vld [vmem:[#allocation5 + $0x2eb8] sm:$0xff] }
 0x68f   :  { %13061 = vmatpush1.bf16.msra.mxu0 %v16260_v52  ;;  %v16284_v52 = vld [vmem:[#allocation8 + $0x220] ss:$16 sps:$4 sm:$0xff]  }
 0x690   :  { %13062 = vmatprep.subr.bf16.mxu0 %v16265_v14  ;;  %v16289_v14 = vld [vmem:[#allocation8 + $0x244] ss:$16 sps:$4 sm:$0xff]  }
 0x691   :  { %11407 = vmatpush1.bf16.msra.mxu1 %v15446_v20  ;;  %v15510_v20 = vcombine.low %v1585_v51, %v1589_v25  ;;  %v1657_v51 = vld [vmem:[#allocation5 + $0x2ed8] sm:$0xff] }
 0x692   :  { %11408 = vmatprep.subr.bf16.mxu1 %v15455_v35  ;;  %v16292_v35 = vld [vmem:[#allocation8 + $0x264] ss:$16 sps:$4 sm:$0xff]  }
 0x693   :  { %13063 = vmatpush1.bf16.msra.mxu0 %v16263_v31  ;;  %v15519_v31 = vcombine.high %v1593_v42, %v1597_v27  ;;  %v1661_v25 = vld [vmem:[#allocation5 + $0x2ef8] sm:$0xff] }
 0x694   :  { %13064 = vmatprep.subr.bf16.mxu0 %v16268_v3  ;;  %v1601_v3 = vld [vmem:[#allocation5 + $0x2d18] sm:$0xff] }
 0x695   :  { %11409 = vmatpush1.bf16.msra.mxu1 %v15454_v37  ;;  %v16290_v37 = vld [vmem:[#allocation8 + $0x260] ss:$16 sps:$4 sm:$0xff]   ;;  %v15526_v0 = vcombine.low %v1601_v3, %v1605_v62 }
 0x696   :  { %11410 = vmatprep.subr.bf16.mxu1 %v15463_v39  ;;  %v16295_v39 = vld [vmem:[#allocation8 + $0x284] ss:$16 sps:$4 sm:$0xff]  }
 0x697   :  { %13065 = vmatpush1.bf16.msra.mxu0 %v16266_v50  ;;  %v15527_v50 = vcombine.high %v1601_v3, %v1605_v62  ;;  %v1665_v42 = vld [vmem:[#allocation5 + $0x2f18] sm:$0xff] }
 0x698   :  { %13066 = vmatprep.subr.bf16.mxu0 %v16271_v7  ;;  %v1609_v7 = vld [vmem:[#allocation5 + $0x2d58] sm:$0xff] }
 0x699   :  { %11411 = vmatpush1.bf16.msra.mxu1 %v15462_v41  ;;  %v1669_v27 = vld [vmem:[#allocation5 + $0x2f38] sm:$0xff] }
 0x69a   :  { %11412 = vmatprep.subr.bf16.mxu1 %v15471_v24  ;;  %v1617_v24 = vld [vmem:[#allocation5 + $0x2d98] sm:$0xff] }
 0x69b   :  { %13067 = vmatpush1.bf16.msra.mxu0 %v16269_v61  ;;  %v16298_v61 = vld [vmem:[#allocation8 + $0x2a4] ss:$16 sps:$4 sm:$0xff]  }
 0x69c   :  { %13068 = vmatprep.subr.bf16.mxu0 %v16274_v48  ;;  %v1621_v48 = vld [vmem:[#allocation5 + $0x2db8] sm:$0xff] }
 0x69d   :  { %11413 = vmatpush1.bf16.msra.mxu1 %v15470_v46  ;;  %v15543_v46 = vcombine.high %v1617_v24, %v1621_v48  ;;  %v15542_v57 = vcombine.low %v1617_v24, %v1621_v48  ;;  %v1673_v3 = vld [vmem:[#allocation5 + $0x2f58] sm:$0xff] }
 0x69e   :  { %11414 = vmatprep.subr.bf16.mxu1 %v15479_v55  ;;  %v1625_v55 = vld [vmem:[#allocation5 + $0x2dd8] sm:$0xff] }
 0x69f   :  { %13069 = vmatpush1.bf16.msra.mxu0 %v16272_v47  ;;  %v16301_v47 = vld [vmem:[#allocation8 + $0x2c4] ss:$16 sps:$4 sm:$0xff]  }
 0x6a0   :  { %13070 = vmatprep.subr.bf16.mxu0 %v16277_v56  ;;  %v1629_v56 = vld [vmem:[#allocation5 + $0x2df8] sm:$0xff] }
 0x6a1   :  { %11415 = vmatpush1.bf16.msra.mxu1 %v15478_v21  ;;  %v15551_v54 = vcombine.high %v1625_v55, %v1629_v56  ;;  %v16304_v21 = vld [vmem:[#allocation8 + $0x2e4] ss:$16 sps:$4 sm:$0xff]  }
 0x6a2   :  { %11416 = vmatprep.subr.bf16.mxu1 %v15487_v1  ;;  %v1637_v1 = vld [vmem:[#allocation5 + $0x2e38] sm:$0xff] }
 0x6a3   :  { %13071 = vmatpush1.bf16.msra.mxu0 %v16275_v12  ;;  %v1633_v12 = vld [vmem:[#allocation5 + $0x2e18] sm:$0xff] }
 0x6a4   :  { %13072 = vmatprep.subr.bf16.mxu0 %v16280_v2  ;;  %v15550_v2 = vcombine.low %v1625_v55, %v1629_v56  ;;  %v15559_v5 = vcombine.high %v1633_v12, %v1637_v1  ;;  %v1677_v62 = vld [vmem:[#allocation5 + $0x2f78] sm:$0xff] }
 0x6a5   :  { %11417 = vmatpush1.bf16.msra.mxu1 %v15486_v6  ;;  %v1641_v6 = vld [vmem:[#allocation5 + $0x2e58] sm:$0xff] }
 0x6a6   :  { %11427 = vmatprep.subr.bf16.mxu1 %v15495_v34  ;;  %v15558_v34 = vcombine.low %v1633_v12, %v1637_v1  ;;  %v16325_v48 = vld [vmem:[#allocation8 + $0x3c4] ss:$16 sps:$4 sm:$0xff]  }
 0x6a7   :  { %13073 = vmatpush1.bf16.msra.mxu0 %v16278_v13  ;;  %v1645_v13 = vld [vmem:[#allocation5 + $0x2e78] sm:$0xff] }
 0x6a8   :  { %13083 = vmatprep.subr.bf16.mxu0 %v16283_v9  ;;  %11419 = vmatmul.mubr.bf16.vlgmr.msra.gmra.mrb[8].mxu1 %v17291_v38  ;;  %v16287_v38 = vld [vmem:[#allocation8 + $0x240] ss:$16 sps:$4 sm:$0xff]   ;;  %v15567_v9 = vcombine.high %v1641_v6, %v1645_v13  ;;  %v16352_v1 = vld [vmem:[#allocation8 + $0x404] ss:$16 sps:$4 sm:$0xff]  }
 0x6a9   :  { %11428 = vmatpush1.bf16.msra.mxu1 %v15494_v15  ;;  %11459 = vmatprep.mubr.bf16.mxu1 %v17295_v44  ;;  %v1613_v44 = vld [vmem:[#allocation5 + $0x2d78] sm:$0xff]  ;;  %v15566_v15 = vcombine.low %v1641_v6, %v1645_v13  ;;  %v16332_v6 = vld [vmem:[#allocation8 + $0x28] ss:$16 sps:$4 sm:$0xff]   ;;  %v16337_v13 = vld [vmem:[#allocation8 + $0x4c] ss:$16 sps:$4 sm:$0xff]  }
 0x6aa   :  { %13075 = vmatmul.mubr.bf16.vlgmr.msra.gmra.mrb[8].mxu0 %v17388_v18  ;;  %11429 = vmatprep.subr.bf16.mxu1 %v15503_v60  ;;  %v15535_v41 = vcombine.high %v1609_v7, %v1613_v44  ;;  %v15534_v43 = vcombine.low %v1609_v7, %v1613_v44  ;;  %v15575_v60 = vcombine.high %v1649_v28, %v1653_v11  ;;  %v16322_v7 = vld [vmem:[#allocation8 + $0x3a4] ss:$16 sps:$4 sm:$0xff]  }
 0x6ab   :  { %13084 = vmatpush1.bf16.msra.mxu0 %v16281_v17  ;;  %13115 = vmatprep.mubr.bf16.mxu0 %v17390_v58  ;;  %v16308_v17 = vld [vmem:[#allocation8 + $0x320] ss:$16 sps:$4 sm:$0xff]  }
 0x6ac   :  { %13085 = vmatprep.subr.bf16.mxu0 %v16286_v40  ;;  %v16313_v40 = vld [vmem:[#allocation8 + $0x344] ss:$16 sps:$4 sm:$0xff]  }
 0x6ad   :  { %11430 = vmatpush1.bf16.msra.mxu1 %v15502_v16  ;;  %v15574_v16 = vcombine.low %v1649_v28, %v1653_v11  ;;  %v1681_v44 = vld [vmem:[#allocation5 + $0x2f98] sm:$0xff]  ;;  %v16338_v11 = vld [vmem:[#allocation8 + $0x68] ss:$16 sps:$4 sm:$0xff]  }
 0x6ae   :  { %11431 = vmatprep.subr.bf16.mxu1 %v15511_v26  ;;  %v15583_v26 = vcombine.high %v1657_v51, %v1661_v25  ;;  %v16362_v28 = vld [vmem:[#allocation8 + $0x440] ss:$16 sps:$4 sm:$0xff]  }
 0x6af   :  { %13086 = vmatpush1.bf16.msra.mxu0 %v16284_v52  ;;  %v16311_v52 = vld [vmem:[#allocation8 + $0x340] ss:$16 sps:$4 sm:$0xff]  }
 0x6b0   :  { %13087 = vmatprep.subr.bf16.mxu0 %v16289_v14  ;;  %v16316_v14 = vld [vmem:[#allocation8 + $0x364] ss:$16 sps:$4 sm:$0xff]  }
 0x6b1   :  { %11432 = vmatpush1.bf16.msra.mxu1 %v15510_v20  ;;  %v15582_v20 = vcombine.low %v1657_v51, %v1661_v25  ;;  %v16374_v51 = vld [vmem:[#allocation8 + $0x480] ss:$16 sps:$4 sm:$0xff]   ;;  %v16382_v25 = vld [vmem:[#allocation8 + $0x4a4] ss:$16 sps:$4 sm:$0xff]  }
 0x6b2   :  { %11433 = vmatprep.subr.bf16.mxu1 %v15519_v31  ;;  %v15591_v31 = vcombine.high %v1665_v42, %v1669_v27 }
 0x6b3   :  { %13088 = vmatpush1.bf16.msra.mxu0 %v16287_v38  ;;  %v16314_v38 = vld [vmem:[#allocation8 + $0x360] ss:$16 sps:$4 sm:$0xff]  }
 0x6b4   :  { %13089 = vmatprep.subr.bf16.mxu0 %v16292_v35  ;;  %v16319_v35 = vld [vmem:[#allocation8 + $0x384] ss:$16 sps:$4 sm:$0xff]  }
 0x6b5   :  { %11434 = vmatpush1.bf16.msra.mxu1 %v15518_v36  ;;  %v15590_v36 = vcombine.low %v1665_v42, %v1669_v27  ;;  %v16347_v42 = vld [vmem:[#allocation8 + $0xc8] ss:$16 sps:$4 sm:$0xff]   ;;  %v16355_v27 = vld [vmem:[#allocation8 + $0xec] ss:$16 sps:$4 sm:$0xff]  }
 0x6b6   :  { %11435 = vmatprep.subr.bf16.mxu1 %v15527_v50  ;;  %v15599_v50 = vcombine.high %v1673_v3, %v1677_v62 }
 0x6b7   :  { %13090 = vmatpush1.bf16.msra.mxu0 %v16290_v37  ;;  %v16317_v37 = vld [vmem:[#allocation8 + $0x380] ss:$16 sps:$4 sm:$0xff]  }
 0x6b8   :  { %13091 = vmatprep.subr.bf16.mxu0 %v16295_v39  ;;  %v1706_v39 = vsub.s32 2, %v17321_v29 }
 0x6b9   :  { %11436 = vmatpush1.bf16.msra.mxu1 %v15526_v0  ;;  %v1685_v0 = vld [vmem:[#allocation5 + $0x2fb8] sm:$0xff] }
 0x6ba   :  { %11437 = vmatprep.subr.bf16.mxu1 %v15535_v41  ;;  %v16320_v41 = vld [vmem:[#allocation8 + $0x3a0] ss:$16 sps:$4 sm:$0xff]   ;;  %v1707_v24 = vrot.slane %v17381_v32, %v1706_v39 }
 0x6bb   :  { %13092 = vmatpush1.bf16.msra.mxu0 %v16293_v23  ;;  %v15598_v23 = vcombine.low %v1673_v3, %v1677_v62  ;;  %v16392_v3 = vld [vmem:[#allocation8 + $0x4e0] ss:$16 sps:$4 sm:$0xff]   ;;  %v16400_v62 = vld [vmem:[#allocation8 + $0x504] ss:$16 sps:$4 sm:$0xff]  }
 0x6bc   :  { %13093 = vmatprep.subr.bf16.mxu0 %v16298_v61  ;;  %v15607_v61 = vcombine.high %v1681_v44, %v1685_v0  ;;  %v15979_v56 = vadd.f32 %v17345_v49, %v1707_v24  ;;  %v16358_v49 = vld [vmem:[#allocation8 + $0x424] ss:$16 sps:$4 sm:$0xff]   ;;  %v16379_v24 = vld [vmem:[#allocation8 + $0x16c] ss:$16 sps:$4 sm:$0xff]  }
 0x6bd   :  { %11438 = vmatpush1.bf16.msra.mxu1 %v15534_v43  ;;  %v1689_v43 = vld [vmem:[#allocation5 + $0x2fd8] sm:$0xff] }
 0x6be   :  { %11439 = vmatprep.subr.bf16.mxu1 %v15543_v46  ;;  %v15606_v46 = vcombine.low %v1681_v44, %v1685_v0  ;;  %v11470_v12 = vmax.f32 %v15979_v56, 0.0  ;;  %v16365_v44 = vld [vmem:[#allocation8 + $0x128] ss:$16 sps:$4 sm:$0xff]   ;;  %v16373_v0 = vld [vmem:[#allocation8 + $0x14c] ss:$16 sps:$4 sm:$0xff]  }
 0x6bf   :  { %13094 = vmatpush1.bf16.msra.mxu0 %v16296_v30  ;;  %v1693_v30 = vld [vmem:[#allocation5 + $0x2ff8] sm:$0xff]  ;;  %v16383_v56 = vld [vmem:[#allocation8 + $0x188] ss:$16 sps:$4 sm:$0xff]  }
 0x6c0   :  { %13095 = vmatprep.subr.bf16.mxu0 %v16301_v47  ;;  %v16323_v47 = vld [vmem:[#allocation8 + $0x3c0] ss:$16 sps:$4 sm:$0xff]   ;;  %v15615_v55 = vcombine.high %v1689_v43, %v1693_v30 }
 0x6c1   :  { %11440 = vmatpush1.bf16.msra.mxu1 %v15542_v57  ;;  %v16328_v57 = vld [vmem:[#allocation8 + $0x3e4] ss:$16 sps:$4 sm:$0xff]  }
 0x6c2   :  { %11441 = vmatprep.subr.bf16.mxu1 %v15551_v54  ;;  %v16326_v54 = vld [vmem:[#allocation8 + $0x3e0] ss:$16 sps:$4 sm:$0xff]  }
 0x6c3   :  { %13096 = vmatpush1.bf16.msra.mxu0 %v16299_v63  ;;  %v15614_v63 = vcombine.low %v1689_v43, %v1693_v30  ;;  %v16418_v43 = vld [vmem:[#allocation8 + $0x564] ss:$16 sps:$4 sm:$0xff]   ;;  %v16377_v30 = vld [vmem:[#allocation8 + $0x168] ss:$16 sps:$4 sm:$0xff]  }
 0x6c4   :  { %13097 = vmatprep.subr.bf16.mxu0 %v16304_v21  ;;  %v16331_v21 = vld [vmem:[#allocation8 + $0xc] ss:$16 sps:$4 sm:$0xff]  }
 0x6c5   :  { %11442 = vmatpush1.bf16.msra.mxu1 %v15550_v2  ;;  %v16329_v2 = vld [vmem:[#allocation8 + $0x8] ss:$16 sps:$4 sm:$0xff]  }
 0x6c6   :  { %11443 = vmatprep.subr.bf16.mxu1 %v15559_v5  ;;  %v17401_v5 = vpack.c.bf16 %v11470_v12, %v11470_v12  ;;  %v16397_v12 = vld [vmem:[#allocation8 + $0x1cc] ss:$16 sps:$4 sm:$0xff]  }
 0x6c7   :  { %13098 = vmatpush1.bf16.msra.mxu0 %v16302_v4  ;;  %v16334_v4 = vld [vmem:[#allocation8 + $0x2c] ss:$16 sps:$4 sm:$0xff]  }
 0x6c8   :  { %13099 = vmatprep.subr.bf16.mxu0 %v16307_v33  ;;  %v16350_v33 = vld [vmem:[#allocation8 + $0x400] ss:$16 sps:$4 sm:$0xff]  }
 0x6c9   :  { %11444 = vmatpush1.bf16.msra.mxu1 %v15558_v34  ;;  %v16356_v34 = vld [vmem:[#allocation8 + $0x420] ss:$16 sps:$4 sm:$0xff]  }
 0x6ca   :  { %11445 = vmatprep.subr.bf16.mxu1 %v15567_v9  ;;  %v16335_v9 = vld [vmem:[#allocation8 + $0x48] ss:$16 sps:$4 sm:$0xff]  }
 0x6cb   :  { %13100 = vmatpush1.bf16.msra.mxu0 %v16305_v8  ;;  %v16364_v8 = vld [vmem:[#allocation8 + $0x444] ss:$16 sps:$4 sm:$0xff]  }
 0x6cc   :  { %13101 = vmatprep.subr.bf16.mxu0 %v16310_v10  ;;  %v16340_v10 = vld [vmem:[#allocation8 + $0x6c] ss:$16 sps:$4 sm:$0xff]  }
 0x6cd   :  { %11446 = vmatpush1.bf16.msra.mxu1 %v15566_v15  ;;  %v16343_v15 = vld [vmem:[#allocation8 + $0x8c] ss:$16 sps:$4 sm:$0xff]  }
 0x6ce   :  { %11447 = vmatprep.subr.bf16.mxu1 %v15575_v60  ;;  %v16341_v60 = vld [vmem:[#allocation8 + $0x88] ss:$16 sps:$4 sm:$0xff]  }
 0x6cf   :  { %13102 = vmatpush1.bf16.msra.mxu0 %v16308_v17  ;;  %v16376_v17 = vld [vmem:[#allocation8 + $0x484] ss:$16 sps:$4 sm:$0xff]  }
 0x6d0   :  { %13103 = vmatprep.subr.bf16.mxu0 %v16313_v40  ;;  %v16346_v40 = vld [vmem:[#allocation8 + $0xac] ss:$16 sps:$4 sm:$0xff]  }
 0x6d1   :  { %11448 = vmatpush1.bf16.msra.mxu1 %v15574_v16  ;;  %v16344_v16 = vld [vmem:[#allocation8 + $0xa8] ss:$16 sps:$4 sm:$0xff]  }
 0x6d2   :  { %11449 = vmatprep.subr.bf16.mxu1 %v15583_v26  ;;  %v16380_v26 = vld [vmem:[#allocation8 + $0x4a0] ss:$16 sps:$4 sm:$0xff]  }
 0x6d3   :  { %13104 = vmatpush1.bf16.msra.mxu0 %v16311_v52  ;;  %v16349_v52 = vld [vmem:[#allocation8 + $0xcc] ss:$16 sps:$4 sm:$0xff]  }
 0x6d4   :  { %13105 = vmatprep.subr.bf16.mxu0 %v16316_v14  ;;  %v16388_v14 = vld [vmem:[#allocation8 + $0x4c4] ss:$16 sps:$4 sm:$0xff]  }
 0x6d5   :  { %11450 = vmatpush1.bf16.msra.mxu1 %v15582_v20  ;;  %v16386_v20 = vld [vmem:[#allocation8 + $0x4c0] ss:$16 sps:$4 sm:$0xff]  }
 0x6d6   :  { %11451 = vmatprep.subr.bf16.mxu1 %v15591_v31  ;;  %v16353_v31 = vld [vmem:[#allocation8 + $0xe8] ss:$16 sps:$4 sm:$0xff]  }
 0x6d7   :  { %13106 = vmatpush1.bf16.msra.mxu0 %v16314_v38  ;;  %v16394_v38 = vld [vmem:[#allocation8 + $0x4e4] ss:$16 sps:$4 sm:$0xff]  }
 0x6d8   :  { %13107 = vmatprep.subr.bf16.mxu0 %v16319_v35  ;;  %v16361_v35 = vld [vmem:[#allocation8 + $0x10c] ss:$16 sps:$4 sm:$0xff]  }
 0x6d9   :  { %11452 = vmatpush1.bf16.msra.mxu1 %v15590_v36  ;;  %v16359_v36 = vld [vmem:[#allocation8 + $0x108] ss:$16 sps:$4 sm:$0xff]  }
 0x6da   :  { %11453 = vmatprep.subr.bf16.mxu1 %v15599_v50  ;;  %v16398_v50 = vld [vmem:[#allocation8 + $0x500] ss:$16 sps:$4 sm:$0xff]  }
 0x6db   :  { %13108 = vmatpush1.bf16.msra.mxu0 %v16317_v37  ;;  %v16367_v37 = vld [vmem:[#allocation8 + $0x12c] ss:$16 sps:$4 sm:$0xff]  }
 0x6dc   :  { %13109 = vmatprep.subr.bf16.mxu0 %v16322_v7  ;;  %v16406_v7 = vld [vmem:[#allocation8 + $0x524] ss:$16 sps:$4 sm:$0xff]  }
 0x6dd   :  { %11454 = vmatpush1.bf16.msra.mxu1 %v15598_v23  ;;  %v16404_v23 = vld [vmem:[#allocation8 + $0x520] ss:$16 sps:$4 sm:$0xff]  }
 0x6de   :  { %11455 = vmatprep.subr.bf16.mxu1 %v15607_v61  ;;  %v16371_v61 = vld [vmem:[#allocation8 + $0x148] ss:$16 sps:$4 sm:$0xff]  }
 0x6df   :  { %13110 = vmatpush1.bf16.msra.mxu0 %v16320_v41  ;;  %v16412_v41 = vld [vmem:[#allocation8 + $0x544] ss:$16 sps:$4 sm:$0xff]  }
 0x6e0   :  { %13111 = vmatprep.subr.bf16.mxu0 %v16325_v48  ;;  %v16410_v48 = vld [vmem:[#allocation8 + $0x540] ss:$16 sps:$4 sm:$0xff]  }
 0x6e1   :  { %11456 = vmatpush1.bf16.msra.mxu1 %v15606_v46  ;;  %v16385_v46 = vld [vmem:[#allocation8 + $0x18c] ss:$16 sps:$4 sm:$0xff]  }
 0x6e2   :  { %11457 = vmatprep.subr.bf16.mxu1 %v15615_v55  ;;  %v16424_v55 = vld [vmem:[#allocation8 + $0x584] ss:$16 sps:$4 sm:$0xff]  }
 0x6e3   :  { %13112 = vmatpush1.bf16.msra.mxu0 %v16323_v47  ;;  %v16416_v47 = vld [vmem:[#allocation8 + $0x560] ss:$16 sps:$4 sm:$0xff]  }
 0x6e4   :  { %13113 = vmatprep.subr.bf16.mxu0 %v16328_v57  ;;  %v16391_v57 = vld [vmem:[#allocation8 + $0x1ac] ss:$16 sps:$4 sm:$0xff]  }
 0x6e5   :  { %11458 = vmatpush1.bf16.msra.mxu1 %v15614_v63  ;;  %v16422_v63 = vld [vmem:[#allocation8 + $0x580] ss:$16 sps:$4 sm:$0xff]  }
 0x6e6   :  { %13206 = vmatprep.subr.bf16.mxu1 %v16331_v21  ;;  %v16389_v21 = vld [vmem:[#allocation8 + $0x1a8] ss:$16 sps:$4 sm:$0xff]  }
 0x6e7   :  { %13114 = vmatpush1.bf16.msra.mxu0 %v16326_v54  ;;  %v16430_v54 = vld [vmem:[#allocation8 + $0x5a4] ss:$16 sps:$4 sm:$0xff]  }
 0x6e8   :  { %13124 = vmatprep.subr.bf16.mxu0 %v16352_v1  ;;  %11460 = vmatmul.mubr.bf16.vlgmr.msra.gmra.mrb[8].mxu1 %v17303_v59  ;;  %v16370_v59 = vld [vmem:[#allocation8 + $0x464] ss:$16 sps:$4 sm:$0xff]   ;;  %v16428_v1 = vld [vmem:[#allocation8 + $0x5a0] ss:$16 sps:$4 sm:$0xff]  }
 0x6e9   :  { %13207 = vmatpush1.bf16.msra.mxu1 %v16329_v2  ;;  %13238 = vmatprep.mubr.bf16.mxu1 %v17374_v53  ;;  %v16368_v53 = vld [vmem:[#allocation8 + $0x460] ss:$16 sps:$4 sm:$0xff]   ;;  %v16436_v2 = vld [vmem:[#allocation8 + $0x5c4] ss:$16 sps:$4 sm:$0xff]  }
 0x6ea   :  { %13116 = vmatmul.mubr.bf16.vlgmr.msra.gmra.mrb[8].mxu0 %v17401_v5  ;;  %13208 = vmatprep.subr.bf16.mxu1 %v16334_v4  ;;  %v16395_v4 = vld [vmem:[#allocation8 + $0x1c8] ss:$16 sps:$4 sm:$0xff]  }
 0x6eb   :  { %13125 = vmatpush1.bf16.msra.mxu0 %v16350_v33  ;;  %v16403_v33 = vld [vmem:[#allocation8 + $0x1ec] ss:$16 sps:$4 sm:$0xff]  }
 0x6ec   :  { %13126 = vmatprep.subr.bf16.mxu0 %v16358_v49  ;;  %v16434_v49 = vld [vmem:[#allocation8 + $0x5c0] ss:$16 sps:$4 sm:$0xff]  }
 0x6ed   :  { %13209 = vmatpush1.bf16.msra.mxu1 %v16332_v6  ;;  %v16442_v6 = vld [vmem:[#allocation8 + $0x5e4] ss:$16 sps:$4 sm:$0xff]  }
 0x6ee   :  { %13210 = vmatprep.subr.bf16.mxu1 %v16337_v13  ;;  %v16401_v13 = vld [vmem:[#allocation8 + $0x1e8] ss:$16 sps:$4 sm:$0xff]  }
 0x6ef   :  { %13127 = vmatpush1.bf16.msra.mxu0 %v16356_v34  ;;  %v16409_v34 = vld [vmem:[#allocation8 + $0x20c] ss:$16 sps:$4 sm:$0xff]  }
 0x6f0   :  { %13128 = vmatprep.subr.bf16.mxu0 %v16364_v8  ;;  %v16440_v8 = vld [vmem:[#allocation8 + $0x5e0] ss:$16 sps:$4 sm:$0xff]  }
 0x6f1   :  { %13211 = vmatpush1.bf16.msra.mxu1 %v16335_v9  ;;  %v16496_v9 = vld [vmem:[#allocation8 + $0x604] ss:$16 sps:$4 sm:$0xff]  }
 0x6f2   :  { %13212 = vmatprep.subr.bf16.mxu1 %v16340_v10  ;;  %v16407_v10 = vld [vmem:[#allocation8 + $0x208] ss:$16 sps:$4 sm:$0xff]  }
 0x6f3   :  { %13129 = vmatpush1.bf16.msra.mxu0 %v16362_v28  ;;  %v16415_v28 = vld [vmem:[#allocation8 + $0x22c] ss:$16 sps:$4 sm:$0xff]  }
 0x6f4   :  { %13130 = vmatprep.subr.bf16.mxu0 %v16370_v59  ;;  %v16413_v59 = vld [vmem:[#allocation8 + $0x228] ss:$16 sps:$4 sm:$0xff]  }
 0x6f5   :  { %13213 = vmatpush1.bf16.msra.mxu1 %v16338_v11  ;;  %v16421_v11 = vld [vmem:[#allocation8 + $0x24c] ss:$16 sps:$4 sm:$0xff]  }
 0x6f6   :  { %13214 = vmatprep.subr.bf16.mxu1 %v16343_v15  ;;  %v16419_v15 = vld [vmem:[#allocation8 + $0x248] ss:$16 sps:$4 sm:$0xff]  }
 0x6f7   :  { %13131 = vmatpush1.bf16.msra.mxu0 %v16368_v53  ;;  %v16427_v53 = vld [vmem:[#allocation8 + $0x26c] ss:$16 sps:$4 sm:$0xff]  }
 0x6f8   :  { %13132 = vmatprep.subr.bf16.mxu0 %v16376_v17  ;;  %v16425_v17 = vld [vmem:[#allocation8 + $0x268] ss:$16 sps:$4 sm:$0xff]  }
 0x6f9   :  { %13215 = vmatpush1.bf16.msra.mxu1 %v16341_v60  ;;  %v16433_v60 = vld [vmem:[#allocation8 + $0x28c] ss:$16 sps:$4 sm:$0xff]  }
 0x6fa   :  { %13216 = vmatprep.subr.bf16.mxu1 %v16346_v40  ;;  %v16431_v40 = vld [vmem:[#allocation8 + $0x288] ss:$16 sps:$4 sm:$0xff]  }
 0x6fb   :  { %13133 = vmatpush1.bf16.msra.mxu0 %v16374_v51  ;;  %v1714_v51 = vsub.s32 4, %v17321_v29 }
 0x6fc   :  { %13134 = vmatprep.subr.bf16.mxu0 %v16382_v25  ;;  %v16439_v25 = vld [vmem:[#allocation8 + $0x2ac] ss:$16 sps:$4 sm:$0xff]  }
 0x6fd   :  { %13217 = vmatpush1.bf16.msra.mxu1 %v16344_v16  ;;  %v16437_v16 = vld [vmem:[#allocation8 + $0x2a8] ss:$16 sps:$4 sm:$0xff]  }
 0x6fe   :  { %13218 = vmatprep.subr.bf16.mxu1 %v16349_v52 }
 0x6ff   :  { %13135 = vmatpush1.bf16.msra.mxu0 %v16380_v26  ;;  %v16445_v26 = vld [vmem:[#allocation8 + $0x2cc] ss:$16 sps:$4 sm:$0xff]  }
 0x700   :  { %13136 = vmatprep.subr.bf16.mxu0 %v16388_v14 }
 0x701   :  { %13219 = vmatpush1.bf16.msra.mxu1 %v16347_v42 }
 0x702   :  { %13220 = vmatprep.subr.bf16.mxu1 %v16355_v27 }
 0x703   :  { %13137 = vmatpush1.bf16.msra.mxu0 %v16386_v20  ;;  %v16443_v20 = vld [vmem:[#allocation8 + $0x2c8] ss:$16 sps:$4 sm:$0xff]  }
 0x704   :  { %13138 = vmatprep.subr.bf16.mxu0 %v16394_v38 }
 0x705   :  { %13221 = vmatpush1.bf16.msra.mxu1 %v16353_v31 }
 0x706   :  { %13222 = vmatprep.subr.bf16.mxu1 %v16361_v35  ;;  %v16448_v35 = vld [vmem:[#allocation8 + $0x2ec] ss:$16 sps:$4 sm:$0xff]  }
 0x707   :  { %13139 = vmatpush1.bf16.msra.mxu0 %v16392_v3 }
 0x708   :  { %13140 = vmatprep.subr.bf16.mxu0 %v16400_v62 }
 0x709   :  { %13223 = vmatpush1.bf16.msra.mxu1 %v16359_v36 }
 0x70a   :  { %13224 = vmatprep.subr.bf16.mxu1 %v16367_v37  ;;  %v16446_v37 = vld [vmem:[#allocation8 + $0x2e8] ss:$16 sps:$4 sm:$0xff]  }
 0x70b   :  { %13141 = vmatpush1.bf16.msra.mxu0 %v16398_v50 }
 0x70c   :  { %13142 = vmatprep.subr.bf16.mxu0 %v16406_v7  ;;  %v16494_v7 = vld [vmem:[#allocation8 + $0x600] ss:$16 sps:$4 sm:$0xff]  }
 0x70d   :  { %13225 = vmatpush1.bf16.msra.mxu1 %v16365_v44 }
 0x70e   :  { %13226 = vmatprep.subr.bf16.mxu1 %v16373_v0  ;;  %v16502_v0 = vld [vmem:[#allocation8 + $0x624] ss:$16 sps:$4 sm:$0xff]  }
 0x70f   :  { %13143 = vmatpush1.bf16.msra.mxu0 %v16404_v23  ;;  %v16449_v23 = vld [vmem:[#allocation8 + $0x308] ss:$16 sps:$4 sm:$0xff]  }
 0x710   :  { %13144 = vmatprep.subr.bf16.mxu0 %v16412_v41  ;;  %v16454_v41 = vld [vmem:[#allocation8 + $0x32c] ss:$16 sps:$4 sm:$0xff]  }
 0x711   :  { %13227 = vmatpush1.bf16.msra.mxu1 %v16371_v61  ;;  %v16500_v61 = vld [vmem:[#allocation8 + $0x620] ss:$16 sps:$4 sm:$0xff]  }
 0x712   :  { %13228 = vmatprep.subr.bf16.mxu1 %v16379_v24  ;;  %v16508_v24 = vld [vmem:[#allocation8 + $0x644] ss:$16 sps:$4 sm:$0xff]  }
 0x713   :  { %13145 = vmatpush1.bf16.msra.mxu0 %v16410_v48  ;;  %v16452_v48 = vld [vmem:[#allocation8 + $0x328] ss:$16 sps:$4 sm:$0xff]  }
 0x714   :  { %13146 = vmatprep.subr.bf16.mxu0 %v16418_v43  ;;  %v16457_v43 = vld [vmem:[#allocation8 + $0x34c] ss:$16 sps:$4 sm:$0xff]  }
 0x715   :  { %13229 = vmatpush1.bf16.msra.mxu1 %v16377_v30  ;;  %v16506_v30 = vld [vmem:[#allocation8 + $0x640] ss:$16 sps:$4 sm:$0xff]  }
 0x716   :  { %13230 = vmatprep.subr.bf16.mxu1 %v16385_v46  ;;  %v16514_v46 = vld [vmem:[#allocation8 + $0x664] ss:$16 sps:$4 sm:$0xff]  }
 0x717   :  { %13147 = vmatpush1.bf16.msra.mxu0 %v16416_v47  ;;  %v16455_v47 = vld [vmem:[#allocation8 + $0x348] ss:$16 sps:$4 sm:$0xff]  }
 0x718   :  { %13148 = vmatprep.subr.bf16.mxu0 %v16424_v55  ;;  %v16460_v55 = vld [vmem:[#allocation8 + $0x36c] ss:$16 sps:$4 sm:$0xff]  }
 0x719   :  { %13231 = vmatpush1.bf16.msra.mxu1 %v16383_v56  ;;  %v16512_v56 = vld [vmem:[#allocation8 + $0x660] ss:$16 sps:$4 sm:$0xff]  }
 0x71a   :  { %13232 = vmatprep.subr.bf16.mxu1 %v16391_v57  ;;  %v16520_v57 = vld [vmem:[#allocation8 + $0x684] ss:$16 sps:$4 sm:$0xff]  }
 0x71b   :  { %13149 = vmatpush1.bf16.msra.mxu0 %v16422_v63  ;;  %v16458_v63 = vld [vmem:[#allocation8 + $0x368] ss:$16 sps:$4 sm:$0xff]  }
 0x71c   :  { %13150 = vmatprep.subr.bf16.mxu0 %v16430_v54  ;;  %v16463_v54 = vld [vmem:[#allocation8 + $0x38c] ss:$16 sps:$4 sm:$0xff]  }
 0x71d   :  { %13233 = vmatpush1.bf16.msra.mxu1 %v16389_v21  ;;  %v16518_v21 = vld [vmem:[#allocation8 + $0x680] ss:$16 sps:$4 sm:$0xff]  }
 0x71e   :  { %13234 = vmatprep.subr.bf16.mxu1 %v16397_v12  ;;  %v16526_v12 = vld [vmem:[#allocation8 + $0x6a4] ss:$16 sps:$4 sm:$0xff]  }
 0x71f   :  { %13151 = vmatpush1.bf16.msra.mxu0 %v16428_v1  ;;  %v16461_v1 = vld [vmem:[#allocation8 + $0x388] ss:$16 sps:$4 sm:$0xff]  }
 0x720   :  { %13152 = vmatprep.subr.bf16.mxu0 %v16436_v2  ;;  %v16466_v2 = vld [vmem:[#allocation8 + $0x3ac] ss:$16 sps:$4 sm:$0xff]  }
 0x721   :  { %13235 = vmatpush1.bf16.msra.mxu1 %v16395_v4  ;;  %v16524_v4 = vld [vmem:[#allocation8 + $0x6a0] ss:$16 sps:$4 sm:$0xff]  }
 0x722   :  { %13236 = vmatprep.subr.bf16.mxu1 %v16403_v33  ;;  %v16532_v33 = vld [vmem:[#allocation8 + $0x6c4] ss:$16 sps:$4 sm:$0xff]  }
 0x723   :  { %13153 = vmatpush1.bf16.msra.mxu0 %v16434_v49  ;;  %v16464_v49 = vld [vmem:[#allocation8 + $0x3a8] ss:$16 sps:$4 sm:$0xff]  }
 0x724   :  { %13154 = vmatprep.subr.bf16.mxu0 %v16442_v6  ;;  %v16469_v6 = vld [vmem:[#allocation8 + $0x3cc] ss:$16 sps:$4 sm:$0xff]  }
 0x725   :  { %13237 = vmatpush1.bf16.msra.mxu1 %v16401_v13  ;;  %v16530_v13 = vld [vmem:[#allocation8 + $0x6c0] ss:$16 sps:$4 sm:$0xff]  }
 0x726   :  { %13247 = vmatprep.subr.bf16.mxu1 %v16409_v34  ;;  %v16538_v34 = vld [vmem:[#allocation8 + $0x6e4] ss:$16 sps:$4 sm:$0xff]  }
 0x727   :  { %13155 = vmatpush1.bf16.msra.mxu0 %v16440_v8  ;;  %v16467_v8 = vld [vmem:[#allocation8 + $0x3c8] ss:$16 sps:$4 sm:$0xff]  }
 0x728   :  { %13239 = vmatmul.mubr.bf16.vlgmr.msra.gmra.mrb[12].mxu1 %v17388_v18  ;;  %13165 = vmatprep.subr.bf16.mxu0 %v16496_v9  ;;  %v1718_v18 = vsub.s32 5, %v17321_v29  ;;  %v16472_v9 = vld [vmem:[#allocation8 + $0x3ec] ss:$16 sps:$4 sm:$0xff]  }
 0x729   :  { %13248 = vmatpush1.bf16.msra.mxu1 %v16407_v10  ;;  %13279 = vmatprep.mubr.bf16.mxu1 %v17390_v58  ;;  %v1715_v58 = vrot.slane %v17381_v32, %v1714_v51  ;;  %v16536_v10 = vld [vmem:[#allocation8 + $0x6e0] ss:$16 sps:$4 sm:$0xff]   ;;  %v16556_v51 = vld [vmem:[#allocation8 + $0x744] ss:$16 sps:$4 sm:$0xff]  }
 0x72a   :  { %13249 = vmatprep.subr.bf16.mxu1 %v16415_v28  ;;  %v1719_v52 = vrot.slane %v17381_v32, %v1718_v18  ;;  %v16451_v32 = vld [vmem:[#allocation8 + $0x30c] ss:$16 sps:$4 sm:$0xff]   ;;  %v16544_v28 = vld [vmem:[#allocation8 + $0x704] ss:$16 sps:$4 sm:$0xff]   ;;  %v16476_v18 = vld [vmem:[#allocation8 + $0x428] ss:$16 sps:$4 sm:$0xff]  }
 0x72d   :  { %13250 = vmatpush1.bf16.msra.mxu1 %v16413_v59  ;;  %v16470_v59 = vld [vmem:[#allocation8 + $0x3e8] ss:$16 sps:$4 sm:$0xff]  }
 0x72e   :  { %13251 = vmatprep.subr.bf16.mxu1 %v16421_v11  ;;  %v16475_v11 = vld [vmem:[#allocation8 + $0x40c] ss:$16 sps:$4 sm:$0xff]  }
 0x731   :  { %13252 = vmatpush1.bf16.msra.mxu1 %v16419_v15  ;;  %v16542_v15 = vld [vmem:[#allocation8 + $0x700] ss:$16 sps:$4 sm:$0xff]  }
 0x732   :  { %13253 = vmatprep.subr.bf16.mxu1 %v16427_v53  ;;  %v16550_v53 = vld [vmem:[#allocation8 + $0x724] ss:$16 sps:$4 sm:$0xff]  }
 0x735   :  { %13254 = vmatpush1.bf16.msra.mxu1 %v16425_v17  ;;  %v16473_v17 = vld [vmem:[#allocation8 + $0x408] ss:$16 sps:$4 sm:$0xff]  }
 0x736   :  { %13255 = vmatprep.subr.bf16.mxu1 %v16433_v60  ;;  %v16478_v60 = vld [vmem:[#allocation8 + $0x42c] ss:$16 sps:$4 sm:$0xff]  }
 0x739   :  { %13256 = vmatpush1.bf16.msra.mxu1 %v16431_v40  ;;  %v16548_v40 = vld [vmem:[#allocation8 + $0x720] ss:$16 sps:$4 sm:$0xff]  }
 0x73a   :  { %13257 = vmatprep.subr.bf16.mxu1 %v16439_v25  ;;  %v16481_v25 = vld [vmem:[#allocation8 + $0x44c] ss:$16 sps:$4 sm:$0xff]  }
 0x73d   :  { %v10969_v14 = vpop.f32.mrb[4].mxu0  ;;  %13258 = vmatpush1.bf16.msra.mxu1 %v16437_v16  ;;  %v16562_v16 = vld [vmem:[#allocation8 + $0x764] ss:$16 sps:$4 sm:$0xff]  }
 0x73e   :  { %v15981_v42 = vadd.f32 %v10969_v14, %v1715_v58  ;;  %v10971_v27 = vpop.f32.mrb[5].mxu0  ;;  %13259 = vmatprep.subr.bf16.mxu1 %v16445_v26  ;;  %v16554_v58 = vld [vmem:[#allocation8 + $0x740] ss:$16 sps:$4 sm:$0xff]   ;;  %v16484_v26 = vld [vmem:[#allocation8 + $0x46c] ss:$16 sps:$4 sm:$0xff]  }
 0x73f   :  { %v15982_v38 = vadd.f32 %v10971_v27, %v1719_v52  ;;  %v10973_v31 = vpop.f32.mrb[6].mxu0  ;;  %v16479_v52 = vld [vmem:[#allocation8 + $0x448] ss:$16 sps:$4 sm:$0xff]   ;;  %v16560_v14 = vld [vmem:[#allocation8 + $0x760] ss:$16 sps:$4 sm:$0xff]  }
 0x740   :  { %v11472_v3 = vmax.f32 %v15981_v42, 0.0  ;;  %v10974_v62 = vpop.f32.mrb[7].mxu0  ;;  %v16568_v42 = vld [vmem:[#allocation8 + $0x784] ss:$16 sps:$4 sm:$0xff]   ;;  %v16487_v27 = vld [vmem:[#allocation8 + $0x48c] ss:$16 sps:$4 sm:$0xff]  }
 0x741   :  { %v11473_v36 = vmax.f32 %v15982_v38, 0.0  ;;  %13260 = vmatpush1.bf16.msra.mxu1 %v16443_v20  ;;  %v16566_v20 = vld [vmem:[#allocation8 + $0x780] ss:$16 sps:$4 sm:$0xff]   ;;  %v16574_v38 = vld [vmem:[#allocation8 + $0x7a4] ss:$16 sps:$4 sm:$0xff]  }
 0x742   :  { %13261 = vmatprep.subr.bf16.mxu1 %v16448_v35  ;;  %v17414_v44 = vpack.c.bf16 %v11472_v3, %v11472_v3  ;;  %v16485_v31 = vld [vmem:[#allocation8 + $0x488] ss:$16 sps:$4 sm:$0xff]   ;;  %v16490_v35 = vld [vmem:[#allocation8 + $0x4ac] ss:$16 sps:$4 sm:$0xff]   ;;  %v16572_v3 = vld [vmem:[#allocation8 + $0x7a0] ss:$16 sps:$4 sm:$0xff]  }
 0x743   :  { %v17412_v50 = vpack.c.bf16 %v11473_v36, %v11473_v36  ;;  %v16580_v62 = vld [vmem:[#allocation8 + $0x7c4] ss:$16 sps:$4 sm:$0xff]   ;;  %v16488_v36 = vld [vmem:[#allocation8 + $0x4a8] ss:$16 sps:$4 sm:$0xff]  }
 0x745   :  { %13156 = vmatprep.mubr.bf16.mxu0 %v17412_v50  ;;  %13262 = vmatpush1.bf16.msra.mxu1 %v16446_v37  ;;  %v16493_v37 = vld [vmem:[#allocation8 + $0x4cc] ss:$16 sps:$4 sm:$0xff]  }
 0x746   :  { %13157 = vmatmul.mubr.bf16.vlgmr.msra.gmra.mrb[8].mxu0 %v17414_v44  ;;  %13263 = vmatprep.subr.bf16.mxu1 %v16451_v32  ;;  %v16586_v32 = vld [vmem:[#allocation8 + $0x7e4] ss:$16 sps:$4 sm:$0xff]  }
 0x747   :  { %13166 = vmatpush1.bf16.msra.mxu0 %v16494_v7  ;;  %v16491_v7 = vld [vmem:[#allocation8 + $0x4c8] ss:$16 sps:$4 sm:$0xff]  }
 0x748   :  { %13167 = vmatprep.subr.bf16.mxu0 %v16502_v0  ;;  %v16499_v0 = vld [vmem:[#allocation8 + $0x4ec] ss:$16 sps:$4 sm:$0xff]  }
 0x749   :  { %13264 = vmatpush1.bf16.msra.mxu1 %v16449_v23  ;;  %v16584_v23 = vld [vmem:[#allocation8 + $0x7e0] ss:$16 sps:$4 sm:$0xff]  }
 0x74a   :  { %13265 = vmatprep.subr.bf16.mxu1 %v16454_v41  ;;  %v16619_v41 = vld [vmem:[#allocation11 + $0x4] ss:$8 sps:$4 sm:$0xff]  }
 0x74b   :  { %13168 = vmatpush1.bf16.msra.mxu0 %v16500_v61  ;;  %v16497_v61 = vld [vmem:[#allocation8 + $0x4e8] ss:$16 sps:$4 sm:$0xff]  }
 0x74c   :  { %13169 = vmatprep.subr.bf16.mxu0 %v16508_v24  ;;  %v16505_v24 = vld [vmem:[#allocation8 + $0x50c] ss:$16 sps:$4 sm:$0xff]  }
 0x74d   :  { %13266 = vmatpush1.bf16.msra.mxu1 %v16452_v48  ;;  %v16503_v48 = vld [vmem:[#allocation8 + $0x508] ss:$16 sps:$4 sm:$0xff]  }
 0x74e   :  { %13267 = vmatprep.subr.bf16.mxu1 %v16457_v43  ;;  %v16511_v43 = vld [vmem:[#allocation8 + $0x52c] ss:$16 sps:$4 sm:$0xff]  }
 0x74f   :  { %13170 = vmatpush1.bf16.msra.mxu0 %v16506_v30  ;;  %v16509_v30 = vld [vmem:[#allocation8 + $0x528] ss:$16 sps:$4 sm:$0xff]  }
 0x750   :  { %13171 = vmatprep.subr.bf16.mxu0 %v16514_v46  ;;  %v16517_v46 = vld [vmem:[#allocation8 + $0x54c] ss:$16 sps:$4 sm:$0xff]  }
 0x751   :  { %13268 = vmatpush1.bf16.msra.mxu1 %v16455_v47  ;;  %v16515_v47 = vld [vmem:[#allocation8 + $0x548] ss:$16 sps:$4 sm:$0xff]  }
 0x752   :  { %13269 = vmatprep.subr.bf16.mxu1 %v16460_v55  ;;  %v16523_v55 = vld [vmem:[#allocation8 + $0x56c] ss:$16 sps:$4 sm:$0xff]  }
 0x753   :  { %13172 = vmatpush1.bf16.msra.mxu0 %v16512_v56  ;;  %v16521_v56 = vld [vmem:[#allocation8 + $0x568] ss:$16 sps:$4 sm:$0xff]  }
 0x754   :  { %13173 = vmatprep.subr.bf16.mxu0 %v16520_v57  ;;  %v16529_v57 = vld [vmem:[#allocation8 + $0x58c] ss:$16 sps:$4 sm:$0xff]  }
 0x755   :  { %13270 = vmatpush1.bf16.msra.mxu1 %v16458_v63  ;;  %v16527_v63 = vld [vmem:[#allocation8 + $0x588] ss:$16 sps:$4 sm:$0xff]  }
 0x756   :  { %13271 = vmatprep.subr.bf16.mxu1 %v16463_v54  ;;  %v16535_v54 = vld [vmem:[#allocation8 + $0x5ac] ss:$16 sps:$4 sm:$0xff]  }
 0x757   :  { %13174 = vmatpush1.bf16.msra.mxu0 %v16518_v21  ;;  %v16533_v21 = vld [vmem:[#allocation8 + $0x5a8] ss:$16 sps:$4 sm:$0xff]  }
 0x758   :  { %13175 = vmatprep.subr.bf16.mxu0 %v16526_v12  ;;  %v16541_v12 = vld [vmem:[#allocation8 + $0x5cc] ss:$16 sps:$4 sm:$0xff]  }
 0x759   :  { %13272 = vmatpush1.bf16.msra.mxu1 %v16461_v1  ;;  %v16539_v1 = vld [vmem:[#allocation8 + $0x5c8] ss:$16 sps:$4 sm:$0xff]  }
 0x75a   :  { %13273 = vmatprep.subr.bf16.mxu1 %v16466_v2  ;;  %v16547_v2 = vld [vmem:[#allocation8 + $0x5ec] ss:$16 sps:$4 sm:$0xff]  }
 0x75b   :  { %13176 = vmatpush1.bf16.msra.mxu0 %v16524_v4  ;;  %v16545_v4 = vld [vmem:[#allocation8 + $0x5e8] ss:$16 sps:$4 sm:$0xff]  }
 0x75c   :  { %13177 = vmatprep.subr.bf16.mxu0 %v16532_v33  ;;  %v16553_v33 = vld [vmem:[#allocation8 + $0x60c] ss:$16 sps:$4 sm:$0xff]  }
 0x75d   :  { %13274 = vmatpush1.bf16.msra.mxu1 %v16464_v49  ;;  %v16551_v49 = vld [vmem:[#allocation8 + $0x608] ss:$16 sps:$4 sm:$0xff]  }
 0x75e   :  { %13275 = vmatprep.subr.bf16.mxu1 %v16469_v6  ;;  %v16559_v6 = vld [vmem:[#allocation8 + $0x62c] ss:$16 sps:$4 sm:$0xff]  }
 0x75f   :  { %13178 = vmatpush1.bf16.msra.mxu0 %v16530_v13  ;;  %v16557_v13 = vld [vmem:[#allocation8 + $0x628] ss:$16 sps:$4 sm:$0xff]  }
 0x760   :  { %13179 = vmatprep.subr.bf16.mxu0 %v16538_v34  ;;  %v16565_v34 = vld [vmem:[#allocation8 + $0x64c] ss:$16 sps:$4 sm:$0xff]  }
 0x761   :  { %13276 = vmatpush1.bf16.msra.mxu1 %v16467_v8  ;;  %v16563_v8 = vld [vmem:[#allocation8 + $0x648] ss:$16 sps:$4 sm:$0xff]  }
 0x762   :  { %13277 = vmatprep.subr.bf16.mxu1 %v16472_v9  ;;  %v16571_v9 = vld [vmem:[#allocation8 + $0x66c] ss:$16 sps:$4 sm:$0xff]  }
 0x763   :  { %13180 = vmatpush1.bf16.msra.mxu0 %v16536_v10  ;;  %v16569_v10 = vld [vmem:[#allocation8 + $0x668] ss:$16 sps:$4 sm:$0xff]  }
 0x764   :  { %13181 = vmatprep.subr.bf16.mxu0 %v16544_v28  ;;  %v16577_v28 = vld [vmem:[#allocation8 + $0x68c] ss:$16 sps:$4 sm:$0xff]  }
 0x765   :  { %13278 = vmatpush1.bf16.msra.mxu1 %v16470_v59  ;;  %v1722_v59 = vsub.s32 6, %v17321_v29 }
 0x766   :  { %13288 = vmatprep.subr.bf16.mxu1 %v16475_v11  ;;  %v16575_v11 = vld [vmem:[#allocation8 + $0x688] ss:$16 sps:$4 sm:$0xff]  }
 0x767   :  { %13182 = vmatpush1.bf16.msra.mxu0 %v16542_v15  ;;  %v1726_v15 = vsub.s32 7, %v17321_v29  ;;  %v16727_v29 = vld [vmem:[#allocation14 + $0x78] sm:$0xff]  }
 0x768   :  { %13183 = vmatprep.subr.bf16.mxu0 %v16550_v53  ;;  %13280 = vmatmul.mubr.bf16.vlgmr.msra.gmra.mrb[12].mxu1 %v17401_v5  ;;  %v16482_v5 = vld [vmem:[#allocation8 + $0x468] ss:$16 sps:$4 sm:$0xff]  }
 0x769   :  { %13289 = vmatpush1.bf16.msra.mxu1 %v16473_v17  ;;  %13320 = vmatprep.mubr.bf16.mxu1 %v17412_v50  ;;  %v16578_v50 = vld [vmem:[#allocation8 + $0x7c0] ss:$16 sps:$4 sm:$0xff]   ;;  %v16730_v53 = vld [vmem:[#allocation7] sm:$0xff] }
 0x76a   :  { %13290 = vmatprep.subr.bf16.mxu1 %v16478_v60  ;;  %v1723_v17 = vrot.slane %v16730_v53, %v1722_v59  ;;  %v1727_v60 = vrot.slane %v16730_v53, %v1726_v15  ;;  %v16652_v59 = vld [vmem:[#allocation11 + $0xb4] ss:$8 sps:$4 sm:$0xff]   ;;  %v16655_v15 = vld [vmem:[#allocation11 + $0xc4] ss:$8 sps:$4 sm:$0xff]  }
 0x76b   :  { %13184 = vmatpush1.bf16.msra.mxu0 %v16548_v40  ;;  %v16581_v40 = vld [vmem:[#allocation8 + $0x6a8] ss:$16 sps:$4 sm:$0xff]  }
 0x76c   :  { %13185 = vmatprep.subr.bf16.mxu0 %v16556_v51  ;;  %v16589_v51 = vld [vmem:[#allocation8 + $0x6cc] ss:$16 sps:$4 sm:$0xff]   ;;  %v16658_v53 = vld [vmem:[#allocation11 + $0xd4] ss:$8 sps:$4 sm:$0xff]  }
 0x76d   :  { %13291 = vmatpush1.bf16.msra.mxu1 %v16476_v18 }
 0x76e   :  { %13292 = vmatprep.subr.bf16.mxu1 %v16481_v25 }
 0x76f   :  { %13186 = vmatpush1.bf16.msra.mxu0 %v16554_v58 }
 0x770   :  { %13187 = vmatprep.subr.bf16.mxu0 %v16562_v16 }
 0x771   :  { %13293 = vmatpush1.bf16.msra.mxu1 %v16479_v52 }
 0x772   :  { %13294 = vmatprep.subr.bf16.mxu1 %v16484_v26  ;;  %v16587_v26 = vld [vmem:[#allocation8 + $0x6c8] ss:$16 sps:$4 sm:$0xff]  }
 0x773   :  { %13188 = vmatpush1.bf16.msra.mxu0 %v16560_v14 }
 0x774   :  { %13189 = vmatprep.subr.bf16.mxu0 %v16568_v42 }
 0x775   :  { %13295 = vmatpush1.bf16.msra.mxu1 %v16482_v5  ;;  %v16592_v5 = vld [vmem:[#allocation8 + $0x6ec] ss:$16 sps:$4 sm:$0xff]  }
 0x776   :  { %13296 = vmatprep.subr.bf16.mxu1 %v16487_v27 }
 0x777   :  { %13190 = vmatpush1.bf16.msra.mxu0 %v16566_v20 }
 0x778   :  { %13191 = vmatprep.subr.bf16.mxu0 %v16574_v38  ;;  %v16590_v38 = vld [vmem:[#allocation8 + $0x6e8] ss:$16 sps:$4 sm:$0xff]  }
 0x779   :  { %13297 = vmatpush1.bf16.msra.mxu1 %v16485_v31  ;;  %v16617_v31 = vld [vmem:[#allocation11] ss:$8 sps:$4 sm:$0xff]  }
 0x77a   :  { %13298 = vmatprep.subr.bf16.mxu1 %v16490_v35 }
 0x77b   :  { %13192 = vmatpush1.bf16.msra.mxu0 %v16572_v3  ;;  %v16595_v3 = vld [vmem:[#allocation8 + $0x70c] ss:$16 sps:$4 sm:$0xff]  }
 0x77c   :  { %13193 = vmatprep.subr.bf16.mxu0 %v16580_v62  ;;  %v16622_v62 = vld [vmem:[#allocation11 + $0x14] ss:$8 sps:$4 sm:$0xff]  }
 0x77d   :  { %13299 = vmatpush1.bf16.msra.mxu1 %v16488_v36  ;;  %v16593_v36 = vld [vmem:[#allocation8 + $0x708] ss:$16 sps:$4 sm:$0xff]  }
 0x77e   :  { %13300 = vmatprep.subr.bf16.mxu1 %v16493_v37  ;;  %v16620_v37 = vld [vmem:[#allocation11 + $0x10] ss:$8 sps:$4 sm:$0xff]  }
 0x77f   :  { %13194 = vmatpush1.bf16.msra.mxu0 %v16578_v50  ;;  %v16598_v50 = vld [vmem:[#allocation8 + $0x72c] ss:$16 sps:$4 sm:$0xff]  }
 0x780   :  { %13195 = vmatprep.subr.bf16.mxu0 %v16586_v32  ;;  %v16625_v32 = vld [vmem:[#allocation11 + $0x24] ss:$8 sps:$4 sm:$0xff]  }
 0x781   :  { %13301 = vmatpush1.bf16.msra.mxu1 %v16491_v7  ;;  %v16596_v7 = vld [vmem:[#allocation8 + $0x728] ss:$16 sps:$4 sm:$0xff]  }
 0x782   :  { %13302 = vmatprep.subr.bf16.mxu1 %v16499_v0  ;;  %v16623_v0 = vld [vmem:[#allocation11 + $0x20] ss:$8 sps:$4 sm:$0xff]  }
 0x783   :  { %13196 = vmatpush1.bf16.msra.mxu0 %v16584_v23  ;;  %v16601_v23 = vld [vmem:[#allocation8 + $0x74c] ss:$16 sps:$4 sm:$0xff]  }
 0x784   :  { %13774 = vmatprep.subr.bf16.mxu0 %v16619_v41  ;;  %v16628_v41 = vld [vmem:[#allocation11 + $0x34] ss:$8 sps:$4 sm:$0xff]  }
 0x785   :  { %13303 = vmatpush1.bf16.msra.mxu1 %v16497_v61  ;;  %v16599_v61 = vld [vmem:[#allocation8 + $0x748] ss:$16 sps:$4 sm:$0xff]  }
 0x786   :  { %13304 = vmatprep.subr.bf16.mxu1 %v16505_v24  ;;  %v16626_v24 = vld [vmem:[#allocation11 + $0x30] ss:$8 sps:$4 sm:$0xff]  }
 0x789   :  { %13305 = vmatpush1.bf16.msra.mxu1 %v16503_v48  ;;  %v16604_v48 = vld [vmem:[#allocation8 + $0x76c] ss:$16 sps:$4 sm:$0xff]  }
 0x78a   :  { %13306 = vmatprep.subr.bf16.mxu1 %v16511_v43  ;;  %v16631_v43 = vld [vmem:[#allocation11 + $0x44] ss:$8 sps:$4 sm:$0xff]  }
 0x78d   :  { %13307 = vmatpush1.bf16.msra.mxu1 %v16509_v30  ;;  %v16602_v30 = vld [vmem:[#allocation8 + $0x768] ss:$16 sps:$4 sm:$0xff]  }
 0x78e   :  { %13308 = vmatprep.subr.bf16.mxu1 %v16517_v46  ;;  %v16629_v46 = vld [vmem:[#allocation11 + $0x40] ss:$8 sps:$4 sm:$0xff]  }
 0x791   :  { %13309 = vmatpush1.bf16.msra.mxu1 %v16515_v47  ;;  %v16607_v47 = vld [vmem:[#allocation8 + $0x78c] ss:$16 sps:$4 sm:$0xff]  }
 0x792   :  { %13310 = vmatprep.subr.bf16.mxu1 %v16523_v55  ;;  %v16634_v55 = vld [vmem:[#allocation11 + $0x54] ss:$8 sps:$4 sm:$0xff]  }
 0x795   :  { %13311 = vmatpush1.bf16.msra.mxu1 %v16521_v56  ;;  %v16605_v56 = vld [vmem:[#allocation8 + $0x788] ss:$16 sps:$4 sm:$0xff]  }
 0x796   :  { %13312 = vmatprep.subr.bf16.mxu1 %v16529_v57  ;;  %v16632_v57 = vld [vmem:[#allocation11 + $0x50] ss:$8 sps:$4 sm:$0xff]  }
 0x799   :  { %13313 = vmatpush1.bf16.msra.mxu1 %v16527_v63  ;;  %v16610_v63 = vld [vmem:[#allocation8 + $0x7ac] ss:$16 sps:$4 sm:$0xff]  }
 0x79a   :  { %13314 = vmatprep.subr.bf16.mxu1 %v16535_v54  ;;  %v16637_v54 = vld [vmem:[#allocation11 + $0x64] ss:$8 sps:$4 sm:$0xff]  }
 0x79d   :  { %13315 = vmatpush1.bf16.msra.mxu1 %v16533_v21  ;;  %v16608_v21 = vld [vmem:[#allocation8 + $0x7a8] ss:$16 sps:$4 sm:$0xff]  }
 0x79e   :  { %13316 = vmatprep.subr.bf16.mxu1 %v16541_v12  ;;  %v16635_v12 = vld [vmem:[#allocation11 + $0x60] ss:$8 sps:$4 sm:$0xff]  }
 0x7a1   :  { %13317 = vmatpush1.bf16.msra.mxu1 %v16539_v1  ;;  %v16613_v1 = vld [vmem:[#allocation8 + $0x7cc] ss:$16 sps:$4 sm:$0xff]  }
 0x7a2   :  { %13318 = vmatprep.subr.bf16.mxu1 %v16547_v2  ;;  %v16640_v2 = vld [vmem:[#allocation11 + $0x74] ss:$8 sps:$4 sm:$0xff]  }
 0x7a5   :  { %13319 = vmatpush1.bf16.msra.mxu1 %v16545_v4  ;;  %v16611_v4 = vld [vmem:[#allocation8 + $0x7c8] ss:$16 sps:$4 sm:$0xff]  }
 0x7a6   :  { %13329 = vmatprep.subr.bf16.mxu1 %v16553_v33  ;;  %v16638_v33 = vld [vmem:[#allocation11 + $0x70] ss:$8 sps:$4 sm:$0xff]  }
 0x7a8   :  { %13321 = vmatmul.mubr.bf16.vlgmr.msra.gmra.mrb[12].mxu1 %v17414_v44  ;;  %v16583_v44 = vld [vmem:[#allocation8 + $0x6ac] ss:$16 sps:$4 sm:$0xff]  }
 0x7a9   :  { %13330 = vmatpush1.bf16.msra.mxu1 %v16551_v49  ;;  %v16616_v49 = vld [vmem:[#allocation8 + $0x7ec] ss:$16 sps:$4 sm:$0xff]  }
 0x7aa   :  { %13331 = vmatprep.subr.bf16.mxu1 %v16559_v6  ;;  %v16643_v6 = vld [vmem:[#allocation11 + $0x84] ss:$8 sps:$4 sm:$0xff]  }
 0x7ad   :  { %13332 = vmatpush1.bf16.msra.mxu1 %v16557_v13  ;;  %v16614_v13 = vld [vmem:[#allocation8 + $0x7e8] ss:$16 sps:$4 sm:$0xff]  }
 0x7ae   :  { %13333 = vmatprep.subr.bf16.mxu1 %v16565_v34  ;;  %v16641_v34 = vld [vmem:[#allocation11 + $0x80] ss:$8 sps:$4 sm:$0xff]  }
 0x7b1   :  { %13334 = vmatpush1.bf16.msra.mxu1 %v16563_v8  ;;  %v16646_v8 = vld [vmem:[#allocation11 + $0x94] ss:$8 sps:$4 sm:$0xff]  }
 0x7b2   :  { %13335 = vmatprep.subr.bf16.mxu1 %v16571_v9  ;;  %v16644_v9 = vld [vmem:[#allocation11 + $0x90] ss:$8 sps:$4 sm:$0xff]  }
 0x7b5   :  { %13336 = vmatpush1.bf16.msra.mxu1 %v16569_v10  ;;  %v16649_v10 = vld [vmem:[#allocation11 + $0xa4] ss:$8 sps:$4 sm:$0xff]  }
 0x7b6   :  { %13337 = vmatprep.subr.bf16.mxu1 %v16577_v28  ;;  %v16647_v28 = vld [vmem:[#allocation11 + $0xa0] ss:$8 sps:$4 sm:$0xff]  }
 0x7b9   :  { %13338 = vmatpush1.bf16.msra.mxu1 %v16575_v11  ;;  %v16650_v11 = vld [vmem:[#allocation11 + $0xb0] ss:$8 sps:$4 sm:$0xff]  }
 0x7ba   :  { %13339 = vmatprep.subr.bf16.mxu1 %v16583_v44  ;;  %v16653_v44 = vld [vmem:[#allocation11 + $0xc0] ss:$8 sps:$4 sm:$0xff]  }
 0x7bb   :  { %v11461_v18 = vpop.f32.mrb[8].mxu1 }
 0x7bc   :  { %v15983_v25 = vadd.f32 %v11461_v18, %v1723_v17  ;;  %v11463_v58 = vpop.f32.mrb[9].mxu1  ;;  %v16656_v17 = vld [vmem:[#allocation11 + $0xd0] ss:$8 sps:$4 sm:$0xff]  }
 0x7bd   :  { %v15984_v16 = vadd.f32 %v11463_v58, %v1727_v60  ;;  %v11465_v52 = vpop.f32.mrb[10].mxu1  ;;  %13340 = vmatpush1.bf16.msra.mxu1 %v16581_v40  ;;  %v16661_v60 = vld [vmem:[#allocation11 + $0xe4] ss:$8 sps:$4 sm:$0xff]   ;;  %v16659_v40 = vld [vmem:[#allocation11 + $0xe0] ss:$8 sps:$4 sm:$0xff]  }
 0x7be   :  { %v11474_v14 = vmax.f32 %v15983_v25, 0.0  ;;  %v11466_v42 = vpop.f32.mrb[11].mxu1  ;;  %13341 = vmatprep.subr.bf16.mxu1 %v16589_v51  ;;  %v16664_v51 = vld [vmem:[#allocation11 + $0xf4] ss:$8 sps:$4 sm:$0xff]   ;;  %v16662_v18 = vld [vmem:[#allocation11 + $0xf0] ss:$8 sps:$4 sm:$0xff]  }
 0x7bf   :  { %v11475_v27 = vmax.f32 %v15984_v16, 0.0  ;;  %v16667_v25 = vld [vmem:[#allocation11 + $0x104] ss:$8 sps:$4 sm:$0xff]   ;;  %v16718_v42 = vld [vmem:[#allocation14 + $0x10] sm:$0xff]  }
 0x7c0   :  { %v17423_v35 = vpack.c.bf16 %v11474_v14, %v11474_v14  ;;  %v16713_v58 = vld [vmem:[#allocation14 + $0x40] sm:$0xff]   ;;  %v16715_v52 = vld [vmem:[#allocation14 + $0x48] sm:$0xff]   ;;  %v16717_v14 = vld [vmem:[#allocation14 + $0x50] sm:$0xff]  }
 0x7c1   :  { %v11483_v20 = vpack.c.bf16 %v11475_v27, %v11475_v27  ;;  %13342 = vmatpush1.bf16.msra.mxu1 %v16587_v26  ;;  %v16714_v16 = vld [vmem:[#allocation14] sm:$0xff]   ;;  %v16716_v26 = vld [vmem:[#allocation14 + $0x8] sm:$0xff]   ;;  %v16720_v27 = vld [vmem:[#allocation14 + $0x18] sm:$0xff]  }
 0x7c2   :  { %13343 = vmatprep.subr.bf16.mxu1 %v16592_v5  ;;  %v16719_v5 = vld [vmem:[#allocation14 + $0x58] sm:$0xff]  }
 0x7c3   :  { %13197 = vmatprep.mubr.bf16.mxu0 %v11483_v20  ;;  %13361 = vmatprep.mubr.bf16.mxu1 %v11483_v20  ;;  %v16721_v20 = vld [vmem:[#allocation14 + $0x60] sm:$0xff]  }
 0x7c4   :  { %13198 = vmatmul.mubr.bf16.vlgmr.msra.gmra.mrb[8].mxu0 %v17423_v35 }
 0x7c5   :  { %13344 = vmatpush1.bf16.msra.mxu1 %v16590_v38  ;;  %13775 = vmatpush1.bf16.msra.mxu0 %v16617_v31  ;;  %v16722_v38 = vld [vmem:[#allocation14 + $0x20] sm:$0xff]   ;;  %v16723_v31 = vld [vmem:[#allocation14 + $0x68] sm:$0xff]  }
 0x7c6   :  { %13345 = vmatprep.subr.bf16.mxu1 %v16595_v3  ;;  %13776 = vmatprep.subr.bf16.mxu0 %v16622_v62  ;;  %v17427_v3 = vld [vmem:[#allocation10] sm:$0xf] }
 0x7c7   :  { %v11745_v62 = vrot.slane %v17427_v3, %v17324_v19 }
 0x7c9   :  { %13346 = vmatpush1.bf16.msra.mxu1 %v16593_v36  ;;  %13777 = vmatpush1.bf16.msra.mxu0 %v16620_v37  ;;  %v11749_v36 = vrot.slane %v17427_v3, %v17327_v22 }
 0x7ca   :  { %13347 = vmatprep.subr.bf16.mxu1 %v16598_v50  ;;  %13778 = vmatprep.subr.bf16.mxu0 %v16625_v32 }
 0x7cd   :  { %13348 = vmatpush1.bf16.msra.mxu1 %v16596_v7  ;;  %13779 = vmatpush1.bf16.msra.mxu0 %v16623_v0 }
 0x7ce   :  { %13349 = vmatprep.subr.bf16.mxu1 %v16601_v23  ;;  %13780 = vmatprep.subr.bf16.mxu0 %v16628_v41 }
 0x7d1   :  { %13350 = vmatpush1.bf16.msra.mxu1 %v16599_v61  ;;  %13781 = vmatpush1.bf16.msra.mxu0 %v16626_v24 }
 0x7d2   :  { %13351 = vmatprep.subr.bf16.mxu1 %v16604_v48  ;;  %13782 = vmatprep.subr.bf16.mxu0 %v16631_v43  ;;  %v16665_v48 = vld [vmem:[#allocation11 + $0x100] ss:$8 sps:$4 sm:$0xff]  }
 0x7d5   :  { %13352 = vmatpush1.bf16.msra.mxu1 %v16602_v30  ;;  %13783 = vmatpush1.bf16.msra.mxu0 %v16629_v46  ;;  %v16670_v30 = vld [vmem:[#allocation11 + $0x114] ss:$8 sps:$4 sm:$0xff]   ;;  %v16668_v46 = vld [vmem:[#allocation11 + $0x110] ss:$8 sps:$4 sm:$0xff]  }
 0x7d6   :  { %13353 = vmatprep.subr.bf16.mxu1 %v16607_v47  ;;  %13784 = vmatprep.subr.bf16.mxu0 %v16634_v55  ;;  %v16673_v47 = vld [vmem:[#allocation11 + $0x124] ss:$8 sps:$4 sm:$0xff]   ;;  %v16671_v55 = vld [vmem:[#allocation11 + $0x120] ss:$8 sps:$4 sm:$0xff]  }
 0x7d9   :  { %13354 = vmatpush1.bf16.msra.mxu1 %v16605_v56  ;;  %13785 = vmatpush1.bf16.msra.mxu0 %v16632_v57  ;;  %v16676_v56 = vld [vmem:[#allocation11 + $0x134] ss:$8 sps:$4 sm:$0xff]   ;;  %v16674_v57 = vld [vmem:[#allocation11 + $0x130] ss:$8 sps:$4 sm:$0xff]  }
 0x7da   :  { %13355 = vmatprep.subr.bf16.mxu1 %v16610_v63  ;;  %13786 = vmatprep.subr.bf16.mxu0 %v16637_v54  ;;  %v16679_v63 = vld [vmem:[#allocation11 + $0x144] ss:$8 sps:$4 sm:$0xff]   ;;  %v16677_v54 = vld [vmem:[#allocation11 + $0x140] ss:$8 sps:$4 sm:$0xff]  }
 0x7dd   :  { %13356 = vmatpush1.bf16.msra.mxu1 %v16608_v21  ;;  %13787 = vmatpush1.bf16.msra.mxu0 %v16635_v12  ;;  %v16682_v21 = vld [vmem:[#allocation11 + $0x154] ss:$8 sps:$4 sm:$0xff]   ;;  %v16680_v12 = vld [vmem:[#allocation11 + $0x150] ss:$8 sps:$4 sm:$0xff]  }
 0x7de   :  { %13357 = vmatprep.subr.bf16.mxu1 %v16613_v1  ;;  %13788 = vmatprep.subr.bf16.mxu0 %v16640_v2  ;;  %v16685_v1 = vld [vmem:[#allocation11 + $0x164] ss:$8 sps:$4 sm:$0xff]   ;;  %v16683_v2 = vld [vmem:[#allocation11 + $0x160] ss:$8 sps:$4 sm:$0xff]  }
 0x7e1   :  { %13358 = vmatpush1.bf16.msra.mxu1 %v16611_v4  ;;  %13789 = vmatpush1.bf16.msra.mxu0 %v16638_v33  ;;  %v16688_v4 = vld [vmem:[#allocation11 + $0x174] ss:$8 sps:$4 sm:$0xff]   ;;  %v16686_v33 = vld [vmem:[#allocation11 + $0x170] ss:$8 sps:$4 sm:$0xff]  }
 0x7e2   :  { %13359 = vmatprep.subr.bf16.mxu1 %v16616_v49  ;;  %13790 = vmatprep.subr.bf16.mxu0 %v16643_v6  ;;  %v11757_v49 = vrot.slane %v17427_v3, %v1710_v45  ;;  %v16691_v6 = vld [vmem:[#allocation11 + $0x184] ss:$8 sps:$4 sm:$0xff]   ;;  %v16695_v45 = vld [vmem:[#allocation11 + $0x1a0] ss:$8 sps:$4 sm:$0xff]  }
 0x7e5   :  { %13360 = vmatpush1.bf16.msra.mxu1 %v16614_v13  ;;  %13791 = vmatpush1.bf16.msra.mxu0 %v16641_v34 }
 0x7e6   :  { %13792 = vmatprep.subr.bf16.mxu0 %v16646_v8  ;;  %15953 = vmatprep.subr.bf16.mxu1 %v16713_v58  ;;  %v11753_v58 = vrot.slane %v17427_v3, %v1706_v39  ;;  %v16728_v39 = vld [vmem:[#allocation14 + $0x38] sm:$0xff]  }
 0x7e8   :  { %13362 = vmatmul.mubr.bf16.vlgmr.msra.gmra.mrb[12].mxu1 %v17423_v35  ;;  %v16724_v35 = vld [vmem:[#allocation14 + $0x28] sm:$0xff]  }
 0x7e9   :  { %13793 = vmatpush1.bf16.msra.mxu0 %v16644_v9  ;;  %15954 = vmatpush3.bf16.msra.mxu1 %v16714_v16  ;;  %v16709_v16 = vld [vmem:[#allocation11 + $0x1e4] ss:$8 sps:$4 sm:$0xff]  }
 0x7ea   :  { %13794 = vmatprep.subr.bf16.mxu0 %v16649_v10  ;;  %15955 = vmatprep.subr.bf16.mxu1 %v16715_v52  ;;  %v16689_v10 = vld [vmem:[#allocation11 + $0x180] ss:$8 sps:$4 sm:$0xff]  }
 0x7eb   :  { %v16707_v52 = vld [vmem:[#allocation11 + $0x1e0] ss:$8 sps:$4 sm:$0xff]  }
 0x7ed   :  { %13795 = vmatpush1.bf16.msra.mxu0 %v16647_v28  ;;  %15956 = vmatpush3.bf16.msra.mxu1 %v16716_v26 }
 0x7ee   :  { %13796 = vmatprep.subr.bf16.mxu0 %v16652_v59  ;;  %15957 = vmatprep.subr.bf16.mxu1 %v16717_v14  ;;  %v16694_v59 = vld [vmem:[#allocation11 + $0x194] ss:$8 sps:$4 sm:$0xff]  }
 0x7ef   :  { %v16712_v14 = vld [vmem:[#allocation11 + $0x1f4] ss:$8 sps:$4 sm:$0xff]  }
 0x7f1   :  { %13797 = vmatpush1.bf16.msra.mxu0 %v16650_v11  ;;  %15958 = vmatpush3.bf16.msra.mxu1 %v16718_v42  ;;  %v16710_v42 = vld [vmem:[#allocation11 + $0x1f0] ss:$8 sps:$4 sm:$0xff]  }
 0x7f2   :  { %13798 = vmatprep.subr.bf16.mxu0 %v16655_v15  ;;  %15959 = vmatprep.subr.bf16.mxu1 %v16719_v5 }
 0x7f5   :  { %13799 = vmatpush1.bf16.msra.mxu0 %v16653_v44  ;;  %15960 = vmatpush3.bf16.msra.mxu1 %v16720_v27  ;;  %v16692_v44 = vld [vmem:[#allocation11 + $0x190] ss:$8 sps:$4 sm:$0xff]  }
 0x7f6   :  { %13800 = vmatprep.subr.bf16.mxu0 %v16658_v53  ;;  %15961 = vmatprep.subr.bf16.mxu1 %v16721_v20  ;;  %v16697_v53 = vld [vmem:[#allocation11 + $0x1a4] ss:$8 sps:$4 sm:$0xff]   ;;  %v16725_v20 = vld [vmem:[#allocation14 + $0x70] sm:$0xff]  }
 0x7f9   :  { %13801 = vmatpush1.bf16.msra.mxu0 %v16656_v17  ;;  %15962 = vmatpush3.bf16.msra.mxu1 %v16722_v38  ;;  %v16700_v17 = vld [vmem:[#allocation11 + $0x1b4] ss:$8 sps:$4 sm:$0xff]  }
 0x7fa   :  { %13802 = vmatprep.subr.bf16.mxu0 %v16661_v60  ;;  %15963 = vmatprep.subr.bf16.mxu1 %v16723_v31  ;;  %v16698_v60 = vld [vmem:[#allocation11 + $0x1b0] ss:$8 sps:$4 sm:$0xff]   ;;  %v13442_v31 = vld [vmem:[#allocation13] sm:$0x3] }
 0x7fb   :  { %v16726_v38 = vld [vmem:[#allocation14 + $0x30] sm:$0xff]   ;;  %v13451_v3 = vrot.slane %v13442_v31, %v17327_v22 }
 0x7fd   :  { %13803 = vmatpush1.bf16.msra.mxu0 %v16659_v40  ;;  %15964 = vmatpush3.bf16.msra.mxu1 %v16724_v35  ;;  %v16703_v40 = vld [vmem:[#allocation11 + $0x1c4] ss:$8 sps:$4 sm:$0xff]   ;;  %v13447_v35 = vrot.slane %v13442_v31, %v17324_v19 }
 0x7fe   :  { %13804 = vmatprep.subr.bf16.mxu0 %v16664_v51  ;;  %v16701_v51 = vld [vmem:[#allocation11 + $0x1c0] ss:$8 sps:$4 sm:$0xff]   ;;  %15965 = vmatprep.subr.bf16.mxu1 %v16725_v20 }
 0x801   :  { %13805 = vmatpush1.bf16.msra.mxu0 %v16662_v18  ;;  %v16706_v18 = vld [vmem:[#allocation11 + $0x1d4] ss:$8 sps:$4 sm:$0xff]   ;;  %15966 = vmatpush3.bf16.msra.mxu1 %v16726_v38 }
 0x802   :  { %13815 = vmatprep.subr.bf16.mxu0 %v16667_v25  ;;  %v16704_v25 = vld [vmem:[#allocation11 + $0x1d0] ss:$8 sps:$4 sm:$0xff]   ;;  %15967 = vmatprep.subr.bf16.mxu1 %v16727_v29 }
 0x805   :  { %15968 = vmatpush3.bf16.msra.mxu1 %v16728_v39 }
 0x897   :  { %v13199_v37 = vpop.f32.mrb[8].mxu0 }
 0x898   :  { %v15985_v50 = vadd.f32 %v13199_v37, %v11745_v62  ;;  %v13201_v32 = vpop.f32.mrb[9].mxu0 }
 0x899   :  { %v15986_v7 = vadd.f32 %v13201_v32, %v11749_v36  ;;  %v13203_v0 = vpop.f32.mrb[10].mxu0 }
 0x89a   :  { %v13370_v23 = vmax.f32 %v15985_v50, 0.0  ;;  %v13204_v41 = vpop.f32.mrb[11].mxu0 }
 0x89b   :  { %v13371_v61 = vmax.f32 %v15986_v7, 0.0 }
 0x89c   :  { %v13374_v43 = vpack.c.bf16 %v13370_v23, %v13370_v23 }
 0x89d   :  { %v13375_v24 = vpack.c.bf16 %v13371_v61, %v13371_v61 }
 0x89f   :  { %13806 = vmatprep.mubr.bf16.mxu0 %v13375_v24 }
 0x8a0   :  { %13807 = vmatmul.mubr.bf16.vlgmr.msra.gmra.mrb[12].mxu0 %v13374_v43 }
 0x8a1   :  { %13816 = vmatpush1.bf16.msra.mxu0 %v16665_v48  ;;  %v15936_v48 = vld [vmem:[#allocation16] ss:$0 sm:$0xff] }
 0x8a2   :  { %13817 = vmatprep.subr.bf16.mxu0 %v16670_v30 }
 0x8a5   :  { %13818 = vmatpush1.bf16.msra.mxu0 %v16668_v46 }
 0x8a6   :  { %13819 = vmatprep.subr.bf16.mxu0 %v16673_v47 }
 0x8a9   :  { %13820 = vmatpush1.bf16.msra.mxu0 %v16671_v55 }
 0x8aa   :  { %13821 = vmatprep.subr.bf16.mxu0 %v16676_v56 }
 0x8ad   :  { %13822 = vmatpush1.bf16.msra.mxu0 %v16674_v57 }
 0x8ae   :  { %13823 = vmatprep.subr.bf16.mxu0 %v16679_v63 }
 0x8b1   :  { %13824 = vmatpush1.bf16.msra.mxu0 %v16677_v54 }
 0x8b2   :  { %13825 = vmatprep.subr.bf16.mxu0 %v16682_v21 }
 0x8b5   :  { %13826 = vmatpush1.bf16.msra.mxu0 %v16680_v12 }
 0x8b6   :  { %13827 = vmatprep.subr.bf16.mxu0 %v16685_v1 }
 0x8b9   :  { %13828 = vmatpush1.bf16.msra.mxu0 %v16683_v2 }
 0x8ba   :  { %13829 = vmatprep.subr.bf16.mxu0 %v16688_v4 }
 0x8bb   :  { %v13363_v13 = vpop.f32.mrb[12].mxu1 }
 0x8bc   :  { %v13365_v34 = vpop.f32.mrb[13].mxu1  ;;  %v15987_v26 = vadd.f32 %v13363_v13, %v11753_v58 }
 0x8bd   :  { %v15988_v8 = vadd.f32 %v13365_v34, %v11757_v49  ;;  %13830 = vmatpush1.bf16.msra.mxu0 %v16686_v33  ;;  %v13367_v9 = vpop.f32.mrb[14].mxu1 }
 0x8be   :  { %v13368_v28 = vpop.f32.mrb[15].mxu1  ;;  %13831 = vmatprep.subr.bf16.mxu0 %v16691_v6  ;;  %v13372_v5 = vmax.f32 %v15987_v26, 0.0 }
 0x8bf   :  { %v13373_v11 = vmax.f32 %v15988_v8, 0.0 }
 0x8c0   :  { %v13376_v27 = vpack.c.bf16 %v13372_v5, %v13372_v5 }
 0x8c1   :  { %v13377_v15 = vpack.c.bf16 %v13373_v11, %v13373_v11  ;;  %13832 = vmatpush1.bf16.msra.mxu0 %v16689_v10 }
 0x8c2   :  { %13833 = vmatprep.subr.bf16.mxu0 %v16694_v59 }
 0x8c3   :  { %13847 = vmatprep.mubr.bf16.mxu0 %v13377_v15 }
 0x8c5   :  { %13834 = vmatpush1.bf16.msra.mxu0 %v16692_v44 }
 0x8c6   :  { %13835 = vmatprep.subr.bf16.mxu0 %v16697_v53 }
 0x8c9   :  { %13836 = vmatpush1.bf16.msra.mxu0 %v16695_v45 }
 0x8ca   :  { %13837 = vmatprep.subr.bf16.mxu0 %v16700_v17 }
 0x8cd   :  { %13838 = vmatpush1.bf16.msra.mxu0 %v16698_v60 }
 0x8ce   :  { %13839 = vmatprep.subr.bf16.mxu0 %v16703_v40 }
 0x8d1   :  { %13840 = vmatpush1.bf16.msra.mxu0 %v16701_v51 }
 0x8d2   :  { %13841 = vmatprep.subr.bf16.mxu0 %v16706_v18 }
 0x8d5   :  { %13842 = vmatpush1.bf16.msra.mxu0 %v16704_v25 }
 0x8d6   :  { %13843 = vmatprep.subr.bf16.mxu0 %v16709_v16 }
 0x8d9   :  { %13844 = vmatpush1.bf16.msra.mxu0 %v16707_v52 }
 0x8da   :  { %13845 = vmatprep.subr.bf16.mxu0 %v16712_v14 }
 0x8dd   :  { %13846 = vmatpush1.bf16.msra.mxu0 %v16710_v42 }
 0x8e0   :  { %13848 = vmatmul.mubr.bf16.vlgmr.msra.gmra.mrb[12].mxu0 %v13376_v27 }
 0x9b3   :  { %v13849_v62 = vpop.f32.mrb[12].mxu0 }
 0x9b4   :  { %v15989_v36 = vadd.f32 %v13849_v62, %v13447_v35  ;;  %v13851_v37 = vpop.f32.mrb[13].mxu0 }
 0x9b5   :  { %v15990_v50 = vadd.f32 %v13851_v37, %v13451_v3  ;;  %v13853_v32 = vpop.f32.mrb[14].mxu0 }
 0x9b6   :  { %v13856_v7 = vmax.f32 %v15989_v36, 0.0  ;;  %v13854_v0 = vpop.f32.mrb[15].mxu0 }
 0x9b7   :  { %v13857_v23 = vmax.f32 %v15990_v50, 0.0 }
 0x9b8   :  { %v13858_v61 = vpack.c.bf16 %v13856_v7, %v13856_v7 }
 0x9b9   :  { %v13859_v41 = vpack.c.bf16 %v13857_v23, %v13857_v23 }
 0x9bb   :  { %14027 = vmatprep.mubr.bf16.mxu1 %v13859_v41 }
 0x9bc   :  { %14028 = vmatmul.mubr.bf16.vlgmr.msra.gmra.mrb[16].mxu1 %v13858_v61 }
 0xa8f   :  { %v15969_v24 = vpop.f32.mrb[16].mxu1 }
 0xa90   :  { %v15970_v43 = vpop.f32.mrb[17].mxu1 }
 0xa91   :  { %v15971_v30 = vadd.f32 %v15970_v43, %v15969_v24  ;;  %v15972_v46 = vpop.f32.mrb[18].mxu1 }
 0xa92   :  { %v15973_v19 = vpop.f32.mrb[19].mxu1 }
 0xa93   :  { %v14030_v22 = vadd.f32 %v15971_v30, %v15936_v48 }
 0xa95   :  { %v14035_v47 = vmax.f32 %v14030_v22, 0.0 }
 0xa97   :  { %14036 = vst [vmem:[#allocation17] sm:$0xff] %v14035_v47 }
 0xa98   :  { %16940 = shalt.err (!%p16937_p6)
}
 0xa99   :  { %s16941_s22 = scalar_lea.hbm %s17462_s9, 128 }
 0xa9a   :  { %p16942_p7 = scmp.ne.s32.totalorder %s17462_s9, %s16941_s22  ;;  %p16945_p8 = scmp.lt.u32.totalorder %s16941_s22, %s17462_s9 }
 0xa9c   :  { %p16947_p9 = pnand %p16945_p8, %p16942_p7 }
 0xa9e   :  { %16950 = shalt.err (!%p16947_p9)
}
 0xa9f   :  { %14046 = dma.vmem_to_hbm [thread:$0]  %s14044_s24, 128, %s17462_s9, [#allocation4]  }
 0xaa0   :  { %16961 = dma.done.wait [#allocation4], 128  }
 0xaa1   :  { %16962 = vsyncadd [#allocation4], 4294967168 }
 0xaa2   :  { %14050 = vsyncpa [#allocation3], 1 }
 0xaa3   :  { %14051 = vsyncpa [#allocation6], 1 }
 0xaa4   :  { %14052 = vsyncpa [#allocation9], 1 }
 0xaa5   :  { %14053 = vsyncpa [#allocation12], 1 }
 0xaa6   :  { %14054 = vsyncpa [#allocation15], 1 }
 0xaa7   :  { %14055 = vsyncpa [#allocation4], 1 }

</bundles_post_ra>
